<compile_context>
chip_gen: v6e
topology: v6e:2x2x1
jax: 0.10.0
libtpu: 0.0.40
codegen_flags: <defaults>
</compile_context>

<pallas_src>
import functools

import jax
import jax.numpy as jnp
import numpy as np
from jax import lax
from jax.experimental import pallas as pl
from jax.experimental.pallas import tpu as pltpu

ACT_DTYPE = jnp.bfloat16   # inter-layer activations / scratches
WGT_DTYPE = jnp.bfloat16   # matmul weights (biases stay f32)

MODEL_CFG = dict(
    # Each level's ZeroPad2d(1) grows the map by 2, so strides/upsample strides
    # are chosen so both levels' upsampled maps land on 18x18 (concat works):
    #   level0: 16 ->(pad,stride2) 9  ->(deconv x2) 18
    #   level1:  9 ->(pad,stride2) 6  ->(deconv x3) 18
    LAYER_NUMS=[1, 1],
    LAYER_STRIDES=[2, 2],
    NUM_FILTERS=[16, 32],
    UPSAMPLE_STRIDES=[2, 3],
    NUM_UPSAMPLE_FILTERS=[16, 16],
)


# ---------------------------------------------------------------------------
# Fused per-level Pallas kernel
# ---------------------------------------------------------------------------

def _level_kernel(x_ref, w1c_ref, b1_ref, bd_ref, w2_ref, b2_ref,
                  wi1_ref, bi1_ref, wi2_ref, bi2_ref, wdc_ref, bdc_ref,
                  xo_ref, up_ref, xpad_ref, hpad_ref,
                  *, stride, Hout, Wout, layer_num):
    s = stride
    H = x_ref.shape[1]
    W = x_ref.shape[2]
    cout = xo_ref.shape[3]
    f32 = jnp.float32

    # Pre-zeroed padding scratches (no concatenate-based padding).  Re-zeroed
    # every grid step so the "parallel" batch axis stays correct on megacore.
    xpad_ref[...] = jnp.zeros_like(xpad_ref)
    hpad_ref[...] = jnp.zeros_like(hpad_ref)
    # ZeroPad2d(1) + conv1's padding=1  ->  interior written at offset 2.
    xpad_ref[2:2 + H, 2:2 + W, :] = x_ref[0]

    def conv3x3(pad_ref, w_at, st, n_out):
        """3x3 conv as 3 accumulating (HW, 3C) x (3C, n_out) matmuls (one per
        kh tap).  Stride handled by direct strided sampling of the padded
        map: no compute-then-subsample waste, no 9x im2col buffer."""
        xp = pad_ref[...]
        C = xp.shape[-1]
        acc = None
        for kh in range(3):
            rows = xp[kh:kh + st * Hout]                        # (st*Hout, PW, C)
            slab = jnp.concatenate(
                [rows[:, kw:kw + st * Wout, :] for kw in range(3)], axis=-1)
            if st > 1:                                          # stride-s subsample
                slab = slab.reshape(Hout, st, st * Wout, 3 * C)[:, 0]
                slab = slab.reshape(Hout, Wout, st, 3 * C)[:, :, 0]
            slab = slab.reshape(Hout * Wout, 3 * C)
            part = jnp.dot(slab, w_at(kh), preferred_element_type=f32)
            acc = part if acc is None else acc + part
        return acc                                              # (HW, n_out) f32

    # ---- downsampling BasicBlock: conv1(3x3, stride) fused with the 1x1
    #      stride-s downsample (extra Cout output columns of the same matmul).
    w1c = w1c_ref[...]
    acc = conv3x3(xpad_ref, lambda kh: w1c[kh], s, 2 * cout)
    h = jnp.maximum(acc[:, :cout] + b1_ref[...], 0.0)           # conv1 + bn + relu
    ident = acc[:, cout:] + bd_ref[...]                         # downsample + bn

    w2 = w2_ref[...]
    hpad_ref[1:1 + Hout, 1:1 + Wout, :] = (
        h.astype(hpad_ref.dtype).reshape(Hout, Wout, cout))
    y = conv3x3(hpad_ref, lambda kh: w2[kh], 1, cout)
    x = jnp.maximum(y + b2_ref[...] + ident, 0.0)               # f32 (HW, cout)

    # ---- identity BasicBlocks ---------------------------------------------
    for j in range(layer_num):
        x16 = x.astype(hpad_ref.dtype)
        wa = wi1_ref[j]
        wb = wi2_ref[j]
        hpad_ref[1:1 + Hout, 1:1 + Wout, :] = x16.reshape(Hout, Wout, cout)
        a = conv3x3(hpad_ref, lambda kh, wa=wa: wa[kh], 1, cout)
        hh = jnp.maximum(a + bi1_ref[j], 0.0)
        hpad_ref[1:1 + Hout, 1:1 + Wout, :] = (
            hh.astype(hpad_ref.dtype).reshape(Hout, Wout, cout))
        yy = conv3x3(hpad_ref, lambda kh, wb=wb: wb[kh], 1, cout)
        x = jnp.maximum(yy + bi2_ref[j] + x16.astype(f32), 0.0)

    x16 = x.astype(xo_ref.dtype)
    xo_ref[...] = x16.reshape(1, Hout, Wout, cout)

    # ---- fused deblock: ConvTranspose2d(k=us, s=us) + BN + ReLU ------------
    # (pixel shuffle to (H*us, W*us, Cuo) is done by XLA outside the kernel)
    u = jnp.dot(x16, wdc_ref[...], preferred_element_type=f32)
    u = jnp.maximum(u + bdc_ref[...], 0.0)
    up_ref[...] = u.astype(up_ref.dtype).reshape(1, Hout, Wout, u.shape[-1])


# ---------------------------------------------------------------------------
# pallas_call wrapper
# ---------------------------------------------------------------------------

def _compiler_params():
    # Generation-aware scoped-VMEM budget (v5e/v6e: 128 MiB phys -> ~96 MiB,
    # v7x: 64 MiB phys -> ~48 MiB).
    try:
        cap = int(pltpu.get_tpu_info().vmem_capacity_bytes)
    except Exception:                                   # conservative fallback
        cap = 64 * 1024 * 1024
    return pltpu.CompilerParams(
        dimension_semantics=("parallel",),
        vmem_limit_bytes=min(100 * 1024 * 1024, (cap * 3) // 4),
    )


def level_forward(x, lp):
    """x: (N, H, W, cin_p) bf16 ->
         (x_next (N,Hout,Wout,cout), up (N,Hout,Wout,us*us*cuo)), both bf16."""
    N, H, W, cin_p = x.shape
    s, cout, L = lp["stride"], lp["cout"], lp["layer_num"]
    us, cuo = lp["us"], lp["cuo"]
    Hout = (H + 1) // s + 1                       # ZeroPad2d(1) + conv pad 1
    Wout = (W + 1) // s + 1
    PH, PW = s * Hout + 2, s * Wout + 2           # padded-input scratch extent

    def full(arr):
        return pl.BlockSpec(arr.shape, lambda n, _nd=arr.ndim: (0,) * _nd)

    kern = functools.partial(_level_kernel, stride=s, Hout=Hout, Wout=Wout,
                             layer_num=L)
    return pl.pallas_call(
        kern,
        out_shape=(jax.ShapeDtypeStruct((N, Hout, Wout, cout), ACT_DTYPE),
                   jax.ShapeDtypeStruct((N, Hout, Wout, us * us * cuo),
                                        ACT_DTYPE)),
        grid=(N,),
        in_specs=[
            pl.BlockSpec((1, H, W, cin_p), lambda n: (n, 0, 0, 0)),
            full(lp["w1c"]), full(lp["b1"]), full(lp["bd"]),
            full(lp["w2"]), full(lp["b2"]),
            full(lp["wi1"]), full(lp["bi1"]), full(lp["wi2"]), full(lp["bi2"]),
            full(lp["wdc"]), full(lp["bdc"]),
        ],
        out_specs=(pl.BlockSpec((1, Hout, Wout, cout), lambda n: (n, 0, 0, 0)),
                   pl.BlockSpec((1, Hout, Wout, us * us * cuo),
                                lambda n: (n, 0, 0, 0))),
        scratch_shapes=[pltpu.VMEM((PH, PW, cin_p), ACT_DTYPE),
                        pltpu.VMEM((Hout + 2, Wout + 2, cout), ACT_DTYPE)],
        compiler_params=_compiler_params(),
    )(x, lp["w1c"], lp["b1"], lp["bd"], lp["w2"], lp["b2"],
      lp["wi1"], lp["bi1"], lp["wi2"], lp["bi2"], lp["wdc"], lp["bdc"])


def bev_backbone_forward(data_dict, params):
    x = jnp.transpose(data_dict["spatial_features"], (0, 2, 3, 1))   # NCHW->NHWC
    ups = []
    for lp in params["levels"]:
        if lp["cin_p"] > x.shape[-1]:          # lane-pack narrow input channels
            x = jnp.pad(x, ((0, 0), (0, 0), (0, 0),
                            (0, lp["cin_p"] - x.shape[-1])))
        x = x.astype(ACT_DTYPE)
        x, up = level_forward(x, lp)
        # deblock pixel shuffle: (N,Ho,Wo,us*us*Cuo) -> (N,Ho*us,Wo*us,Cuo)
        N, Ho, Wo, _ = up.shape
        us, cuo = lp["us"], lp["cuo"]
        up = up.reshape(N, Ho, Wo, us, us, cuo).transpose(0, 1, 3, 2, 4, 5)
        ups.append(up.reshape(N, Ho * us, Wo * us, cuo))
    out = jnp.concatenate(ups, axis=-1) if len(ups) > 1 else ups[0]
    data_dict["spatial_features_2d"] = jnp.transpose(
        out, (0, 3, 1, 2)).astype(jnp.float32)                        # -> NCHW
    return data_dict


# ---------------------------------------------------------------------------
# Parameter construction (mirrors BaseBEVResBackbone.__init__, BN folded)
# ---------------------------------------------------------------------------

def _round_up(v, m):
    return ((v + m - 1) // m) * m


def _fold_bn(key, c, eps=1e-3):
    """Random eval-mode BatchNorm folded to per-channel (scale, bias)."""
    k1, k2, k3, k4 = jax.random.split(key, 4)
    gamma = 1.0 + 0.1 * jax.random.normal(k1, (c,), jnp.float32)
    beta = 0.1 * jax.random.normal(k2, (c,), jnp.float32)
    mean = 0.05 * jax.random.normal(k3, (c,), jnp.float32)
    var = jax.random.uniform(k4, (c,), jnp.float32, 0.5, 1.5)
    scale = gamma / jnp.sqrt(var + eps)
    return scale, beta - mean * scale


def _conv3x3_folded(key, cin, cout, cin_p):
    """3x3 conv weight with BN scale folded; returns per-kh (3, 3*cin_p, cout)
    kernel weight (kw,cin row order), the bias, and the HWIO weight for the
    pure-JAX reference."""
    kw_, kb = jax.random.split(key)
    w_oihw = 0.1 * jax.random.normal(kw_, (cout, cin, 3, 3), jnp.float32)
    scale, bias = _fold_bn(kb, cout)
    w = w_oihw * scale[:, None, None, None]
    w_hwio = jnp.transpose(w, (2, 3, 1, 0))                        # (3,3,cin,cout)
    if cin_p > cin:
        w = jnp.pad(w, ((0, 0), (0, cin_p - cin), (0, 0), (0, 0)))
    w_kh = jnp.transpose(w, (2, 3, 1, 0)).reshape(3, 3 * cin_p, cout)
    return w_kh, bias, w_hwio


def build_params(key, input_channels, cfg):
    layer_nums = cfg["LAYER_NUMS"]
    layer_strides = cfg["LAYER_STRIDES"]
    num_filters = cfg["NUM_FILTERS"]
    up_strides = cfg["UPSAMPLE_STRIDES"]
    num_up_filters = cfg["NUM_UPSAMPLE_FILTERS"]
    c_in_list = [input_channels, *num_filters[:-1]]

    levels = []
    for idx in range(len(layer_nums)):
        cin, cout, s = c_in_list[idx], num_filters[idx], layer_strides[idx]
        cin_p = _round_up(cin, 8)

        key, k1, k2, kd, kdb = jax.random.split(key, 5)
        w1, b1, w1_hwio = _conv3x3_folded(k1, cin, cout, cin_p)
        w2, b2, w2_hwio = _conv3x3_folded(k2, cout, cout, cout)
        # 1x1 stride-s downsample, BN folded, zero-extended to the conv1 tap
        # weight (nonzero only at kh=1, kw=1) and fused along the output axis.
        wd_oi = 0.1 * jax.random.normal(kd, (cout, cin), jnp.float32)
        dscale, dbias = _fold_bn(kdb, cout)
        wd = (wd_oi * dscale[:, None]).T                           # (cin, cout)
        wd_p = jnp.pad(wd, ((0, cin_p - cin), (0, 0)))
        wd_ext = jnp.zeros((3, 3 * cin_p, cout), jnp.float32)
        wd_ext = wd_ext.at[1, cin_p:2 * cin_p, :].set(wd_p)
        w1c = jnp.concatenate([w1, wd_ext], axis=-1)               # (3,3cin_p,2cout)

        wi1_l, bi1_l, wi2_l, bi2_l, ref_ident = [], [], [], [], []
        for _ in range(layer_nums[idx]):
            key, ka, kc = jax.random.split(key, 3)
            a_kh, a_b, a_hwio = _conv3x3_folded(ka, cout, cout, cout)
            c_kh, c_b, c_hwio = _conv3x3_folded(kc, cout, cout, cout)
            wi1_l.append(a_kh)
            bi1_l.append(a_b[None])
            wi2_l.append(c_kh)
            bi2_l.append(c_b[None])
            ref_ident.append(dict(w1=a_hwio.astype(WGT_DTYPE), b1=a_b,
                                  w2=c_hwio.astype(WGT_DTYPE), b2=c_b))

        # deblock: ConvTranspose2d(cout, cuo, k=us, s=us) + BN + ReLU
        key, kw_, kb2 = jax.random.split(key, 3)
        us, cuo = up_strides[idx], num_up_filters[idx]
        wt = 0.1 * jax.random.normal(kw_, (cout, cuo, us, us), jnp.float32)
        uscale, ubias = _fold_bn(kb2, cuo)
        wt = wt * uscale[None, :, None, None]
        wdc = jnp.transpose(wt, (0, 2, 3, 1)).reshape(cout, us * us * cuo)
        bdc = jnp.tile(ubias, us * us)

        levels.append(dict(
            cin=cin, cin_p=cin_p, cout=cout, stride=s,
            layer_num=layer_nums[idx], us=us, cuo=cuo,
            w1c=w1c.astype(WGT_DTYPE), b1=b1[None], bd=dbias[None],
            w2=w2.astype(WGT_DTYPE), b2=b2[None],
            wi1=jnp.stack(wi1_l).astype(WGT_DTYPE), bi1=jnp.stack(bi1_l),
            wi2=jnp.stack(wi2_l).astype(WGT_DTYPE), bi2=jnp.stack(bi2_l),
            wdc=wdc.astype(WGT_DTYPE), bdc=bdc[None],
            ref=dict(w1=w1_hwio.astype(WGT_DTYPE), b1=b1,
                     w2=w2_hwio.astype(WGT_DTYPE), b2=b2,
                     wd=wd.astype(WGT_DTYPE).reshape(1, 1, cin, cout), bd=dbias,
                     ident=ref_ident,
                     wt=wt.astype(WGT_DTYPE), bup=ubias),
        ))
    return dict(levels=levels)


# ---------------------------------------------------------------------------
# Pure-JAX reference (mirrors the kernel's bf16 cast points exactly)
# ---------------------------------------------------------------------------

def _conv_ref(x16, w_hwio, b, stride, padding):
    y = lax.conv_general_dilated(
        x16, w_hwio, (stride, stride),
        ((padding, padding), (padding, padding)),
        dimension_numbers=("NHWC", "HWIO", "NHWC"),
        preferred_element_type=jnp.float32)
    return y + b[None, None, None, :]


def reference_forward(x_nchw, params):
    x = jnp.transpose(x_nchw, (0, 2, 3, 1)).astype(ACT_DTYPE)
    ups = []
    for lp in params["levels"]:
        r = lp["ref"]
        s = lp["stride"]
        xp = jnp.pad(x, ((0, 0), (1, 1), (1, 1), (0, 0)))            # ZeroPad2d(1)
        h = jnp.maximum(_conv_ref(xp, r["w1"], r["b1"], s, 1), 0.0)
        y = _conv_ref(h.astype(ACT_DTYPE), r["w2"], r["b2"], 1, 1)
        ident = lax.conv_general_dilated(
            xp, r["wd"], (s, s), "VALID",
            dimension_numbers=("NHWC", "HWIO", "NHWC"),
            preferred_element_type=jnp.float32) + r["bd"][None, None, None, :]
        xf = jnp.maximum(y + ident, 0.0)                             # f32
        for blk in r["ident"]:
            xin = xf.astype(ACT_DTYPE)
            h = jnp.maximum(_conv_ref(xin, blk["w1"], blk["b1"], 1, 1), 0.0)
            y = _conv_ref(h.astype(ACT_DTYPE), blk["w2"], blk["b2"], 1, 1)
            xf = jnp.maximum(y + xin.astype(jnp.float32), 0.0)
        x = xf.astype(ACT_DTYPE)                                     # next level in
        us, cuo = lp["us"], lp["cuo"]
        N, Ho, Wo, _ = x.shape
        y = jnp.einsum("nhwc,cdab->nhawbd", x, r["wt"],
                       preferred_element_type=jnp.float32)
        y = y.reshape(N, Ho * us, Wo * us, cuo) + r["bup"][None, None, None, :]
        ups.append(jnp.maximum(y, 0.0).astype(ACT_DTYPE))
    out = jnp.concatenate(ups, axis=-1) if len(ups) > 1 else ups[0]
    return jnp.transpose(out, (0, 3, 1, 2)).astype(jnp.float32)


# ---------------------------------------------------------------------------

if __name__ == "__main__":
    key = jax.random.PRNGKey(0)
    k_in, k_par = jax.random.split(key)

    N, C, H, W = 2, 4, 16, 16
    spatial_features = jax.random.normal(k_in, (N, C, H, W), jnp.float32)
    params = build_params(k_par, input_channels=C, cfg=MODEL_CFG)

    data_dict = {"spatial_features": spatial_features}
    out_dict = bev_backbone_forward(data_dict, params)
    out = jax.block_until_ready(out_dict["spatial_features_2d"])

    expected_c = sum(MODEL_CFG["NUM_UPSAMPLE_FILTERS"])
    assert out.shape == (N, expected_c, 18, 18), out.shape   # both levels -> 18x18

    ref = jax.block_until_ready(reference_forward(spatial_features, params))
    np.testing.assert_allclose(np.asarray(out), np.asarray(ref),
                               rtol=2e-2, atol=2e-2)

    print("KERNEL_OK")
</pallas_src>

<mosaic_0001>
module attributes {stable_mosaic.version = 11 : i64} {
  func.func @_level_kernel(%arg0: i32, %arg1: memref<1x16x16x8xbf16, #tpu.memory_space<vmem>>, %arg2: memref<3x24x32xbf16, #tpu.memory_space<vmem>>, %arg3: memref<1x16xf32, #tpu.memory_space<vmem>>, %arg4: memref<1x16xf32, #tpu.memory_space<vmem>>, %arg5: memref<3x48x16xbf16, #tpu.memory_space<vmem>>, %arg6: memref<1x16xf32, #tpu.memory_space<vmem>>, %arg7: memref<1x3x48x16xbf16, #tpu.memory_space<vmem>>, %arg8: memref<1x1x16xf32, #tpu.memory_space<vmem>>, %arg9: memref<1x3x48x16xbf16, #tpu.memory_space<vmem>>, %arg10: memref<1x1x16xf32, #tpu.memory_space<vmem>>, %arg11: memref<16x64xbf16, #tpu.memory_space<vmem>>, %arg12: memref<1x64xf32, #tpu.memory_space<vmem>>, %arg13: memref<1x9x9x16xbf16, #tpu.memory_space<vmem>>, %arg14: memref<1x9x9x64xbf16, #tpu.memory_space<vmem>>, %arg15: memref<20x20x8xbf16, #tpu.memory_space<vmem>>, %arg16: memref<11x11x16xbf16, #tpu.memory_space<vmem>>) attributes {dimension_semantics = [#tpu.dimension_semantics<parallel>], iteration_bounds = array<i64: 2>, scalar_prefetch = 0 : i64, scratch_operands = 2 : i64, tpu.core_type = #tpu.core_type<tc>, window_params = [{transform_indices = @transform_0, window_bounds = array<i64: 1, 16, 16, 8>}, {pipeline_mode = #tpu.pipeline_mode<synchronous>, transform_indices = @transform_1, window_bounds = array<i64: 3, 24, 32>}, {pipeline_mode = #tpu.pipeline_mode<synchronous>, transform_indices = @transform_2, window_bounds = array<i64: 1, 16>}, {pipeline_mode = #tpu.pipeline_mode<synchronous>, transform_indices = @transform_3, window_bounds = array<i64: 1, 16>}, {pipeline_mode = #tpu.pipeline_mode<synchronous>, transform_indices = @transform_4, window_bounds = array<i64: 3, 48, 16>}, {pipeline_mode = #tpu.pipeline_mode<synchronous>, transform_indices = @transform_5, window_bounds = array<i64: 1, 16>}, {pipeline_mode = #tpu.pipeline_mode<synchronous>, transform_indices = @transform_6, window_bounds = array<i64: 1, 3, 48, 16>}, {pipeline_mode = #tpu.pipeline_mode<synchronous>, transform_indices = @transform_7, window_bounds = array<i64: 1, 1, 16>}, {pipeline_mode = #tpu.pipeline_mode<synchronous>, transform_indices = @transform_8, window_bounds = array<i64: 1, 3, 48, 16>}, {pipeline_mode = #tpu.pipeline_mode<synchronous>, transform_indices = @transform_9, window_bounds = array<i64: 1, 1, 16>}, {pipeline_mode = #tpu.pipeline_mode<synchronous>, transform_indices = @transform_10, window_bounds = array<i64: 16, 64>}, {pipeline_mode = #tpu.pipeline_mode<synchronous>, transform_indices = @transform_11, window_bounds = array<i64: 1, 64>}, {transform_indices = @transform_12, window_bounds = array<i64: 1, 9, 9, 16>}, {transform_indices = @transform_13, window_bounds = array<i64: 1, 9, 9, 64>}]} {
    %cst = arith.constant 0.000000e+00 : bf16
    %0 = vector.broadcast %cst : bf16 to vector<20x20x8xbf16>
    %c0 = arith.constant 0 : index
    %c0_0 = arith.constant 0 : index
    %c0_1 = arith.constant 0 : index
    %1 = vector.load %arg15[%c0, %c0_0, %c0_1] : memref<20x20x8xbf16, #tpu.memory_space<vmem>>, vector<20x20x8xbf16>
    tpu.vector_store %arg15[%c0, %c0_0, %c0_1], %0 {strides = array<i32>} : memref<20x20x8xbf16, #tpu.memory_space<vmem>>, vector<20x20x8xbf16>,
    %cst_2 = arith.constant 0.000000e+00 : bf16
    %2 = vector.broadcast %cst_2 : bf16 to vector<11x11x16xbf16>
    %c0_3 = arith.constant 0 : index
    %c0_4 = arith.constant 0 : index
    %c0_5 = arith.constant 0 : index
    %3 = vector.load %arg16[%c0_3, %c0_4, %c0_5] : memref<11x11x16xbf16, #tpu.memory_space<vmem>>, vector<11x11x16xbf16>
    tpu.vector_store %arg16[%c0_3, %c0_4, %c0_5], %2 {strides = array<i32>} : memref<11x11x16xbf16, #tpu.memory_space<vmem>>, vector<11x11x16xbf16>,
    %c0_6 = arith.constant 0 : index
    %c0_7 = arith.constant 0 : index
    %c0_8 = arith.constant 0 : index
    %c0_9 = arith.constant 0 : index
    %4 = vector.load %arg1[%c0_6, %c0_7, %c0_8, %c0_9] : memref<1x16x16x8xbf16, #tpu.memory_space<vmem>>, vector<1x16x16x8xbf16>
    %5 = vector.shape_cast %4 : vector<1x16x16x8xbf16> to vector<16x16x8xbf16>
    %c2 = arith.constant 2 : index
    %c2_10 = arith.constant 2 : index
    %c0_11 = arith.constant 0 : index
    %6 = vector.load %arg15[%c2, %c2_10, %c0_11] : memref<20x20x8xbf16, #tpu.memory_space<vmem>>, vector<16x16x8xbf16>
    tpu.vector_store %arg15[%c2, %c2_10, %c0_11], %5 {strides = array<i32>} : memref<20x20x8xbf16, #tpu.memory_space<vmem>>, vector<16x16x8xbf16>,
    %c0_12 = arith.constant 0 : index
    %c0_13 = arith.constant 0 : index
    %c0_14 = arith.constant 0 : index
    %7 = vector.load %arg2[%c0_12, %c0_13, %c0_14] : memref<3x24x32xbf16, #tpu.memory_space<vmem>>, vector<3x24x32xbf16>
    %c0_15 = arith.constant 0 : index
    %c0_16 = arith.constant 0 : index
    %c0_17 = arith.constant 0 : index
    %8 = vector.load %arg15[%c0_15, %c0_16, %c0_17] : memref<20x20x8xbf16, #tpu.memory_space<vmem>>, vector<20x20x8xbf16>
    %9 = vector.extract_strided_slice %8 {offsets = [0, 0, 0], sizes = [18, 20, 8], strides = [1, 1, 1]} : vector<20x20x8xbf16> to vector<18x20x8xbf16>
    %10 = vector.extract_strided_slice %9 {offsets = [0, 0, 0], sizes = [18, 18, 8], strides = [1, 1, 1]} : vector<18x20x8xbf16> to vector<18x18x8xbf16>
    %11 = vector.extract_strided_slice %9 {offsets = [0, 1, 0], sizes = [18, 18, 8], strides = [1, 1, 1]} : vector<18x20x8xbf16> to vector<18x18x8xbf16>
    %12 = vector.extract_strided_slice %9 {offsets = [0, 2, 0], sizes = [18, 18, 8], strides = [1, 1, 1]} : vector<18x20x8xbf16> to vector<18x18x8xbf16>
    %13 = tpu.concatenate %10, %11, %12 in 2 : vector<18x18x8xbf16>, vector<18x18x8xbf16>, vector<18x18x8xbf16> -> vector<18x18x24xbf16>
    %14 = vector.shape_cast %13 : vector<18x18x24xbf16> to vector<9x2x18x24xbf16>
    %15 = vector.extract_strided_slice %14 {offsets = [0, 0, 0, 0], sizes = [9, 1, 18, 24], strides = [1, 1, 1, 1]} : vector<9x2x18x24xbf16> to vector<9x1x18x24xbf16>
    %16 = vector.shape_cast %15 : vector<9x1x18x24xbf16> to vector<9x18x24xbf16>
    %17 = vector.shape_cast %16 : vector<9x18x24xbf16> to vector<9x9x2x24xbf16>
    %18 = vector.extract_strided_slice %17 {offsets = [0, 0, 0, 0], sizes = [9, 9, 1, 24], strides = [1, 1, 1, 1]} : vector<9x9x2x24xbf16> to vector<9x9x1x24xbf16>
    %19 = vector.shape_cast %18 : vector<9x9x1x24xbf16> to vector<9x9x24xbf16>
    %20 = vector.shape_cast %19 : vector<9x9x24xbf16> to vector<81x24xbf16>
    %21 = vector.extract_strided_slice %7 {offsets = [0, 0, 0], sizes = [1, 24, 32], strides = [1, 1, 1]} : vector<3x24x32xbf16> to vector<1x24x32xbf16>
    %22 = vector.shape_cast %21 : vector<1x24x32xbf16> to vector<24x32xbf16>
    %cst_18 = arith.constant dense<0.000000e+00> : vector<81x32xf32>
    %23 = tpu.matmul %20, %22, %cst_18 {dimension_numbers = #tpu.dot_dimension_numbers<[1], [0], [0], [1], [0, 0, 1, 1], [], []>} : vector<81x24xbf16>, vector<24x32xbf16>, vector<81x32xf32> -> vector<81x32xf32>
    %24 = vector.extract_strided_slice %8 {offsets = [1, 0, 0], sizes = [18, 20, 8], strides = [1, 1, 1]} : vector<20x20x8xbf16> to vector<18x20x8xbf16>
    %25 = vector.extract_strided_slice %24 {offsets = [0, 0, 0], sizes = [18, 18, 8], strides = [1, 1, 1]} : vector<18x20x8xbf16> to vector<18x18x8xbf16>
    %26 = vector.extract_strided_slice %24 {offsets = [0, 1, 0], sizes = [18, 18, 8], strides = [1, 1, 1]} : vector<18x20x8xbf16> to vector<18x18x8xbf16>
    %27 = vector.extract_strided_slice %24 {offsets = [0, 2, 0], sizes = [18, 18, 8], strides = [1, 1, 1]} : vector<18x20x8xbf16> to vector<18x18x8xbf16>
    %28 = tpu.concatenate %25, %26, %27 in 2 : vector<18x18x8xbf16>, vector<18x18x8xbf16>, vector<18x18x8xbf16> -> vector<18x18x24xbf16>
    %29 = vector.shape_cast %28 : vector<18x18x24xbf16> to vector<9x2x18x24xbf16>
    %30 = vector.extract_strided_slice %29 {offsets = [0, 0, 0, 0], sizes = [9, 1, 18, 24], strides = [1, 1, 1, 1]} : vector<9x2x18x24xbf16> to vector<9x1x18x24xbf16>
    %31 = vector.shape_cast %30 : vector<9x1x18x24xbf16> to vector<9x18x24xbf16>
    %32 = vector.shape_cast %31 : vector<9x18x24xbf16> to vector<9x9x2x24xbf16>
    %33 = vector.extract_strided_slice %32 {offsets = [0, 0, 0, 0], sizes = [9, 9, 1, 24], strides = [1, 1, 1, 1]} : vector<9x9x2x24xbf16> to vector<9x9x1x24xbf16>
    %34 = vector.shape_cast %33 : vector<9x9x1x24xbf16> to vector<9x9x24xbf16>
    %35 = vector.shape_cast %34 : vector<9x9x24xbf16> to vector<81x24xbf16>
    %36 = vector.extract_strided_slice %7 {offsets = [1, 0, 0], sizes = [1, 24, 32], strides = [1, 1, 1]} : vector<3x24x32xbf16> to vector<1x24x32xbf16>
    %37 = vector.shape_cast %36 : vector<1x24x32xbf16> to vector<24x32xbf16>
    %cst_19 = arith.constant dense<0.000000e+00> : vector<81x32xf32>
    %38 = tpu.matmul %35, %37, %cst_19 {dimension_numbers = #tpu.dot_dimension_numbers<[1], [0], [0], [1], [0, 0, 1, 1], [], []>} : vector<81x24xbf16>, vector<24x32xbf16>, vector<81x32xf32> -> vector<81x32xf32>
    %39 = arith.addf %23, %38 : vector<81x32xf32>
    %40 = vector.extract_strided_slice %8 {offsets = [2, 0, 0], sizes = [18, 20, 8], strides = [1, 1, 1]} : vector<20x20x8xbf16> to vector<18x20x8xbf16>
    %41 = vector.extract_strided_slice %40 {offsets = [0, 0, 0], sizes = [18, 18, 8], strides = [1, 1, 1]} : vector<18x20x8xbf16> to vector<18x18x8xbf16>
    %42 = vector.extract_strided_slice %40 {offsets = [0, 1, 0], sizes = [18, 18, 8], strides = [1, 1, 1]} : vector<18x20x8xbf16> to vector<18x18x8xbf16>
    %43 = vector.extract_strided_slice %40 {offsets = [0, 2, 0], sizes = [18, 18, 8], strides = [1, 1, 1]} : vector<18x20x8xbf16> to vector<18x18x8xbf16>
    %44 = tpu.concatenate %41, %42, %43 in 2 : vector<18x18x8xbf16>, vector<18x18x8xbf16>, vector<18x18x8xbf16> -> vector<18x18x24xbf16>
    %45 = vector.shape_cast %44 : vector<18x18x24xbf16> to vector<9x2x18x24xbf16>
    %46 = vector.extract_strided_slice %45 {offsets = [0, 0, 0, 0], sizes = [9, 1, 18, 24], strides = [1, 1, 1, 1]} : vector<9x2x18x24xbf16> to vector<9x1x18x24xbf16>
    %47 = vector.shape_cast %46 : vector<9x1x18x24xbf16> to vector<9x18x24xbf16>
    %48 = vector.shape_cast %47 : vector<9x18x24xbf16> to vector<9x9x2x24xbf16>
    %49 = vector.extract_strided_slice %48 {offsets = [0, 0, 0, 0], sizes = [9, 9, 1, 24], strides = [1, 1, 1, 1]} : vector<9x9x2x24xbf16> to vector<9x9x1x24xbf16>
    %50 = vector.shape_cast %49 : vector<9x9x1x24xbf16> to vector<9x9x24xbf16>
    %51 = vector.shape_cast %50 : vector<9x9x24xbf16> to vector<81x24xbf16>
    %52 = vector.extract_strided_slice %7 {offsets = [2, 0, 0], sizes = [1, 24, 32], strides = [1, 1, 1]} : vector<3x24x32xbf16> to vector<1x24x32xbf16>
    %53 = vector.shape_cast %52 : vector<1x24x32xbf16> to vector<24x32xbf16>
    %cst_20 = arith.constant dense<0.000000e+00> : vector<81x32xf32>
    %54 = tpu.matmul %51, %53, %cst_20 {dimension_numbers = #tpu.dot_dimension_numbers<[1], [0], [0], [1], [0, 0, 1, 1], [], []>} : vector<81x24xbf16>, vector<24x32xbf16>, vector<81x32xf32> -> vector<81x32xf32>
    %55 = arith.addf %39, %54 : vector<81x32xf32>
    %56 = vector.extract_strided_slice %55 {offsets = [0, 0], sizes = [81, 16], strides = [1, 1]} : vector<81x32xf32> to vector<81x16xf32>
    %c0_21 = arith.constant 0 : index
    %c0_22 = arith.constant 0 : index
    %57 = vector.load %arg3[%c0_21, %c0_22] : memref<1x16xf32, #tpu.memory_space<vmem>>, vector<1x16xf32>
    %58 = vector.broadcast %57 : vector<1x16xf32> to vector<81x16xf32>
    %59 = arith.addf %56, %58 : vector<81x16xf32>
    %cst_23 = arith.constant 0.000000e+00 : f32
    %60 = vector.broadcast %cst_23 : f32 to vector<81x16xf32>
    %61 = arith.maximumf %59, %60 : vector<81x16xf32>
    %62 = vector.extract_strided_slice %55 {offsets = [0, 16], sizes = [81, 16], strides = [1, 1]} : vector<81x32xf32> to vector<81x16xf32>
    %c0_24 = arith.constant 0 : index
    %c0_25 = arith.constant 0 : index
    %63 = vector.load %arg4[%c0_24, %c0_25] : memref<1x16xf32, #tpu.memory_space<vmem>>, vector<1x16xf32>
    %64 = vector.broadcast %63 : vector<1x16xf32> to vector<81x16xf32>
    %65 = arith.addf %62, %64 : vector<81x16xf32>
    %c0_26 = arith.constant 0 : index
    %c0_27 = arith.constant 0 : index
    %c0_28 = arith.constant 0 : index
    %66 = vector.load %arg5[%c0_26, %c0_27, %c0_28] : memref<3x48x16xbf16, #tpu.memory_space<vmem>>, vector<3x48x16xbf16>
    %67 = arith.truncf %61 : vector<81x16xf32> to vector<81x16xbf16>
    %68 = vector.shape_cast %67 : vector<81x16xbf16> to vector<9x9x16xbf16>
    %c1 = arith.constant 1 : index
    %c1_29 = arith.constant 1 : index
    %c0_30 = arith.constant 0 : index
    %69 = vector.load %arg16[%c1, %c1_29, %c0_30] : memref<11x11x16xbf16, #tpu.memory_space<vmem>>, vector<9x9x16xbf16>
    tpu.vector_store %arg16[%c1, %c1_29, %c0_30], %68 {strides = array<i32>} : memref<11x11x16xbf16, #tpu.memory_space<vmem>>, vector<9x9x16xbf16>,
    %c0_31 = arith.constant 0 : index
    %c0_32 = arith.constant 0 : index
    %c0_33 = arith.constant 0 : index
    %70 = vector.load %arg16[%c0_31, %c0_32, %c0_33] : memref<11x11x16xbf16, #tpu.memory_space<vmem>>, vector<11x11x16xbf16>
    %71 = vector.extract_strided_slice %70 {offsets = [0, 0, 0], sizes = [9, 11, 16], strides = [1, 1, 1]} : vector<11x11x16xbf16> to vector<9x11x16xbf16>
    %72 = vector.extract_strided_slice %71 {offsets = [0, 0, 0], sizes = [9, 9, 16], strides = [1, 1, 1]} : vector<9x11x16xbf16> to vector<9x9x16xbf16>
    %73 = vector.extract_strided_slice %71 {offsets = [0, 1, 0], sizes = [9, 9, 16], strides = [1, 1, 1]} : vector<9x11x16xbf16> to vector<9x9x16xbf16>
    %74 = vector.extract_strided_slice %71 {offsets = [0, 2, 0], sizes = [9, 9, 16], strides = [1, 1, 1]} : vector<9x11x16xbf16> to vector<9x9x16xbf16>
    %75 = tpu.concatenate %72, %73, %74 in 2 : vector<9x9x16xbf16>, vector<9x9x16xbf16>, vector<9x9x16xbf16> -> vector<9x9x48xbf16>
    %76 = vector.shape_cast %75 : vector<9x9x48xbf16> to vector<81x48xbf16>
    %77 = vector.extract_strided_slice %66 {offsets = [0, 0, 0], sizes = [1, 48, 16], strides = [1, 1, 1]} : vector<3x48x16xbf16> to vector<1x48x16xbf16>
    %78 = vector.shape_cast %77 : vector<1x48x16xbf16> to vector<48x16xbf16>
    %cst_34 = arith.constant dense<0.000000e+00> : vector<81x16xf32>
    %79 = tpu.matmul %76, %78, %cst_34 {dimension_numbers = #tpu.dot_dimension_numbers<[1], [0], [0], [1], [0, 0, 1, 1], [], []>} : vector<81x48xbf16>, vector<48x16xbf16>, vector<81x16xf32> -> vector<81x16xf32>
    %80 = vector.extract_strided_slice %70 {offsets = [1, 0, 0], sizes = [9, 11, 16], strides = [1, 1, 1]} : vector<11x11x16xbf16> to vector<9x11x16xbf16>
    %81 = vector.extract_strided_slice %80 {offsets = [0, 0, 0], sizes = [9, 9, 16], strides = [1, 1, 1]} : vector<9x11x16xbf16> to vector<9x9x16xbf16>
    %82 = vector.extract_strided_slice %80 {offsets = [0, 1, 0], sizes = [9, 9, 16], strides = [1, 1, 1]} : vector<9x11x16xbf16> to vector<9x9x16xbf16>
    %83 = vector.extract_strided_slice %80 {offsets = [0, 2, 0], sizes = [9, 9, 16], strides = [1, 1, 1]} : vector<9x11x16xbf16> to vector<9x9x16xbf16>
    %84 = tpu.concatenate %81, %82, %83 in 2 : vector<9x9x16xbf16>, vector<9x9x16xbf16>, vector<9x9x16xbf16> -> vector<9x9x48xbf16>
    %85 = vector.shape_cast %84 : vector<9x9x48xbf16> to vector<81x48xbf16>
    %86 = vector.extract_strided_slice %66 {offsets = [1, 0, 0], sizes = [1, 48, 16], strides = [1, 1, 1]} : vector<3x48x16xbf16> to vector<1x48x16xbf16>
    %87 = vector.shape_cast %86 : vector<1x48x16xbf16> to vector<48x16xbf16>
    %cst_35 = arith.constant dense<0.000000e+00> : vector<81x16xf32>
    %88 = tpu.matmul %85, %87, %cst_35 {dimension_numbers = #tpu.dot_dimension_numbers<[1], [0], [0], [1], [0, 0, 1, 1], [], []>} : vector<81x48xbf16>, vector<48x16xbf16>, vector<81x16xf32> -> vector<81x16xf32>
    %89 = arith.addf %79, %88 : vector<81x16xf32>
    %90 = vector.extract_strided_slice %70 {offsets = [2, 0, 0], sizes = [9, 11, 16], strides = [1, 1, 1]} : vector<11x11x16xbf16> to vector<9x11x16xbf16>
    %91 = vector.extract_strided_slice %90 {offsets = [0, 0, 0], sizes = [9, 9, 16], strides = [1, 1, 1]} : vector<9x11x16xbf16> to vector<9x9x16xbf16>
    %92 = vector.extract_strided_slice %90 {offsets = [0, 1, 0], sizes = [9, 9, 16], strides = [1, 1, 1]} : vector<9x11x16xbf16> to vector<9x9x16xbf16>
    %93 = vector.extract_strided_slice %90 {offsets = [0, 2, 0], sizes = [9, 9, 16], strides = [1, 1, 1]} : vector<9x11x16xbf16> to vector<9x9x16xbf16>
    %94 = tpu.concatenate %91, %92, %93 in 2 : vector<9x9x16xbf16>, vector<9x9x16xbf16>, vector<9x9x16xbf16> -> vector<9x9x48xbf16>
    %95 = vector.shape_cast %94 : vector<9x9x48xbf16> to vector<81x48xbf16>
    %96 = vector.extract_strided_slice %66 {offsets = [2, 0, 0], sizes = [1, 48, 16], strides = [1, 1, 1]} : vector<3x48x16xbf16> to vector<1x48x16xbf16>
    %97 = vector.shape_cast %96 : vector<1x48x16xbf16> to vector<48x16xbf16>
    %cst_36 = arith.constant dense<0.000000e+00> : vector<81x16xf32>
    %98 = tpu.matmul %95, %97, %cst_36 {dimension_numbers = #tpu.dot_dimension_numbers<[1], [0], [0], [1], [0, 0, 1, 1], [], []>} : vector<81x48xbf16>, vector<48x16xbf16>, vector<81x16xf32> -> vector<81x16xf32>
    %99 = arith.addf %89, %98 : vector<81x16xf32>
    %c0_37 = arith.constant 0 : index
    %c0_38 = arith.constant 0 : index
    %100 = vector.load %arg6[%c0_37, %c0_38] : memref<1x16xf32, #tpu.memory_space<vmem>>, vector<1x16xf32>
    %101 = vector.broadcast %100 : vector<1x16xf32> to vector<81x16xf32>
    %102 = arith.addf %99, %101 : vector<81x16xf32>
    %103 = arith.addf %102, %65 : vector<81x16xf32>
    %cst_39 = arith.constant 0.000000e+00 : f32
    %104 = vector.broadcast %cst_39 : f32 to vector<81x16xf32>
    %105 = arith.maximumf %103, %104 : vector<81x16xf32>
    %106 = arith.truncf %105 : vector<81x16xf32> to vector<81x16xbf16>
    %c0_40 = arith.constant 0 : index
    %c0_41 = arith.constant 0 : index
    %c0_42 = arith.constant 0 : index
    %c0_43 = arith.constant 0 : index
    %107 = vector.load %arg7[%c0_40, %c0_41, %c0_42, %c0_43] : memref<1x3x48x16xbf16, #tpu.memory_space<vmem>>, vector<1x3x48x16xbf16>
    %108 = vector.shape_cast %107 : vector<1x3x48x16xbf16> to vector<3x48x16xbf16>
    %c0_44 = arith.constant 0 : index
    %c0_45 = arith.constant 0 : index
    %c0_46 = arith.constant 0 : index
    %c0_47 = arith.constant 0 : index
    %109 = vector.load %arg9[%c0_44, %c0_45, %c0_46, %c0_47] : memref<1x3x48x16xbf16, #tpu.memory_space<vmem>>, vector<1x3x48x16xbf16>
    %110 = vector.shape_cast %109 : vector<1x3x48x16xbf16> to vector<3x48x16xbf16>
    %111 = vector.shape_cast %106 : vector<81x16xbf16> to vector<9x9x16xbf16>
    %c1_48 = arith.constant 1 : index
    %c1_49 = arith.constant 1 : index
    %c0_50 = arith.constant 0 : index
    %112 = vector.load %arg16[%c1_48, %c1_49, %c0_50] : memref<11x11x16xbf16, #tpu.memory_space<vmem>>, vector<9x9x16xbf16>
    tpu.vector_store %arg16[%c1_48, %c1_49, %c0_50], %111 {strides = array<i32>} : memref<11x11x16xbf16, #tpu.memory_space<vmem>>, vector<9x9x16xbf16>,
    %c0_51 = arith.constant 0 : index
    %c0_52 = arith.constant 0 : index
    %c0_53 = arith.constant 0 : index
    %113 = vector.load %arg16[%c0_51, %c0_52, %c0_53] : memref<11x11x16xbf16, #tpu.memory_space<vmem>>, vector<11x11x16xbf16>
    %114 = vector.extract_strided_slice %113 {offsets = [0, 0, 0], sizes = [9, 11, 16], strides = [1, 1, 1]} : vector<11x11x16xbf16> to vector<9x11x16xbf16>
    %115 = vector.extract_strided_slice %114 {offsets = [0, 0, 0], sizes = [9, 9, 16], strides = [1, 1, 1]} : vector<9x11x16xbf16> to vector<9x9x16xbf16>
    %116 = vector.extract_strided_slice %114 {offsets = [0, 1, 0], sizes = [9, 9, 16], strides = [1, 1, 1]} : vector<9x11x16xbf16> to vector<9x9x16xbf16>
    %117 = vector.extract_strided_slice %114 {offsets = [0, 2, 0], sizes = [9, 9, 16], strides = [1, 1, 1]} : vector<9x11x16xbf16> to vector<9x9x16xbf16>
    %118 = tpu.concatenate %115, %116, %117 in 2 : vector<9x9x16xbf16>, vector<9x9x16xbf16>, vector<9x9x16xbf16> -> vector<9x9x48xbf16>
    %119 = vector.shape_cast %118 : vector<9x9x48xbf16> to vector<81x48xbf16>
    %120 = vector.extract_strided_slice %108 {offsets = [0, 0, 0], sizes = [1, 48, 16], strides = [1, 1, 1]} : vector<3x48x16xbf16> to vector<1x48x16xbf16>
    %121 = vector.shape_cast %120 : vector<1x48x16xbf16> to vector<48x16xbf16>
    %cst_54 = arith.constant dense<0.000000e+00> : vector<81x16xf32>
    %122 = tpu.matmul %119, %121, %cst_54 {dimension_numbers = #tpu.dot_dimension_numbers<[1], [0], [0], [1], [0, 0, 1, 1], [], []>} : vector<81x48xbf16>, vector<48x16xbf16>, vector<81x16xf32> -> vector<81x16xf32>
    %123 = vector.extract_strided_slice %113 {offsets = [1, 0, 0], sizes = [9, 11, 16], strides = [1, 1, 1]} : vector<11x11x16xbf16> to vector<9x11x16xbf16>
    %124 = vector.extract_strided_slice %123 {offsets = [0, 0, 0], sizes = [9, 9, 16], strides = [1, 1, 1]} : vector<9x11x16xbf16> to vector<9x9x16xbf16>
    %125 = vector.extract_strided_slice %123 {offsets = [0, 1, 0], sizes = [9, 9, 16], strides = [1, 1, 1]} : vector<9x11x16xbf16> to vector<9x9x16xbf16>
    %126 = vector.extract_strided_slice %123 {offsets = [0, 2, 0], sizes = [9, 9, 16], strides = [1, 1, 1]} : vector<9x11x16xbf16> to vector<9x9x16xbf16>
    %127 = tpu.concatenate %124, %125, %126 in 2 : vector<9x9x16xbf16>, vector<9x9x16xbf16>, vector<9x9x16xbf16> -> vector<9x9x48xbf16>
    %128 = vector.shape_cast %127 : vector<9x9x48xbf16> to vector<81x48xbf16>
    %129 = vector.extract_strided_slice %108 {offsets = [1, 0, 0], sizes = [1, 48, 16], strides = [1, 1, 1]} : vector<3x48x16xbf16> to vector<1x48x16xbf16>
    %130 = vector.shape_cast %129 : vector<1x48x16xbf16> to vector<48x16xbf16>
    %cst_55 = arith.constant dense<0.000000e+00> : vector<81x16xf32>
    %131 = tpu.matmul %128, %130, %cst_55 {dimension_numbers = #tpu.dot_dimension_numbers<[1], [0], [0], [1], [0, 0, 1, 1], [], []>} : vector<81x48xbf16>, vector<48x16xbf16>, vector<81x16xf32> -> vector<81x16xf32>
    %132 = arith.addf %122, %131 : vector<81x16xf32>
    %133 = vector.extract_strided_slice %113 {offsets = [2, 0, 0], sizes = [9, 11, 16], strides = [1, 1, 1]} : vector<11x11x16xbf16> to vector<9x11x16xbf16>
    %134 = vector.extract_strided_slice %133 {offsets = [0, 0, 0], sizes = [9, 9, 16], strides = [1, 1, 1]} : vector<9x11x16xbf16> to vector<9x9x16xbf16>
    %135 = vector.extract_strided_slice %133 {offsets = [0, 1, 0], sizes = [9, 9, 16], strides = [1, 1, 1]} : vector<9x11x16xbf16> to vector<9x9x16xbf16>
    %136 = vector.extract_strided_slice %133 {offsets = [0, 2, 0], sizes = [9, 9, 16], strides = [1, 1, 1]} : vector<9x11x16xbf16> to vector<9x9x16xbf16>
    %137 = tpu.concatenate %134, %135, %136 in 2 : vector<9x9x16xbf16>, vector<9x9x16xbf16>, vector<9x9x16xbf16> -> vector<9x9x48xbf16>
    %138 = vector.shape_cast %137 : vector<9x9x48xbf16> to vector<81x48xbf16>
    %139 = vector.extract_strided_slice %108 {offsets = [2, 0, 0], sizes = [1, 48, 16], strides = [1, 1, 1]} : vector<3x48x16xbf16> to vector<1x48x16xbf16>
    %140 = vector.shape_cast %139 : vector<1x48x16xbf16> to vector<48x16xbf16>
    %cst_56 = arith.constant dense<0.000000e+00> : vector<81x16xf32>
    %141 = tpu.matmul %138, %140, %cst_56 {dimension_numbers = #tpu.dot_dimension_numbers<[1], [0], [0], [1], [0, 0, 1, 1], [], []>} : vector<81x48xbf16>, vector<48x16xbf16>, vector<81x16xf32> -> vector<81x16xf32>
    %142 = arith.addf %132, %141 : vector<81x16xf32>
    %c0_57 = arith.constant 0 : index
    %c0_58 = arith.constant 0 : index
    %c0_59 = arith.constant 0 : index
    %143 = vector.load %arg8[%c0_57, %c0_58, %c0_59] : memref<1x1x16xf32, #tpu.memory_space<vmem>>, vector<1x1x16xf32>
    %144 = vector.shape_cast %143 : vector<1x1x16xf32> to vector<1x16xf32>
    %145 = vector.broadcast %144 : vector<1x16xf32> to vector<81x16xf32>
    %146 = arith.addf %142, %145 : vector<81x16xf32>
    %cst_60 = arith.constant 0.000000e+00 : f32
    %147 = vector.broadcast %cst_60 : f32 to vector<81x16xf32>
    %148 = arith.maximumf %146, %147 : vector<81x16xf32>
    %149 = arith.truncf %148 : vector<81x16xf32> to vector<81x16xbf16>
    %150 = vector.shape_cast %149 : vector<81x16xbf16> to vector<9x9x16xbf16>
    %c1_61 = arith.constant 1 : index
    %c1_62 = arith.constant 1 : index
    %c0_63 = arith.constant 0 : index
    %151 = vector.load %arg16[%c1_61, %c1_62, %c0_63] : memref<11x11x16xbf16, #tpu.memory_space<vmem>>, vector<9x9x16xbf16>
    tpu.vector_store %arg16[%c1_61, %c1_62, %c0_63], %150 {strides = array<i32>} : memref<11x11x16xbf16, #tpu.memory_space<vmem>>, vector<9x9x16xbf16>,
    %c0_64 = arith.constant 0 : index
    %c0_65 = arith.constant 0 : index
    %c0_66 = arith.constant 0 : index
    %152 = vector.load %arg16[%c0_64, %c0_65, %c0_66] : memref<11x11x16xbf16, #tpu.memory_space<vmem>>, vector<11x11x16xbf16>
    %153 = vector.extract_strided_slice %152 {offsets = [0, 0, 0], sizes = [9, 11, 16], strides = [1, 1, 1]} : vector<11x11x16xbf16> to vector<9x11x16xbf16>
    %154 = vector.extract_strided_slice %153 {offsets = [0, 0, 0], sizes = [9, 9, 16], strides = [1, 1, 1]} : vector<9x11x16xbf16> to vector<9x9x16xbf16>
    %155 = vector.extract_strided_slice %153 {offsets = [0, 1, 0], sizes = [9, 9, 16], strides = [1, 1, 1]} : vector<9x11x16xbf16> to vector<9x9x16xbf16>
    %156 = vector.extract_strided_slice %153 {offsets = [0, 2, 0], sizes = [9, 9, 16], strides = [1, 1, 1]} : vector<9x11x16xbf16> to vector<9x9x16xbf16>
    %157 = tpu.concatenate %154, %155, %156 in 2 : vector<9x9x16xbf16>, vector<9x9x16xbf16>, vector<9x9x16xbf16> -> vector<9x9x48xbf16>
    %158 = vector.shape_cast %157 : vector<9x9x48xbf16> to vector<81x48xbf16>
    %159 = vector.extract_strided_slice %110 {offsets = [0, 0, 0], sizes = [1, 48, 16], strides = [1, 1, 1]} : vector<3x48x16xbf16> to vector<1x48x16xbf16>
    %160 = vector.shape_cast %159 : vector<1x48x16xbf16> to vector<48x16xbf16>
    %cst_67 = arith.constant dense<0.000000e+00> : vector<81x16xf32>
    %161 = tpu.matmul %158, %160, %cst_67 {dimension_numbers = #tpu.dot_dimension_numbers<[1], [0], [0], [1], [0, 0, 1, 1], [], []>} : vector<81x48xbf16>, vector<48x16xbf16>, vector<81x16xf32> -> vector<81x16xf32>
    %162 = vector.extract_strided_slice %152 {offsets = [1, 0, 0], sizes = [9, 11, 16], strides = [1, 1, 1]} : vector<11x11x16xbf16> to vector<9x11x16xbf16>
    %163 = vector.extract_strided_slice %162 {offsets = [0, 0, 0], sizes = [9, 9, 16], strides = [1, 1, 1]} : vector<9x11x16xbf16> to vector<9x9x16xbf16>
    %164 = vector.extract_strided_slice %162 {offsets = [0, 1, 0], sizes = [9, 9, 16], strides = [1, 1, 1]} : vector<9x11x16xbf16> to vector<9x9x16xbf16>
    %165 = vector.extract_strided_slice %162 {offsets = [0, 2, 0], sizes = [9, 9, 16], strides = [1, 1, 1]} : vector<9x11x16xbf16> to vector<9x9x16xbf16>
    %166 = tpu.concatenate %163, %164, %165 in 2 : vector<9x9x16xbf16>, vector<9x9x16xbf16>, vector<9x9x16xbf16> -> vector<9x9x48xbf16>
    %167 = vector.shape_cast %166 : vector<9x9x48xbf16> to vector<81x48xbf16>
    %168 = vector.extract_strided_slice %110 {offsets = [1, 0, 0], sizes = [1, 48, 16], strides = [1, 1, 1]} : vector<3x48x16xbf16> to vector<1x48x16xbf16>
    %169 = vector.shape_cast %168 : vector<1x48x16xbf16> to vector<48x16xbf16>
    %cst_68 = arith.constant dense<0.000000e+00> : vector<81x16xf32>
    %170 = tpu.matmul %167, %169, %cst_68 {dimension_numbers = #tpu.dot_dimension_numbers<[1], [0], [0], [1], [0, 0, 1, 1], [], []>} : vector<81x48xbf16>, vector<48x16xbf16>, vector<81x16xf32> -> vector<81x16xf32>
    %171 = arith.addf %161, %170 : vector<81x16xf32>
    %172 = vector.extract_strided_slice %152 {offsets = [2, 0, 0], sizes = [9, 11, 16], strides = [1, 1, 1]} : vector<11x11x16xbf16> to vector<9x11x16xbf16>
    %173 = vector.extract_strided_slice %172 {offsets = [0, 0, 0], sizes = [9, 9, 16], strides = [1, 1, 1]} : vector<9x11x16xbf16> to vector<9x9x16xbf16>
    %174 = vector.extract_strided_slice %172 {offsets = [0, 1, 0], sizes = [9, 9, 16], strides = [1, 1, 1]} : vector<9x11x16xbf16> to vector<9x9x16xbf16>
    %175 = vector.extract_strided_slice %172 {offsets = [0, 2, 0], sizes = [9, 9, 16], strides = [1, 1, 1]} : vector<9x11x16xbf16> to vector<9x9x16xbf16>
    %176 = tpu.concatenate %173, %174, %175 in 2 : vector<9x9x16xbf16>, vector<9x9x16xbf16>, vector<9x9x16xbf16> -> vector<9x9x48xbf16>
    %177 = vector.shape_cast %176 : vector<9x9x48xbf16> to vector<81x48xbf16>
    %178 = vector.extract_strided_slice %110 {offsets = [2, 0, 0], sizes = [1, 48, 16], strides = [1, 1, 1]} : vector<3x48x16xbf16> to vector<1x48x16xbf16>
    %179 = vector.shape_cast %178 : vector<1x48x16xbf16> to vector<48x16xbf16>
    %cst_69 = arith.constant dense<0.000000e+00> : vector<81x16xf32>
    %180 = tpu.matmul %177, %179, %cst_69 {dimension_numbers = #tpu.dot_dimension_numbers<[1], [0], [0], [1], [0, 0, 1, 1], [], []>} : vector<81x48xbf16>, vector<48x16xbf16>, vector<81x16xf32> -> vector<81x16xf32>
    %181 = arith.addf %171, %180 : vector<81x16xf32>
    %c0_70 = arith.constant 0 : index
    %c0_71 = arith.constant 0 : index
    %c0_72 = arith.constant 0 : index
    %182 = vector.load %arg10[%c0_70, %c0_71, %c0_72] : memref<1x1x16xf32, #tpu.memory_space<vmem>>, vector<1x1x16xf32>
    %183 = vector.shape_cast %182 : vector<1x1x16xf32> to vector<1x16xf32>
    %184 = vector.broadcast %183 : vector<1x16xf32> to vector<81x16xf32>
    %185 = arith.addf %181, %184 : vector<81x16xf32>
    %186 = arith.extf %106 : vector<81x16xbf16> to vector<81x16xf32>
    %187 = arith.addf %185, %186 : vector<81x16xf32>
    %cst_73 = arith.constant 0.000000e+00 : f32
    %188 = vector.broadcast %cst_73 : f32 to vector<81x16xf32>
    %189 = arith.maximumf %187, %188 : vector<81x16xf32>
    %190 = arith.truncf %189 : vector<81x16xf32> to vector<81x16xbf16>
    %191 = vector.shape_cast %190 : vector<81x16xbf16> to vector<1x9x9x16xbf16>
    %c0_74 = arith.constant 0 : index
    %c0_75 = arith.constant 0 : index
    %c0_76 = arith.constant 0 : index
    %c0_77 = arith.constant 0 : index
    %192 = vector.load %arg13[%c0_74, %c0_75, %c0_76, %c0_77] : memref<1x9x9x16xbf16, #tpu.memory_space<vmem>>, vector<1x9x9x16xbf16>
    tpu.vector_store %arg13[%c0_74, %c0_75, %c0_76, %c0_77], %191 {strides = array<i32>} : memref<1x9x9x16xbf16, #tpu.memory_space<vmem>>, vector<1x9x9x16xbf16>,
    %c0_78 = arith.constant 0 : index
    %c0_79 = arith.constant 0 : index
    %193 = vector.load %arg11[%c0_78, %c0_79] : memref<16x64xbf16, #tpu.memory_space<vmem>>, vector<16x64xbf16>
    %cst_80 = arith.constant dense<0.000000e+00> : vector<81x64xf32>
    %194 = tpu.matmul %190, %193, %cst_80 {dimension_numbers = #tpu.dot_dimension_numbers<[1], [0], [0], [1], [0, 0, 1, 1], [], []>} : vector<81x16xbf16>, vector<16x64xbf16>, vector<81x64xf32> -> vector<81x64xf32>
    %c0_81 = arith.constant 0 : index
    %c0_82 = arith.constant 0 : index
    %195 = vector.load %arg12[%c0_81, %c0_82] : memref<1x64xf32, #tpu.memory_space<vmem>>, vector<1x64xf32>
    %196 = vector.broadcast %195 : vector<1x64xf32> to vector<81x64xf32>
    %197 = arith.addf %194, %196 : vector<81x64xf32>
    %cst_83 = arith.constant 0.000000e+00 : f32
    %198 = vector.broadcast %cst_83 : f32 to vector<81x64xf32>
    %199 = arith.maximumf %197, %198 : vector<81x64xf32>
    %200 = arith.truncf %199 : vector<81x64xf32> to vector<81x64xbf16>
    %201 = vector.shape_cast %200 : vector<81x64xbf16> to vector<1x9x9x64xbf16>
    %c0_84 = arith.constant 0 : index
    %c0_85 = arith.constant 0 : index
    %c0_86 = arith.constant 0 : index
    %c0_87 = arith.constant 0 : index
    %202 = vector.load %arg14[%c0_84, %c0_85, %c0_86, %c0_87] : memref<1x9x9x64xbf16, #tpu.memory_space<vmem>>, vector<1x9x9x64xbf16>
    tpu.vector_store %arg14[%c0_84, %c0_85, %c0_86, %c0_87], %201 {strides = array<i32>} : memref<1x9x9x64xbf16, #tpu.memory_space<vmem>>, vector<1x9x9x64xbf16>,
    return
  }
  func.func @transform_0(%arg0: i32) -> (i32, i32, i32, i32) {
    %c0_i32 = arith.constant 0 : i32
    %c0_i32_0 = arith.constant 0 : i32
    %c0_i32_1 = arith.constant 0 : i32
    %c0_i32_2 = arith.constant 0 : i32
    return %arg0, %c0_i32, %c0_i32_0, %c0_i32_1 : i32, i32, i32, i32
  }
  func.func @transform_1(%arg0: i32) -> (i32, i32, i32) {
    %c0_i32 = arith.constant 0 : i32
    %c0_i32_0 = arith.constant 0 : i32
    %c0_i32_1 = arith.constant 0 : i32
    %c0_i32_2 = arith.constant 0 : i32
    return %c0_i32, %c0_i32_0, %c0_i32_1 : i32, i32, i32
  }
  func.func @transform_2(%arg0: i32) -> (i32, i32) {
    %c0_i32 = arith.constant 0 : i32
    %c0_i32_0 = arith.constant 0 : i32
    %c0_i32_1 = arith.constant 0 : i32
    return %c0_i32, %c0_i32_0 : i32, i32
  }
  func.func @transform_3(%arg0: i32) -> (i32, i32) {
    %c0_i32 = arith.constant 0 : i32
    %c0_i32_0 = arith.constant 0 : i32
    %c0_i32_1 = arith.constant 0 : i32
    return %c0_i32, %c0_i32_0 : i32, i32
  }
  func.func @transform_4(%arg0: i32) -> (i32, i32, i32) {
    %c0_i32 = arith.constant 0 : i32
    %c0_i32_0 = arith.constant 0 : i32
    %c0_i32_1 = arith.constant 0 : i32
    %c0_i32_2 = arith.constant 0 : i32
    return %c0_i32, %c0_i32_0, %c0_i32_1 : i32, i32, i32
  }
  func.func @transform_5(%arg0: i32) -> (i32, i32) {
    %c0_i32 = arith.constant 0 : i32
    %c0_i32_0 = arith.constant 0 : i32
    %c0_i32_1 = arith.constant 0 : i32
    return %c0_i32, %c0_i32_0 : i32, i32
  }
  func.func @transform_6(%arg0: i32) -> (i32, i32, i32, i32) {
    %c0_i32 = arith.constant 0 : i32
    %c0_i32_0 = arith.constant 0 : i32
    %c0_i32_1 = arith.constant 0 : i32
    %c0_i32_2 = arith.constant 0 : i32
    %c0_i32_3 = arith.constant 0 : i32
    return %c0_i32, %c0_i32_0, %c0_i32_1, %c0_i32_2 : i32, i32, i32, i32
  }
  func.func @transform_7(%arg0: i32) -> (i32, i32, i32) {
    %c0_i32 = arith.constant 0 : i32
    %c0_i32_0 = arith.constant 0 : i32
    %c0_i32_1 = arith.constant 0 : i32
    %c0_i32_2 = arith.constant 0 : i32
    return %c0_i32, %c0_i32_0, %c0_i32_1 : i32, i32, i32
  }
  func.func @transform_8(%arg0: i32) -> (i32, i32, i32, i32) {
    %c0_i32 = arith.constant 0 : i32
    %c0_i32_0 = arith.constant 0 : i32
    %c0_i32_1 = arith.constant 0 : i32
    %c0_i32_2 = arith.constant 0 : i32
    %c0_i32_3 = arith.constant 0 : i32
    return %c0_i32, %c0_i32_0, %c0_i32_1, %c0_i32_2 : i32, i32, i32, i32
  }
  func.func @transform_9(%arg0: i32) -> (i32, i32, i32) {
    %c0_i32 = arith.constant 0 : i32
    %c0_i32_0 = arith.constant 0 : i32
    %c0_i32_1 = arith.constant 0 : i32
    %c0_i32_2 = arith.constant 0 : i32
    return %c0_i32, %c0_i32_0, %c0_i32_1 : i32, i32, i32
  }
  func.func @transform_10(%arg0: i32) -> (i32, i32) {
    %c0_i32 = arith.constant 0 : i32
    %c0_i32_0 = arith.constant 0 : i32
    %c0_i32_1 = arith.constant 0 : i32
    return %c0_i32, %c0_i32_0 : i32, i32
  }
  func.func @transform_11(%arg0: i32) -> (i32, i32) {
    %c0_i32 = arith.constant 0 : i32
    %c0_i32_0 = arith.constant 0 : i32
    %c0_i32_1 = arith.constant 0 : i32
    return %c0_i32, %c0_i32_0 : i32, i32
  }
  func.func @transform_12(%arg0: i32) -> (i32, i32, i32, i32) {
    %c0_i32 = arith.constant 0 : i32
    %c0_i32_0 = arith.constant 0 : i32
    %c0_i32_1 = arith.constant 0 : i32
    %c0_i32_2 = arith.constant 0 : i32
    return %arg0, %c0_i32, %c0_i32_0, %c0_i32_1 : i32, i32, i32, i32
  }
  func.func @transform_13(%arg0: i32) -> (i32, i32, i32, i32) {
    %c0_i32 = arith.constant 0 : i32
    %c0_i32_0 = arith.constant 0 : i32
    %c0_i32_1 = arith.constant 0 : i32
    %c0_i32_2 = arith.constant 0 : i32
    return %arg0, %c0_i32, %c0_i32_0, %c0_i32_1 : i32, i32, i32, i32
  }
}

</mosaic_0001>

<bundles_post_ra>
// kernel: tpu_custom_call.1
= control target key start
LH: loop header
LB: loop body
LE: loop exit
PB: predicated region body
PF: predicated region fallthrough
CT: control target
= control target key end

     0   :  { %s17870_s25 = smov 0   ;;  %s23424_s0 = inlined_call_operand.vmem [shape: bf16[2,16,16,8], index: 0, kind: input, shape index: {}]   ;;  %s23425_s1 = inlined_call_operand.vmem [shape: bf16[3,24,32], index: 1, kind: input, shape index: {}]   ;;  %s23426_s2 = inlined_call_operand.vmem [shape: f32[1,16], index: 2, kind: input, shape index: {}]   ;;  %s23427_s3 = inlined_call_operand.vmem [shape: f32[1,16], index: 3, kind: input, shape index: {}]   ;;  %s23428_s4 = inlined_call_operand.vmem [shape: bf16[3,48,16], index: 4, kind: input, shape index: {}]   ;;  %s23429_s5 = inlined_call_operand.vmem [shape: f32[1,16], index: 5, kind: input, shape index: {}]   ;;  %s23430_s6 = inlined_call_operand.vmem [shape: bf16[1,3,48,16], index: 6, kind: input, shape index: {}]   ;;  %s23431_s7 = inlined_call_operand.vmem [shape: f32[1,1,16], index: 7, kind: input, shape index: {}]   ;;  %s23432_s8 = inlined_call_operand.vmem [shape: bf16[1,3,48,16], index: 8, kind: input, shape index: {}]   ;;  %s23433_s9 = inlined_call_operand.vmem [shape: f32[1,1,16], index: 9, kind: input, shape index: {}]   ;;  %s23434_s10 = inlined_call_operand.vmem [shape: bf16[16,64], index: 10, kind: input, shape index: {}]   ;;  %s23435_s11 = inlined_call_operand.vmem [shape: f32[1,64], index: 11, kind: input, shape index: {}]   ;;  %s23436_s12 = inlined_call_operand.vmem [shape: bf16[2,9,9,16], index: 12, kind: output, shape index: {0}]   ;;  %s23437_s13 = inlined_call_operand.vmem [shape: bf16[2,9,9,64], index: 13, kind: output, shape index: {1}]  }
   0x1 LB: > { %s16784_s26 = sadd.s32 4294967295, %s17791_s25   ;;  %p16788_p0 = scmp.ge.s32.totalorder %s17791_s25, 1  ;;  %s17791_s25 = sphi %s17870_s25, %s24_s25  }
   0x2   : > { %p390_p1 = scmp.lt.s32.totalorder %s17791_s25, 3 }
   0x4   : > { %p391_p2 = pnand %p16788_p0, %p390_p1 }
   0x6   : > { %394 = sbr.rel (%p391_p2) target bundleno = 2361 (0x939), region = 68 }
   0xb   : > { %p17880_p3 = scmp.lt.s32.totalorder %s16784_s26, 1  ;;  %vm458_vm0 = vcmask 58368   ;;  %vm455_vm1 = vcmask 60416   ;;  %v23438_v0 = vmov 0   ;;  %vm629_vm2 = vcmask 1040384   ;;  %s17794_s15 = smov 16  }
   0xc   : > { %486 = vst.msk [vmem:[#allocation2 + $0x74] sm:$0x3] %vm458_vm0, %v23438_v0  ;;  %459 = vst.msk [vmem:[#allocation2 + $0x8] sm:$0x3] %vm458_vm0, %v23438_v0  ;;  %vm630_vm3 = vcmask 1044484   ;;  %vm761_vm4 = vcmask 60417  }
   0xd   : > { %462 = vst.msk [vmem:[#allocation2 + $0x14] sm:$0x3] %vm458_vm0, %v23438_v0  ;;  %465 = vst.msk [vmem:[#allocation2 + $0x20] sm:$0x3] %vm458_vm0, %v23438_v0  ;;  %s23828_s26 = smov (!%p17880_p3, %s16784_s26), 1  ;;  %vm764_vm5 = vcmask 57344  }
   0xe   : > { %468 = vst.msk [vmem:[#allocation2 + $0x2c] sm:$0x3] %vm458_vm0, %v23438_v0  ;;  %471 = vst.msk [vmem:[#allocation2 + $0x38] sm:$0x3] %vm458_vm0, %v23438_v0  ;;  %s17281_s28 = sshll.u32 %s23828_s26, 7  ;;  %vm1121_vm7 = vcmask 1046528  }
   0xf   : > { %474 = vst.msk [vmem:[#allocation2 + $0x44] sm:$0x3] %vm458_vm0, %v23438_v0  ;;  %477 = vst.msk [vmem:[#allocation2 + $0x50] sm:$0x3] %vm458_vm0, %v23438_v0  ;;  %s18008_s14 = scalar_lea.vmem %s23424_s0, %s17281_s28  ;;  %vm949_vm8 = vsmask.f32 7424 }
  0x10   : > { %480 = vst.msk [vmem:[#allocation2 + $0x5c] sm:$0x3] %vm458_vm0, %v23438_v0  ;;  %483 = vst.msk [vmem:[#allocation2 + $0x68] sm:$0x3] %vm458_vm0, %v23438_v0  ;;  %v580_v1 = vld [vmem:[%s18008_s14 + $0x3c] sm:$0xf] }
  0x11   : > { %489 = vst.msk [vmem:[#allocation2 + $0x80] sm:$0x3] %vm458_vm0, %v23438_v0  ;;  %492 = vst.msk [vmem:[#allocation2 + $0x8c] sm:$0x3] %vm458_vm0, %v23438_v0  ;;  %v576_v2 = vld [vmem:[%s18008_s14 + $0x2c] sm:$0xf] }
  0x12   : > { %495 = vst.msk [vmem:[#allocation2 + $0x98] sm:$0x3] %vm458_vm0, %v23438_v0  ;;  %498 = vst.msk [vmem:[#allocation2 + $0xa4] sm:$0x3] %vm458_vm0, %v23438_v0  ;;  %v579_v3 = vld [vmem:[%s18008_s14 + $0x38] sm:$0xf] }
  0x13   : > { %501 = vst.msk [vmem:[#allocation2 + $0xb0] sm:$0x3] %vm458_vm0, %v23438_v0  ;;  %504 = vst.msk [vmem:[#allocation2 + $0xbc] sm:$0x3] %vm458_vm0, %v23438_v0  ;;  %v669_v4 = vrot.slane %v580_v1, 7  ;;  %v659_v5 = vrot.slane %v576_v2, 7 }
  0x14   : > { %507 = vst.msk [vmem:[#allocation2 + $0xc8] sm:$0x3] %vm458_vm0, %v23438_v0  ;;  %510 = vst.msk [vmem:[#allocation2 + $0xd4] sm:$0x3] %vm458_vm0, %v23438_v0  ;;  %v667_v6 = vrot.slane %v579_v3, 7  ;;  %s17795_s16 = smov 8  }
  0x15   : > { %513 = vst.msk [vmem:[#allocation2 + $0xe0] sm:$0x3] %vm458_vm0, %v23438_v0  ;;  %v575_v7 = vld [vmem:[%s18008_s14 + $0x28] sm:$0xf]  ;;  %vm18015_vm6 = vmor %vm629_vm2, %vm630_vm3  ;;  %v587_v10 = vld [vmem:[%s18008_s14 + $0x58] sm:$0xf] }
  0x16   : > { %484 = vst.msk [vmem:[#allocation2 + $0x6c] sm:$0xf] %vm455_vm1, %v23438_v0  ;;  %485 = vst.msk [vmem:[#allocation2 + $0x70] sm:$0xf] %vm455_vm1, %v23438_v0  ;;  %v657_v9 = vrot.slane %v575_v7, 7  ;;  %v671_v12 = vrot.slane %v669_v4, 4 }
  0x17   : > { %456 = vst.msk [vmem:[#allocation2] sm:$0xf] %vm455_vm1, %v23438_v0  ;;  %457 = vst.msk [vmem:[#allocation2 + $0x4] sm:$0xf] %vm455_vm1, %v23438_v0  ;;  %v588_v11 = vld [vmem:[%s18008_s14 + $0x5c] sm:$0xf] }
  0x18   : > { %460 = vst.msk [vmem:[#allocation2 + $0xc] sm:$0xf] %vm455_vm1, %v23438_v0  ;;  %461 = vst.msk [vmem:[#allocation2 + $0x10] sm:$0xf] %vm455_vm1, %v23438_v0  ;;  %v661_v13 = vrot.slane %v659_v5, 4  ;;  %v668_v14 = vrot.slane %v667_v6, 4 }
  0x19   : > { %463 = vst.msk [vmem:[#allocation2 + $0x18] sm:$0xf] %vm455_vm1, %v23438_v0  ;;  %464 = vst.msk [vmem:[#allocation2 + $0x1c] sm:$0xf] %vm455_vm1, %v23438_v0  ;;  %v687_v15 = vrot.slane %v587_v10, 7  ;;  %v658_v17 = vrot.slane %v657_v9, 4 }
  0x1a   : > { %466 = vst.msk [vmem:[#allocation2 + $0x24] sm:$0xf] %vm455_vm1, %v23438_v0  ;;  %467 = vst.msk [vmem:[#allocation2 + $0x28] sm:$0xf] %vm455_vm1, %v23438_v0  ;;  %v583_v16 = vld [vmem:[%s18008_s14 + $0x48] sm:$0xf]  ;;  %v670_v21 = vsel %vm18015_vm6, %v668_v14, %v669_v4 }
  0x1b   : > { %469 = vst.msk [vmem:[#allocation2 + $0x30] sm:$0xf] %vm455_vm1, %v23438_v0  ;;  %470 = vst.msk [vmem:[#allocation2 + $0x34] sm:$0xf] %vm455_vm1, %v23438_v0  ;;  %v689_v18 = vrot.slane %v588_v11, 7  ;;  %v677_v20 = vrot.slane %v583_v16, 7  ;;  %v660_v26 = vsel %vm18015_vm6, %v658_v17, %v659_v5 }
  0x1c   : > { %472 = vst.msk [vmem:[#allocation2 + $0x3c] sm:$0xf] %vm455_vm1, %v23438_v0  ;;  %473 = vst.msk [vmem:[#allocation2 + $0x40] sm:$0xf] %vm455_vm1, %v23438_v0  ;;  %v584_v19 = vld [vmem:[%s18008_s14 + $0x4c] sm:$0xf] }
  0x1d   : > { %475 = vst.msk [vmem:[#allocation2 + $0x48] sm:$0xf] %vm455_vm1, %v23438_v0  ;;  %476 = vst.msk [vmem:[#allocation2 + $0x4c] sm:$0xf] %vm455_vm1, %v23438_v0  ;;  %v688_v22 = vrot.slane %v687_v15, 4  ;;  %v679_v23 = vrot.slane %v584_v19, 7 }
  0x1e   : > { %478 = vst.msk [vmem:[#allocation2 + $0x54] sm:$0xf] %vm455_vm1, %v23438_v0  ;;  %479 = vst.msk [vmem:[#allocation2 + $0x58] sm:$0xf] %vm455_vm1, %v23438_v0  ;;  %v571_v24 = vld [vmem:[%s18008_s14 + $0x18] sm:$0xf] }
  0x1f   : > { %481 = vst.msk [vmem:[#allocation2 + $0x60] sm:$0xf] %vm455_vm1, %v23438_v0  ;;  %482 = vst.msk [vmem:[#allocation2 + $0x64] sm:$0xf] %vm455_vm1, %v23438_v0  ;;  %v572_v25 = vld [vmem:[%s18008_s14 + $0x1c] sm:$0xf]  ;;  %v690_v31 = vsel %vm18015_vm6, %v688_v22, %v689_v18 }
  0x20   : > { %487 = vst.msk [vmem:[#allocation2 + $0x78] sm:$0xf] %vm455_vm1, %v23438_v0  ;;  %488 = vst.msk [vmem:[#allocation2 + $0x7c] sm:$0xf] %vm455_vm1, %v23438_v0  ;;  %v691_v27 = vrot.slane %v689_v18, 4  ;;  %v678_v28 = vrot.slane %v677_v20, 4 }
  0x21   : > { %490 = vst.msk [vmem:[#allocation2 + $0x84] sm:$0xf] %vm455_vm1, %v23438_v0  ;;  %491 = vst.msk [vmem:[#allocation2 + $0x88] sm:$0xf] %vm455_vm1, %v23438_v0  ;;  %v647_v29 = vrot.slane %v571_v24, 7  ;;  %v681_v32 = vrot.slane %v679_v23, 4 }
  0x22   : > { %493 = vst.msk [vmem:[#allocation2 + $0x90] sm:$0xf] %vm455_vm1, %v23438_v0  ;;  %494 = vst.msk [vmem:[#allocation2 + $0x94] sm:$0xf] %vm455_vm1, %v23438_v0  ;;  %v591_v30 = vld [vmem:[%s18008_s14 + $0x68] sm:$0xf]  ;;  %v680_v36 = vsel %vm18015_vm6, %v678_v28, %v679_v23 }
  0x23   : > { %496 = vst.msk [vmem:[#allocation2 + $0x9c] sm:$0xf] %vm455_vm1, %v23438_v0  ;;  %497 = vst.msk [vmem:[#allocation2 + $0xa0] sm:$0xf] %vm455_vm1, %v23438_v0  ;;  %v649_v33 = vrot.slane %v572_v25, 7  ;;  %v697_v35 = vrot.slane %v591_v30, 7 }
  0x24   : > { %499 = vst.msk [vmem:[#allocation2 + $0xa8] sm:$0xf] %vm455_vm1, %v23438_v0  ;;  %500 = vst.msk [vmem:[#allocation2 + $0xac] sm:$0xf] %vm455_vm1, %v23438_v0  ;;  %v592_v34 = vld [vmem:[%s18008_s14 + $0x6c] sm:$0xf] }
  0x25   : > { %502 = vst.msk [vmem:[#allocation2 + $0xb4] sm:$0xf] %vm455_vm1, %v23438_v0  ;;  %503 = vst.msk [vmem:[#allocation2 + $0xb8] sm:$0xf] %vm455_vm1, %v23438_v0  ;;  %v648_v37 = vrot.slane %v647_v29, 4  ;;  %v699_v38 = vrot.slane %v592_v34, 7 }
  0x26   : > { %505 = vst.msk [vmem:[#allocation2 + $0xc0] sm:$0xf] %vm455_vm1, %v23438_v0  ;;  %506 = vst.msk [vmem:[#allocation2 + $0xc4] sm:$0xf] %vm455_vm1, %v23438_v0  ;;  %v595_v39 = vld [vmem:[%s18008_s14 + $0x78] sm:$0xf] }
  0x27   : > { %508 = vst.msk [vmem:[#allocation2 + $0xcc] sm:$0xf] %vm455_vm1, %v23438_v0  ;;  %509 = vst.msk [vmem:[#allocation2 + $0xd0] sm:$0xf] %vm455_vm1, %v23438_v0  ;;  %v596_v40 = vld [vmem:[%s18008_s14 + $0x7c] sm:$0xf]  ;;  %v650_v46 = vsel %vm18015_vm6, %v648_v37, %v649_v33 }
  0x28   : > { %511 = vst.msk [vmem:[#allocation2 + $0xd8] sm:$0xf] %vm455_vm1, %v23438_v0  ;;  %512 = vst.msk [vmem:[#allocation2 + $0xdc] sm:$0xf] %vm455_vm1, %v23438_v0  ;;  %v651_v41 = vrot.slane %v649_v33, 4  ;;  %v698_v42 = vrot.slane %v697_v35, 4 }
  0x29   : > { %784 = vst.msk [vmem:[#allocation2 + $0x6c] sm:$0xe] %vm761_vm4, %v667_v6  ;;  %778 = vst.msk [vmem:[#allocation2 + $0x54] sm:$0xe] %vm761_vm4, %v657_v9  ;;  %v707_v43 = vrot.slane %v595_v39, 7  ;;  %v709_v44 = vrot.slane %v596_v40, 7 }
  0x2a   : > { %786 = vst.msk [vmem:[#allocation2 + $0x74] sm:$0x1] %vm764_vm5, %v671_v12  ;;  %780 = vst.msk [vmem:[#allocation2 + $0x5c] sm:$0x1] %vm764_vm5, %v661_v13  ;;  %v567_v45 = vld [vmem:[%s18008_s14 + $0x8] sm:$0xf]  ;;  %v700_v50 = vsel %vm18015_vm6, %v698_v42, %v699_v38 }
  0x2b   : > { %796 = vst.msk [vmem:[#allocation2 + $0x9c] sm:$0xe] %vm761_vm4, %v687_v15  ;;  %790 = vst.msk [vmem:[#allocation2 + $0x84] sm:$0xe] %vm761_vm4, %v677_v20  ;;  %v701_v47 = vrot.slane %v699_v38, 4  ;;  %v637_v49 = vrot.slane %v567_v45, 7 }
  0x2c   : > { %785 = vst.msk [vmem:[#allocation2 + $0x70] sm:$0xf] %vm455_vm1, %v670_v21  ;;  %779 = vst.msk [vmem:[#allocation2 + $0x58] sm:$0xf] %vm455_vm1, %v660_v26  ;;  %v18055_v48 = vld [vmem:[%s18008_s14 + $0xc] sm:$0xf] }
  0x2d   : > { %797 = vst.msk [vmem:[#allocation2 + $0xa0] sm:$0xf] %vm455_vm1, %v690_v31  ;;  %791 = vst.msk [vmem:[#allocation2 + $0x88] sm:$0xf] %vm455_vm1, %v680_v36  ;;  %v708_v51 = vrot.slane %v707_v43, 4  ;;  %v711_v52 = vrot.slane %v709_v44, 4 }
  0x2e   : > { %798 = vst.msk [vmem:[#allocation2 + $0xa4] sm:$0x1] %vm764_vm5, %v691_v27  ;;  %792 = vst.msk [vmem:[#allocation2 + $0x8c] sm:$0x1] %vm764_vm5, %v681_v32  ;;  %v639_v53 = vrot.slane %v18055_v48, 7  ;;  %v638_v55 = vrot.slane %v637_v49, 4 }
  0x2f   : > { %772 = vst.msk [vmem:[#allocation2 + $0x3c] sm:$0xe] %vm761_vm4, %v647_v29  ;;  %802 = vst.msk [vmem:[#allocation2 + $0xb4] sm:$0xe] %vm761_vm4, %v697_v35  ;;  %v710_v58 = vsel %vm18015_vm6, %v708_v51, %v709_v44  ;;  %vm4203_vm9 = vcmask 1043456   ;;  %vm1185_vm10 = vcmask 64512  }
  0x30   : > { %773 = vst.msk [vmem:[#allocation2 + $0x40] sm:$0xf] %vm455_vm1, %v650_v46  ;;  %803 = vst.msk [vmem:[#allocation2 + $0xb8] sm:$0xf] %vm455_vm1, %v700_v50  ;;  %v640_v61 = vsel %vm18015_vm6, %v638_v55, %v639_v53  ;;  %vm1222_vm11 = vcmask 130048   ;;  %vm4023_vm12 = vcmask 1041409  }
  0x31   : > { %774 = vst.msk [vmem:[#allocation2 + $0x44] sm:$0x1] %vm764_vm5, %v651_v41  ;;  %v17642_v54 = vld [vmem:[#allocation2 + $0x74] ss:$0 sps:$4 sm:$0x33]   ;;  %vm4026_vm13 = vcmask 1042434  }
  0x32   : > { %808 = vst.msk [vmem:[#allocation2 + $0xcc] sm:$0xe] %vm761_vm4, %v707_v43  ;;  %766 = vst.msk [vmem:[#allocation2 + $0x24] sm:$0xe] %vm761_vm4, %v637_v49  ;;  %v2100_v59 = vrot.slane %v17642_v54, 1  ;;  %v1984_v14 = vshll.u32 %v17642_v54, 16 }
  0x33   : > { %804 = vst.msk [vmem:[#allocation2 + $0xbc] sm:$0x1] %vm764_vm5, %v701_v47  ;;  %v17643_v56 = vld [vmem:[#allocation2 + $0x5c] ss:$0 sps:$4 sm:$0x33]   ;;  %v18066_v57 = vld [vmem:[#allocation2 + $0x6c] sm:$0xff]  }
  0x34   : > { %810 = vst.msk [vmem:[#allocation2 + $0xd4] sm:$0x1] %vm764_vm5, %v711_v52  ;;  %v17645_v60 = vld [vmem:[#allocation2 + $0x54] sm:$0xff]   ;;  %v2097_v62 = vrot.slane %v17643_v56, 1  ;;  %v2099_v63 = vrot.slane %v18066_v57, 1  ;;  %2132 = vrot.lane.b32.xlu1 %v2100_v59, %s17794_s15  ;;  %v18079_v2 = vld [vmem:[#allocation2 + $0x9c] sm:$0xff]  }
  0x35   : > { %809 = vst.msk [vmem:[#allocation2 + $0xd0] sm:$0xf] %vm455_vm1, %v710_v58  ;;  %767 = vst.msk [vmem:[#allocation2 + $0x28] sm:$0xf] %vm455_vm1, %v640_v61  ;;  %v2096_v1 = vrot.slane %v17645_v60, 1  ;;  %v18084_v4 = vld [vmem:[#allocation2 + $0x84] sm:$0xff]  }
  0x36   : > { %2128 = vrot.lane.b32.xlu0 %v2097_v62, %s17794_s15  ;;  %v18082_v3 = vld [vmem:[#allocation2 + $0xa4] ss:$0 sps:$4 sm:$0x33]   ;;  %v2101_v5 = vsel %vm1121_vm7, %v2099_v63, %v2100_v59  ;;  %v2105_v7 = vrot.slane %v18079_v2, 1  ;;  %v2102_v11 = vrot.slane %v18084_v4, 1  ;;  %v1969_v12 = vshll.u32 %v17643_v56, 16 }
  0x37   : > { %v2098_v6 = vsel %vm1121_vm7, %v2096_v1, %v2097_v62  ;;  %v18089_v9 = vld [vmem:[#allocation2 + $0x8c] ss:$0 sps:$4 sm:$0x33]   ;;  %v2106_v10 = vrot.slane %v18082_v3, 1  ;;  %v1988_v15 = vshrl.u32 %v17642_v54, 16  ;;  %v1973_v19 = vshrl.u32 %v17643_v56, 16 }
  0x38   : > { %2126 = vrot.lane.b32.xlu1 %v2098_v6, %s17794_s15  ;;  %v2103_v13 = vrot.slane %v18089_v9, 1  ;;  %v1999_v16 = vshll.u32 %v18089_v9, 16  ;;  %v1971_v18 = vrot.slane %v1969_v12, 1  ;;  %v1986_v21 = vrot.slane %v1984_v14, 1  ;;  %v18103_v24 = vld [vmem:[#allocation2 + $0x3c] sm:$0xff]   ;;  %v18114_v34 = vld [vmem:[#allocation2 + $0xb4] sm:$0xff]  }
  0x39   : > { %v2107_v17 = vsel %vm1121_vm7, %v2105_v7, %v2106_v10  ;;  %v1962_v22 = vshrl.u32 %v17645_v60, 16  ;;  %v1964_v23 = vshll.u32 %v17645_v60, 16  ;;  %v2003_v26 = vshrl.u32 %v18089_v9, 16  ;;  %v18117_v38 = vld [vmem:[#allocation2 + $0x44] ss:$0 sps:$4 sm:$0x33]  }
  0x3a   : > { %2130 = vrot.lane.b32.xlu0 %v2101_v5, %s17794_s15  ;;  %v2104_v20 = vsel %vm1121_vm7, %v2102_v11, %v2103_v13  ;;  %v18105_v25 = vrot.slane %v1999_v16, 1  ;;  %v2014_v27 = vshll.u32 %v18082_v3, 16  ;;  %v1990_v28 = vor.u32 %v1988_v15, %v1986_v21  ;;  %v18120_v41 = vld [vmem:[#allocation2 + $0xbc] ss:$0 sps:$4 sm:$0x33]   ;;  %s17798_s17 = smov 32  }
  0x3b   : > { %v1966_v29 = vrot.slane %v1964_v23, 1  ;;  %v1979_v30 = vshll.u32 %v18066_v57, 16  ;;  %v1975_v31 = vor.u32 %v1973_v19, %v1971_v18  ;;  %v2018_v32 = vshrl.u32 %v18082_v3, 16  ;;  %v18138_v62 = vld [vmem:[#allocation2 + $0xd4] ss:$0 sps:$4 sm:$0x33]  }
  0x3c   : > { %2134 = vrot.lane.b32.xlu1 %v2104_v20, %s17794_s15  ;;  %v2009_v33 = vshll.u32 %v18079_v2, 16  ;;  %v1977_v36 = vshrl.u32 %v18066_v57, 16  ;;  %v1949_v39 = vshll.u32 %v18103_v24, 16  ;;  %v2016_v40 = vrot.slane %v2014_v27, 1  ;;  %v18129_v49 = vld [vmem:[#allocation2 + $0xcc] sm:$0xff]   ;;  %v18152_v15 = vld [vmem:[#allocation2 + $0x24] sm:$0xff]  }
  0x3d   : > { %v1967_v35 = vor.u32 %v1966_v29, %v1962_v22  ;;  %v1981_v37 = vrot.slane %v1979_v30, 1  ;;  %v2005_v42 = vor.u32 %v2003_v26, %v18105_v25  ;;  %v1994_v43 = vshll.u32 %v18084_v4, 16  ;;  %v569_v16 = vld [vmem:[%s18008_s14 + $0x10] sm:$0xf]  ;;  %v573_v19 = vld [vmem:[%s18008_s14 + $0x20] sm:$0xf] }
  0x3e   : > { %2138 = vrot.lane.b32.xlu0 %v2107_v17, %s17794_s15  ;;  %v2007_v44 = vshrl.u32 %v18079_v2, 16  ;;  %v2011_v45 = vrot.slane %v2009_v33, 1  ;;  %v1947_v46 = vshrl.u32 %v18103_v24, 16  ;;  %v2024_v47 = vshll.u32 %v18114_v34, 16  ;;  %v565_v22 = vld [vmem:[%s18008_s14] sm:$0xf] }
  0x3f   : > { %v1972_v50 = vsel %vm949_vm8, %v1967_v35, %v1971_v18  ;;  %v1982_v51 = vor.u32 %v1981_v37, %v1977_v36  ;;  %v1951_v52 = vrot.slane %v1949_v39, 1  ;;  %v1954_v54 = vshll.u32 %v18117_v38, 16  ;;  %v570_v18 = vld [vmem:[%s18008_s14 + $0x14] sm:$0xf]  ;;  %v18171_v29 = vld [vmem:[#allocation2 + $0xc] sm:$0xff]   ;;  %s17799_s27 = smov 112  }
  0x40   : > { %2069 = vrot.lane.b32.xlu1 %v1990_v28, %s17795_s16  ;;  %v2020_v55 = vor.u32 %v2018_v32, %v2016_v40  ;;  %v1992_v56 = vshrl.u32 %v18084_v4, 16  ;;  %v1996_v57 = vrot.slane %v1994_v43, 1  ;;  %v2022_v58 = vshrl.u32 %v18114_v34, 16  ;;  %v566_v36 = vld [vmem:[%s18008_s14 + $0x4] sm:$0xf] }
  0x41   : > { %v2026_v59 = vrot.slane %v2024_v47, 1  ;;  %v2029_v60 = vshll.u32 %v18120_v41, 16  ;;  %v2012_v61 = vor.u32 %v2011_v45, %v2007_v44  ;;  %v2039_v63 = vshll.u32 %v18129_v49, 16 }
  0x42   : > { %2065 = vrot.lane.b32.xlu0 %v1975_v31, %s17795_s16  ;;  %v1987_v1 = vsel %vm949_vm8, %v1982_v51, %v1986_v21  ;;  %v1952_v2 = vor.u32 %v1951_v52, %v1947_v46  ;;  %v18142_v4 = vrot.slane %v1954_v54, 1  ;;  %v641_v5 = vrot.slane %v639_v53, 4  ;;  %v574_v21 = vld [vmem:[%s18008_s14 + $0x24] sm:$0xf] }
  0x43   : > { %v2093_v6 = vrot.slane %v18103_v24, 1  ;;  %v1997_v7 = vor.u32 %v1996_v57, %v1992_v56  ;;  %v2027_v11 = vor.u32 %v2026_v59, %v2022_v58  ;;  %v18148_v12 = vrot.slane %v2029_v60, 1  ;;  %v18194_v54 = vld [vmem:[#allocation2 + $0x14] ss:$0 sps:$4 sm:$0x33]  }
  0x44   : > { %2073 = vrot.lane.b32.xlu1 %v2005_v42, %s17795_s16  ;;  %v2037_v14 = vshrl.u32 %v18129_v49, 16  ;;  %768 = vst.msk [vmem:[#allocation2 + $0x2c] sm:$0x1] %vm764_vm5, %v641_v5  ;;  %v2017_v48 = vsel %vm949_vm8, %v2012_v61, %v2016_v40  ;;  %v2041_v53 = vrot.slane %v2039_v63, 1  ;;  %v2044_v17 = vshll.u32 %v18138_v62, 16 }
  0x45   : > { %v1957_v20 = vsel %vm949_vm8, %v1952_v2, %v18142_v4  ;;  %v2094_v23 = vrot.slane %v18117_v38, 1  ;;  %v642_v24 = vrot.slane %v569_v16, 7  ;;  %v2002_v26 = vsel %vm949_vm8, %v1997_v7, %v18105_v25  ;;  %v577_v61 = vld [vmem:[%s18008_s14 + $0x30] sm:$0xf]  ;;  %v578_v63 = vld [vmem:[%s18008_s14 + $0x34] sm:$0xf] }
  0x46   : > { %2063 = vrot.lane.b32.xlu0 %v1972_v50, %s17795_s16  ;;  %v2032_v27 = vsel %vm949_vm8, %v2027_v11, %v18148_v12  ;;  %v2108_v28 = vrot.slane %v18114_v34, 1  ;;  %v644_v30 = vrot.slane %v570_v18, 7  ;;  %v1934_v31 = vshll.u32 %v18152_v15, 16 }
  0x47   : > { %v643_v32 = vrot.slane %v642_v24, 4  ;;  %769 = vst.msk [vmem:[#allocation2 + $0x30] sm:$0xe] %vm761_vm4, %v642_v24  ;;  %v652_v33 = vrot.slane %v573_v19, 7  ;;  %v654_v35 = vrot.slane %v574_v21, 7  ;;  %v2042_v37 = vor.u32 %v2041_v53, %v2037_v14 }
  0x48   : > { %2077 = vrot.lane.b32.xlu1 %v2020_v55, %s17795_s16  ;;  %v18177_v25 = vrot.slane %v2044_v17, 1  ;;  %v646_v39 = vrot.slane %v644_v30, 4  ;;  %v632_v40 = vrot.slane %v565_v22, 7  ;;  %v2095_v34 = vsel %vm1121_vm7, %v2093_v6, %v2094_v23 }
  0x49   : > { %v645_v43 = vsel %vm18015_vm6, %v643_v32, %v644_v30  ;;  %v653_v44 = vrot.slane %v652_v33, 4  ;;  %775 = vst.msk [vmem:[#allocation2 + $0x48] sm:$0xe] %vm761_vm4, %v652_v33  ;;  %v2109_v45 = vrot.slane %v18120_v41, 1  ;;  %v656_v46 = vrot.slane %v654_v35, 4 }
  0x4a   : > { %2067 = vrot.lane.b32.xlu0 %v1987_v1, %s17795_s16  ;;  %770 = vst.msk [vmem:[#allocation2 + $0x34] sm:$0xf] %vm455_vm1, %v645_v43  ;;  %v633_v47 = vrot.slane %v632_v40, 4  ;;  %v634_v50 = vrot.slane %v566_v36, 7  ;;  %v1932_v51 = vshrl.u32 %v18152_v15, 16  ;;  %v1936_v52 = vrot.slane %v1934_v31, 1 }
  0x4b   : > { %v18182_v42 = vld [vmem:[#allocation2 + $0x2c] ss:$0 sps:$4 sm:$0x33]   ;;  %771 = vst.msk [vmem:[#allocation2 + $0x38] sm:$0x1] %vm764_vm5, %v646_v39  ;;  %v1919_v55 = vshll.u32 %v18171_v29, 16  ;;  %v655_v56 = vsel %vm18015_vm6, %v653_v44, %v654_v35  ;;  %v2047_v57 = vsel %vm949_vm8, %v2042_v37, %v18177_v25  ;;  %v2110_v2 = vsel %vm1121_vm7, %v2108_v28, %v2109_v45 }
  0x4c   : > { %2075 = vrot.lane.b32.xlu1 %v2017_v48, %s17795_s16  ;;  %762 = vst.msk [vmem:[#allocation2 + $0x18] sm:$0xe] %vm761_vm4, %v632_v40  ;;  %v1939_v58 = vshll.u32 %v18182_v42, 16  ;;  %v635_v59 = vsel %vm18015_vm6, %v633_v47, %v634_v50  ;;  %v636_v60 = vrot.slane %v634_v50, 4  ;;  %v1917_v1 = vshrl.u32 %v18171_v29, 16 }
  0x4d   : > { %776 = vst.msk [vmem:[#allocation2 + $0x4c] sm:$0xf] %vm455_vm1, %v655_v56  ;;  %763 = vst.msk [vmem:[#allocation2 + $0x1c] sm:$0xf] %vm455_vm1, %v635_v59  ;;  %v1921_v5 = vrot.slane %v1919_v55, 1  ;;  %v1924_v6 = vshll.u32 %v18194_v54, 16  ;;  %v1937_v11 = vor.u32 %v1936_v52, %v1932_v51 }
  0x4e   : > { %2059 = vrot.lane.b32.xlu0 %v1957_v20, %s17795_s16  ;;  %777 = vst.msk [vmem:[#allocation2 + $0x50] sm:$0x1] %vm764_vm5, %v656_v46  ;;  %765 = vst.msk [vmem:[#allocation2 + $0x20] sm:$0x1] %vm764_vm5, %v636_v60  ;;  %v662_v7 = vrot.slane %v577_v61, 7  ;;  %v1941_v14 = vrot.slane %v1939_v58, 1 }
  0x4f   : > { %v664_v16 = vrot.slane %v578_v63, 7  ;;  %v2111_v17 = vrot.slane %v18129_v49, 1  ;;  %v2112_v18 = vrot.slane %v18138_v62, 1  ;;  %v1922_v20 = vor.u32 %v1921_v5, %v1917_v1  ;;  %v585_v35 = vld [vmem:[%s18008_s14 + $0x50] sm:$0xf] }
  0x50   : > { %2071 = vrot.lane.b32.xlu1 %v2002_v26, %s17795_s16  ;;  %v663_v53 = vrot.slane %v662_v7, 4  ;;  %781 = vst.msk [vmem:[#allocation2 + $0x60] sm:$0xe] %vm761_vm4, %v662_v7  ;;  %v1926_v21 = vrot.slane %v1924_v6, 1  ;;  %v1942_v26 = vsel %vm949_vm8, %v1937_v11, %v1941_v14  ;;  %v2088_v49 = vrot.slane %v18194_v54, 1 }
  0x51   : > { %v18217_v48 = vld [vmem:[#allocation2 + $0x30] sm:$0xff]   ;;  %v666_v19 = vrot.slane %v664_v16, 4  ;;  %v2113_v9 = vsel %vm1121_vm7, %v2111_v17, %v2112_v18  ;;  %v2090_v30 = vrot.slane %v18152_v15, 1  ;;  %v2091_v31 = vrot.slane %v18182_v42, 1  ;;  %v582_v51 = vld [vmem:[%s18008_s14 + $0x44] sm:$0xf] }
  0x52   : > { %2079 = vrot.lane.b32.xlu0 %v2032_v27, %s17795_s16  ;;  %v18226_v22 = vld [vmem:[#allocation2 + $0x38] ss:$0 sps:$4 sm:$0x33]   ;;  %v665_v24 = vsel %vm18015_vm6, %v663_v53, %v664_v16  ;;  %v983_v27 = vshll.u32 %v18217_v48, 16  ;;  %v1927_v28 = vsel %vm949_vm8, %v1922_v20, %v1926_v21  ;;  %v1928_v3 = vshrl.u32 %v18194_v54, 16 }
  0x53   : > { %782 = vst.msk [vmem:[#allocation2 + $0x64] sm:$0xf] %vm455_vm1, %v665_v24  ;;  %v988_v33 = vshll.u32 %v18226_v22, 16  ;;  %v1943_v36 = vshrl.u32 %v18182_v42, 16  ;;  %v586_v15 = vld [vmem:[%s18008_s14 + $0x54] sm:$0xf]  ;;  %v2092_v40 = vsel %vm1121_vm7, %v2090_v30, %v2091_v31 }
  0x54   : > { %2122 = vrot.lane.b32.xlu1 %v2095_v34, %s17794_s15  ;;  %783 = vst.msk [vmem:[#allocation2 + $0x68] sm:$0x1] %vm764_vm5, %v666_v19  ;;  %v985_v32 = vrot.slane %v983_v27, 1  ;;  %v18253_v37 = vld [vmem:[#allocation2 + $0x48] sm:$0xff]   ;;  %v581_v34 = vld [vmem:[%s18008_s14 + $0x40] sm:$0xf]  ;;  %v1930_v16 = vor.u32 %v1928_v3, %v1926_v21 }
  0x55   : > { %v18264_v44 = vrot.slane %v988_v33, 1  ;;  %v1128_v46 = vrot.slane %v18217_v48, 1  ;;  %v18267_v47 = vld [vmem:[#allocation2 + $0x18] sm:$0xff]   ;;  %v682_v50 = vrot.slane %v585_v35, 7  ;;  %v589_v52 = vld [vmem:[%s18008_s14 + $0x60] sm:$0xf]  ;;  %v1945_v60 = vor.u32 %v1943_v36, %v1941_v14 }
  0x56   : > { %2083 = vrot.lane.b32.xlu0 %v2047_v57, %s17795_s16  ;;  %v1129_v55 = vrot.slane %v18226_v22, 1  ;;  %v18272_v56 = vld [vmem:[#allocation2 + $0x50] ss:$0 sps:$4 sm:$0x33]   ;;  %v996_v57 = vshrl.u32 %v18253_v37, 16  ;;  %v684_v58 = vrot.slane %v586_v15, 7 }
  0x57   : > { %v590_v59 = vld [vmem:[%s18008_s14 + $0x64] sm:$0xf]  ;;  %v998_v61 = vshll.u32 %v18253_v37, 16  ;;  %v683_v63 = vrot.slane %v682_v50, 4  ;;  %793 = vst.msk [vmem:[#allocation2 + $0x90] sm:$0xe] %vm761_vm4, %v682_v50 }
  0x58   : > { %2142 = vrot.lane.b32.xlu1 %v2110_v2, %s17794_s15  ;;  %v18280_v1 = vld [vmem:[#allocation2 + $0x20] ss:$0 sps:$4 sm:$0x33]   ;;  %v686_v2 = vrot.slane %v684_v58, 4  ;;  %v968_v6 = vshll.u32 %v18267_v47, 16  ;;  %v672_v11 = vrot.slane %v581_v34, 7  ;;  %v1130_v30 = vsel %vm1121_vm7, %v1128_v46, %v1129_v55 }
  0x59   : > { %v685_v7 = vsel %vm18015_vm6, %v683_v63, %v684_v58  ;;  %v593_v14 = vld [vmem:[%s18008_s14 + $0x70] sm:$0xf]  ;;  %v674_v53 = vrot.slane %v582_v51, 7  ;;  %v692_v17 = vrot.slane %v589_v52, 7  ;;  %v594_v19 = vld [vmem:[%s18008_s14 + $0x74] sm:$0xf] }
  0x5a   : > { %2136 = vrot.lane.b32.xlu0 %v2103_v13, %s17794_s15  ;;  %v2087_v13 = vrot.slane %v18171_v29, 1  ;;  %v1958_v29 = vshrl.u32 %v18117_v38, 16  ;;  %794 = vst.msk [vmem:[#allocation2 + $0x94] sm:$0xf] %vm455_vm1, %v685_v7  ;;  %v1000_v20 = vrot.slane %v998_v61, 1  ;;  %v1003_v24 = vshll.u32 %v18272_v56, 16 }
  0x5b   : > { %795 = vst.msk [vmem:[#allocation2 + $0x98] sm:$0x1] %vm764_vm5, %v686_v2  ;;  %v694_v27 = vrot.slane %v590_v59, 7  ;;  %v966_v21 = vshrl.u32 %v18267_v47, 16  ;;  %v970_v3 = vrot.slane %v968_v6, 1  ;;  %v702_v35 = vrot.slane %v593_v14, 7 }
  0x5c   : > { %2140 = vrot.lane.b32.xlu1 %v2106_v10, %s17794_s15  ;;  %v981_v10 = vshrl.u32 %v18217_v48, 16  ;;  %v2089_v39 = vsel %vm1121_vm7, %v2087_v13, %v2088_v49  ;;  %v18288_v48 = vld [vmem:[#allocation2] sm:$0xff]   ;;  %787 = vst.msk [vmem:[#allocation2 + $0x78] sm:$0xe] %vm761_vm4, %v672_v11  ;;  %v676_v13 = vrot.slane %v674_v53, 4  ;;  %v1960_v36 = vor.u32 %v1958_v29, %v18142_v4  ;;  %s17626_s14 = smul.u32 72, %s23828_s26 }
  0x5d   : > { %799 = vst.msk [vmem:[#allocation2 + $0xa8] sm:$0xe] %vm761_vm4, %v692_v17  ;;  %v18313_v15 = vld [vmem:[#allocation2 + $0x8] ss:$0 sps:$4 sm:$0x33]   ;;  %v18318_v34 = vrot.slane %v1003_v24, 1  ;;  %v971_v50 = vor.u32 %v970_v3, %v966_v21 }
  0x5e   : > { %2055 = vrot.lane.b32.xlu0 %v1942_v26, %s17795_s16  ;;  %v986_v43 = vor.u32 %v985_v32, %v981_v10  ;;  %v673_v26 = vrot.slane %v672_v11, 4  ;;  %v696_v32 = vrot.slane %v694_v27, 4  ;;  %789 = vst.msk [vmem:[#allocation2 + $0x80] sm:$0x1] %vm764_vm5, %v676_v13  ;;  %v703_v46 = vrot.slane %v702_v35, 4  ;;  %v18339_v63 = vld [vmem:[#allocation2 + $0x60] sm:$0xff]   ;;  %s23265_s22 = scalar_lea.vmem %s23437_s13, %s17626_s14 }
  0x5f   : > { %805 = vst.msk [vmem:[#allocation2 + $0xc0] sm:$0xe] %vm761_vm4, %v702_v35  ;;  %v958_v8 = vshll.u32 %v18313_v15, 16  ;;  %v1125_v42 = vrot.slane %v18267_v47, 1  ;;  %v2033_v2 = vshrl.u32 %v18120_v41, 16  ;;  %v1131_v47 = vrot.slane %v18253_v37, 1 }
  0x60   : > { %2051 = vrot.lane.b32.xlu1 %v1927_v28, %s17795_s16  ;;  %v991_v5 = vsel %vm949_vm8, %v986_v43, %v18264_v44  ;;  %v693_v28 = vrot.slane %v692_v17, 4  ;;  %v675_v10 = vsel %vm18015_vm6, %v673_v26, %v674_v53  ;;  %801 = vst.msk [vmem:[#allocation2 + $0xb0] sm:$0x1] %vm764_vm5, %v696_v32  ;;  %v953_v43 = vshll.u32 %v18288_v48, 16 }
  0x61   : > { %788 = vst.msk [vmem:[#allocation2 + $0x7c] sm:$0xf] %vm455_vm1, %v675_v10  ;;  %v960_v61 = vrot.slane %v958_v8, 1  ;;  %v1132_v6 = vrot.slane %v18272_v56, 1  ;;  %v1013_v14 = vshll.u32 %v18339_v63, 16  ;;  %v18355_v38 = vld [vmem:[#allocation2 + $0x90] sm:$0xff]   ;;  %v2035_v54 = vor.u32 %v2033_v2, %v18148_v12 }
  0x62   : > { %2146 = vrot.lane.b32.xlu0 %v2113_v9, %s17794_s15  ;;  %v973_v9 = vshll.u32 %v18280_v1, 16  ;;  %v695_v33 = vsel %vm18015_vm6, %v693_v28, %v694_v27  ;;  %v955_v59 = vrot.slane %v953_v43, 1  ;;  %v18351_v7 = vld [vmem:[#allocation2 + $0x68] ss:$0 sps:$4 sm:$0x33]   ;;  %v962_v37 = vshrl.u32 %v18313_v15, 16 }
  0x63   : > { %800 = vst.msk [vmem:[#allocation2 + $0xac] sm:$0xf] %vm455_vm1, %v695_v33  ;;  %v992_v53 = vshrl.u32 %v18226_v22, 16  ;;  %v1011_v17 = vshrl.u32 %v18339_v63, 16  ;;  %v1043_v12 = vshll.u32 %v18355_v38, 16  ;;  %v1007_v13 = vshrl.u32 %v18272_v56, 16 }
  0x64   : > { %2114 = vrot.lane.b32.xlu1 %v2089_v39, %s17794_s15  ;;  %v704_v39 = vrot.slane %v594_v19, 7  ;;  %v975_v51 = vrot.slane %v973_v9, 1  ;;  %v1018_v19 = vshll.u32 %v18351_v7, 16  ;;  %v18378_v27 = vld [vmem:[#allocation2 + $0x98] ss:$0 sps:$4 sm:$0x33]  }
  0x65   : > { %v994_v21 = vor.u32 %v992_v53, %v18264_v44  ;;  %v1045_v28 = vrot.slane %v1043_v12, 1  ;;  %v1009_v44 = vor.u32 %v1007_v13, %v18318_v34  ;;  %v2048_v10 = vshrl.u32 %v18138_v62, 16 }
  0x66   : > { %2118 = vrot.lane.b32.xlu0 %v2092_v40, %s17794_s15  ;;  %v1001_v40 = vor.u32 %v1000_v20, %v996_v57  ;;  %v706_v4 = vrot.slane %v704_v39, 4  ;;  %v705_v29 = vsel %vm18015_vm6, %v703_v46, %v704_v39  ;;  %v951_v57 = vshrl.u32 %v18288_v48, 16 }
  0x67   : > { %806 = vst.msk [vmem:[#allocation2 + $0xc4] sm:$0xf] %vm455_vm1, %v705_v29  ;;  %v976_v58 = vsel %vm949_vm8, %v971_v50, %v975_v51  ;;  %v1015_v20 = vrot.slane %v1013_v14, 1  ;;  %v18384_v9 = vrot.slane %v1018_v19, 1  ;;  %v2050_v22 = vor.u32 %v2048_v10, %v18177_v25 }
  0x68   : > { %2057 = vrot.lane.b32.xlu1 %v1945_v60, %s17795_s16  ;;  %807 = vst.msk [vmem:[#allocation2 + $0xc8] sm:$0x1] %vm764_vm5, %v706_v4  ;;  %v1006_v52 = vsel %vm949_vm8, %v1001_v40, %v18318_v34  ;;  %v956_v60 = vor.u32 %v955_v59, %v951_v57  ;;  %v17672_v3 = vld [vmem:[#allocation2 + $0x78] sm:$0xff]   ;;  %v1135_v40 = vrot.slane %v18351_v7, 1  ;;  %v1281_v53 = vlaneseq }
  0x69   : > { %v1016_v41 = vor.u32 %v1015_v20, %v1011_v17  ;;  %v1026_v34 = vshrl.u32 %v17672_v3, 16  ;;  %v18457_v20 = vld [vmem:[#allocation2 + $0xd8] sm:$0xff]   ;;  %vm4029_vm14 = vcmask 1043459   ;;  %vm4035_vm15 = vcmask 1045509  }
  0x6a   : > { %1093 = vrot.lane.b32.xlu0 %v991_v5, %s17795_s16  ;;  %v961_v11 = vsel %vm949_vm8, %v956_v60, %v960_v61  ;;  %v17674_v39 = vld [vmem:[#allocation2 + $0xa8] sm:$0xff]   ;;  %v1140_v60 = vrot.slane %v18355_v38, 1  ;;  %v18469_v13 = vshrl.u32 %v1281_v53, 7  ;;  %v5769_v10 = vshll.u32 %v18457_v20, 16 }
  0x6b   : > { %v1021_v32 = vsel %vm949_vm8, %v1016_v41, %v18384_v9  ;;  %v1058_v4 = vshll.u32 %v17674_v39, 16  ;;  %v1056_v29 = vshrl.u32 %v17674_v39, 16  ;;  %v1143_v56 = vrot.slane %v17674_v39, 1 }
  0x6c   : > { %2053 = vrot.lane.b32.xlu1 %v1930_v16, %s17795_s16  ;;  %v977_v16 = vshrl.u32 %v18280_v1, 16  ;;  %23527 = vst [vmem:[#allocation4_spill] sm:$0xff] %v18469_v13  ;;  %vm4038_vm0 = vcmask 1046534   ;;  %vm4041_vm1 = vcmask 1047559   ;;  %vm4184_vm2 = vcmask 195584  }
  0x6d   : > { %vm519_vm4 = vcmask 123904   ;;  %vm520_vm5 = vsmask.f32 1280 }
  0x6e   : > { %1157 = vrot.lane.b32.xlu0 %v1130_v30, %s17794_s15  ;;  %v979_v26 = vor.u32 %v977_v16, %v975_v51  ;;  %v1048_v30 = vshll.u32 %v18378_v27, 16  ;;  %v18410_v51 = vld [vmem:[#allocation2 + $0xb0] ss:$0 sps:$4 sm:$0x33]   ;;  %vm20216_vm6 = vmand %vm519_vm4, %vm520_vm5 }
  0x6f   : > { %v1063_v59 = vshll.u32 %v18410_v51, 16  ;;  %v1144_v2 = vrot.slane %v18410_v51, 1  ;;  %v18452_v17 = vld [vmem:[#allocation2 + $0xc8] ss:$0 sps:$4 sm:$0x33]  }
  0x70   : > { %2120 = vrot.lane.b32.xlu1 %v2091_v31, %s17794_s15  ;;  %v1126_v31 = vrot.slane %v18280_v1, 1  ;;  %v964_v1 = vor.u32 %v962_v37, %v960_v61  ;;  %v18398_v35 = vrot.slane %v1048_v30, 1  ;;  %v1141_v61 = vrot.slane %v18378_v27, 1 }
  0x71   : > { %v1145_v62 = vsel %vm1121_vm7, %v1143_v56, %v1144_v2  ;;  %v17796_v37 = vmov 1966171168  }
  0x72   : > { %2061 = vrot.lane.b32.xlu0 %v1960_v36, %s17795_s16  ;;  %v1127_v5 = vsel %vm1121_vm7, %v1125_v42, %v1126_v31  ;;  %v18400_v36 = vld [vmem:[#allocation2 + $0x80] ss:$0 sps:$4 sm:$0x33]   ;;  %v1279_v16 = vunpack.c.l.s4 %v17796_v37 }
  0x73   : > { %v1033_v50 = vshll.u32 %v18400_v36, 16 }
  0x74   : > { %1097 = vrot.lane.b32.xlu1 %v1006_v52, %s17795_s16 }
  0x75   : > { %v1035_v57 = vrot.slane %v1033_v50, 1 }
  0x76   : > { %1089 = vrot.lane.b32.xlu0 %v976_v58, %s17795_s16  ;;  %v1060_v58 = vrot.slane %v1058_v4, 1  ;;  %v17748_v4 = vld [vmem:[#allocation2 + $0x5c] ss:$0 sps:$4 sm:$0x33]  }
  0x78   : > { %2124 = vrot.lane.b32.xlu1 %v2094_v23, %s17794_s15  ;;  %v1122_v23 = vrot.slane %v18288_v48, 1  ;;  %v1133_v48 = vsel %vm1121_vm7, %v1131_v47, %v1132_v6  ;;  %v1061_v42 = vor.u32 %v1060_v58, %v1056_v29  ;;  %v1137_v47 = vrot.slane %v17672_v3, 1 }
  0x7a   : > { %2116 = vrot.lane.b32.xlu0 %v2088_v49, %s17794_s15  ;;  %v1123_v49 = vrot.slane %v18313_v15, 1  ;;  %v1028_v15 = vshll.u32 %v17672_v3, 16 }
  0x7c   : > { %1153 = vrot.lane.b32.xlu1 %v1127_v5, %s17794_s15  ;;  %v1124_v24 = vsel %vm1121_vm7, %v1122_v23, %v1123_v49  ;;  %v1030_v46 = vrot.slane %v1028_v15, 1  ;;  %v1142_v5 = vsel %vm1121_vm7, %v1140_v60, %v1141_v61 }
  0x7e   : > { %1085 = vrot.lane.b32.xlu0 %v961_v11, %s17795_s16  ;;  %v1031_v52 = vor.u32 %v1030_v46, %v1026_v34  ;;  %v18442_v11 = vld [vmem:[#allocation2 + $0xc0] sm:$0xff]   ;;  %v17747_v46 = vld [vmem:[#allocation2 + $0x74] ss:$0 sps:$4 sm:$0x33]  }
  0x7f   : > { %v1073_v19 = vshll.u32 %v18442_v11, 16  ;;  %v1071_v41 = vshrl.u32 %v18442_v11, 16 }
  0x80   : > { %2081 = vrot.lane.b32.xlu1 %v2035_v54, %s17795_s16  ;;  %v1036_v8 = vsel %vm949_vm8, %v1031_v52, %v1035_v57  ;;  %v1052_v54 = vshrl.u32 %v18378_v27, 16 }
  0x82   : > { %1161 = vrot.lane.b32.xlu0 %v1133_v48, %s17794_s15 }
  0x84   : > { %2144 = vrot.lane.b32.xlu1 %v2109_v45, %s17794_s15  ;;  %v1041_v45 = vshrl.u32 %v18355_v38, 16 }
  0x86   : > { %1149 = vrot.lane.b32.xlu0 %v1124_v24, %s17794_s15  ;;  %v1046_v33 = vor.u32 %v1045_v28, %v1041_v45  ;;  %v17680_v24 = vld [vmem:[%s23425_s1 + $0x14] ss:$0 sps:$4 sm:$0xff]   ;;  %v1075_v45 = vrot.slane %v1073_v19, 1  ;;  %v1078_v28 = vshll.u32 %v18452_v17, 16 }
  0x87   : > { %17623 = vmatprep.subr.msk.bf16.mxu1 %vm4203_vm9, %v17680_v24  ;;  %v4205_v30 = vsel %vm4203_vm9, %v17680_v24, 0  ;;  %17622 = vmatprep.subr.msk.bf16.mxu0 %vm4203_vm9, %v17680_v24 }
  0x88   : > { %1087 = vrot.lane.b32.xlu1 %v964_v1, %s17795_s16  ;;  %v1051_v43 = vsel %vm949_vm8, %v1046_v33, %v18398_v35  ;;  %v17681_v1 = vld [vmem:[%s23425_s1 + $0xc] sm:$0xff]   ;;  %17620 = vmatpush3.bf16.msra.mxu1 %v4205_v30  ;;  %v1067_v33 = vshrl.u32 %v18410_v51, 16  ;;  %v1076_v15 = vor.u32 %v1075_v45, %v1071_v41  ;;  %v1080_v39 = vrot.slane %v1078_v28, 1 }
  0x89   : > { %17619 = vmatprep.subr.bf16.mxu1 %v17681_v1  ;;  %17395 = vmatpush3.bf16.msra.mxu0 %v4205_v30  ;;  %v17750_v41 = vld [vmem:[#allocation2 + $0x8c] ss:$0 sps:$4 sm:$0x33]  }
  0x8a   : > { %1091 = vrot.lane.b32.xlu0 %v979_v26, %s17795_s16  ;;  %v1054_v26 = vor.u32 %v1052_v54, %v18398_v35  ;;  %17396 = vmatprep.subr.bf16.mxu0 %v17681_v1  ;;  %v17751_v28 = vld [vmem:[#allocation2 + $0x6c] sm:$0xff]  }
  0x8c   : > { %1155 = vrot.lane.b32.xlu1 %v1126_v31, %s17794_s15  ;;  %v18421_v31 = vrot.slane %v1063_v59, 1  ;;  %17621 = vmatpush3.bf16.msra.mxu1 %v17681_v1 }
  0x8d   : > { %17397 = vmatpush3.bf16.msra.mxu0 %v17681_v1 }
  0x8e   : > { %1095 = vrot.lane.b32.xlu0 %v994_v21, %s17795_s16  ;;  %v1069_v52 = vor.u32 %v1067_v33, %v18421_v31 }
  0x90   : > { %1159 = vrot.lane.b32.xlu1 %v1129_v55, %s17794_s15  ;;  %v1134_v55 = vrot.slane %v18339_v63, 1  ;;  %v1066_v63 = vsel %vm949_vm8, %v1061_v42, %v18421_v31  ;;  %v1147_v42 = vrot.slane %v18452_v17, 1 }
  0x92   : > { %1151 = vrot.lane.b32.xlu0 %v1123_v49, %s17794_s15  ;;  %v1136_v25 = vsel %vm1121_vm7, %v1134_v55, %v1135_v40  ;;  %v1037_v49 = vshrl.u32 %v18400_v36, 16  ;;  %v5767_v55 = vshrl.u32 %v18457_v20, 16 }
  0x94   : > { %1101 = vrot.lane.b32.xlu1 %v1021_v32, %s17795_s16  ;;  %v1039_v21 = vor.u32 %v1037_v49, %v1035_v57  ;;  %v1146_v57 = vrot.slane %v18442_v11, 1 }
  0x96   : > { %1099 = vrot.lane.b32.xlu0 %v1009_v44, %s17795_s16  ;;  %v18478_v44 = vld [vmem:[#allocation2 + $0xe0] ss:$0 sps:$4 sm:$0x33]  }
  0x97   : > { %v5774_v34 = vshll.u32 %v18478_v44, 16 }
  0x98   : > { %1109 = vrot.lane.b32.xlu1 %v1051_v43, %s17795_s16 }
  0x9a   : > { %2085 = vrot.lane.b32.xlu0 %v2050_v22, %s17795_s16 }
  0x9c   : > { %1165 = vrot.lane.b32.xlu1 %v1136_v25, %s17794_s15 }
  0x9e   : > { %1163 = vrot.lane.b32.xlu0 %v1132_v6, %s17794_s15  ;;  %v1138_v6 = vrot.slane %v18400_v36, 1 }
  0xa0   : > { %1105 = vrot.lane.b32.xlu1 %v1036_v8, %s17795_s16  ;;  %v1139_v38 = vsel %vm1121_vm7, %v1137_v47, %v1138_v6  ;;  %v1081_v8 = vsel %vm949_vm8, %v1076_v15, %v1080_v39  ;;  %v5786_v47 = vrot.slane %v18478_v44, 1 }
  0xa2   : > { %2148 = vrot.lane.b32.xlu0 %v2112_v18, %s17794_s15  ;;  %v1022_v18 = vshrl.u32 %v18351_v7, 16 }
  0xa4   : > { %1113 = vrot.lane.b32.xlu1 %v1066_v63, %s17795_s16  ;;  %v1024_v7 = vor.u32 %v1022_v18, %v18384_v9  ;;  %v1280_v9 = vunpack.c.0.s8 %v1279_v16  ;;  %v5776_v63 = vrot.slane %v5774_v34, 1 }
  0xa6   : > { %1173 = vrot.lane.b32.xlu0 %v1142_v5, %s17794_s15  ;;  %v2133_v14 = vpop.permute.xlu1 %2132  ;;  %v18488_v35 = vsub.s32 %v1280_v9, %v18469_v13  ;;  %v5785_v5 = vrot.slane %v18457_v20, 1 }
  0xa8   : > { %v2129_v23 = vpop.permute.xlu0 %2128  ;;  %1177 = vrot.lane.b32.xlu1 %v1145_v62, %s17794_s15  ;;  %v1082_v62 = vshrl.u32 %v18452_v17, 16 }
  0xaa   : > { %1169 = vrot.lane.b32.xlu0 %v1139_v38, %s17794_s15  ;;  %v18455_v48 = vpop.permute.xlu1 %2126  ;;  %v1148_v38 = vsel %vm1121_vm7, %v1146_v57, %v1147_v42  ;;  %v1084_v20 = vor.u32 %v1082_v62, %v1080_v39 }
  0xac   : > { %v18459_v12 = vpop.permute.xlu0 %2130  ;;  %1167 = vrot.lane.b32.xlu1 %v1135_v40, %s17794_s15  ;;  %v5771_v40 = vrot.slane %v5769_v10, 1 }
  0xae   : > { %1103 = vrot.lane.b32.xlu0 %v1024_v7, %s17795_s16  ;;  %v18476_v3 = vpop.permute.xlu1 %2134 }
  0xb0   : > { %v18482_v32 = vpop.permute.xlu0 %2138  ;;  %1111 = vrot.lane.b32.xlu1 %v1054_v26, %s17795_s16 }
  0xb2   : > { %1107 = vrot.lane.b32.xlu0 %v1039_v21, %s17795_s16  ;;  %v2070_v22 = vpop.permute.xlu1 %2069 }
  0xb3   : > { %v2169_v50 = vsel %vm1185_vm10, %v17747_v46, %v2070_v22  ;;  %v17752_v22 = vld [vmem:[#allocation2 + $0xa4] ss:$0 sps:$4 sm:$0x33]  }
  0xb4   : > { %v2066_v43 = vpop.permute.xlu0 %2065  ;;  %v2205_v29 = vsel %vm1222_vm11, %v2169_v50, %v2133_v14  ;;  %1175 = vrot.lane.b32.xlu1 %v1141_v61, %s17794_s15  ;;  %v5772_v61 = vor.u32 %v5771_v40, %v5767_v55 }
  0xb5   : > { %v2165_v25 = vsel %vm1185_vm10, %v17748_v4, %v2066_v43  ;;  %v2547_v59 = vrot.slane %v2205_v29, %v18488_v35 }
  0xb6   : > { %v2201_v58 = vsel %vm1222_vm11, %v2165_v25, %v2129_v23  ;;  %1171 = vrot.lane.b32.xlu0 %v1138_v6, %s17794_s15  ;;  %v2074_v27 = vpop.permute.xlu1 %2073  ;;  %v17749_v6 = vld [vmem:[#allocation2 + $0x54] sm:$0xff]   ;;  %v5778_v23 = vshrl.u32 %v18478_v44, 16  ;;  %v5777_v19 = vsel %vm949_vm8, %v5772_v61, %v5776_v63  ;;  %vm7093_vm8 = vsmask.f32 7938 }
  0xb7   : > { %v2484_v60 = vrot.slane %v2201_v58, %v18488_v35  ;;  %v2554_v31 = vrot.slane %v2547_v59, %v18488_v35  ;;  %v18535_v45 = vsel %vm1185_vm10, %v17750_v41, %v2074_v27 }
  0xb8   : > { %v2064_v56 = vpop.permute.xlu0 %2063  ;;  %1117 = vrot.lane.b32.xlu1 %v1081_v8, %s17795_s16  ;;  %v5780_v10 = vor.u32 %v5778_v23, %v5776_v63 }
  0xb9   : > { %v2491_v36 = vrot.slane %v2484_v60, %v18488_v35  ;;  %v2163_v18 = vsel %vm1185_vm10, %v17749_v6, %v2064_v56  ;;  %v3429_v11 = vrot.slane %v2554_v31, %v18488_v35 }
  0xba   : > { %v2199_v14 = vsel %vm1222_vm11, %v2163_v18, %v18455_v48  ;;  %1115 = vrot.lane.b32.xlu0 %v1069_v52, %s17795_s16  ;;  %v2078_v53 = vpop.permute.xlu1 %2077  ;;  %v5787_v48 = vsel %vm1121_vm7, %v5785_v5, %v5786_v47  ;;  %vm7098_vm7 = vcmask 122880  }
  0xbb   : > { %v3303_v54 = vrot.slane %v2491_v36, %v18488_v35  ;;  %v2429_v49 = vcombine.high %v2199_v14, %v2199_v14  ;;  %v2436_v37 = vrot.slane %v2199_v14, %v18488_v35  ;;  %v3436_v16 = vrot.slane %v3429_v11, %v18488_v35 }
  0xbc   : > { %v2068_v7 = vpop.permute.xlu0 %2067  ;;  %1181 = vrot.lane.b32.xlu1 %v1148_v38, %s17794_s15  ;;  %v18544_v55 = vsel %vm1185_vm10, %v17752_v22, %v2078_v53 }
  0xbd   : > { %v3310_v24 = vrot.slane %v3303_v54, %v18488_v35  ;;  %v2443_v1 = vrot.slane %v2429_v49, %v18488_v35  ;;  %v2444_v26 = vcombine.high %v2436_v37, %v2436_v37  ;;  %v2452_v21 = vrot.slane %v2436_v37, %v18488_v35 }
  0xbe   : > { %v3985_v9 = vunpack.c.l.b16 %v3436_v16  ;;  %v2167_v30 = vsel %vm1185_vm10, %v17751_v28, %v2068_v7  ;;  %1179 = vrot.lane.b32.xlu0 %v1144_v2, %s17794_s15  ;;  %v2076_v58 = vpop.permute.xlu1 %2075 }
  0xbf   : > { %v2445_v33 = vcombine.high %v2443_v1, %v2443_v1  ;;  %v2459_v15 = vrot.slane %v2443_v1, %v18488_v35  ;;  %v2466_v39 = vrot.slane %v2444_v26, %v18488_v35  ;;  %v3976_v40 = vunpack.c.l.b16 %v3310_v24  ;;  %v17753_v24 = vld [vmem:[#allocation2 + $0x9c] sm:$0xff]  }
  0xc0   : > { %v18546_v34 = vrot.slane %v3985_v9, 4  ;;  %v2474_v43 = vcombine.high %v2452_v21, %v2452_v21  ;;  %v3191_v46 = vrot.slane %v2452_v21, %v18488_v35  ;;  %v2203_v4 = vsel %vm1222_vm11, %v2167_v30, %v18459_v12  ;;  %5788 = vrot.lane.b32.xlu1 %v5787_v48, %s17794_s15  ;;  %v2060_v6 = vpop.permute.xlu0 %2059 }
  0xc1   : > { %v2473_v50 = vrot.slane %v2445_v33, %v18488_v35  ;;  %v2475_v51 = vcombine.high %v2459_v15, %v2459_v15  ;;  %v2476_v2 = vcombine.high %v2466_v39, %v2466_v39  ;;  %v3205_v29 = vrot.slane %v2466_v39, %v18488_v35  ;;  %v17754_v33 = vld [vmem:[#allocation2 + $0x3c] sm:$0xff]   ;;  %v17755_v39 = vld [vmem:[#allocation2 + $0x84] sm:$0xff]  }
  0xc2   : > { %v3198_v25 = vrot.slane %v3191_v46, %v18488_v35  ;;  %v3219_v52 = vrot.slane %v2474_v43, %v18488_v35  ;;  %v3247_v57 = vrot.slane %v2459_v15, %v18488_v35  ;;  %5781 = vrot.lane.b32.xlu0 %v5777_v19, %s17795_s16  ;;  %v18561_v27 = vrot.slane %v3976_v40, 5  ;;  %v2072_v7 = vpop.permute.xlu1 %2071 }
  0xc3   : > { %v2477_v59 = vcombine.high %v2473_v50, %v2473_v50  ;;  %v3233_v8 = vrot.slane %v2476_v2, %v18488_v35  ;;  %v3261_v60 = vrot.slane %v2473_v50, %v18488_v35  ;;  %v3275_v12 = vrot.slane %v2475_v51, %v18488_v35 }
  0xc4   : > { %v3212_v61 = vrot.slane %v3205_v29, %v18488_v35  ;;  %v3226_v63 = vrot.slane %v3219_v52, %v18488_v35  ;;  %v3968_v31 = vunpack.c.l.b16 %v3198_v25  ;;  %1183 = vrot.lane.b32.xlu1 %v1147_v42, %s17794_s15  ;;  %v18575_v18 = vrot.slane %v3247_v57, %v18488_v35  ;;  %v17756_v29 = vld [vmem:[#allocation2 + $0xb4] sm:$0xff]  }
  0xc5   : > { %v3240_v56 = vrot.slane %v3233_v8, %v18488_v35  ;;  %v18567_v5 = vrot.slane %v3261_v60, %v18488_v35  ;;  %v3282_v62 = vrot.slane %v3275_v12, %v18488_v35  ;;  %v3289_v36 = vrot.slane %v2477_v59, %v18488_v35 }
  0xc6   : > { %23528 = vst [vmem:[#allocation5_spill] sm:$0xff] %v18575_v18  ;;  %v3969_v11 = vunpack.c.l.b16 %v3212_v61  ;;  %v18577_v14 = vunpack.c.l.b16 %v3226_v63  ;;  %v2492_v38 = vcombine.high %v2203_v4, %v2203_v4  ;;  %1119 = vrot.lane.b32.xlu0 %v1084_v20, %s17795_s16  ;;  %v18585_v37 = vrot.slane %v3968_v31, 5 }
  0xc7   : > { %v3296_v23 = vrot.slane %v3289_v36, %v18488_v35  ;;  %v18581_v54 = vunpack.c.l.b16 %v3240_v56  ;;  %v18583_v49 = vunpack.c.l.b16 %v3282_v62  ;;  %v2499_v16 = vrot.slane %v2203_v4, %v18488_v35 }
  0xc8   : > { %23529 = vst [vmem:[#allocation6_spill] sm:$0xff] %v18577_v14  ;;  %v18588_v42 = vrot.slane %v3969_v11, 4  ;;  %v2506_v53 = vrot.slane %v2492_v38, %v18488_v35  ;;  %v2175_v1 = vsel %vm1185_vm10, %v17753_v24, %v2076_v58  ;;  %5790 = vrot.lane.b32.xlu1 %v5786_v47, %s17794_s15  ;;  %v18607_v15 = vsel %vm1185_vm10, %v17754_v33, %v2060_v6  ;;  %v2080_v47 = vpop.permute.xlu0 %2079 }
  0xc9   : > { %23530 = vst [vmem:[#allocation7_spill] sm:$0xff] %v18581_v54  ;;  %v18592_v19 = vunpack.c.l.b16 %v3296_v23  ;;  %v2507_v26 = vcombine.high %v2499_v16, %v2499_v16  ;;  %v2515_v9 = vrot.slane %v2499_v16, %v18488_v35  ;;  %v2211_v30 = vsel %vm1222_vm11, %v2175_v1, %v18482_v32 }
  0xca   : > { %23531 = vst [vmem:[#allocation8_spill] sm:$0xff] %v18588_v42  ;;  %v2508_v21 = vcombine.high %v2506_v53, %v2506_v53  ;;  %v2522_v41 = vrot.slane %v2506_v53, %v18488_v35  ;;  %5783 = vrot.lane.b32.xlu0 %v5780_v10, %s17795_s16  ;;  %v2171_v44 = vsel %vm1185_vm10, %v17755_v39, %v2072_v7 }
  0xcb   : > { %v18611_v22 = vrot.slane %v2507_v26, %v18488_v35  ;;  %v2537_v43 = vcombine.high %v2515_v9, %v2515_v9  ;;  %v3317_v46 = vrot.slane %v2515_v9, %v18488_v35  ;;  %v2618_v32 = vcombine.high %v2211_v30, %v2211_v30 }
  0xcc   : > { %v2536_v40 = vrot.slane %v2508_v21, %v18488_v35  ;;  %v2538_v10 = vcombine.high %v2522_v41, %v2522_v41  ;;  %v3373_v50 = vrot.slane %v2522_v41, %v18488_v35  ;;  %v2625_v51 = vrot.slane %v2211_v30, %v18488_v35 }
  0xcd   : > { %v18622_v52 = vsel %vm1185_vm10, %v17756_v29, %v2080_v47  ;;  %v3324_v57 = vrot.slane %v3317_v46, %v18488_v35  ;;  %v18631_v60 = vrot.slane %v2537_v43, %v18488_v35  ;;  %v2632_v12 = vrot.slane %v2618_v32, %v18488_v35 }
  0xce   : > { %v2540_v4 = vcombine.high %v2536_v40, %v2536_v40  ;;  %v18626_v58 = vrot.slane %v3373_v50, %v18488_v35  ;;  %v3387_v59 = vrot.slane %v2536_v40, %v18488_v35  ;;  %v3401_v8 = vrot.slane %v2538_v10, %v18488_v35 }
  0xcf   : > { %v2633_v61 = vcombine.high %v2625_v51, %v2625_v51  ;;  %v2641_v63 = vrot.slane %v2625_v51, %v18488_v35  ;;  %v3977_v36 = vunpack.c.l.b16 %v3324_v57  ;;  %v2634_v6 = vcombine.high %v2632_v12, %v2632_v12 }
  0xd0   : > { %v3394_v31 = vrot.slane %v3387_v59, %v18488_v35  ;;  %v3408_v56 = vrot.slane %v3401_v8, %v18488_v35  ;;  %v18638_v62 = vrot.slane %v2540_v4, %v18488_v35  ;;  %v2648_v11 = vrot.slane %v2632_v12, %v18488_v35  ;;  %v2123_v8 = vpop.permute.xlu1 %2122 }
  0xd1   : > { %v2655_v38 = vrot.slane %v2633_v61, %v18488_v35  ;;  %v2663_v23 = vcombine.high %v2641_v63, %v2641_v63  ;;  %v3569_v24 = vrot.slane %v2641_v63, %v18488_v35  ;;  %v18646_v1 = vrot.slane %v3977_v36, 4 }
  0xd2   : > { %v3982_v53 = vunpack.c.l.b16 %v3394_v31  ;;  %v18643_v7 = vunpack.c.l.b16 %v3408_v56  ;;  %v2662_v26 = vrot.slane %v2634_v6, %v18488_v35  ;;  %v2664_v21 = vcombine.high %v2648_v11, %v2648_v11 }
  0xd3   : > { %v2665_v9 = vcombine.high %v2655_v38, %v2655_v38  ;;  %v3576_v30 = vrot.slane %v3569_v24, %v18488_v35  ;;  %v3583_v33 = vrot.slane %v2655_v38, %v18488_v35  ;;  %v3597_v39 = vrot.slane %v2663_v23, %v18488_v35 }
  0xd4   : > { %v18649_v41 = vrot.slane %v3982_v53, 7  ;;  %v2666_v40 = vcombine.high %v2662_v26, %v2662_v26  ;;  %v3625_v10 = vrot.slane %v2648_v11, %v18488_v35  ;;  %v3639_v50 = vrot.slane %v2662_v26, %v18488_v35 }
  0xd5   : > { %v3611_v43 = vrot.slane %v2665_v9, %v18488_v35  ;;  %v3604_v46 = vrot.slane %v3597_v39, %v18488_v35  ;;  %v3653_v32 = vrot.slane %v2664_v21, %v18488_v35  ;;  %v3995_v51 = vunpack.c.l.b16 %v3576_v30 }
  0xd6   : > { %v3632_v29 = vrot.slane %v3625_v10, %v18488_v35  ;;  %v3667_v57 = vrot.slane %v2666_v40, %v18488_v35  ;;  %v2207_v59 = vsel %vm1222_vm11, %v2171_v44, %v18476_v3  ;;  %v18666_v12 = vrot.slane %v3583_v33, %v18488_v35 }
  0xd7   : > { %v3618_v4 = vrot.slane %v3611_v43, %v18488_v35  ;;  %v3646_v61 = vrot.slane %v3639_v50, %v18488_v35  ;;  %v3660_v63 = vrot.slane %v3653_v32, %v18488_v35  ;;  %v3997_v31 = vunpack.c.l.b16 %v3604_v46  ;;  %v18688_v46 = vpop.permute.xlu0 %2083 }
  0xd8   : > { %v3674_v56 = vrot.slane %v3667_v57, %v18488_v35  ;;  %v3999_v6 = vunpack.c.l.b16 %v3632_v29  ;;  %v2555_v11 = vcombine.high %v2207_v59, %v2207_v59  ;;  %v2562_v53 = vrot.slane %v2207_v59, %v18488_v35 }
  0xd9   : > { %v3998_v36 = vunpack.c.l.b16 %v3618_v4  ;;  %v4000_v38 = vunpack.c.l.b16 %v3646_v61  ;;  %v18671_v23 = vunpack.c.l.b16 %v3660_v63  ;;  %v2195_v3 = vsel %vm1222_vm11, %v18607_v15, %v2123_v8 }
  0xda   : > { %v18676_v44 = vunpack.c.l.b16 %v3674_v56  ;;  %v18678_v24 = vrot.slane %v3995_v51, 2  ;;  %v2569_v21 = vrot.slane %v2555_v11, %v18488_v35  ;;  %v4129_v9 = vrot.slane %v3999_v6, 6 }
  0xdb   : > { %v4127_v26 = vrot.slane %v3998_v36, 7  ;;  %v18681_v30 = vrot.slane %v4000_v38, 5  ;;  %v2570_v33 = vcombine.high %v2562_v53, %v2562_v53  ;;  %v18684_v39 = vrot.slane %v2562_v53, %v18488_v35  ;;  %v18713_v53 = vpop.permute.xlu1 %2142 }
  0xdc   : > { %v2571_v43 = vcombine.high %v2569_v21, %v2569_v21  ;;  %v2585_v10 = vrot.slane %v2569_v21, %v18488_v35  ;;  %v2366_v15 = vcombine.high %v2195_v3, %v2195_v3  ;;  %v2373_v8 = vrot.slane %v2195_v3, %v18488_v35 }
  0xdd   : > { %v4128_v40 = vsel %vm4023_vm12, %v4127_v26, %v3997_v31  ;;  %v18695_v51 = vrot.slane %v2570_v33, %v18488_v35  ;;  %v3443_v4 = vrot.slane %v18684_v39, %v18488_v35 }
  0xde   : > { %v18691_v50 = vsel %vm4026_vm13, %v4129_v9, %v4128_v40  ;;  %v2599_v29 = vrot.slane %v2571_v43, %v18488_v35  ;;  %v2601_v57 = vcombine.high %v2585_v10, %v2585_v10  ;;  %v3499_v59 = vrot.slane %v2585_v10, %v18488_v35 }
  0xdf   : > { %v2602_v63 = vcombine.high %v18695_v51, %v18695_v51  ;;  %v18707_v31 = vrot.slane %v3443_v4, %v18488_v35  ;;  %v2380_v56 = vrot.slane %v2366_v15, %v18488_v35  ;;  %v2381_v21 = vcombine.high %v2373_v8, %v2373_v8  ;;  %v2137_v15 = vpop.permute.xlu0 %2136  ;;  %v2141_v16 = vpop.permute.xlu1 %2140 }
  0xe0   : > { %v2603_v36 = vcombine.high %v2599_v29, %v2599_v29  ;;  %v3506_v6 = vrot.slane %v3499_v59, %v18488_v35  ;;  %v3513_v11 = vrot.slane %v2599_v29, %v18488_v35  ;;  %v3527_v38 = vrot.slane %v2601_v57, %v18488_v35 }
  0xe1   : > { %v3485_v26 = vrot.slane %v2602_v63, %v18488_v35  ;;  %v2382_v9 = vcombine.high %v2380_v56, %v2380_v56  ;;  %v2389_v29 = vrot.slane %v2373_v8, %v18488_v35  ;;  %v2396_v57 = vrot.slane %v2380_v56, %v18488_v35 }
  0xe2   : > { %v3520_v33 = vrot.slane %v3513_v11, %v18488_v35  ;;  %v3534_v40 = vrot.slane %v3527_v38, %v18488_v35  ;;  %v3541_v43 = vrot.slane %v2603_v36, %v18488_v35  ;;  %v3990_v10 = vunpack.c.l.b16 %v3506_v6 }
  0xe3   : > { %v3492_v4 = vrot.slane %v3485_v26, %v18488_v35  ;;  %v2403_v59 = vrot.slane %v2381_v21, %v18488_v35  ;;  %v2410_v38 = vrot.slane %v2382_v9, %v18488_v35  ;;  %v2411_v36 = vcombine.high %v2389_v29, %v2389_v29  ;;  %v2052_v17 = vpop.permute.xlu1 %2051 }
  0xe4   : > { %v3548_v63 = vrot.slane %v3541_v43, %v18488_v35  ;;  %v3991_v0 = vunpack.c.l.b16 %v3520_v33  ;;  %v18726_v48 = vunpack.c.l.b16 %v3534_v40  ;;  %v4113_v11 = vrot.slane %v3990_v10, 7 }
  0xe5   : > { %v3989_v32 = vunpack.c.l.b16 %v3492_v4  ;;  %v2412_v6 = vcombine.high %v2396_v57, %v2396_v57  ;;  %v2413_v56 = vcombine.high %v2403_v59, %v2403_v59  ;;  %v2414_v43 = vcombine.high %v2410_v38, %v2410_v38 }
  0xe6   : > { %v18730_v26 = vunpack.c.l.b16 %v3548_v63  ;;  %v18732_v8 = vrot.slane %v3991_v0, 6  ;;  %v3065_v33 = vrot.slane %v2389_v29, %v18488_v35  ;;  %v3079_v40 = vrot.slane %v2403_v59, %v18488_v35  ;;  %v2056_v0 = vpop.permute.xlu0 %2055 }
  0xe7   : > { %v18738_v10 = vsel %vm4023_vm12, %v4113_v11, %v3989_v32  ;;  %v3093_v9 = vrot.slane %v2411_v36, %v18488_v35  ;;  %v3107_v4 = vrot.slane %v2413_v56, %v18488_v35  ;;  %v3121_v63 = vrot.slane %v2396_v57, %v18488_v35 }
  0xe8   : > { %v3072_v47 = vrot.slane %v3065_v33, %v18488_v35  ;;  %v3086_v28 = vrot.slane %v3079_v40, %v18488_v35  ;;  %v3135_v21 = vrot.slane %v2410_v38, %v18488_v35  ;;  %v3149_v29 = vrot.slane %v2412_v6, %v18488_v35 }
  0xe9   : > { %v3100_v59 = vrot.slane %v3093_v9, %v18488_v35  ;;  %v3114_v32 = vrot.slane %v3107_v4, %v18488_v35  ;;  %v3128_v11 = vrot.slane %v3121_v63, %v18488_v35  ;;  %v3163_v36 = vrot.slane %v2414_v43, %v18488_v35 }
  0xea   : > { %v18752_v56 = vrot.slane %v3135_v21, %v18488_v35  ;;  %v3156_v57 = vrot.slane %v3149_v29, %v18488_v35  ;;  %v3959_v33 = vunpack.c.l.b16 %v3072_v47  ;;  %v3960_v20 = vunpack.c.l.b16 %v3086_v28 }
  0xeb   : > { %v3170_v40 = vrot.slane %v3163_v36, %v18488_v35  ;;  %v18756_v38 = vunpack.c.l.b16 %v3100_v59  ;;  %v18758_v6 = vunpack.c.l.b16 %v3114_v32  ;;  %v3963_v9 = vunpack.c.l.b16 %v3128_v11  ;;  %v2147_v59 = vpop.permute.xlu0 %2146 }
  0xec   : > { %23532 = vst [vmem:[#allocation9_spill] sm:$0xff] %v18752_v56  ;;  %v18762_v43 = vunpack.c.l.b16 %v3156_v57  ;;  %v18764_v21 = vrot.slane %v3959_v33, 6  ;;  %v18768_v47 = vrot.slane %v3960_v20, 5  ;;  %v2215_v11 = vsel %vm1222_vm11, %v18622_v52, %v18713_v53  ;;  %v17757_v33 = vld [vmem:[#allocation2 + $0xcc] sm:$0xff]   ;;  %v17758_v52 = vld [vmem:[#allocation2 + $0x24] sm:$0xff]  }
  0xed   : > { %23533 = vst [vmem:[#allocation10_spill] sm:$0xff] %v18756_v38  ;;  %23534 = vst [vmem:[#allocation11_spill] sm:$0xff] %v18758_v6  ;;  %v18766_v61 = vunpack.c.l.b16 %v3170_v40  ;;  %v18772_v32 = vrot.slane %v3963_v9, 2  ;;  %v2209_v36 = vsel %vm1222_vm11, %v18535_v45, %v2137_v15  ;;  %v2213_v57 = vsel %vm1222_vm11, %v18544_v55, %v2141_v16 }
  0xee   : > { %23535 = vst [vmem:[#allocation12_spill] sm:$0xff] %v18768_v47  ;;  %v2183_v20 = vsel %vm1185_vm10, %v17757_v33, %v18688_v46  ;;  %v2681_v40 = vcombine.high %v2215_v11, %v2215_v11  ;;  %v2688_v29 = vrot.slane %v2215_v11, %v18488_v35  ;;  %v2610_v9 = vrot.slane %v2209_v36, %v18488_v35  ;;  %v2115_v11 = vpop.permute.xlu1 %2114  ;;  %v17759_v33 = vld [vmem:[#allocation2 + $0xc] sm:$0xff]  }
  0xef   : > { %23536 = vst [vmem:[#allocation13_spill] sm:$0xff] %v18772_v32  ;;  %v2673_v28 = vrot.slane %v2213_v57, %v18488_v35  ;;  %v18788_v53 = vsel %vm1185_vm10, %v17758_v52, %v2056_v0  ;;  %v2219_v45 = vsel %vm1222_vm11, %v2183_v20, %v2147_v59  ;;  %v2151_v63 = vsel %vm1185_vm10, %v17759_v33, %v2052_v17 }
  0xf0   : > { %v2695_v55 = vrot.slane %v2681_v40, %v18488_v35  ;;  %v2696_v16 = vcombine.high %v2688_v29, %v2688_v29  ;;  %v2704_v46 = vrot.slane %v2688_v29, %v18488_v35  ;;  %v2617_v15 = vrot.slane %v2610_v9, %v18488_v35 }
  0xf1   : > { %v2680_v36 = vrot.slane %v2673_v28, %v18488_v35  ;;  %v2744_v57 = vcombine.high %v2219_v45, %v2219_v45  ;;  %v2751_v4 = vrot.slane %v2219_v45, %v18488_v35  ;;  %v18803_v28 = vsel %vm1222_vm11, %v2151_v63, %v2115_v11 }
  0xf2   : > { %v2697_v0 = vcombine.high %v2695_v55, %v2695_v55  ;;  %v2711_v52 = vrot.slane %v2695_v55, %v18488_v35  ;;  %v2718_v59 = vrot.slane %v2696_v16, %v18488_v35  ;;  %v2726_v20 = vcombine.high %v2704_v46, %v2704_v46 }
  0xf3   : > { %v3695_v40 = vrot.slane %v2704_v46, %v18488_v35  ;;  %v3555_v29 = vrot.slane %v2617_v15, %v18488_v35  ;;  %v3681_v9 = vrot.slane %v2680_v36, %v18488_v35  ;;  %v2758_v13 = vrot.slane %v2744_v57, %v18488_v35 }
  0xf4   : > { %v2725_v17 = vrot.slane %v2697_v0, %v18488_v35  ;;  %v2727_v33 = vcombine.high %v2711_v52, %v2711_v52  ;;  %v2728_v3 = vcombine.high %v2718_v59, %v2718_v59  ;;  %v3709_v45 = vrot.slane %v2718_v59, %v18488_v35 }
  0xf5   : > { %v3702_v55 = vrot.slane %v3695_v40, %v18488_v35  ;;  %v3723_v16 = vrot.slane %v2726_v20, %v18488_v35  ;;  %v3751_v2 = vrot.slane %v2711_v52, %v18488_v35  ;;  %v3562_v46 = vrot.slane %v3555_v29, %v18488_v35 }
  0xf6   : > { %v2729_v15 = vcombine.high %v2725_v17, %v2725_v17  ;;  %v3716_v36 = vrot.slane %v3709_v45, %v18488_v35  ;;  %v3737_v63 = vrot.slane %v2728_v3, %v18488_v35  ;;  %v3765_v11 = vrot.slane %v2725_v17, %v18488_v35 }
  0xf7   : > { %v3730_v0 = vrot.slane %v3723_v16, %v18488_v35  ;;  %v3758_v59 = vrot.slane %v3751_v2, %v18488_v35  ;;  %v3779_v40 = vrot.slane %v2727_v33, %v18488_v35  ;;  %v4004_v25 = vunpack.c.l.b16 %v3702_v55 }
  0xf8   : > { %v3744_v20 = vrot.slane %v3737_v63, %v18488_v35  ;;  %v3772_v52 = vrot.slane %v3765_v11, %v18488_v35  ;;  %v3793_v29 = vrot.slane %v2729_v15, %v18488_v35  ;;  %v4005_v3 = vunpack.c.l.b16 %v3716_v36 }
  0xf9   : > { %v3786_v45 = vrot.slane %v3779_v40, %v18488_v35  ;;  %v4006_v32 = vunpack.c.l.b16 %v3730_v0  ;;  %v4008_v17 = vunpack.c.l.b16 %v3758_v59  ;;  %v3994_v14 = vunpack.c.l.b16 %v3562_v46 }
  0xfa   : > { %v3800_v16 = vrot.slane %v3793_v29, %v18488_v35  ;;  %v4007_v54 = vunpack.c.l.b16 %v3744_v20  ;;  %v4009_v2 = vunpack.c.l.b16 %v3772_v52  ;;  %v18825_v55 = vrot.slane %v4004_v25, 1 }
  0xfb   : > { %v18823_v33 = vunpack.c.l.b16 %v3786_v45  ;;  %v4141_v63 = vrot.slane %v4006_v32, 7  ;;  %v3688_v11 = vrot.slane %v3681_v9, %v18488_v35  ;;  %v4145_v6 = vrot.slane %v4008_v17, 5 }
  0xfc   : > { %v18828_v15 = vunpack.c.l.b16 %v3800_v16  ;;  %v4143_v57 = vrot.slane %v4007_v54, 6  ;;  %v18830_v40 = vrot.slane %v4009_v2, 4  ;;  %v18834_v59 = vrot.slane %v3994_v14, 3 }
  0xfd   : > { %23537 = vst [vmem:[#allocation14_spill] sm:$0xff] %v18823_v33  ;;  %v4142_v36 = vsel %vm4023_vm12, %v4141_v63, %v4005_v3  ;;  %v2759_v46 = vcombine.high %v2751_v4, %v2751_v4  ;;  %v2760_v25 = vcombine.high %v2758_v13, %v2758_v13  ;;  %v2767_v32 = vrot.slane %v2751_v4, %v18488_v35 }
  0xfe   : > { %23538 = vst [vmem:[#allocation15_spill] sm:$0xff] %v18828_v15  ;;  %23539 = vst [vmem:[#allocation16_spill] sm:$0xff] %v18830_v40  ;;  %v4144_v20 = vsel %vm4026_vm13, %v4143_v57, %v4142_v36  ;;  %v2774_v9 = vrot.slane %v2758_v13, %v18488_v35  ;;  %v4003_v54 = vunpack.c.l.b16 %v3688_v11  ;;  %v2240_v45 = vcombine.high %v18803_v28, %v18803_v28 }
  0xff   : > { %v18840_v52 = vsel %vm4029_vm14, %v4145_v6, %v4144_v20  ;;  %v2781_v29 = vrot.slane %v2759_v46, %v18488_v35  ;;  %v2788_v14 = vrot.slane %v2760_v25, %v18488_v35  ;;  %v2789_v3 = vcombine.high %v2767_v32, %v2767_v32 }
 0x100   : > { %23540 = vst [vmem:[#allocation17_spill] sm:$0xff] %v18840_v52  ;;  %v2790_v17 = vcombine.high %v2774_v9, %v2774_v9  ;;  %v3821_v16 = vrot.slane %v2767_v32, %v18488_v35  ;;  %v3877_v13 = vrot.slane %v2774_v9, %v18488_v35  ;;  %v2247_v6 = vrot.slane %v18803_v28, %v18488_v35 }
 0x101   : > { %v2791_v2 = vcombine.high %v2781_v29, %v2781_v29  ;;  %v3835_v4 = vrot.slane %v2781_v29, %v18488_v35  ;;  %v2792_v63 = vcombine.high %v2788_v14, %v2788_v14  ;;  %v3849_v57 = vrot.slane %v2789_v3, %v18488_v35 }
 0x102   : > { %v3828_v11 = vrot.slane %v3821_v16, %v18488_v35  ;;  %v3891_v36 = vrot.slane %v2788_v14, %v18488_v35  ;;  %v3884_v25 = vrot.slane %v3877_v13, %v18488_v35  ;;  %v3905_v32 = vrot.slane %v2790_v17, %v18488_v35 }
 0x103   : > { %v3842_v46 = vrot.slane %v3835_v4, %v18488_v35  ;;  %v3863_v20 = vrot.slane %v2791_v2, %v18488_v35  ;;  %v18858_v29 = vrot.slane %v4003_v54, 2  ;;  %v3856_v9 = vrot.slane %v3849_v57, %v18488_v35 }
 0x104   : > { %v3898_v28 = vrot.slane %v3891_v36, %v18488_v35  ;;  %v18863_v16 = vrot.slane %v2792_v63, %v18488_v35  ;;  %v3912_v14 = vrot.slane %v3905_v32, %v18488_v35  ;;  %v4017_v0 = vunpack.c.l.b16 %v3884_v25  ;;  %v2119_v32 = vpop.permute.xlu0 %2118 }
 0x105   : > { %v3870_v3 = vrot.slane %v3863_v20, %v18488_v35  ;;  %v4014_v4 = vunpack.c.l.b16 %v3842_v46  ;;  %v4015_v2 = vunpack.c.l.b16 %v3856_v9  ;;  %v2254_v13 = vrot.slane %v2240_v45, %v18488_v35 }
 0x106   : > { %23541 = vst [vmem:[#allocation18_spill] sm:$0xff] %v18863_v16  ;;  %v4018_v33 = vunpack.c.l.b16 %v3898_v28  ;;  %v2255_v17 = vcombine.high %v2247_v6, %v2247_v6  ;;  %v4013_v54 = vunpack.c.l.b16 %v3828_v11  ;;  %v18870_v57 = vunpack.c.l.b16 %v3912_v14 }
 0x107   : > { %v18868_v15 = vunpack.c.l.b16 %v3870_v3  ;;  %v4155_v36 = vrot.slane %v4014_v4, 7  ;;  %v4157_v40 = vrot.slane %v4015_v2, 6  ;;  %v18872_v63 = vrot.slane %v4017_v0, 4 }
 0x108   : > { %23543 = vst [vmem:[#allocation20_spill] sm:$0xff] %v18870_v57  ;;  %v2256_v52 = vcombine.high %v2254_v13, %v2254_v13  ;;  %v2263_v20 = vrot.slane %v2247_v6, %v18488_v35  ;;  %v18877_v9 = vrot.slane %v4018_v33, 3  ;;  %v2270_v45 = vrot.slane %v2254_v13, %v18488_v35 }
 0x109   : > { %23542 = vst [vmem:[#allocation19_spill] sm:$0xff] %v18868_v15  ;;  %23544 = vst [vmem:[#allocation21_spill] sm:$0xff] %v18872_v63  ;;  %v4156_v46 = vsel %vm4023_vm12, %v4155_v36, %v4013_v54  ;;  %v2277_v28 = vrot.slane %v2255_v17, %v18488_v35  ;;  %v2191_v2 = vsel %vm1222_vm11, %v18788_v53, %v2119_v32 }
 0x10a   : > { %23545 = vst [vmem:[#allocation22_spill] sm:$0xff] %v18877_v9  ;;  %v18883_v3 = vrot.slane %v2256_v52, %v18488_v35  ;;  %v2285_v0 = vcombine.high %v2263_v20, %v2263_v20  ;;  %v2286_v14 = vcombine.high %v2270_v45, %v2270_v45  ;;  %v2813_v6 = vrot.slane %v2263_v20, %v18488_v35  ;;  %v18929_v9 = vpop.permute.xlu1 %2057 }
 0x10b   : > { %v2869_v4 = vrot.slane %v2270_v45, %v18488_v35  ;;  %v18890_v33 = vsel %vm4026_vm13, %v4157_v40, %v4156_v46  ;;  %v2287_v13 = vcombine.high %v2277_v28, %v2277_v28  ;;  %v2827_v54 = vrot.slane %v2277_v28, %v18488_v35 }
 0x10c   : > { %23546 = vst [vmem:[#allocation23_spill] sm:$0xff] %v18890_v33  ;;  %v2841_v17 = vrot.slane %v2285_v0, %v18488_v35  ;;  %v2820_v36 = vrot.slane %v2813_v6, %v18488_v35  ;;  %v2303_v46 = vcombine.high %v2191_v2, %v2191_v2  ;;  %v18904_v28 = vrot.slane %v2286_v14, %v18488_v35 }
 0x10d   : > { %v2876_v20 = vrot.slane %v2869_v4, %v18488_v35  ;;  %v2834_v53 = vrot.slane %v2827_v54, %v18488_v35  ;;  %v2855_v32 = vrot.slane %v2287_v13, %v18488_v35  ;;  %v2310_v25 = vrot.slane %v2191_v2, %v18488_v35 }
 0x10e   : > { %v2848_v40 = vrot.slane %v2841_v17, %v18488_v35  ;;  %v3941_v0 = vunpack.c.l.b16 %v2820_v36  ;;  %v2317_v45 = vrot.slane %v2303_v46, %v18488_v35  ;;  %v23548_v14 = vrot.slane %v18611_v22, %v18488_v35 }
 0x10f   : > { %v3945_v11 = vunpack.c.l.b16 %v2876_v20  ;;  %v2862_v6 = vrot.slane %v2855_v32, %v18488_v35  ;;  %v3942_v4 = vunpack.c.l.b16 %v2834_v53  ;;  %v2318_v17 = vcombine.high %v2310_v25, %v2310_v25  ;;  %v18918_v20 = vpop.permute.xlu0 %1093 }
 0x110   : > { %v18908_v52 = vunpack.c.l.b16 %v2848_v40  ;;  %v2326_v13 = vrot.slane %v2310_v25, %v18488_v35  ;;  %v3338_v36 = vrot.slane %v23548_v14, %v18488_v35  ;;  %v2319_v53 = vcombine.high %v2317_v45, %v2317_v45 }
 0x111   : > { %v18911_v54 = vrot.slane %v3945_v11, 4  ;;  %v18920_v2 = vunpack.c.l.b16 %v2862_v6  ;;  %v4022_v32 = vrot.slane %v3942_v4, 7  ;;  %v3352_v40 = vrot.slane %v18631_v60, %v18488_v35 }
 0x112   : > { %v18925_v11 = vrot.slane %v2317_v45, %v18488_v35  ;;  %v2340_v46 = vrot.slane %v2318_v17, %v18488_v35  ;;  %v2348_v25 = vcombine.high %v2326_v13, %v2326_v13  ;;  %v2939_v57 = vrot.slane %v2326_v13, %v18488_v35 }
 0x113   : > { %23547 = vst [vmem:[#allocation24_spill] sm:$0xff] %v18911_v54  ;;  %v18932_v14 = vsel %vm4023_vm12, %v4022_v32, %v3941_v0  ;;  %v18936_v4 = vrot.slane %v2319_v53, %v18488_v35  ;;  %v23549_v60 = vcombine.high %v18611_v22, %v18611_v22  ;;  %v1158_v17 = vpop.permute.xlu0 %1157  ;;  %v3978_v38 = vunpack.c.l.b16 %v3338_v36 }
 0x114   : > { %v2350_v63 = vcombine.high %v2340_v46, %v2340_v46  ;;  %v2946_v13 = vrot.slane %v2939_v57, %v18488_v35  ;;  %v2953_v15 = vrot.slane %v2340_v46, %v18488_v35  ;;  %v2967_v53 = vrot.slane %v2348_v25, %v18488_v35 }
 0x115   : > { %v3359_v45 = vrot.slane %v23549_v60, %v18488_v35  ;;  %v2351_v32 = vcombine.high %v18936_v4, %v18936_v4  ;;  %v2995_v6 = vrot.slane %v18925_v11, %v18488_v35  ;;  %v3979_v47 = vunpack.c.l.b16 %v3352_v40 }
 0x116   : > { %v2960_v22 = vrot.slane %v2953_v15, %v18488_v35  ;;  %v2981_v60 = vrot.slane %v2350_v63, %v18488_v35  ;;  %v3950_v46 = vunpack.c.l.b16 %v2946_v13  ;;  %v2974_v0 = vrot.slane %v2967_v53, %v18488_v35  ;;  %v2054_v53 = vpop.permute.xlu1 %2053 }
 0x117   : > { %v18958_v33 = vrot.slane %v2995_v6, %v18488_v35  ;;  %v3037_v25 = vrot.slane %v2351_v32, %v18488_v35  ;;  %v3366_v16 = vrot.slane %v3359_v45, %v18488_v35  ;;  %v3422_v63 = vrot.slane %v18638_v62, %v18488_v35  ;;  %v18992_v36 = vpop.permute.xlu0 %2061 }
 0x118   : > { %v2988_v15 = vrot.slane %v2981_v60, %v18488_v35  ;;  %v3951_v42 = vunpack.c.l.b16 %v2960_v22  ;;  %v23550_v13 = vrot.slane %v18695_v51, %v18488_v35  ;;  %v18970_v56 = vunpack.c.l.b16 %v2974_v0 }
 0x119   : > { %v3044_v6 = vrot.slane %v3037_v25, %v18488_v35  ;;  %v18972_v32 = vrot.slane %v3950_v46, 7  ;;  %v23551_v45 = vcombine.high %v18684_v39, %v18684_v39  ;;  %v3980_v25 = vunpack.c.l.b16 %v3366_v16 }
 0x11a   : > { %v3464_v57 = vrot.slane %v23550_v13, %v18488_v35  ;;  %v18978_v60 = vunpack.c.l.b16 %v2988_v15  ;;  %v18983_v13 = vrot.slane %v3951_v42, 6  ;;  %v3984_v18 = vunpack.c.l.b16 %v3422_v63  ;;  %v2121_v62 = vpop.permute.xlu1 %2120 }
 0x11b   : > { %v3471_v22 = vrot.slane %v23551_v45, %v18488_v35  ;;  %v18981_v51 = vunpack.c.l.b16 %v3044_v6  ;;  %v23552_v39 = vunpack.c.l.b16 %v18567_v5  ;;  %v23553_v15 = vrot.slane %v18583_v49, 7 }
 0x11c   : > { %v3987_v54 = vunpack.c.l.b16 %v3464_v57  ;;  %v23554_v42 = vrot.slane %v18592_v19, 6  ;;  %v4095_v16 = vrot.slane %v3979_v47, 2  ;;  %v23555_v57 = vunpack.c.l.b16 %v18626_v58 }
 0x11d   : > { %v3478_v0 = vrot.slane %v3471_v22, %v18488_v35  ;;  %v4086_v45 = vsel %vm4023_vm12, %v23553_v15, %v23552_v39  ;;  %v4093_v22 = vrot.slane %v3978_v38, 3  ;;  %v4103_v49 = vrot.slane %v3984_v18, 5 }
 0x11e   : > { %v4088_v6 = vsel %vm4026_vm13, %v23554_v42, %v4086_v45  ;;  %v4100_v5 = vsel %vm4023_vm12, %v18649_v41, %v23555_v57  ;;  %v23556_v39 = vunpack.c.l.b16 %v18707_v31  ;;  %v23557_v38 = vrot.slane %v18643_v7, 6  ;;  %v17760_v41 = vld [vmem:[#allocation2 + $0x30] sm:$0xff]   ;;  %v19023_v57 = vpop.permute.xlu0 %1089 }
 0x11f   : > { %v3988_v40 = vunpack.c.l.b16 %v3478_v0  ;;  %v4090_v63 = vsel %vm4029_vm14, %v18561_v27, %v4088_v6  ;;  %v4097_v0 = vrot.slane %v3980_v25, 1  ;;  %v4109_v45 = vrot.slane %v3987_v54, 2  ;;  %v17761_v25 = vld [vmem:[#allocation2 + $0x2c] ss:$0 sps:$4 sm:$0x33]  }
 0x120   : > { %v4107_v15 = vrot.slane %v23556_v39, 3  ;;  %v4092_v19 = vsel %vm630_vm3, %v18646_v1, %v4090_v63  ;;  %v4102_v47 = vsel %vm4026_vm13, %v23557_v38, %v4100_v5  ;;  %v1195_v18 = vsel %vm1185_vm10, %v17760_v41, %v18918_v20 }
 0x121   : > { %v4094_v27 = vsel %vm4035_vm15, %v4093_v22, %v4092_v19  ;;  %v4104_v58 = vsel %vm4029_vm14, %v4103_v49, %v4102_v47  ;;  %v4111_v42 = vrot.slane %v3988_v40, 1  ;;  %v2157_v7 = vsel %vm1185_vm10, %v17761_v25, %v18929_v9 }
 0x122   : > { %v4096_v31 = vsel %vm4038_vm0, %v4095_v16, %v4094_v27  ;;  %v4106_v1 = vsel %vm630_vm3, %v18546_v34, %v4104_v58  ;;  %v1232_v54 = vsel %vm1222_vm11, %v1195_v18, %v1158_v17  ;;  %v3996_v16 = vunpack.c.l.b16 %v18666_v12 }
 0x123   : > { %v4098_v6 = vsel %vm4041_vm1, %v4097_v0, %v4096_v31  ;;  %v4108_v22 = vsel %vm4035_vm15, %v4107_v15, %v4106_v1  ;;  %v1403_v40 = vcombine.high %v1232_v54, %v1232_v54  ;;  %v1410_v63 = vrot.slane %v1232_v54, %v18488_v35  ;;  %v19036_v15 = vpop.permute.xlu1 %1097  ;;  %v17762_v0 = vld [vmem:[#allocation2 + $0x14] ss:$0 sps:$4 sm:$0x33]   ;;  %v2117_v54 = vpop.permute.xlu0 %2116 }
 0x124   : > { %v4110_v20 = vsel %vm4038_vm0, %v4109_v45, %v4108_v22  ;;  %v4116_v34 = vsel %vm4026_vm13, %v18732_v8, %v18738_v10  ;;  %v4132_v9 = vsel %vm4029_vm14, %v18681_v30, %v18691_v50  ;;  %v19039_v12 = vsel %vm1185_vm10, %v17762_v0, %v2054_v53 }
 0x125   : > { %v4112_v17 = vsel %vm4041_vm1, %v4111_v42, %v4110_v20  ;;  %v1417_v5 = vrot.slane %v1403_v40, %v18488_v35  ;;  %v1418_v49 = vcombine.high %v1410_v63, %v1410_v63  ;;  %v1426_v39 = vrot.slane %v1410_v63, %v18488_v35 }
 0x126   : > { %v4171_v19 = vpack.c.b16 %v4112_v17, %v4098_v6  ;;  %v23558_v8 = vrot.slane %v18726_v48, 5  ;;  %v4125_v38 = vrot.slane %v3996_v16, 1  ;;  %v23559_v58 = vrot.slane %v18730_v26, 4 }
 0x127   : > { %v1419_v30 = vcombine.high %v1417_v5, %v1417_v5  ;;  %v1433_v50 = vrot.slane %v1417_v5, %v18488_v35  ;;  %v1440_v47 = vrot.slane %v1418_v49, %v18488_v35  ;;  %v1448_v45 = vcombine.high %v1426_v39, %v1426_v39  ;;  %v2125_v16 = vpop.permute.xlu1 %2124 }
 0x128   : > { %v4118_v10 = vsel %vm4029_vm14, %v23558_v8, %v4116_v34  ;;  %17402 = vmatprep.mubr.msk.bf16.mxu1 %vm4184_vm2, %v4171_v19  ;;  %v4545_v27 = vrot.slane %v1426_v39, %v18488_v35  ;;  %v23560_v42 = vrot.slane %v18671_v23, 4  ;;  %v4135_v41 = vrot.slane %v18676_v44, 3 }
 0x129   : > { %v4120_v53 = vsel %vm630_vm3, %v23559_v58, %v4118_v10  ;;  %v1447_v18 = vrot.slane %v1419_v30, %v18488_v35  ;;  %v1449_v31 = vcombine.high %v1433_v50, %v1433_v50  ;;  %v1450_v1 = vcombine.high %v1440_v47, %v1440_v47 }
 0x12a   : > { %v4134_v48 = vsel %vm630_vm3, %v23560_v42, %v4132_v9  ;;  %v4559_v25 = vrot.slane %v1440_v47, %v18488_v35  ;;  %v4552_v6 = vrot.slane %v4545_v27, %v18488_v35  ;;  %v4573_v22 = vrot.slane %v1448_v45, %v18488_v35  ;;  %v1086_v27 = vpop.permute.xlu0 %1085 }
 0x12b   : > { %v4601_v26 = vrot.slane %v1433_v50, %v18488_v35  ;;  %v2193_v40 = vsel %vm1222_vm11, %v2157_v7, %v2121_v62  ;;  %v1451_v23 = vcombine.high %v1447_v18, %v1447_v18  ;;  %v4587_v44 = vrot.slane %v1450_v1, %v18488_v35 }
 0x12c   : > { %v4566_v63 = vrot.slane %v4559_v25, %v18488_v35  ;;  %v4615_v20 = vrot.slane %v1447_v18, %v18488_v35  ;;  %v4580_v34 = vrot.slane %v4573_v22, %v18488_v35  ;;  %v4629_v17 = vrot.slane %v1449_v31, %v18488_v35 }
 0x12d   : > { %v4608_v9 = vrot.slane %v4601_v26, %v18488_v35  ;;  %v5439_v5 = vunpack.c.l.b16 %v4552_v6  ;;  %v4594_v49 = vrot.slane %v4587_v44, %v18488_v35  ;;  %v4643_v62 = vrot.slane %v1451_v23, %v18488_v35  ;;  %v1154_v6 = vpop.permute.xlu1 %1153 }
 0x12e   : > { %v19069_v39 = vrot.slane %v4615_v20, %v18488_v35  ;;  %v5440_v7 = vunpack.c.l.b16 %v4566_v63  ;;  %v4636_v19 = vrot.slane %v4629_v17, %v18488_v35  ;;  %v19073_v0 = vunpack.c.l.b16 %v4580_v34 }
 0x12f   : > { %v5443_v8 = vunpack.c.l.b16 %v4608_v9  ;;  %v4122_v10 = vsel %vm4035_vm15, %v18834_v59, %v4120_v53  ;;  %v4650_v30 = vrot.slane %v4643_v62, %v18488_v35  ;;  %v19078_v50 = vunpack.c.l.b16 %v4594_v49  ;;  %v17763_v49 = vld [vmem:[#allocation2 + $0x44] ss:$0 sps:$4 sm:$0x33]  }
 0x130   : > { %23561 = vst [vmem:[#allocation25_spill] sm:$0xff] %v19069_v39  ;;  %v23448_v47 = vunpack.c.l.b16 %v19069_v39  ;;  %v19081_v45 = vrot.slane %v5439_v5, 6  ;;  %v19083_v58 = vunpack.c.l.b16 %v4636_v19  ;;  %v19085_v42 = vrot.slane %v5440_v7, 5 }
 0x131   : > { %v19088_v31 = vrot.slane %v5443_v8, 2  ;;  %v19090_v1 = vunpack.c.l.b16 %v4650_v30  ;;  %v19097_v25 = vrot.slane %v5439_v5, 7  ;;  %v19099_v22 = vrot.slane %v5440_v7, 6  ;;  %v17764_v7 = vld [vmem:[#allocation2 + $0x48] sm:$0xff]  }
 0x132   : > { %23562 = vst [vmem:[#allocation26_spill] sm:$0xff] %v19083_v58  ;;  %23563 = vst [vmem:[#allocation27_spill] sm:$0xff] %v19085_v42  ;;  %v19095_v53 = vrot.slane %v23448_v47, 1  ;;  %v4124_v63 = vsel %vm4038_vm0, %v18678_v24, %v4122_v10  ;;  %v19106_v20 = vrot.slane %v5443_v8, 3  ;;  %v4136_v34 = vsel %vm4035_vm15, %v4135_v41, %v4134_v48  ;;  %v17765_v41 = vld [vmem:[#allocation2 + $0x18] sm:$0xff]  }
 0x133   : > { %23564 = vst [vmem:[#allocation28_spill] sm:$0xff] %v19088_v31  ;;  %v5544_v44 = vrot.slane %v19090_v1, 7  ;;  %v2358_v9 = vrot.slane %v2193_v40, %v18488_v35  ;;  %v4126_v17 = vsel %vm4041_vm1, %v4125_v38, %v4124_v63  ;;  %v4138_v5 = vsel %vm4038_vm0, %v18858_v29, %v4136_v34  ;;  %v1162_v40 = vpop.permute.xlu0 %1161  ;;  %v2082_v34 = vpop.permute.xlu1 %2081 }
 0x134   : > { %23565 = vst [vmem:[#allocation29_spill] sm:$0xff] %v19095_v53  ;;  %v2161_v62 = vsel %vm1185_vm10, %v17763_v49, %v18992_v36  ;;  %v1199_v24 = vsel %vm1185_vm10, %v17764_v7, %v19036_v15  ;;  %v4140_v48 = vsel %vm4041_vm1, %v18825_v55, %v4138_v5  ;;  %v1191_v29 = vsel %vm1185_vm10, %v17765_v41, %v19023_v57  ;;  %v17767_v7 = vld [vmem:[#allocation2 + $0xbc] ss:$0 sps:$4 sm:$0x33]  }
 0x135   : > { %v19119_v19 = vsel %vm4023_vm12, %v5544_v44, %v19083_v58  ;;  %v2365_v38 = vrot.slane %v2358_v9, %v18488_v35  ;;  %v4172_v8 = vpack.c.b16 %v4140_v48, %v4126_v17  ;;  %v2197_v36 = vsel %vm1222_vm11, %v2161_v62, %v2125_v16 }
 0x136   : > { %v2189_v15 = vsel %vm1222_vm11, %v19039_v12, %v2117_v54  ;;  %v1228_v10 = vsel %vm1222_vm11, %v1191_v29, %v1154_v6  ;;  %v2421_v63 = vrot.slane %v2197_v36, %v18488_v35  ;;  %v23566_v57 = vrot.slane %v18766_v61, 7  ;;  %v17766_v12 = vld [vmem:[#allocation2] sm:$0xff]  }
 0x137   : > { %v3051_v30 = vrot.slane %v2365_v38, %v18488_v35  ;;  %v2295_v55 = vrot.slane %v2189_v15, %v18488_v35  ;;  %v1340_v44 = vcombine.high %v1228_v10, %v1228_v10  ;;  %17403 = vmatmul.mubr.msk.bf16.vlgmr.msra.gmra.mxu1 %vm4184_vm2, %v4172_v8  ;;  %v1347_v9 = vrot.slane %v1228_v10, %v18488_v35 }
 0x138   : > { %v4072_v16 = vsel %vm4023_vm12, %v23566_v57, %v18762_v43  ;;  %v19140_v54 = vsel %vm1185_vm10, %v17766_v12, %v1086_v27  ;;  %v19143_v6 = vsel %vm1222_vm11, %v1199_v24, %v1162_v40  ;;  %v2428_v5 = vrot.slane %v2421_v63, %v18488_v35 }
 0x139   : > { %v3058_v17 = vrot.slane %v3051_v30, %v18488_v35  ;;  %v2302_v49 = vrot.slane %v2295_v55, %v18488_v35  ;;  %v1354_v62 = vrot.slane %v1340_v44, %v18488_v35  ;;  %v1355_v61 = vcombine.high %v1347_v9, %v1347_v9  ;;  %v19166_v44 = vld [vmem:[%s23425_s1 + $0x20] ss:$0 sps:$4 sm:$0xff]  }
 0x13a   : > { %v1363_v43 = vrot.slane %v1347_v9, %v18488_v35  ;;  %v19151_v48 = vsel %vm1185_vm10, %v17767_v7, %v2082_v34  ;;  %v1466_v27 = vcombine.high %v19143_v6, %v19143_v6  ;;  %v3177_v38 = vrot.slane %v2428_v5, %v18488_v35  ;;  %23567 = vst [vmem:[#allocation30_spill] sm:$0xff] %v19166_v44  ;;  %v19171_v34 = vld [vmem:[%s23425_s1 + $0x8] ss:$0 sps:$4 sm:$0xff]  }
 0x13b   : > { %v3958_v24 = vunpack.c.l.b16 %v3058_v17  ;;  %v2925_v41 = vrot.slane %v2302_v49, %v18488_v35  ;;  %v1356_v29 = vcombine.high %v1354_v62, %v1354_v62  ;;  %v1370_v40 = vrot.slane %v1354_v62, %v18488_v35  ;;  %23568 = vst [vmem:[#allocation31_spill] sm:$0xff] %v19171_v34  ;;  %17625 = vmatprep.subr.msk.bf16.mxu0 %vm4203_vm9, %v19166_v44 }
 0x13c   : > { %v1377_v8 = vrot.slane %v1355_v61, %v18488_v35  ;;  %v1385_v36 = vcombine.high %v1363_v43, %v1363_v43  ;;  %v4419_v15 = vrot.slane %v1363_v43, %v18488_v35  ;;  %v3184_v30 = vrot.slane %v3177_v38, %v18488_v35  ;;  %17624 = vmatprep.subr.msk.bf16.mxu1 %vm4203_vm9, %v19171_v34 }
 0x13d   : > { %v4057_v10 = vrot.slane %v3958_v24, 7  ;;  %v2932_v63 = vrot.slane %v2925_v41, %v18488_v35  ;;  %v1384_v55 = vrot.slane %v1356_v29, %v18488_v35  ;;  %v1386_v57 = vcombine.high %v1370_v40, %v1370_v40 }
 0x13e   : > { %v1387_v9 = vcombine.high %v1377_v8, %v1377_v8  ;;  %v4433_v12 = vrot.slane %v1377_v8, %v18488_v35  ;;  %v1473_v17 = vrot.slane %v19143_v6, %v18488_v35  ;;  %v3967_v49 = vunpack.c.l.b16 %v3184_v30 }
 0x13f   : > { %v4058_v5 = vsel %vm4023_vm12, %v4057_v10, %v18981_v51  ;;  %v1388_v62 = vcombine.high %v1384_v55, %v1384_v55  ;;  %v4426_v61 = vrot.slane %v4419_v15, %v18488_v35  ;;  %v3949_v43 = vunpack.c.l.b16 %v2932_v63  ;;  %v2145_v15 = vpop.permute.xlu1 %2144 }
 0x140   : > { %v4440_v7 = vrot.slane %v4433_v12, %v18488_v35  ;;  %v4447_v24 = vrot.slane %v1385_v36, %v18488_v35  ;;  %v4461_v38 = vrot.slane %v1387_v9, %v18488_v35  ;;  %v19188_v51 = vsel %vm4026_vm13, %v18764_v21, %v4058_v5  ;;  %v1150_v5 = vpop.permute.xlu0 %1149 }
 0x141   : > { %v4073_v41 = vrot.slane %v3967_v49, 6  ;;  %v4475_v29 = vrot.slane %v1370_v40, %v18488_v35  ;;  %v4489_v8 = vrot.slane %v1384_v55, %v18488_v35  ;;  %v4503_v63 = vrot.slane %v1386_v57, %v18488_v35 }
 0x142   : > { %v4454_v10 = vrot.slane %v4447_v24, %v18488_v35  ;;  %v4468_v30 = vrot.slane %v4461_v38, %v18488_v35  ;;  %v19196_v36 = vrot.slane %v1388_v62, %v18488_v35  ;;  %v5430_v40 = vunpack.c.l.b16 %v4426_v61 }
 0x143   : > { %v4074_v9 = vsel %vm4026_vm13, %v4073_v41, %v4072_v16  ;;  %v4482_v21 = vrot.slane %v4475_v29, %v18488_v35  ;;  %v19201_v12 = vrot.slane %v4489_v8, %v18488_v35  ;;  %v19209_v49 = vsel %vm4023_vm12, %v18972_v32, %v3949_v43 }
 0x144   : > { %v19205_v55 = vsel %vm4029_vm14, %v18585_v37, %v4074_v9  ;;  %v4510_v57 = vrot.slane %v4503_v63, %v18488_v35  ;;  %v5431_v62 = vunpack.c.l.b16 %v4440_v7  ;;  %v19212_v24 = vunpack.c.l.b16 %v4454_v10  ;;  %v1092_v43 = vpop.permute.xlu0 %1091 }
 0x145   : > { %23569 = vst [vmem:[#allocation32_spill] sm:$0xff] %v19201_v12  ;;  %v19214_v16 = vunpack.c.l.b16 %v4468_v30  ;;  %v5434_v38 = vunpack.c.l.b16 %v4482_v21  ;;  %v23449_v41 = vunpack.c.l.b16 %v19201_v12  ;;  %v19221_v37 = vrot.slane %v5430_v40, 7  ;;  %v1088_v30 = vpop.permute.xlu1 %1087  ;;  %v17769_v21 = vld [vmem:[#allocation2 + $0x20] ss:$0 sps:$4 sm:$0x33]  }
 0x146   : > { %23570 = vst [vmem:[#allocation33_spill] sm:$0xff] %v19212_v24  ;;  %v19219_v29 = vunpack.c.l.b16 %v4510_v57  ;;  %v6000_v8 = vrot.slane %v5431_v62, 7  ;;  %v19223_v32 = vrot.slane %v5431_v62, 6  ;;  %v6002_v10 = vrot.slane %v19212_v24, 6 }
 0x147   : > { %v19228_v63 = vrot.slane %v5434_v38, 3  ;;  %v19232_v57 = vrot.slane %v5434_v38, 4  ;;  %v19236_v59 = vrot.slane %v23449_v41, 3  ;;  %v1480_v62 = vrot.slane %v1466_v27, %v18488_v35 }
 0x148   : > { %v6001_v9 = vsel %vm4023_vm12, %v6000_v8, %v5430_v40  ;;  %v1481_v18 = vcombine.high %v1473_v17, %v1473_v17  ;;  %v1489_v7 = vrot.slane %v1473_v17, %v18488_v35  ;;  %v2217_v40 = vsel %vm1222_vm11, %v19151_v48, %v2145_v15  ;;  %v17768_v8 = vld [vmem:[#allocation2 + $0x8] ss:$0 sps:$4 sm:$0x33]  }
 0x149   : > { %23571 = vst [vmem:[#allocation34_spill] sm:$0xff] %v19228_v63  ;;  %v19244_v47 = vsel %vm4026_vm13, %v6002_v10, %v6001_v9  ;;  %v1224_v38 = vsel %vm1222_vm11, %v19140_v54, %v1150_v5  ;;  %v19251_v41 = vsel %vm1185_vm10, %v17768_v8, %v1088_v30  ;;  %v1482_v23 = vcombine.high %v1480_v62, %v1480_v62 }
 0x14a   : > { %v1496_v6 = vrot.slane %v1480_v62, %v18488_v35  ;;  %v1503_v27 = vrot.slane %v1481_v18, %v18488_v35  ;;  %v1511_v17 = vcombine.high %v1489_v7, %v1489_v7  ;;  %v4671_v26 = vrot.slane %v1489_v7, %v18488_v35 }
 0x14b   : > { %v2736_v10 = vrot.slane %v2217_v40, %v18488_v35  ;;  %v1277_v9 = vcombine.high %v1224_v38, %v1224_v38  ;;  %v1193_v48 = vsel %vm1185_vm10, %v17769_v21, %v1092_v43  ;;  %v1510_v54 = vrot.slane %v1482_v23, %v18488_v35 }
 0x14c   : > { %v1512_v15 = vcombine.high %v1496_v6, %v1496_v6  ;;  %v1513_v5 = vcombine.high %v1503_v27, %v1503_v27  ;;  %v4685_v30 = vrot.slane %v1503_v27, %v18488_v35  ;;  %v4678_v8 = vrot.slane %v4671_v26, %v18488_v35 }
 0x14d   : > { %v4699_v62 = vrot.slane %v1511_v17, %v18488_v35  ;;  %v4727_v18 = vrot.slane %v1496_v6, %v18488_v35  ;;  %v1284_v7 = vrot.slane %v1224_v38, %v18488_v35  ;;  %v1514_v61 = vcombine.high %v1510_v54, %v1510_v54 }
 0x14e   : > { %v4692_v40 = vrot.slane %v4685_v30, %v18488_v35  ;;  %v4713_v46 = vrot.slane %v1513_v5, %v18488_v35  ;;  %v4741_v43 = vrot.slane %v1510_v54, %v18488_v35  ;;  %v4755_v27 = vrot.slane %v1512_v15, %v18488_v35 }
 0x14f   : > { %v4706_v23 = vrot.slane %v4699_v62, %v18488_v35  ;;  %v4734_v21 = vrot.slane %v4727_v18, %v18488_v35  ;;  %v5448_v26 = vunpack.c.l.b16 %v4678_v8  ;;  %v4769_v38 = vrot.slane %v1514_v61, %v18488_v35 }
 0x150   : > { %v4720_v17 = vrot.slane %v4713_v46, %v18488_v35  ;;  %v4748_v6 = vrot.slane %v4741_v43, %v18488_v35  ;;  %v5449_v53 = vunpack.c.l.b16 %v4692_v40  ;;  %v4762_v30 = vrot.slane %v4755_v27, %v18488_v35 }
 0x151   : > { %v19274_v31 = vunpack.c.l.b16 %v4706_v23  ;;  %v5452_v5 = vunpack.c.l.b16 %v4734_v21  ;;  %v2743_v54 = vrot.slane %v2736_v10, %v18488_v35  ;;  %v4776_v62 = vrot.slane %v4769_v38, %v18488_v35 }
 0x152   : > { %v19278_v18 = vunpack.c.l.b16 %v4720_v17  ;;  %v5453_v15 = vunpack.c.l.b16 %v4748_v6  ;;  %v19280_v8 = vrot.slane %v5448_v26, 5  ;;  %v5454_v46 = vunpack.c.l.b16 %v4762_v30  ;;  %v1156_v30 = vpop.permute.xlu1 %1155  ;;  %v1096_v6 = vpop.permute.xlu0 %1095 }
 0x153   : > { %v19282_v63 = vrot.slane %v5449_v53, 4  ;;  %v19285_v40 = vrot.slane %v5452_v5, 1  ;;  %v19287_v43 = vunpack.c.l.b16 %v4776_v62  ;;  %v19290_v21 = vrot.slane %v5448_v26, 6 }
 0x154   : > { %23572 = vst [vmem:[#allocation35_spill] sm:$0xff] %v19278_v18  ;;  %v19292_v10 = vrot.slane %v5449_v53, 5  ;;  %v5558_v27 = vrot.slane %v5454_v46, 7  ;;  %v19296_v38 = vrot.slane %v5452_v5, 2  ;;  %v19298_v12 = vrot.slane %v5453_v15, 1 }
 0x155   : > { %23573 = vst [vmem:[#allocation36_spill] sm:$0xff] %v19285_v40  ;;  %v6042_v61 = vrot.slane %v19287_v43, 7  ;;  %v3807_v62 = vrot.slane %v2743_v54, %v18488_v35  ;;  %v1291_v23 = vrot.slane %v1277_v9, %v18488_v35  ;;  %v1292_v40 = vcombine.high %v1284_v7, %v1284_v7 }
 0x156   : > { %23574 = vst [vmem:[#allocation37_spill] sm:$0xff] %v19296_v38  ;;  %23575 = vst [vmem:[#allocation38_spill] sm:$0xff] %v19298_v12  ;;  %v19304_v26 = vsel %vm4023_vm12, %v5558_v27, %v5453_v15  ;;  %v1300_v17 = vrot.slane %v1284_v7, %v18488_v35  ;;  %v1230_v18 = vsel %vm1222_vm11, %v1193_v48, %v1156_v30  ;;  %v19338_v58 = vpop.permute.xlu1 %1159 }
 0x157   : > { %v3814_v5 = vrot.slane %v3807_v62, %v18488_v35  ;;  %v1293_v38 = vcombine.high %v1291_v23, %v1291_v23  ;;  %v1307_v12 = vrot.slane %v1291_v23, %v18488_v35  ;;  %v19312_v54 = vsel %vm4023_vm12, %v6042_v61, %v5454_v46 }
 0x158   : > { %23576 = vst [vmem:[#allocation39_spill] sm:$0xff] %v19312_v54  ;;  %v1314_v9 = vrot.slane %v1292_v40, %v18488_v35  ;;  %v1322_v15 = vcombine.high %v1300_v17, %v1300_v17  ;;  %v4293_v27 = vrot.slane %v1300_v17, %v18488_v35  ;;  %v1395_v48 = vrot.slane %v1230_v18, %v18488_v35 }
 0x159   : > { %v4012_v53 = vunpack.c.l.b16 %v3814_v5  ;;  %v1321_v24 = vrot.slane %v1293_v38, %v18488_v35  ;;  %v1323_v7 = vcombine.high %v1307_v12, %v1307_v12  ;;  %v4349_v34 = vrot.slane %v1307_v12, %v18488_v35 }
 0x15a   : > { %v1324_v62 = vcombine.high %v1314_v9, %v1314_v9  ;;  %v4307_v44 = vrot.slane %v1314_v9, %v18488_v35  ;;  %v4321_v23 = vrot.slane %v1322_v15, %v18488_v35  ;;  %v4300_v61 = vrot.slane %v4293_v27, %v18488_v35  ;;  %v19328_v9 = vpop.permute.xlu0 %1151 }
 0x15b   : > { %v1325_v46 = vcombine.high %v1321_v24, %v1321_v24  ;;  %v4356_v40 = vrot.slane %v4349_v34, %v18488_v35  ;;  %v4363_v17 = vrot.slane %v1321_v24, %v18488_v35  ;;  %v4377_v5 = vrot.slane %v1323_v7, %v18488_v35 }
 0x15c   : > { %v4314_v30 = vrot.slane %v4307_v44, %v18488_v35  ;;  %v4328_v38 = vrot.slane %v4321_v23, %v18488_v35  ;;  %v4335_v12 = vrot.slane %v1324_v62, %v18488_v35  ;;  %v19330_v15 = vrot.slane %v4012_v53, 1 }
 0x15d   : > { %v4370_v18 = vrot.slane %v4363_v17, %v18488_v35  ;;  %v19334_v27 = vrot.slane %v1325_v46, %v18488_v35  ;;  %v5425_v34 = vunpack.c.l.b16 %v4356_v40  ;;  %v4384_v44 = vrot.slane %v4377_v5, %v18488_v35  ;;  %v17770_v40 = vld [vmem:[#allocation2 + $0x38] ss:$0 sps:$4 sm:$0x33]  }
 0x15e   : > { %v4342_v24 = vrot.slane %v4335_v12, %v18488_v35  ;;  %v5422_v54 = vunpack.c.l.b16 %v4314_v30  ;;  %v5423_v23 = vunpack.c.l.b16 %v4328_v38  ;;  %v5421_v62 = vunpack.c.l.b16 %v4300_v61 }
 0x15f   : > { %23577 = vst [vmem:[#allocation40_spill] sm:$0xff] %v19334_v27  ;;  %v5426_v7 = vunpack.c.l.b16 %v4370_v18  ;;  %v19340_v39 = vrot.slane %v5425_v34, 4  ;;  %v1402_v53 = vrot.slane %v1395_v48, %v18488_v35  ;;  %v19345_v17 = vunpack.c.l.b16 %v4384_v44 }
 0x160   : > { %v19343_v42 = vunpack.c.l.b16 %v4342_v24  ;;  %v5502_v46 = vrot.slane %v5422_v54, 7  ;;  %v1197_v12 = vsel %vm1185_vm10, %v17770_v40, %v1096_v6  ;;  %v5504_v27 = vrot.slane %v5423_v23, 6  ;;  %v19363_v24 = vpop.permute.xlu0 %1099 }
 0x161   : > { %23578 = vst [vmem:[#allocation41_spill] sm:$0xff] %v19345_v17  ;;  %v4531_v30 = vrot.slane %v1402_v53, %v18488_v35  ;;  %v23579_v61 = vrot.slane %v18883_v3, %v18488_v35  ;;  %v2904_v5 = vrot.slane %v18904_v28, %v18488_v35  ;;  %v19357_v34 = vrot.slane %v5426_v7, 3 }
 0x162   : > { %v5503_v48 = vsel %vm4023_vm12, %v5502_v46, %v5421_v62  ;;  %v23580_v6 = vcombine.high %v18883_v3, %v18883_v3  ;;  %v23581_v28 = vrot.slane %v18936_v4, %v18488_v35  ;;  %v23582_v7 = vcombine.high %v18925_v11, %v18925_v11 }
 0x163   : > { %v2890_v38 = vrot.slane %v23579_v61, %v18488_v35  ;;  %v4538_v23 = vrot.slane %v4531_v30, %v18488_v35  ;;  %v3947_v40 = vunpack.c.l.b16 %v2904_v5  ;;  %v23583_v61 = vrot.slane %v18908_v52, 6  ;;  %v1102_v30 = vpop.permute.xlu1 %1101 }
 0x164   : > { %v2911_v54 = vrot.slane %v23580_v6, %v18488_v35  ;;  %v3016_v62 = vrot.slane %v23581_v28, %v18488_v35  ;;  %v3023_v53 = vrot.slane %v23582_v7, %v18488_v35  ;;  %v19381_v44 = vsel %vm4026_vm13, %v5504_v27, %v5503_v48 }
 0x165   : > { %v3946_v3 = vunpack.c.l.b16 %v2890_v38  ;;  %v4027_v6 = vsel %vm4026_vm13, %v23583_v61, %v18932_v14  ;;  %v5438_v4 = vunpack.c.l.b16 %v4538_v23  ;;  %v23584_v18 = vrot.slane %v18920_v2, 5  ;;  %v23585_v38 = vld [vmem:[#allocation24_spill] sm:$0xff] }
 0x166   : > { %v2918_v46 = vrot.slane %v2911_v54, %v18488_v35  ;;  %v3030_v28 = vrot.slane %v3023_v53, %v18488_v35  ;;  %v3955_v54 = vunpack.c.l.b16 %v3016_v62  ;;  %v4037_v61 = vrot.slane %v3947_v40, 2  ;;  %v2086_v53 = vpop.permute.xlu0 %2085 }
 0x167   : > { %v4030_v11 = vsel %vm4029_vm14, %v23584_v18, %v4027_v6  ;;  %v4034_v17 = vrot.slane %v3946_v3, 3  ;;  %v6015_v52 = vsel %vm4023_vm12, %v19097_v25, %v5438_v4  ;;  %v4046_v27 = vsel %vm4026_vm13, %v18983_v13, %v19209_v49 }
 0x168   : > { %v3948_v7 = vunpack.c.l.b16 %v2918_v46  ;;  %v4033_v5 = vsel %vm630_vm3, %v23585_v38, %v4030_v11  ;;  %v3956_v14 = vunpack.c.l.b16 %v3030_v28  ;;  %v19394_v48 = vrot.slane %v5438_v4, 7  ;;  %v23588_v4 = vld [vmem:[#allocation5_spill] sm:$0xff]  ;;  %v23589_v28 = vld [vmem:[#allocation12_spill] sm:$0xff]  ;;  %v23590_v38 = vld [vmem:[#allocation10_spill] sm:$0xff] }
 0x169   : > { %v19398_v2 = vsel %vm4026_vm13, %v19099_v22, %v6015_v52  ;;  %v4036_v18 = vsel %vm4035_vm15, %v4034_v17, %v4033_v5  ;;  %v23586_v23 = vrot.slane %v18970_v56, 5  ;;  %v4049_v3 = vrot.slane %v18978_v60, 4  ;;  %v1110_v56 = vpop.permute.xlu1 %1109  ;;  %v23592_v52 = vld [vmem:[#allocation9_spill] sm:$0xff] }
 0x16a   : > { %v4039_v25 = vsel %vm4038_vm0, %v4037_v61, %v4036_v18  ;;  %v4040_v46 = vrot.slane %v3948_v7, 1  ;;  %v23587_v13 = vunpack.c.l.b16 %v18958_v33  ;;  %v4053_v40 = vrot.slane %v3955_v54, 2  ;;  %v23594_v33 = vld [vmem:[#allocation8_spill] sm:$0xff] }
 0x16b   : > { %v4048_v62 = vsel %vm4029_vm14, %v23586_v23, %v4046_v27  ;;  %v4055_v6 = vrot.slane %v3956_v14, 1  ;;  %v3972_v22 = vunpack.c.l.b16 %v23588_v4  ;;  %v4062_v17 = vsel %vm4029_vm14, %v23589_v28, %v19188_v51  ;;  %v23595_v27 = vld [vmem:[#allocation11_spill] sm:$0xff]  ;;  %v23597_v23 = vld [vmem:[#allocation6_spill] sm:$0xff] }
 0x16c   : > { %v4051_v49 = vrot.slane %v23587_v13, 3  ;;  %v4050_v11 = vsel %vm630_vm3, %v4049_v3, %v4048_v62  ;;  %v23591_v5 = vrot.slane %v23590_v38, 4  ;;  %v23593_v60 = vunpack.c.l.b16 %v23592_v52  ;;  %v23599_v3 = vld [vmem:[#allocation7_spill] sm:$0xff] }
 0x16d   : > { %v4078_v54 = vsel %vm630_vm3, %v23594_v33, %v19205_v55  ;;  %v23596_v18 = vrot.slane %v23595_v27, 3  ;;  %v23598_v13 = vrot.slane %v23597_v23, 3  ;;  %v4081_v4 = vrot.slane %v23599_v3, 2  ;;  %v23601_v27 = vld [vmem:[#allocation18_spill] sm:$0xff] }
 0x16e   : > { %v4064_v7 = vsel %vm630_vm3, %v23591_v5, %v4062_v17  ;;  %v4069_v61 = vrot.slane %v23593_v60, 1  ;;  %v4052_v14 = vsel %vm4035_vm15, %v4051_v49, %v4050_v11  ;;  %v23600_v17 = vld [vmem:[#allocation13_spill] sm:$0xff]  ;;  %v4083_v5 = vrot.slane %v3972_v22, 1  ;;  %v1164_v60 = vpop.permute.xlu0 %1163 }
 0x16f   : > { %v4066_v51 = vsel %vm4035_vm15, %v23596_v18, %v4064_v7  ;;  %v4080_v62 = vsel %vm4035_vm15, %v23598_v13, %v4078_v54  ;;  %v4054_v28 = vsel %vm4038_vm0, %v4053_v40, %v4052_v14  ;;  %v1234_v55 = vsel %vm1222_vm11, %v1197_v12, %v19338_v58  ;;  %v23602_v18 = vld [vmem:[#allocation17_spill] sm:$0xff]  ;;  %v23604_v13 = vld [vmem:[#allocation15_spill] sm:$0xff] }
 0x170   : > { %v4068_v38 = vsel %vm4038_vm0, %v23600_v17, %v4066_v51  ;;  %v4042_v49 = vsel %vm4041_vm1, %v4040_v46, %v4039_v25  ;;  %v4056_v11 = vsel %vm4041_vm1, %v4055_v6, %v4054_v28  ;;  %v4082_v7 = vsel %vm4038_vm0, %v4081_v4, %v4080_v62  ;;  %v17771_v25 = vld [vmem:[#allocation2 + $0x60] sm:$0xff]   ;;  %v1166_v6 = vpop.permute.xlu1 %1165  ;;  %v23603_v51 = vld [vmem:[#allocation16_spill] sm:$0xff]  ;;  %v23608_v17 = vld [vmem:[#allocation14_spill] sm:$0xff] }
 0x171   : > { %v1458_v52 = vrot.slane %v1234_v55, %v18488_v35  ;;  %v4169_v33 = vpack.c.b16 %v4056_v11, %v4042_v49  ;;  %v4070_v54 = vsel %vm4041_vm1, %v4069_v61, %v4068_v38  ;;  %v4084_v40 = vsel %vm4041_vm1, %v4083_v5, %v4082_v7  ;;  %v23606_v62 = vld [vmem:[#allocation19_spill] sm:$0xff]  ;;  %v23610_v55 = vld [vmem:[#allocation21_spill] sm:$0xff] }
 0x172   : > { %v1226_v22 = vsel %vm1222_vm11, %v19251_v41, %v19328_v9  ;;  %v4170_v14 = vpack.c.b16 %v4084_v40, %v4070_v54  ;;  %v1203_v46 = vsel %vm1185_vm10, %v17771_v25, %v1102_v30  ;;  %v3926_v61 = vrot.slane %v23601_v27, %v18488_v35  ;;  %v23605_v9 = vld [vmem:[#allocation23_spill] sm:$0xff]  ;;  %v17772_v11 = vld [vmem:[#allocation2 + $0x50] ss:$0 sps:$4 sm:$0x33]   ;;  %v23611_v54 = vld [vmem:[#allocation22_spill] sm:$0xff] }
 0x173   : > { %v1465_v58 = vrot.slane %v1458_v52, %v18488_v35  ;;  %v1332_v12 = vrot.slane %v1226_v22, %v18488_v35  ;;  %17398 = vmatprep.mubr.msk.bf16.mxu0 %vm4184_vm2, %v4169_v33  ;;  %v4148_v23 = vsel %vm630_vm3, %v23603_v51, %v23602_v18  ;;  %v4151_v41 = vrot.slane %v23604_v13, 2  ;;  %v17773_v27 = vld [vmem:[#allocation2 + $0x90] sm:$0xff]   ;;  %v2149_v51 = vpop.permute.xlu0 %2148 }
 0x174   : > { %v23607_v3 = vrot.slane %v23606_v62, 5  ;;  %17399 = vmatmul.mubr.msk.bf16.vlgmr.msra.gmra.mxu0 %vm4184_vm2, %v4170_v14  ;;  %v23609_v38 = vrot.slane %v23608_v17, 3  ;;  %v1201_v7 = vsel %vm1185_vm10, %v17772_v11, %v19363_v24  ;;  %v4020_v52 = vunpack.c.l.b16 %v3926_v61 }
 0x175   : > { %v4657_v30 = vrot.slane %v1465_v58, %v18488_v35  ;;  %v1339_v28 = vrot.slane %v1332_v12, %v18488_v35  ;;  %v23612_v58 = vld [vmem:[#allocation20_spill] sm:$0xff]  ;;  %v19476_v18 = vsel %vm1185_vm10, %v17773_v27, %v1110_v56  ;;  %v19492_v17 = vsel %vm1222_vm11, %v1201_v7, %v1164_v60 }
 0x176   : > { %v4160_v4 = vsel %vm4029_vm14, %v23607_v3, %v23605_v9  ;;  %v4150_v5 = vsel %vm4035_vm15, %v23609_v38, %v4148_v23  ;;  %v23613_v12 = vrot.slane %v23612_v58, 2  ;;  %v4167_v61 = vrot.slane %v4020_v52, 1  ;;  %v17774_v23 = vld [vmem:[#allocation2 + $0xd4] ss:$0 sps:$4 sm:$0x33]   ;;  %v17775_v52 = vld [vmem:[#allocation2 + $0x78] sm:$0xff]  }
 0x177   : > { %v4162_v49 = vsel %vm630_vm3, %v23610_v55, %v4160_v4  ;;  %v4152_v33 = vsel %vm4038_vm0, %v4151_v41, %v4150_v5  ;;  %v4664_v22 = vrot.slane %v4657_v30, %v18488_v35  ;;  %v4405_v14 = vrot.slane %v1339_v28, %v18488_v35  ;;  %v1106_v30 = vpop.permute.xlu1 %1105 }
 0x178   : > { %v4164_v40 = vsel %vm4035_vm15, %v23611_v54, %v4162_v49  ;;  %v4154_v24 = vsel %vm4041_vm1, %v19330_v15, %v4152_v33  ;;  %v2185_v13 = vsel %vm1185_vm10, %v17774_v23, %v2086_v53  ;;  %v1240_v41 = vsel %vm1222_vm11, %v1203_v46, %v1166_v6 }
 0x179   : > { %v4166_v25 = vsel %vm4038_vm0, %v23613_v12, %v4164_v40  ;;  %v5447_v9 = vunpack.c.l.b16 %v4664_v22  ;;  %v4412_v62 = vrot.slane %v4405_v14, %v18488_v35  ;;  %v1529_v3 = vcombine.high %v1240_v41, %v1240_v41 }
 0x17a   : > { %v1536_v4 = vrot.slane %v1240_v41, %v18488_v35  ;;  %v4168_v56 = vsel %vm4041_vm1, %v4167_v61, %v4166_v25  ;;  %v23614_v28 = vrot.slane %v19287_v43, 6  ;;  %v19495_v53 = vsel %vm1222_vm11, %v2185_v13, %v2149_v51 }
 0x17b   : > { %v5546_v46 = vrot.slane %v5447_v9, 6  ;;  %v6028_v6 = vrot.slane %v5447_v9, 7  ;;  %v5429_v38 = vunpack.c.l.b16 %v4412_v62  ;;  %v4173_v5 = vpack.c.b16 %v4168_v56, %v4154_v24 }
 0x17c   : > { %v19489_v15 = vsel %vm4026_vm13, %v23614_v28, %v19304_v26  ;;  %v1543_v55 = vrot.slane %v1529_v3, %v18488_v35  ;;  %v1544_v49 = vcombine.high %v1536_v4, %v1536_v4  ;;  %v1552_v11 = vrot.slane %v1536_v4, %v18488_v35 }
 0x17d   : > { %v19500_v43 = vsel %vm1185_vm10, %v17775_v52, %v1106_v30  ;;  %v5547_v26 = vsel %vm4026_vm13, %v5546_v46, %v19119_v19  ;;  %v6029_v60 = vsel %vm4023_vm12, %v6028_v6, %v19090_v1  ;;  %v5517_v7 = vsel %vm4023_vm12, %v19221_v37, %v5429_v38  ;;  %17406 = vmatprep.mubr.msk.bf16.mxu1 %vm4184_vm2, %v4173_v5 }
 0x17e   : > { %v1521_v33 = vrot.slane %v19492_v17, %v18488_v35  ;;  %v5549_v54 = vsel %vm4029_vm14, %v19280_v8, %v5547_v26  ;;  %v6031_v40 = vsel %vm4026_vm13, %v19290_v21, %v6029_v60  ;;  %v1545_v22 = vcombine.high %v1543_v55, %v1543_v55 }
 0x17f   : > { %v2799_v19 = vrot.slane %v19495_v53, %v18488_v35  ;;  %v5551_v1 = vsel %vm630_vm3, %v19282_v63, %v5549_v54  ;;  %v19521_v37 = vsel %vm4026_vm13, %v19223_v32, %v5517_v7  ;;  %v1559_v14 = vrot.slane %v1543_v55, %v18488_v35 }
 0x180   : > { %v1566_v58 = vrot.slane %v1544_v49, %v18488_v35  ;;  %v19527_v8 = vsel %vm4029_vm14, %v19292_v10, %v6031_v40  ;;  %v1573_v21 = vrot.slane %v1545_v22, %v18488_v35  ;;  %v1574_v12 = vcombine.high %v1552_v11, %v1552_v11 }
 0x181   : > { %v4797_v25 = vrot.slane %v1552_v11, %v18488_v35  ;;  %v1575_v27 = vcombine.high %v1559_v14, %v1559_v14  ;;  %v4853_v32 = vrot.slane %v1559_v14, %v18488_v35  ;;  %v23615_v28 = vrot.slane %v19274_v31, 3 }
 0x182   : > { %v1576_v51 = vcombine.high %v1566_v58, %v1566_v58  ;;  %v4811_v63 = vrot.slane %v1566_v58, %v18488_v35  ;;  %v1577_v24 = vcombine.high %v1573_v21, %v1573_v21  ;;  %v4825_v23 = vrot.slane %v1574_v12, %v18488_v35 }
 0x183   : > { %v4804_v61 = vrot.slane %v4797_v25, %v18488_v35  ;;  %v4867_v13 = vrot.slane %v1573_v21, %v18488_v35  ;;  %v4860_v9 = vrot.slane %v4853_v32, %v18488_v35  ;;  %v4881_v62 = vrot.slane %v1575_v27, %v18488_v35  ;;  %v23637_v21 = vld [vmem:[#allocation30_spill] sm:$0xff] }
 0x184   : > { %v4818_v10 = vrot.slane %v4811_v63, %v18488_v35  ;;  %v4839_v41 = vrot.slane %v1576_v51, %v18488_v35  ;;  %v4832_v3 = vrot.slane %v4825_v23, %v18488_v35  ;;  %v4895_v30 = vrot.slane %v1577_v24, %v18488_v35 }
 0x185   : > { %v4874_v4 = vrot.slane %v4867_v13, %v18488_v35  ;;  %v5457_v56 = vunpack.c.l.b16 %v4804_v61  ;;  %v19546_v17 = vsel %vm4035_vm15, %v23615_v28, %v5551_v1  ;;  %v4888_v46 = vrot.slane %v4881_v62, %v18488_v35  ;;  %v1114_v1 = vpop.permute.xlu1 %1113 }
 0x186   : > { %v4846_v53 = vrot.slane %v4839_v41, %v18488_v35  ;;  %v5458_v6 = vunpack.c.l.b16 %v4818_v10  ;;  %v4902_v38 = vrot.slane %v4895_v30, %v18488_v35  ;;  %v19551_v5 = vunpack.c.l.b16 %v4832_v3  ;;  %v1174_v3 = vpop.permute.xlu0 %1173 }
 0x187   : > { %v5461_v55 = vunpack.c.l.b16 %v4860_v9  ;;  %v5462_v49 = vunpack.c.l.b16 %v4874_v4  ;;  %v5463_v52 = vunpack.c.l.b16 %v4888_v46  ;;  %v19555_v26 = vrot.slane %v5457_v56, 4 }
 0x188   : > { %v19553_v11 = vunpack.c.l.b16 %v4846_v53  ;;  %v19557_v60 = vrot.slane %v5458_v6, 3  ;;  %v19559_v7 = vunpack.c.l.b16 %v4902_v38  ;;  %v19562_v22 = vrot.slane %v5457_v56, 5 }
 0x189   : > { %v5572_v40 = vrot.slane %v5462_v49, 7  ;;  %v5574_v14 = vrot.slane %v5463_v52, 6  ;;  %v19564_v58 = vrot.slane %v5458_v6, 4  ;;  %v19570_v51 = vrot.slane %v5461_v55, 1  ;;  %v1178_v6 = vpop.permute.xlu1 %1177 }
 0x18a   : > { %v6056_v63 = vrot.slane %v5463_v52, 7  ;;  %v1528_v24 = vrot.slane %v1521_v33, %v18488_v35  ;;  %v19575_v61 = vrot.slane %v2799_v19, %v18488_v35  ;;  %v23616_v23 = vrot.slane %v19196_v36, %v18488_v35  ;;  %v23621_v52 = vld [vmem:[#allocation25_spill] sm:$0xff] }
 0x18b   : > { %v5573_v25 = vsel %vm4023_vm12, %v5572_v40, %v5461_v55  ;;  %v23617_v9 = vrot.slane %v19214_v16, 5  ;;  %v23618_v33 = vrot.slane %v19073_v0, 5  ;;  %v6010_v56 = vrot.slane %v19219_v29, 2 }
 0x18c   : > { %v5437_v13 = vunpack.c.l.b16 %v23616_v23  ;;  %v19581_v10 = vsel %vm4026_vm13, %v5574_v14, %v5573_v25  ;;  %v19584_v41 = vsel %vm4023_vm12, %v6056_v63, %v5462_v49  ;;  %v4783_v36 = vrot.slane %v1528_v24, %v18488_v35  ;;  %v17776_v25 = vld [vmem:[#allocation2 + $0xa8] sm:$0xff]   ;;  %v23623_v23 = vld [vmem:[#allocation26_spill] sm:$0xff] }
 0x18d   : > { %v6005_v62 = vsel %vm4029_vm14, %v23617_v9, %v19244_v47  ;;  %v6019_v19 = vsel %vm4029_vm14, %v23618_v33, %v19398_v2  ;;  %v23619_v2 = vrot.slane %v19078_v50, 4  ;;  %v23622_v40 = vunpack.c.l.b16 %v23621_v52 }
 0x18e   : > { %v5531_v4 = vsel %vm4023_vm12, %v19394_v48, %v5437_v13  ;;  %v6007_v30 = vsel %vm630_vm3, %v19232_v57, %v6005_v62  ;;  %v6012_v53 = vrot.slane %v5437_v13, 1  ;;  %v4790_v38 = vrot.slane %v4783_v36, %v18488_v35 }
 0x18f   : > { %v5533_v28 = vsel %vm4026_vm13, %v19081_v45, %v5531_v4  ;;  %v6009_v47 = vsel %vm4035_vm15, %v19236_v59, %v6007_v30  ;;  %v6021_v46 = vsel %vm630_vm3, %v23619_v2, %v6019_v19  ;;  %v23620_v45 = vld [vmem:[#allocation27_spill] sm:$0xff]  ;;  %v6024_v14 = vrot.slane %v23622_v40, 2  ;;  %v1170_v4 = vpop.permute.xlu0 %1169 }
 0x190   : > { %v6011_v57 = vsel %vm4038_vm0, %v6010_v56, %v6009_v47  ;;  %v6023_v55 = vsel %vm4035_vm15, %v19106_v20, %v6021_v46  ;;  %v19615_v49 = vsel %vm4029_vm14, %v23620_v45, %v5533_v28  ;;  %v1215_v63 = vsel %vm1185_vm10, %v17776_v25, %v1114_v1  ;;  %v23624_v46 = vld [vmem:[#allocation39_spill] sm:$0xff] }
 0x191   : > { %v6013_v59 = vsel %vm4041_vm1, %v6012_v53, %v6011_v57  ;;  %v5456_v24 = vunpack.c.l.b16 %v4790_v38  ;;  %v6026_v13 = vrot.slane %v23623_v23, 1  ;;  %v1248_v9 = vsel %vm1222_vm11, %v19476_v18, %v1174_v3 }
 0x192   : > { %v1252_v20 = vsel %vm1222_vm11, %v1215_v63, %v1178_v6  ;;  %v6025_v62 = vsel %vm4038_vm0, %v6024_v14, %v6023_v55  ;;  %v1655_v33 = vcombine.high %v1248_v9, %v1248_v9  ;;  %v1662_v19 = vrot.slane %v1248_v9, %v18488_v35 }
 0x193   : > { %v1718_v36 = vcombine.high %v1252_v20, %v1252_v20  ;;  %v5562_v30 = vrot.slane %v5456_v24, 5  ;;  %v6044_v56 = vrot.slane %v5456_v24, 6  ;;  %v6027_v28 = vsel %vm4041_vm1, %v6026_v13, %v6025_v62 }
 0x194   : > { %v1725_v1 = vrot.slane %v1252_v20, %v18488_v35  ;;  %v6140_v47 = vpack.c.b16 %v6027_v28, %v6013_v59  ;;  %v1669_v53 = vrot.slane %v1655_v33, %v18488_v35  ;;  %v1670_v2 = vcombine.high %v1662_v19, %v1662_v19 }
 0x195   : > { %v1678_v18 = vrot.slane %v1662_v19, %v18488_v35  ;;  %v19633_v3 = vsel %vm4029_vm14, %v5562_v30, %v19489_v15  ;;  %v6045_v6 = vsel %vm4026_vm13, %v6044_v56, %v23624_v46  ;;  %v1732_v38 = vrot.slane %v1718_v36, %v18488_v35 }
 0x196   : > { %v19640_v57 = vsel %vm1222_vm11, %v19500_v43, %v1170_v4  ;;  %17430 = vmatprep.mubr.msk.bf16.mxu0 %vm4184_vm2, %v6140_v47  ;;  %v1671_v55 = vcombine.high %v1669_v53, %v1669_v53  ;;  %v1685_v45 = vrot.slane %v1669_v53, %v18488_v35  ;;  %v1692_v59 = vrot.slane %v1670_v2, %v18488_v35 }
 0x197   : > { %v1733_v52 = vcombine.high %v1725_v1, %v1725_v1  ;;  %v19647_v15 = vsel %vm4029_vm14, %v19562_v22, %v6045_v6  ;;  %v1700_v40 = vcombine.high %v1678_v18, %v1678_v18  ;;  %v5049_v14 = vrot.slane %v1678_v18, %v18488_v35 }
 0x198   : > { %v1734_v25 = vcombine.high %v1732_v38, %v1732_v38  ;;  %v1699_v63 = vrot.slane %v1671_v55, %v18488_v35  ;;  %v1701_v43 = vcombine.high %v1685_v45, %v1685_v45  ;;  %v1702_v24 = vcombine.high %v1692_v59, %v1692_v59 }
 0x199   : > { %v5063_v23 = vrot.slane %v1692_v59, %v18488_v35  ;;  %v5056_v13 = vrot.slane %v5049_v14, %v18488_v35  ;;  %v5077_v9 = vrot.slane %v1700_v40, %v18488_v35  ;;  %v5105_v20 = vrot.slane %v1685_v45, %v18488_v35 }
 0x19a   : > { %v1741_v62 = vrot.slane %v1725_v1, %v18488_v35  ;;  %v1703_v22 = vcombine.high %v1699_v63, %v1699_v63  ;;  %v5091_v19 = vrot.slane %v1702_v24, %v18488_v35  ;;  %v5119_v36 = vrot.slane %v1699_v63, %v18488_v35 }
 0x19b   : > { %v19657_v33 = vrot.slane %v5063_v23, %v18488_v35  ;;  %v5084_v4 = vrot.slane %v5077_v9, %v18488_v35  ;;  %v5112_v30 = vrot.slane %v5105_v20, %v18488_v35  ;;  %v5133_v56 = vrot.slane %v1701_v43, %v18488_v35 }
 0x19c   : > { %v5475_v28 = vunpack.c.l.b16 %v5056_v13  ;;  %v5098_v47 = vrot.slane %v5091_v19, %v18488_v35  ;;  %v5126_v53 = vrot.slane %v5119_v36, %v18488_v35  ;;  %v5147_v1 = vrot.slane %v1703_v22, %v18488_v35 }
 0x19d   : > { %v23459_v2 = vunpack.c.l.b16 %v19657_v33  ;;  %v5140_v18 = vrot.slane %v5133_v56, %v18488_v35  ;;  %v19669_v46 = vunpack.c.l.b16 %v5084_v4  ;;  %v5479_v6 = vunpack.c.l.b16 %v5112_v30 }
 0x19e   : > { %v1748_v55 = vrot.slane %v1732_v38, %v18488_v35  ;;  %v5154_v45 = vrot.slane %v5147_v1, %v18488_v35  ;;  %v5478_v59 = vunpack.c.l.b16 %v5098_v47  ;;  %v5480_v40 = vunpack.c.l.b16 %v5126_v53 }
 0x19f   : > { %23625 = vst [vmem:[#allocation24_spill] sm:$0xff] %v19669_v46  ;;  %v19673_v14 = vrot.slane %v5475_v28, 2  ;;  %v19675_v63 = vunpack.c.l.b16 %v5140_v18  ;;  %v5602_v43 = vrot.slane %v5479_v6, 6  ;;  %v19677_v24 = vrot.slane %v5475_v28, 3 }
 0x1a0   : > { %v6084_v23 = vrot.slane %v5479_v6, 7  ;;  %v19679_v13 = vunpack.c.l.b16 %v5154_v45  ;;  %v5600_v9 = vrot.slane %v5478_v59, 7  ;;  %v19681_v20 = vrot.slane %v5480_v40, 5 }
 0x1a1   : > { %v19685_v38 = vrot.slane %v23459_v2, 2  ;;  %v19691_v36 = vrot.slane %v5480_v40, 6  ;;  %v1755_v4 = vrot.slane %v1733_v52, %v18488_v35  ;;  %v1762_v47 = vrot.slane %v1734_v25, %v18488_v35 }
 0x1a2   : > { %v19689_v19 = vsel %vm4023_vm12, %v6084_v23, %v5478_v59  ;;  %v5601_v30 = vsel %vm4023_vm12, %v5600_v9, %v19669_v46  ;;  %v1763_v1 = vcombine.high %v1741_v62, %v1741_v62  ;;  %v1764_v18 = vcombine.high %v1748_v55, %v1748_v55 }
 0x1a3   : > { %23626 = vst [vmem:[#allocation5_spill] sm:$0xff] %v19685_v38  ;;  %23627 = vst [vmem:[#allocation12_spill] sm:$0xff] %v19689_v19  ;;  %v1765_v6 = vcombine.high %v1755_v4, %v1755_v4  ;;  %v1766_v45 = vcombine.high %v1762_v47, %v1762_v47  ;;  %v5175_v59 = vrot.slane %v1741_v62, %v18488_v35  ;;  %v6174_v48 = vsel %vm4203_vm9, %v23637_v21, 0 }
 0x1a4   : > { %23628 = vst [vmem:[#allocation10_spill] sm:$0xff] %v19691_v36  ;;  %v5189_v40 = vrot.slane %v1755_v4, %v18488_v35  ;;  %v5231_v52 = vrot.slane %v1748_v55, %v18488_v35  ;;  %v5203_v23 = vrot.slane %v1763_v1, %v18488_v35  ;;  %v5245_v28 = vrot.slane %v1762_v47, %v18488_v35  ;;  %v1104_v47 = vpop.permute.xlu0 %1103 }
 0x1a5   : > { %v5217_v9 = vrot.slane %v1765_v6, %v18488_v35  ;;  %v5259_v25 = vrot.slane %v1764_v18, %v18488_v35  ;;  %v5182_v53 = vrot.slane %v5175_v59, %v18488_v35  ;;  %v5273_v62 = vrot.slane %v1766_v45, %v18488_v35  ;;  %17427 = vmatpush3.bf16.msra.mxu0 %v6174_v48 }
 0x1a6   : > { %v19709_v32 = vrot.slane %v5189_v40, %v18488_v35  ;;  %v5238_v56 = vrot.slane %v5231_v52, %v18488_v35  ;;  %v5210_v4 = vrot.slane %v5203_v23, %v18488_v35  ;;  %v5252_v1 = vrot.slane %v5245_v28, %v18488_v35  ;;  %v1168_v23 = vpop.permute.xlu1 %1167 }
 0x1a7   : > { %v5224_v55 = vrot.slane %v5217_v9, %v18488_v35  ;;  %v5266_v6 = vrot.slane %v5259_v25, %v18488_v35  ;;  %v19718_v18 = vsel %vm4026_vm13, %v5602_v43, %v5601_v30  ;;  %v5280_v59 = vrot.slane %v5273_v62, %v18488_v35 }
 0x1a8   : > { %23629 = vst [vmem:[#allocation9_spill] sm:$0xff] %v19709_v32  ;;  %v5484_v40 = vunpack.c.l.b16 %v5182_v53  ;;  %v5488_v22 = vunpack.c.l.b16 %v5238_v56  ;;  %v5486_v2 = vunpack.c.l.b16 %v5210_v4  ;;  %v5489_v27 = vunpack.c.l.b16 %v5252_v1  ;;  %v17684_v1 = vld [vmem:[%s23425_s1 + $0x18] sm:$0xff]  }
 0x1a9   : > { %v5487_v52 = vunpack.c.l.b16 %v5224_v55  ;;  %v19721_v45 = vunpack.c.l.b16 %v5266_v6  ;;  %v23460_v9 = vunpack.c.l.b16 %v19709_v32  ;;  %v19724_v54 = vunpack.c.l.b16 %v5280_v59  ;;  %17428 = vmatprep.subr.bf16.mxu0 %v17684_v1 }
 0x1aa   : > { %v19726_v28 = vrot.slane %v5484_v40, 1  ;;  %v19728_v25 = vrot.slane %v5488_v22, 5  ;;  %v5614_v43 = vrot.slane %v5486_v2, 7  ;;  %v19730_v12 = vrot.slane %v5489_v27, 4  ;;  %17429 = vmatpush3.bf16.msra.mxu0 %v17684_v1 }
 0x1ab   : > { %23630 = vst [vmem:[#allocation8_spill] sm:$0xff] %v19721_v45  ;;  %23631 = vst [vmem:[#allocation11_spill] sm:$0xff] %v19724_v54  ;;  %v5616_v30 = vrot.slane %v5487_v52, 6  ;;  %v19732_v53 = vrot.slane %v5484_v40, 2  ;;  %v6098_v62 = vrot.slane %v5487_v52, 7  ;;  %v6100_v4 = vrot.slane %v5488_v22, 6  ;;  %v19748_v52 = vpop.permute.xlu0 %1107  ;;  %v19766_v22 = vpop.permute.xlu1 %1111 }
 0x1ac   : > { %23632 = vst [vmem:[#allocation6_spill] sm:$0xff] %v19728_v25  ;;  %23633 = vst [vmem:[#allocation7_spill] sm:$0xff] %v19730_v12  ;;  %v19735_v55 = vrot.slane %v5489_v27, 5  ;;  %v5615_v6 = vsel %vm4023_vm12, %v5614_v43, %v23460_v9  ;;  %v1592_v40 = vcombine.high %v19640_v57, %v19640_v57  ;;  %v1599_v56 = vrot.slane %v19640_v57, %v18488_v35  ;;  %v17685_v9 = vld [vmem:[%s23425_s1] sm:$0xff]   ;;  %v23640_v54 = vld [vmem:[#allocation40_spill] sm:$0xff] }
 0x1ad   : > { %23634 = vst [vmem:[#allocation13_spill] sm:$0xff] %v19732_v53  ;;  %v19751_v27 = vsel %vm4026_vm13, %v5616_v30, %v5615_v6  ;;  %v23638_v43 = vrot.slane %v19575_v61, %v18488_v35  ;;  %v6099_v57 = vsel %vm4023_vm12, %v6098_v62, %v5486_v2  ;;  %v17777_v25 = vld [vmem:[#allocation2 + $0x68] ss:$0 sps:$4 sm:$0x33]   ;;  %v23639_v61 = vld [vmem:[#allocation31_spill] sm:$0xff]  ;;  %v4398_v53 = vrot.slane %v23640_v54, %v18488_v35 }
 0x1ae   : > { %23635 = vst [vmem:[#allocation18_spill] sm:$0xff] %v19735_v55  ;;  %23636 = vst [vmem:[#allocation17_spill] sm:$0xff] %v19751_v27  ;;  %v1606_v12 = vrot.slane %v1592_v40, %v18488_v35  ;;  %v1607_v30 = vcombine.high %v1599_v56, %v1599_v56  ;;  %v1615_v6 = vrot.slane %v1599_v56, %v18488_v35 }
 0x1af   : > { %v3940_v59 = vrot.slane %v23638_v43, %v18488_v35  ;;  %v1205_v27 = vsel %vm1185_vm10, %v17777_v25, %v1104_v47  ;;  %v5676_v43 = vsel %vm4203_vm9, %v23639_v61, 0  ;;  %v19776_v48 = vsel %vm4026_vm13, %v6100_v4, %v6099_v57 }
 0x1b0   : > { %v1608_v2 = vcombine.high %v1606_v12, %v1606_v12  ;;  %v1622_v62 = vrot.slane %v1606_v12, %v18488_v35  ;;  %v1629_v40 = vrot.slane %v1607_v30, %v18488_v35  ;;  %v1637_v56 = vcombine.high %v1615_v6, %v1615_v6  ;;  %17411 = vmatpush3.bf16.msra.mxu1 %v5676_v43  ;;  %v19785_v43 = vpop.permute.xlu0 %1171 }
 0x1b1   : > { %v16829_v21 = vcombine.low %v3940_v59, %v3940_v59  ;;  %23641 = vst [vmem:[#allocation16_spill] sm:$0xff] %v19776_v48  ;;  %v4923_v59 = vrot.slane %v1615_v6, %v18488_v35  ;;  %v1242_v47 = vsel %vm1222_vm11, %v1205_v27, %v1168_v23  ;;  %v19781_v25 = vunpack.c.l.b16 %v4398_v53  ;;  %17412 = vmatprep.subr.bf16.mxu1 %v17685_v9 }
 0x1b2   : > { %v1636_v54 = vrot.slane %v1608_v2, %v18488_v35  ;;  %v1638_v61 = vcombine.high %v1622_v62, %v1622_v62  ;;  %v1639_v12 = vcombine.high %v1629_v40, %v1629_v40  ;;  %v4937_v30 = vrot.slane %v1629_v40, %v18488_v35  ;;  %v1176_v40 = vpop.permute.xlu1 %1175 }
 0x1b3   : > { %17407 = vmatmul.mubr.msk.bf16.gmra.mxu1 %vm4184_vm2, %v16829_v21  ;;  %v4930_v4 = vrot.slane %v4923_v59, %v18488_v35  ;;  %v4951_v57 = vrot.slane %v1637_v56, %v18488_v35  ;;  %v4979_v6 = vrot.slane %v1622_v62, %v18488_v35  ;;  %v23642_v23 = vrot.slane %v19343_v42, 5 }
 0x1b4   : > { %v1640_v27 = vcombine.high %v1636_v54, %v1636_v54  ;;  %v4944_v21 = vrot.slane %v4937_v30, %v18488_v35  ;;  %v4965_v2 = vrot.slane %v1639_v12, %v18488_v35  ;;  %v4993_v1 = vrot.slane %v1636_v54, %v18488_v35  ;;  %17413 = vmatpush3.bf16.msra.mxu1 %v17685_v9 }
 0x1b5   : > { %v5507_v53 = vsel %vm4029_vm14, %v23642_v23, %v19381_v44  ;;  %v4958_v59 = vrot.slane %v4951_v57, %v18488_v35  ;;  %v4986_v56 = vrot.slane %v4979_v6, %v18488_v35  ;;  %v5007_v62 = vrot.slane %v1638_v61, %v18488_v35 }
 0x1b6   : > { %v5466_v45 = vunpack.c.l.b16 %v4930_v4  ;;  %v4972_v42 = vrot.slane %v4965_v2, %v18488_v35  ;;  %v5000_v44 = vrot.slane %v4993_v1, %v18488_v35  ;;  %v5021_v23 = vrot.slane %v1640_v27, %v18488_v35  ;;  %v19812_v2 = vpop.permute.xlu0 %1115 }
 0x1b7   : > { %v5467_v30 = vunpack.c.l.b16 %v4944_v21  ;;  %v5014_v12 = vrot.slane %v5007_v62, %v18488_v35  ;;  %v19804_v55 = vunpack.c.l.b16 %v4958_v59  ;;  %v5470_v9 = vunpack.c.l.b16 %v4986_v56 }
 0x1b8   : > { %v1584_v54 = vrot.slane %v1242_v47, %v18488_v35  ;;  %v5028_v57 = vrot.slane %v5021_v23, %v18488_v35  ;;  %v19808_v6 = vunpack.c.l.b16 %v4972_v42  ;;  %v5471_v61 = vunpack.c.l.b16 %v5000_v44  ;;  %v1118_v23 = vpop.permute.xlu1 %1117 }
 0x1b9   : > { %v19810_v4 = vrot.slane %v5466_v45, 3  ;;  %v19814_v1 = vunpack.c.l.b16 %v5014_v12  ;;  %v19816_v27 = vrot.slane %v5467_v30, 2  ;;  %v5586_v21 = vrot.slane %v5470_v9, 7 }
 0x1ba   : > { %v19818_v62 = vrot.slane %v5466_v45, 4  ;;  %v19820_v59 = vunpack.c.l.b16 %v5028_v57  ;;  %v19822_v56 = vrot.slane %v5471_v61, 6  ;;  %v19824_v47 = vrot.slane %v5467_v30, 3  ;;  %v23643_v45 = vld [vmem:[#allocation41_spill] sm:$0xff]  ;;  %v1180_v46 = vpop.permute.xlu0 %1179 }
 0x1bb   : > { %v6070_v42 = vrot.slane %v5471_v61, 7  ;;  %v19828_v44 = vsel %vm4023_vm12, %v5586_v21, %v19808_v6  ;;  %v6072_v48 = vrot.slane %v19814_v1, 6  ;;  %v1591_v32 = vrot.slane %v1584_v54, %v18488_v35 }
 0x1bc   : > { %v5509_v30 = vsel %vm630_vm3, %v19340_v39, %v5507_v53  ;;  %v5514_v36 = vrot.slane %v19781_v25, 1  ;;  %v23644_v19 = vrot.slane %v23643_v45, 2  ;;  %v23647_v53 = vld [vmem:[#allocation32_spill] sm:$0xff]  ;;  %v5528_v45 = vrot.slane %v19219_v29, 1 }
 0x1bd   : > { %v6071_v38 = vsel %vm4023_vm12, %v6070_v42, %v5470_v9  ;;  %v4909_v21 = vrot.slane %v1591_v32, %v18488_v35  ;;  %v5511_v12 = vsel %vm4035_vm15, %v19357_v34, %v5509_v30  ;;  %v23645_v9 = vld [vmem:[#allocation33_spill] sm:$0xff]  ;;  %v23648_v61 = vunpack.c.l.b16 %v23647_v53  ;;  %v17778_v30 = vld [vmem:[#allocation2 + $0x98] ss:$0 sps:$4 sm:$0x33]  }
 0x1be   : > { %v19844_v54 = vsel %vm4026_vm13, %v6072_v48, %v6071_v38  ;;  %v5513_v57 = vsel %vm4038_vm0, %v23644_v19, %v5511_v12  ;;  %v23646_v42 = vrot.slane %v23645_v9, 5  ;;  %v23649_v38 = vrot.slane %v19214_v16, 4  ;;  %v23650_v19 = vld [vmem:[#allocation34_spill] sm:$0xff]  ;;  %v23652_v9 = vld [vmem:[#allocation35_spill] sm:$0xff] }
 0x1bf   : > { %v5526_v32 = vrot.slane %v23648_v61, 2  ;;  %v4916_v34 = vrot.slane %v4909_v21, %v18488_v35  ;;  %v5515_v25 = vsel %vm4041_vm1, %v5514_v36, %v5513_v57  ;;  %v23651_v61 = vrot.slane %v19274_v31, 4  ;;  %v1182_v36 = vpop.permute.xlu1 %1181 }
 0x1c0   : > { %v5521_v39 = vsel %vm4029_vm14, %v23646_v42, %v19521_v37  ;;  %v1213_v37 = vsel %vm1185_vm10, %v17778_v30, %v19766_v22  ;;  %v6049_v16 = vsel %vm630_vm3, %v19564_v58, %v19647_v15  ;;  %v23653_v42 = vrot.slane %v23652_v9, 3  ;;  %v23657_v30 = vld [vmem:[#allocation38_spill] sm:$0xff] }
 0x1c1   : > { %v5523_v48 = vsel %vm630_vm3, %v23649_v38, %v5521_v39  ;;  %v6035_v21 = vsel %vm630_vm3, %v23651_v61, %v19527_v8  ;;  %v5465_v57 = vunpack.c.l.b16 %v4916_v34  ;;  %v23654_v53 = vrot.slane %v19551_v5, 3  ;;  %v23655_v38 = vld [vmem:[#allocation37_spill] sm:$0xff] }
 0x1c2   : > { %v5525_v12 = vsel %vm4035_vm15, %v23650_v19, %v5523_v48  ;;  %v6037_v39 = vsel %vm4035_vm15, %v23653_v42, %v6035_v21  ;;  %v23656_v48 = vrot.slane %v19553_v11, 2  ;;  %v1250_v15 = vsel %vm1222_vm11, %v1213_v37, %v1176_v40  ;;  %v17779_v19 = vld [vmem:[#allocation2 + $0x80] ss:$0 sps:$4 sm:$0x33]  }
 0x1c3   : > { %v5527_v29 = vsel %vm4038_vm0, %v5526_v32, %v5525_v12  ;;  %v6051_v22 = vsel %vm4035_vm15, %v23654_v53, %v6049_v16  ;;  %v6039_v8 = vsel %vm4038_vm0, %v23655_v38, %v6037_v39  ;;  %v19886_v32 = vrot.slane %v5465_v57, 4  ;;  %v23661_v39 = vld [vmem:[#allocation36_spill] sm:$0xff] }
 0x1c4   : > { %v5529_v31 = vsel %vm4041_vm1, %v5528_v45, %v5527_v29  ;;  %v6053_v58 = vsel %vm4038_vm0, %v23656_v48, %v6051_v22  ;;  %v1209_v12 = vsel %vm1185_vm10, %v17779_v19, %v19748_v52  ;;  %v6041_v61 = vsel %vm4041_vm1, %v23657_v30, %v6039_v8  ;;  %v5782_v29 = vpop.permute.xlu0 %5781  ;;  %v23662_v22 = vld [vmem:[#allocation28_spill] sm:$0xff]  ;;  %v5789_v8 = vpop.permute.xlu1 %5788 }
 0x1c5   : > { %v5642_v34 = vpack.c.b16 %v5529_v31, %v5515_v25  ;;  %v6055_v45 = vsel %vm4041_vm1, %v19570_v51, %v6053_v58  ;;  %v1710_v21 = vrot.slane %v1250_v15, %v18488_v35  ;;  %v23658_v16 = vrot.slane %v19073_v0, 4  ;;  %v17780_v31 = vld [vmem:[#allocation2 + $0xc0] sm:$0xff]   ;;  %v17781_v58 = vld [vmem:[#allocation2 + $0xb0] ss:$0 sps:$4 sm:$0x33]  }
 0x1c6   : > { %v23659_v25 = vrot.slane %v23652_v9, 2  ;;  %v6141_v52 = vpack.c.b16 %v6055_v45, %v6041_v61  ;;  %v23660_v42 = vrot.slane %v19078_v50, 3  ;;  %v1246_v0 = vsel %vm1222_vm11, %v1209_v12, %v19785_v43  ;;  %v23663_v50 = vld [vmem:[#allocation29_spill] sm:$0xff] }
 0x1c7   : > { %v5537_v40 = vsel %vm630_vm3, %v23658_v16, %v19615_v49  ;;  %17414 = vmatprep.mubr.msk.bf16.mxu1 %vm4184_vm2, %v5642_v34  ;;  %v1717_v49 = vrot.slane %v1710_v21, %v18488_v35  ;;  %v1219_v38 = vsel %vm1185_vm10, %v17780_v31, %v1118_v23  ;;  %v1217_v43 = vsel %vm1185_vm10, %v17781_v58, %v19812_v2  ;;  %v17782_v34 = vld [vmem:[#allocation2 + $0xd8] sm:$0xff]  }
 0x1c8   : > { %v5555_v37 = vsel %vm4038_vm0, %v23659_v25, %v19546_v17  ;;  %v5539_v51 = vsel %vm4035_vm15, %v23660_v42, %v5537_v40  ;;  %v1647_v17 = vrot.slane %v1246_v0, %v18488_v35  ;;  %17431 = vmatmul.mubr.msk.bf16.vlgmr.msra.gmra.mxu0 %vm4184_vm2, %v6141_v52  ;;  %v1256_v15 = vsel %vm1222_vm11, %v1219_v38, %v1182_v36 }
 0x1c9   : > { %v5557_v53 = vsel %vm4041_vm1, %v23661_v39, %v5555_v37  ;;  %v5541_v9 = vsel %vm4038_vm0, %v23662_v22, %v5539_v51  ;;  %v5793_v19 = vsel %vm1185_vm10, %v17782_v34, %v5782_v29  ;;  %v5161_v12 = vrot.slane %v1717_v49, %v18488_v35 }
 0x1ca   : > { %v5543_v48 = vsel %vm4041_vm1, %v23663_v50, %v5541_v9  ;;  %v1654_v23 = vrot.slane %v1647_v17, %v18488_v35  ;;  %v1781_v61 = vcombine.high %v1256_v15, %v1256_v15  ;;  %v19925_v45 = vrot.slane %v5465_v57, 5 }
 0x1cb   : > { %v5643_v30 = vpack.c.b16 %v5557_v53, %v5543_v48  ;;  %v1788_v21 = vrot.slane %v1256_v15, %v18488_v35  ;;  %v1254_v16 = vsel %vm1222_vm11, %v1217_v43, %v1180_v46  ;;  %v19930_v40 = vsel %vm1222_vm11, %v5793_v19, %v5789_v8 }
 0x1cc   : > { %v5168_v2 = vrot.slane %v5161_v12, %v18488_v35  ;;  %v5035_v36 = vrot.slane %v1654_v23, %v18488_v35  ;;  %v1795_v25 = vrot.slane %v1781_v61, %v18488_v35  ;;  %v1773_v37 = vrot.slane %v1254_v16, %v18488_v35 }
 0x1cd   : > { %17415 = vmatmul.mubr.msk.bf16.vlgmr.msra.gmra.mxu1 %vm4184_vm2, %v5643_v30  ;;  %v1796_v29 = vcombine.high %v1788_v21, %v1788_v21  ;;  %v1804_v57 = vrot.slane %v1788_v21, %v18488_v35  ;;  %v5802_v52 = vcombine.high %v19930_v40, %v19930_v40  ;;  %v5565_v46 = vsel %vm630_vm3, %v19555_v26, %v19633_v3 }
 0x1ce   : > { %v5483_v42 = vunpack.c.l.b16 %v5168_v2  ;;  %v5042_v51 = vrot.slane %v5035_v36, %v18488_v35  ;;  %v1797_v39 = vcombine.high %v1795_v25, %v1795_v25  ;;  %v1811_v53 = vrot.slane %v1795_v25, %v18488_v35 }
 0x1cf   : > { %v1818_v0 = vrot.slane %v1796_v29, %v18488_v35  ;;  %v1826_v49 = vcombine.high %v1804_v57, %v1804_v57  ;;  %v5301_v22 = vrot.slane %v1804_v57, %v18488_v35  ;;  %v5809_v9 = vrot.slane %v19930_v40, %v18488_v35 }
 0x1d0   : > { %v19949_v17 = vrot.slane %v5483_v42, 2  ;;  %v5474_v31 = vunpack.c.l.b16 %v5042_v51  ;;  %v1825_v38 = vrot.slane %v1797_v39, %v18488_v35  ;;  %v1780_v26 = vrot.slane %v1773_v37, %v18488_v35 }
 0x1d1   : > { %v1827_v3 = vcombine.high %v1811_v53, %v1811_v53  ;;  %v1828_v8 = vcombine.high %v1818_v0, %v1818_v0  ;;  %v5308_v50 = vrot.slane %v5301_v22, %v18488_v35  ;;  %v5315_v48 = vrot.slane %v1818_v0, %v18488_v35 }
 0x1d2   : > { %v19955_v58 = vrot.slane %v5483_v42, 3  ;;  %v19957_v43 = vrot.slane %v5474_v31, 3  ;;  %v1829_v15 = vcombine.high %v1825_v38, %v1825_v38  ;;  %v5329_v34 = vrot.slane %v1826_v49, %v18488_v35 }
 0x1d3   : > { %v5322_v19 = vrot.slane %v5315_v48, %v18488_v35  ;;  %v5343_v12 = vrot.slane %v1828_v8, %v18488_v35  ;;  %v5357_v30 = vrot.slane %v1811_v53, %v18488_v35  ;;  %v5371_v23 = vrot.slane %v1825_v38, %v18488_v35 }
 0x1d4   : > { %v5336_v61 = vrot.slane %v5329_v34, %v18488_v35  ;;  %v5385_v21 = vrot.slane %v1827_v3, %v18488_v35  ;;  %v19967_v16 = vrot.slane %v1829_v15, %v18488_v35  ;;  %v5493_v40 = vunpack.c.l.b16 %v5308_v50 }
 0x1d5   : > { %v5350_v2 = vrot.slane %v5343_v12, %v18488_v35  ;;  %v5364_v36 = vrot.slane %v5357_v30, %v18488_v35  ;;  %v5378_v25 = vrot.slane %v5371_v23, %v18488_v35  ;;  %v5494_v37 = vunpack.c.l.b16 %v5322_v19 }
 0x1d6   : > { %v19972_v29 = vrot.slane %v5474_v31, 4  ;;  %v5392_v57 = vrot.slane %v5385_v21, %v18488_v35  ;;  %v5495_v51 = vunpack.c.l.b16 %v5336_v61  ;;  %v5287_v8 = vrot.slane %v1780_v26, %v18488_v35 }
 0x1d7   : > { %v19977_v39 = vunpack.c.l.b16 %v5350_v2  ;;  %v5497_v53 = vunpack.c.l.b16 %v5364_v36  ;;  %v5498_v0 = vunpack.c.l.b16 %v5378_v25  ;;  %v5628_v49 = vrot.slane %v5494_v37, 7 }
 0x1d8   : > { %v19979_v22 = vunpack.c.l.b16 %v5392_v57  ;;  %v5630_v38 = vrot.slane %v5495_v51, 6  ;;  %v6112_v3 = vrot.slane %v5495_v51, 7  ;;  %v19986_v15 = vrot.slane %v5493_v40, 1 }
 0x1d9   : > { %v5629_v31 = vsel %vm4023_vm12, %v5628_v49, %v5493_v40  ;;  %v19984_v48 = vrot.slane %v5497_v53, 4  ;;  %v19991_v19 = vrot.slane %v5498_v0, 3  ;;  %v6114_v30 = vrot.slane %v19977_v39, 6 }
 0x1da   : > { %v19989_v34 = vsel %vm4026_vm13, %v5630_v38, %v5629_v31  ;;  %v6113_v12 = vsel %vm4023_vm12, %v6112_v3, %v5494_v37  ;;  %v19995_v23 = vrot.slane %v5497_v53, 5  ;;  %v19997_v26 = vrot.slane %v5498_v0, 4 }
 0x1db   : > { %v5294_v61 = vrot.slane %v5287_v8, %v18488_v35  ;;  %v5816_v21 = vrot.slane %v5802_v52, %v18488_v35  ;;  %v5817_v2 = vcombine.high %v5809_v9, %v5809_v9  ;;  %v5825_v36 = vrot.slane %v5809_v9, %v18488_v35 }
 0x1dc   : > { %v5567_v25 = vsel %vm4035_vm15, %v19557_v60, %v5565_v46  ;;  %v20006_v37 = vsel %vm4026_vm13, %v6114_v30, %v6113_v12  ;;  %v23664_v38 = vrot.slane %v19551_v5, 2  ;;  %v5570_v8 = vrot.slane %v19553_v11, 1 }
 0x1dd   : > { %v5492_v57 = vunpack.c.l.b16 %v5294_v61  ;;  %v5818_v51 = vcombine.high %v5816_v21, %v5816_v21  ;;  %v5832_v53 = vrot.slane %v5816_v21, %v18488_v35  ;;  %v5839_v0 = vrot.slane %v5817_v2, %v18488_v35 }
 0x1de   : > { %v5847_v49 = vcombine.high %v5825_v36, %v5825_v36  ;;  %v5871_v52 = vrot.slane %v5825_v36, %v18488_v35  ;;  %v5569_v3 = vsel %vm4038_vm0, %v23664_v38, %v5567_v25 }
 0x1df   : > { %v20014_v9 = vrot.slane %v5492_v57, 1  ;;  %v5846_v60 = vrot.slane %v5818_v51, %v18488_v35  ;;  %v5848_v46 = vcombine.high %v5832_v53, %v5832_v53  ;;  %v5849_v31 = vcombine.high %v5839_v0, %v5839_v0 }
 0x1e0   : > { %v5878_v12 = vrot.slane %v5871_v52, %v18488_v35  ;;  %v5885_v30 = vrot.slane %v5839_v0, %v18488_v35  ;;  %v5899_v61 = vrot.slane %v5847_v49, %v18488_v35  ;;  %v5927_v2 = vrot.slane %v5832_v53, %v18488_v35 }
 0x1e1   : > { %v5850_v21 = vcombine.high %v5846_v60, %v5846_v60  ;;  %v5941_v5 = vrot.slane %v5846_v60, %v18488_v35  ;;  %v5955_v36 = vrot.slane %v5848_v46, %v18488_v35  ;;  %v20024_v25 = vrot.slane %v5492_v57, 2 }
 0x1e2   : > { %v5892_v51 = vrot.slane %v5885_v30, %v18488_v35  ;;  %v5906_v11 = vrot.slane %v5899_v61, %v18488_v35  ;;  %v5913_v38 = vrot.slane %v5849_v31, %v18488_v35  ;;  %v5934_v52 = vrot.slane %v5927_v2, %v18488_v35 }
 0x1e3   : > { %v5948_v0 = vrot.slane %v5941_v5, %v18488_v35  ;;  %v5962_v49 = vrot.slane %v5955_v36, %v18488_v35  ;;  %v5991_v40 = vunpack.c.l.b16 %v5878_v12  ;;  %v20034_v60 = vrot.slane %v5850_v21, %v18488_v35  ;;  %v1120_v21 = vpop.permute.xlu0 %1119 }
 0x1e4   : > { %v5920_v53 = vrot.slane %v5913_v38, %v18488_v35  ;;  %v5992_v57 = vunpack.c.l.b16 %v5892_v51  ;;  %v5993_v46 = vunpack.c.l.b16 %v5906_v11  ;;  %v5995_v50 = vunpack.c.l.b16 %v5934_v52 }
 0x1e5   : > { %v5996_v30 = vunpack.c.l.b16 %v5948_v0  ;;  %v5571_v61 = vsel %vm4041_vm1, %v5570_v8, %v5569_v3  ;;  %v23665_v31 = vrot.slane %v19559_v7, 5  ;;  %v20045_v42 = vunpack.c.l.b16 %v5962_v49  ;;  %v1184_v8 = vpop.permute.xlu1 %1183 }
 0x1e6   : > { %v20041_v5 = vunpack.c.l.b16 %v5920_v53  ;;  %v6126_v36 = vrot.slane %v5992_v57, 7  ;;  %v6128_v12 = vrot.slane %v5993_v46, 6  ;;  %v20047_v51 = vrot.slane %v5995_v50, 4  ;;  %v17783_v50 = vld [vmem:[#allocation2 + $0xc8] ss:$0 sps:$4 sm:$0x33]  }
 0x1e7   : > { %v5577_v2 = vsel %vm4029_vm14, %v23665_v31, %v19581_v10  ;;  %v20049_v11 = vrot.slane %v5996_v30, 3  ;;  %v1221_v53 = vsel %vm1185_vm10, %v17783_v50, %v1120_v21  ;;  %v23666_v57 = vunpack.c.l.b16 %v19657_v33 }
 0x1e8   : > { %v5579_v38 = vsel %vm630_vm3, %v19886_v32, %v5577_v2  ;;  %v6127_v10 = vsel %vm4023_vm12, %v6126_v36, %v5991_v40  ;;  %v6130_v52 = vrot.slane %v20041_v5, 5  ;;  %v5584_v32 = vrot.slane %v19804_v55, 1 }
 0x1e9   : > { %v5581_v3 = vsel %vm4035_vm15, %v19810_v4, %v5579_v38  ;;  %v20059_v49 = vsel %vm4026_vm13, %v6128_v12, %v6127_v10  ;;  %v5589_v4 = vsel %vm4026_vm13, %v19822_v56, %v19828_v44  ;;  %v5598_v40 = vrot.slane %v23666_v57, 1  ;;  %v23674_v57 = vld [vmem:[#allocation24_spill] sm:$0xff] }
 0x1ea   : > { %v5583_v0 = vsel %vm4038_vm0, %v19816_v27, %v5581_v3  ;;  %v1258_v30 = vsel %vm1222_vm11, %v1221_v53, %v1184_v8  ;;  %v23667_v27 = vrot.slane %v19814_v1, 5  ;;  %v5605_v2 = vsel %vm4029_vm14, %v19681_v20, %v19718_v18 }
 0x1eb   : > { %v5585_v46 = vsel %vm4041_vm1, %v5584_v32, %v5583_v0  ;;  %v1836_v12 = vrot.slane %v1258_v30, %v18488_v35  ;;  %v23668_v56 = vrot.slane %v19820_v59, 4  ;;  %v23669_v44 = vrot.slane %v19675_v63, 4 }
 0x1ec   : > { %v5591_v31 = vsel %vm4029_vm14, %v23667_v27, %v5589_v4  ;;  %v5644_v36 = vpack.c.b16 %v5585_v46, %v5571_v61  ;;  %v23670_v21 = vrot.slane %v19679_v13, 3  ;;  %v23671_v20 = vrot.slane %v19559_v7, 6 }
 0x1ed   : > { %v5593_v33 = vsel %vm630_vm3, %v23668_v56, %v5591_v31  ;;  %v5607_v38 = vsel %vm630_vm3, %v23669_v44, %v5605_v2  ;;  %v6068_v61 = vrot.slane %v19808_v6, 1  ;;  %v1843_v8 = vrot.slane %v1836_v12, %v18488_v35  ;;  %v23680_v56 = vld [vmem:[#allocation9_spill] sm:$0xff] }
 0x1ee   : > { %v5595_v1 = vsel %vm4035_vm15, %v19957_v43, %v5593_v33  ;;  %v5609_v3 = vsel %vm4035_vm15, %v23670_v21, %v5607_v38  ;;  %v6059_v18 = vsel %vm4026_vm13, %v23671_v20, %v19584_v41  ;;  %17418 = vmatprep.mubr.msk.bf16.mxu1 %vm4184_vm2, %v5644_v36  ;;  %v23672_v6 = vrot.slane %v19820_v59, 5  ;;  %v23682_v38 = vld [vmem:[#allocation16_spill] sm:$0xff] }
 0x1ef   : > { %v5597_v10 = vsel %vm4038_vm0, %v19673_v14, %v5595_v1  ;;  %v5611_v43 = vsel %vm4038_vm0, %v19949_v17, %v5609_v3  ;;  %v6061_v0 = vsel %vm4029_vm14, %v19925_v45, %v6059_v18  ;;  %v5413_v14 = vrot.slane %v1843_v8, %v18488_v35  ;;  %v23683_v1 = vld [vmem:[#allocation18_spill] sm:$0xff]  ;;  %v5791_v3 = vpop.permute.xlu1 %5790 }
 0x1f0   : > { %v5599_v32 = vsel %vm4041_vm1, %v5598_v40, %v5597_v10  ;;  %v5613_v7 = vsel %vm4041_vm1, %v19726_v28, %v5611_v43  ;;  %v6063_v41 = vsel %vm630_vm3, %v19818_v62, %v6061_v0  ;;  %v6075_v50 = vsel %vm4029_vm14, %v23672_v6, %v19844_v54  ;;  %v23675_v40 = vld [vmem:[#allocation12_spill] sm:$0xff]  ;;  %v23676_v54 = vld [vmem:[#allocation10_spill] sm:$0xff]  ;;  %v23687_v0 = vld [vmem:[#allocation11_spill] sm:$0xff] }
 0x1f1   : > { %v5645_v53 = vpack.c.b16 %v5613_v7, %v5599_v32  ;;  %v6065_v17 = vsel %vm4035_vm15, %v19824_v47, %v6063_v41  ;;  %v6077_v45 = vsel %vm630_vm3, %v19972_v29, %v6075_v50  ;;  %v23673_v4 = vrot.slane %v19804_v55, 2  ;;  %v23677_v29 = vld [vmem:[#allocation5_spill] sm:$0xff]  ;;  %v17784_v41 = vld [vmem:[#allocation2 + $0xe0] ss:$0 sps:$4 sm:$0x33]  }
 0x1f2   : > { %v6079_v62 = vsel %vm4035_vm15, %v19677_v24, %v6077_v45  ;;  %v6082_v59 = vrot.slane %v23674_v57, 1  ;;  %v6087_v46 = vsel %vm4026_vm13, %v23676_v54, %v23675_v40  ;;  %v5420_v30 = vrot.slane %v5413_v14, %v18488_v35  ;;  %v5784_v24 = vpop.permute.xlu0 %5783  ;;  %v23691_v57 = vld [vmem:[#allocation6_spill] sm:$0xff]  ;;  %v23692_v54 = vld [vmem:[#allocation7_spill] sm:$0xff] }
 0x1f3   : > { %v6067_v28 = vsel %vm4038_vm0, %v23673_v4, %v6065_v17  ;;  %17419 = vmatmul.mubr.msk.bf16.gmra.mxu1 %vm4184_vm2, %v5645_v53  ;;  %v6081_v55 = vsel %vm4038_vm0, %v23677_v29, %v6079_v62  ;;  %v23678_v27 = vrot.slane %v19675_v63, 5  ;;  %v23679_v36 = vrot.slane %v19679_v13, 4  ;;  %v23686_v13 = vld [vmem:[#allocation13_spill] sm:$0xff] }
 0x1f4   : > { %v6069_v47 = vsel %vm4041_vm1, %v6068_v61, %v6067_v28  ;;  %v6083_v2 = vsel %vm4041_vm1, %v6082_v59, %v6081_v55  ;;  %v23681_v33 = vunpack.c.l.b16 %v23680_v56  ;;  %v6103_v21 = vsel %vm4029_vm14, %v23683_v1, %v23682_v38  ;;  %v23684_v61 = vld [vmem:[#allocation8_spill] sm:$0xff]  ;;  %v23690_v62 = vld [vmem:[#allocation17_spill] sm:$0xff] }
 0x1f5   : > { %v6089_v31 = vsel %vm4029_vm14, %v23678_v27, %v6087_v46  ;;  %v5501_v20 = vunpack.c.l.b16 %v5420_v30  ;;  %v6142_v18 = vpack.c.b16 %v6083_v2, %v6069_v47  ;;  %v23685_v8 = vrot.slane %v23684_v61, 4 }
 0x1f6   : > { %v6091_v12 = vsel %vm630_vm3, %v23679_v36, %v6089_v31  ;;  %v6096_v44 = vrot.slane %v23681_v33, 1  ;;  %v23688_v32 = vrot.slane %v23687_v0, 3  ;;  %v5795_v6 = vsel %vm1185_vm10, %v17784_v41, %v5784_v24 }
 0x1f7   : > { %v6093_v63 = vsel %vm4035_vm15, %v19955_v58, %v6091_v12  ;;  %v6105_v10 = vsel %vm630_vm3, %v23685_v8, %v6103_v21  ;;  %v23689_v50 = vrot.slane %v19967_v16, %v18488_v35  ;;  %v6124_v53 = vrot.slane %v5501_v20, 1  ;;  %17434 = vmatprep.mubr.msk.bf16.mxu0 %vm4184_vm2, %v6142_v18 }
 0x1f8   : > { %v6095_v43 = vsel %vm4038_vm0, %v23686_v13, %v6093_v63  ;;  %v6107_v7 = vsel %vm4035_vm15, %v23688_v32, %v6105_v10  ;;  %v5799_v45 = vsel %vm1222_vm11, %v5795_v6, %v5791_v3  ;;  %v5619_v16 = vsel %vm4029_vm14, %v23691_v57, %v23690_v62  ;;  %v526_v13 = vld [vmem:[#allocation3 + $0xc] sm:$0x3]  ;;  %v550_v32 = vld [vmem:[#allocation3 + $0x3c] sm:$0x3]  ;;  %v538_v6 = vld [vmem:[#allocation3 + $0x24] sm:$0x3] }
 0x1f9   : > { %v5500_v14 = vunpack.c.l.b16 %v23689_v50  ;;  %v6097_v58 = vsel %vm4041_vm1, %v6096_v44, %v6095_v43  ;;  %v6109_v17 = vsel %vm4038_vm0, %v20024_v25, %v6107_v7  ;;  %v5857_v28 = vrot.slane %v5799_v45, %v18488_v35  ;;  %v542_v50 = vld [vmem:[#allocation3 + $0x2c] sm:$0x3] }
 0x1fa   : > { %v6111_v4 = vsel %vm4041_vm1, %v19986_v15, %v6109_v17  ;;  %v5624_v59 = vrot.slane %v23687_v0, 2  ;;  %v5621_v46 = vsel %vm630_vm3, %v23692_v54, %v5619_v16  ;;  %v23693_v25 = vrot.slane %v19977_v39, 5  ;;  %v546_v0 = vld [vmem:[#allocation3 + $0x34] sm:$0x3]  ;;  %v558_v17 = vld [vmem:[#allocation3 + $0x4c] sm:$0x3] }
 0x1fb   : > { %v6143_v40 = vpack.c.b16 %v6111_v4, %v6097_v58  ;;  %v5638_v29 = vrot.slane %v19979_v22, 2  ;;  %v5864_v15 = vrot.slane %v5857_v28, %v18488_v35  ;;  %v23694_v55 = vrot.slane %v23684_v61, 3  ;;  %v534_v61 = vld [vmem:[#allocation3 + $0x1c] sm:$0x3]  ;;  %v554_v58 = vld [vmem:[#allocation3 + $0x44] sm:$0x3]  ;;  %v20260_v28 = vpop.f32.mrf.mxu1 }
 0x1fc   : > { %v5633_v47 = vsel %vm4029_vm14, %v23693_v25, %v19989_v34  ;;  %v5640_v24 = vrot.slane %v5500_v14, 1  ;;  %v16838_v34 = vcombine.low %v5420_v30, %v5420_v30  ;;  %v5976_v36 = vrot.slane %v20034_v60, %v18488_v35  ;;  %v522_v25 = vld [vmem:[#allocation3 + $0x4] sm:$0x3] }
 0x1fd   : > { %v5623_v27 = vsel %vm4035_vm15, %v23694_v55, %v5621_v46  ;;  %v5635_v31 = vsel %vm630_vm3, %v19984_v48, %v5633_v47  ;;  %17435 = vmatmul.mubr.msk.bf16.gmra.mxu0 %vm4184_vm2, %v6143_v40  ;;  %v5983_v12 = vrot.slane %v5864_v15, %v18488_v35  ;;  %v6117_v48 = vsel %vm4029_vm14, %v19995_v23, %v20006_v37  ;;  %v20262_v62 = vpop.f32.mrf.mxu1  ;;  %v562_v15 = vld [vmem:[#allocation3 + $0x54] sm:$0x3] }
 0x1fe   : > { %v5625_v2 = vsel %vm4038_vm0, %v5624_v59, %v5623_v27  ;;  %v5637_v39 = vsel %vm4035_vm15, %v19991_v19, %v5635_v31  ;;  %v5998_v38 = vunpack.c.l.b16 %v5976_v36  ;;  %v6119_v19 = vsel %vm630_vm3, %v19997_v26, %v6117_v48  ;;  %v20283_v48 = vld [vmem:[%s23426_s2] ss:$0 sm:$0xff] }
 0x1ff   : > { %v5627_v56 = vsel %vm4041_vm1, %v20014_v9, %v5625_v2  ;;  %v5639_v33 = vsel %vm4038_vm0, %v5638_v29, %v5637_v39  ;;  %v6122_v30 = vrot.slane %v5500_v14, 2  ;;  %v23695_v60 = vrot.slane %v19979_v22, 3  ;;  %v20264_v57 = vpop.f32.mrf.mxu1 }
 0x200   : > { %v5641_v44 = vsel %vm4041_vm1, %v5640_v24, %v5639_v33  ;;  %v6131_v9 = vsel %vm4029_vm14, %v6130_v52, %v20059_v49  ;;  %v5990_v3 = vrot.slane %v5983_v12, %v18488_v35  ;;  %v6136_v23 = vrot.slane %v20045_v42, 2 }
 0x201   : > { %v5646_v1 = vpack.c.b16 %v5641_v44, %v5627_v56  ;;  %v6121_v21 = vsel %vm4035_vm15, %v23695_v60, %v6119_v19  ;;  %v6133_v26 = vsel %vm630_vm3, %v20047_v51, %v6131_v9  ;;  %v6138_v20 = vrot.slane %v5998_v38, 1  ;;  %v530_v51 = vld [vmem:[#allocation3 + $0x14] sm:$0x3]  ;;  %v20266_v16 = vpop.f32.mrf.mxu1 }
 0x202   : > { %v6123_v37 = vsel %vm4038_vm0, %v6122_v30, %v6121_v21  ;;  %v6135_v22 = vsel %vm4035_vm15, %v20049_v11, %v6133_v26  ;;  %v16849_v42 = vcombine.low %v5990_v3, %v5990_v3  ;;  %vm517_vm3 = vcmask 125952  }
 0x203   : > { %17422 = vmatprep.mubr.msk.bf16.mxu1 %vm4184_vm2, %v5646_v1  ;;  %v6137_v5 = vsel %vm4038_vm0, %v6136_v23, %v6135_v22  ;;  %v6125_v52 = vsel %vm4041_vm1, %v6124_v53, %v6123_v37  ;;  %v23698_v63 = vmov 0   ;;  %v531_v8 = vsel %vm20216_vm6, 0, %v530_v51  ;;  %vm20335_vm9 = vmand %vm517_vm3, %vm7093_vm8 }
 0x204   : > { %17423 = vmatmul.mubr.msk.bf16.gmra.mxu1 %vm4184_vm2, %v16838_v34  ;;  %v6139_v49 = vsel %vm4041_vm1, %v6138_v20, %v6137_v5  ;;  %533 = vst.msk [vmem:[#allocation3 + $0x18] sm:$0xf] %vm517_vm3, %v23698_v63  ;;  %518 = vst.msk [vmem:[#allocation3] sm:$0xf] %vm517_vm3, %v23698_v63  ;;  %v535_v10 = vsel %vm20216_vm6, 0, %v534_v61  ;;  %v527_v43 = vsel %vm20216_vm6, 0, %v526_v13 }
 0x205   : > { %v6144_v18 = vpack.c.b16 %v6139_v49, %v6125_v52  ;;  %525 = vst.msk [vmem:[#allocation3 + $0x8] sm:$0xf] %vm517_vm3, %v23698_v63  ;;  %529 = vst.msk [vmem:[#allocation3 + $0x10] sm:$0xf] %vm517_vm3, %v23698_v63  ;;  %v547_v7 = vsel %vm20216_vm6, 0, %v546_v0  ;;  %v551_v41 = vsel %vm20216_vm6, 0, %v550_v32 }
 0x206   : > { %537 = vst.msk [vmem:[#allocation3 + $0x20] sm:$0xf] %vm517_vm3, %v23698_v63  ;;  %541 = vst.msk [vmem:[#allocation3 + $0x28] sm:$0xf] %vm517_vm3, %v23698_v63  ;;  %v539_v14 = vsel %vm20216_vm6, 0, %v538_v6  ;;  %v543_v53 = vsel %vm20216_vm6, 0, %v542_v50 }
 0x207   : > { %17438 = vmatprep.mubr.msk.bf16.mxu0 %vm4184_vm2, %v6144_v18  ;;  %545 = vst.msk [vmem:[#allocation3 + $0x30] sm:$0xf] %vm517_vm3, %v23698_v63  ;;  %549 = vst.msk [vmem:[#allocation3 + $0x38] sm:$0xf] %vm517_vm3, %v23698_v63  ;;  %v555_v45 = vsel %vm20216_vm6, 0, %v554_v58  ;;  %v559_v4 = vsel %vm20216_vm6, 0, %v558_v17 }
 0x208   : > { %17439 = vmatmul.mubr.msk.bf16.gmra.mxu0 %vm4184_vm2, %v16849_v42  ;;  %553 = vst.msk [vmem:[#allocation3 + $0x40] sm:$0xf] %vm517_vm3, %v23698_v63  ;;  %557 = vst.msk [vmem:[#allocation3 + $0x48] sm:$0xf] %vm517_vm3, %v23698_v63  ;;  %v523_v29 = vsel %vm20216_vm6, 0, %v522_v25  ;;  %v563_v27 = vsel %vm20216_vm6, 0, %v562_v15 }
 0x209   : > { %561 = vst.msk [vmem:[#allocation3 + $0x50] sm:$0xf] %vm517_vm3, %v23698_v63  ;;  %532 = vst [vmem:[#allocation3 + $0x14] sm:$0x3] %v531_v8  ;;  %v17797_v3 = vmov 1935823168  }
 0x20a   : > { %536 = vst [vmem:[#allocation3 + $0x1c] sm:$0x3] %v535_v10  ;;  %528 = vst [vmem:[#allocation3 + $0xc] sm:$0x3] %v527_v43  ;;  %v6734_v23 = vunpack.c.l.s4 %v17797_v3  ;;  %v23699_v43 = vld [vmem:[#allocation4_spill] sm:$0xff]  ;;  %vm7325_vm10 = vcmask 261120  }
 0x20b   : > { %548 = vst [vmem:[#allocation3 + $0x34] sm:$0x3] %v547_v7  ;;  %552 = vst [vmem:[#allocation3 + $0x3c] sm:$0x3] %v551_v41  ;;  %vm8173_vm12 = vcmask 392192   ;;  %vm16657_vm0 = vcmask 519168  }
 0x20c   : > { %540 = vst [vmem:[#allocation3 + $0x24] sm:$0x3] %v539_v14  ;;  %544 = vst [vmem:[#allocation3 + $0x2c] sm:$0x3] %v543_v53  ;;  %v6735_v42 = vunpack.c.0.s8 %v6734_v23  ;;  %vm15739_vm13 = vsmask.f32 256 }
 0x20d   : > { %556 = vst [vmem:[#allocation3 + $0x44] sm:$0x3] %v555_v45  ;;  %560 = vst [vmem:[#allocation3 + $0x4c] sm:$0x3] %v559_v4 }
 0x20e   : > { %524 = vst [vmem:[#allocation3 + $0x4] sm:$0x3] %v523_v29  ;;  %564 = vst [vmem:[#allocation3 + $0x54] sm:$0x3] %v563_v27  ;;  %v20302_v0 = vsub.s32 %v6735_v42, %v23699_v43 }
 0x20f   : > { %vm23055_vm14 = vmand %vm7098_vm7, %vm15739_vm13 }
 0x210   : > { %23700 = vst [vmem:[#allocation15_spill] sm:$0xff] %v20302_v0 }
 0x234   : > { %v17400_v46 = vpop.f32.mrf.mxu0 }
 0x236   : > { %v4241_v47 = vpop.f32.mrf.mxu0 }
 0x238   : > { %v17401_v55 = vpop.f32.mrf.mxu0 }
 0x23a   : > { %v4244_v31 = vpop.f32.mrf.mxu0 }
 0x273   : > { %v20268_v59 = vpop.f32.mrf.mxu1 }
 0x275   : > { %v20270_v40 = vpop.f32.mrf.mxu1 }
 0x277   : > { %v17409_v54 = vpop.f32.mrf.mxu1 }
 0x279   : > { %v20276_v24 = vpop.f32.mrf.mxu1 }
 0x288   : > { %v17432_v2 = vpop.f32.mrf.mxu0 }
 0x28a   : > { %v6210_v34 = vpop.f32.mrf.mxu0 }
 0x28c   : > { %v17433_v44 = vpop.f32.mrf.mxu0 }
 0x28d   : > { %v17416_v39 = vpop.f32.mrf.mxu1 }
 0x28e   : > { %v5721_v36 = vadd.f32 %v17416_v39, %v17400_v46  ;;  %v6213_v37 = vpop.f32.mrf.mxu0 }
 0x28f   : > { %v5712_v12 = vpop.f32.mrf.mxu1 }
 0x290   : > { %v20278_v56 = vadd.f32 %v17432_v2, %v5721_v36  ;;  %v5713_v33 = vadd.f32 %v5712_v12, %v4241_v47 }
 0x291   : > { %v17417_v38 = vpop.f32.mrf.mxu1 }
 0x292   : > { %v20285_v19 = vadd.f32 %v6210_v34, %v5713_v33  ;;  %v5724_v30 = vadd.f32 %v17417_v38, %v17401_v55  ;;  %v6276_v60 = vadd.f32 %v20283_v48, %v20278_v56 }
 0x293   : > { %v5715_v1 = vpop.f32.mrf.mxu1 }
 0x294   : > { %v20289_v21 = vadd.f32 %v17433_v44, %v5724_v30  ;;  %v5716_v9 = vadd.f32 %v5715_v1, %v4244_v31  ;;  %v6274_v26 = vadd.f32 %v20283_v48, %v20285_v19  ;;  %v6287_v5 = vmax.f32 %v6276_v60, 0.0 }
 0x296   : > { %v6277_v20 = vadd.f32 %v20283_v48, %v20289_v21  ;;  %v20295_v22 = vadd.f32 %v6213_v37, %v5716_v9  ;;  %v6285_v18 = vmax.f32 %v6274_v26, 0.0 }
 0x298   : > { %v6288_v52 = vmax.f32 %v6277_v20, 0.0  ;;  %v6275_v49 = vadd.f32 %v20283_v48, %v20295_v22 }
 0x29a   : > { %v6335_v51 = vpack.c.bf16 %v6288_v52, %v6287_v5  ;;  %v16861_v11 = vpack.c.bf16 %v6288_v52, %v6288_v52  ;;  %v6286_v63 = vmax.f32 %v6275_v49, 0.0 }
 0x29c   : > { %v6402_v61 = vrot.slane %v6335_v51, %v18488_v35  ;;  %v6409_v8 = vrot.slane %v16861_v11, %v18488_v35  ;;  %v6334_v10 = vpack.c.bf16 %v6286_v63, %v6285_v18  ;;  %v16860_v13 = vpack.c.bf16 %v6286_v63, %v6286_v63 }
 0x29e   : > { %v6410_v32 = vcombine.high %v6402_v61, %v6402_v61  ;;  %v6411_v7 = vcombine.high %v6409_v8, %v6409_v8  ;;  %v6418_v41 = vrot.slane %v6402_v61, %v18488_v35  ;;  %v20306_v6 = vrot.slane %v6409_v8, %v18488_v35 }
 0x29f   : > { %v6353_v50 = vrot.slane %v6334_v10, %v18488_v35  ;;  %v6360_v14 = vrot.slane %v16860_v13, %v18488_v35 }
 0x2a0   : > { %v6432_v53 = vrot.slane %v6410_v32, %v18488_v35  ;;  %v20312_v58 = vrot.slane %v6411_v7, %v18488_v35  ;;  %v6440_v17 = vcombine.high %v6418_v41, %v6418_v41  ;;  %v6630_v45 = vunpack.i.h.s16 %v20306_v6 }
 0x2a1   : > { %v6799_v4 = vrot.slane %v6418_v41, %v20302_v0  ;;  %v6361_v54 = vcombine.high %v6353_v50, %v6353_v50  ;;  %v6362_v46 = vcombine.high %v6360_v14, %v6360_v14  ;;  %v6369_v15 = vrot.slane %v6353_v50, %v18488_v35  ;;  %v7104_v41 = vld [vmem:[#allocation3 + $0x18] sm:$0xf] }
 0x2a2   : > { %v6442_v25 = vcombine.high %v6432_v53, %v6432_v53  ;;  %v6624_v47 = vunpack.i.h.s16 %v6432_v53  ;;  %v6626_v29 = vunpack.i.h.s16 %v6440_v17  ;;  %v16874_v55 = vpack.i.b16 %v20312_v58, %v6630_v45 }
 0x2a3   : > { %v6806_v27 = vrot.slane %v6799_v4, %v20302_v0  ;;  %v16870_v2 = vpack.i.b16 %v6432_v53, %v6432_v53  ;;  %v6376_v36 = vrot.slane %v6360_v14, %v18488_v35  ;;  %v6383_v12 = vrot.slane %v6361_v54, %v18488_v35 }
 0x2a4   : > { %v6628_v31 = vunpack.i.h.s16 %v6442_v25  ;;  %v16872_v39 = vpack.i.b16 %v6442_v25, %v6626_v29  ;;  %v6837_v34 = vrot.slane %v16874_v55, %v20302_v0  ;;  %v6390_v33 = vrot.slane %v6362_v46, %v18488_v35  ;;  %v7095_v55 = vld [vmem:[#allocation3 + $0x8] sm:$0xf] }
 0x2a5   : > { %7103 = vst.msk [vmem:[#allocation3 + $0x14] sm:$0x1] %vm7098_vm7, %v6806_v27  ;;  %v16871_v44 = vpack.i.b16 %v6440_v17, %v6624_v47  ;;  %v6391_v1 = vcombine.high %v6369_v15, %v6369_v15  ;;  %v6393_v9 = vcombine.high %v6383_v12, %v6383_v12  ;;  %v6606_v23 = vunpack.i.h.s16 %v6369_v15 }
 0x2a6   : > { %v16873_v38 = vpack.i.b16 %v20306_v6, %v6628_v31  ;;  %v6807_v30 = vcombine.low %v16870_v2, %v16872_v39  ;;  %v6844_v60 = vrot.slane %v6837_v34, %v20302_v0  ;;  %v6394_v3 = vcombine.high %v6390_v33, %v6390_v33  ;;  %v7100_v31 = vld [vmem:[#allocation3 + $0x10] sm:$0xf] }
 0x2a7   : > { %v6608_v20 = vunpack.i.h.s16 %v6383_v12  ;;  %v6610_v5 = vunpack.i.h.s16 %v6391_v1  ;;  %v6612_v52 = vunpack.i.h.s16 %v6393_v9  ;;  %v6614_v49 = vunpack.i.h.s16 %v6376_v36 }
 0x2a8   : > { %v6808_v37 = vcombine.low %v16871_v44, %v16873_v38  ;;  %v6815_v26 = vrot.slane %v6807_v30, %v20302_v0  ;;  %7107 = vst.msk [vmem:[#allocation3 + $0x1c] sm:$0x1] %vm7098_vm7, %v6844_v60  ;;  %v16865_v42 = vpack.i.b16 %v6369_v15, %v6369_v15  ;;  %v16866_v18 = vpack.i.b16 %v6383_v12, %v6606_v23 }
 0x2a9   : > { %v16867_v11 = vpack.i.b16 %v6391_v1, %v6608_v20  ;;  %v16868_v63 = vpack.i.b16 %v6393_v9, %v6610_v5  ;;  %v6770_v61 = vcombine.low %v6390_v33, %v6394_v3  ;;  %v6392_v8 = vcombine.high %v6376_v36, %v6376_v36 }
 0x2aa   : > { %v6822_v51 = vrot.slane %v6808_v37, %v20302_v0  ;;  %v16869_v10 = vpack.i.b16 %v6376_v36, %v6612_v52  ;;  %v6691_v13 = vpack.i.b16 %v6614_v49, %v6614_v49  ;;  %v23701_v54 = vmov 0 }
 0x2ab   : > { %v6731_v32 = vcombine.low %v16865_v42, %v16867_v11  ;;  %v6732_v7 = vcombine.low %v16866_v18, %v16868_v63  ;;  %v6784_v53 = vrot.slane %v6770_v61, %v20302_v0  ;;  %v23702_v54 = vsel %vm20335_vm9, 4294967295, %v23701_v54 }
 0x2ac   : > { %v6823_v43 = vcombine.low %v6815_v26, %v6822_v51  ;;  %v6761_v50 = vrot.slane %v16869_v10, %v20302_v0  ;;  %v6769_v14 = vcombine.low %v6691_v13, %v6392_v8  ;;  %23703 = vst [vmem:[#allocation23_spill] sm:$0xff] %v23702_v54  ;;  %v6632_v38 = vunpack.i.h.s16 %v20312_v58 }
 0x2ad   : > { %v6739_v45 = vrot.slane %v6731_v32, %v20302_v0  ;;  %v6746_v4 = vrot.slane %v6732_v7, %v20302_v0 }
 0x2ae   : > { %v6830_v17 = vrot.slane %v6823_v43, %v20302_v0  ;;  %v6768_v46 = vrot.slane %v6761_v50, %v20302_v0  ;;  %v6777_v25 = vrot.slane %v6769_v14, %v20302_v0 }
 0x2af   : > { %v6747_v29 = vcombine.low %v6739_v45, %v6746_v4 }
 0x2b0   : > { %v7105_v47 = vsel %vm20335_vm9, %v6830_v17, %v7104_v41  ;;  %v6785_v15 = vcombine.low %v6777_v25, %v6784_v53  ;;  %7099 = vst.msk [vmem:[#allocation3 + $0xc] sm:$0x1] %vm7098_vm7, %v6768_v46 }
 0x2b1   : > { %7106 = vst [vmem:[#allocation3 + $0x18] sm:$0xf] %v7105_v47  ;;  %v6754_v27 = vrot.slane %v6747_v29, %v20302_v0 }
 0x2b2   : > { %v6792_v39 = vrot.slane %v6785_v15, %v20302_v0 }
 0x2b3   : > { %v17420_v2 = vpop.f32.mrf.mxu1  ;;  %v7096_v34 = vsel %vm20335_vm9, %v6754_v27, %v7095_v55 }
 0x2b4   : > { %7097 = vst [vmem:[#allocation3 + $0x8] sm:$0xf] %v7096_v34  ;;  %v7101_v12 = vsel %vm20335_vm9, %v6792_v39, %v7100_v31  ;;  %v5737_v44 = vadd.f32 %v17420_v2, %v20260_v28  ;;  %v6701_v28 = vpack.i.b16 %v6632_v38, %v6632_v38  ;;  %v6441_v39 = vcombine.high %v20306_v6, %v20306_v6 }
 0x2b5   : > { %v5728_v36 = vpop.f32.mrf.mxu1  ;;  %7102 = vst [vmem:[#allocation3 + $0x10] sm:$0xf] %v7101_v12 }
 0x2b6   : > { %v5729_v1 = vadd.f32 %v5728_v36, %v20262_v62 }
 0x2b7   : > { %v17421_v33 = vpop.f32.mrf.mxu1 }
 0x2b8   : > { %v20357_v37 = vld [vmem:[#allocation3 + $0x18] sm:$0x3f]   ;;  %v5740_v26 = vadd.f32 %v17421_v33, %v20264_v57  ;;  %v6443_v57 = vcombine.high %v20312_v58, %v20312_v58 }
 0x2b9   : > { %v5731_v9 = vpop.f32.mrf.mxu1  ;;  %v7223_v10 = vshll.u32 %v20357_v37, 16  ;;  %v7283_v45 = vrot.slane %v20357_v37, 1  ;;  %v7221_v36 = vshrl.u32 %v20357_v37, 16 }
 0x2ba   : > { %v5732_v42 = vadd.f32 %v5731_v9, %v20266_v16  ;;  %v20384_v58 = vcombine.low %v6701_v28, %v6443_v57 }
 0x2bb   : > { %v20355_v23 = vld [vmem:[#allocation3 + $0x8] sm:$0x3f]   ;;  %v7225_v29 = vrot.slane %v7223_v10, 1 }
 0x2bc   : > { %v20362_v5 = vld [vmem:[#allocation3 + $0x10] sm:$0x3f]   ;;  %v7281_v49 = vrot.slane %v20355_v23, 1  ;;  %v7209_v62 = vshll.u32 %v20355_v23, 16  ;;  %v7207_v47 = vshrl.u32 %v20355_v23, 16  ;;  %v6853_v9 = vrot.slane %v20384_v58, %v20302_v0 }
 0x2bd   : > { %v17436_v30 = vpop.f32.mrf.mxu0  ;;  %v7282_v11 = vrot.slane %v20362_v5, 1  ;;  %v7216_v8 = vshll.u32 %v20362_v5, 16  ;;  %v7214_v7 = vshrl.u32 %v20362_v5, 16  ;;  %v7226_v28 = vor.u32 %v7225_v29, %v7221_v36 }
 0x2be   : > { %v20353_v60 = vadd.f32 %v17436_v30, %v5737_v44  ;;  %7291 = vrot.lane.b32.xlu0 %v7281_v49, %s17798_s17  ;;  %v7211_v50 = vrot.slane %v7209_v62, 1 }
 0x2bf   : > { %v6226_v3 = vpop.f32.mrf.mxu0  ;;  %7293 = vrot.lane.b32.xlu1 %v7282_v11, %s17798_s17  ;;  %v7218_v41 = vrot.slane %v7216_v8, 1 }
 0x2c0   : > { %v20360_v20 = vadd.f32 %v6226_v3, %v5729_v1  ;;  %v6280_v18 = vadd.f32 %v20283_v48, %v20353_v60 }
 0x2c1   : > { %v17437_v52 = vpop.f32.mrf.mxu0  ;;  %v7219_v25 = vor.u32 %v7218_v41, %v7214_v7 }
 0x2c2   : > { %v20369_v51 = vadd.f32 %v17437_v52, %v5740_v26  ;;  %v6278_v16 = vadd.f32 %v20283_v48, %v20360_v20  ;;  %v6291_v14 = vmax.f32 %v6280_v18, 0.0 }
 0x2c3   : > { %v6229_v63 = vpop.f32.mrf.mxu0  ;;  %7295 = vrot.lane.b32.xlu1 %v7283_v45, %s17798_s17  ;;  %7266 = vrot.lane.b32.xlu0 %v7219_v25, %s17794_s15 }
 0x2c4   : > { %v17424_v61 = vpop.f32.mrf.mxu1  ;;  %v6281_v13 = vadd.f32 %v20283_v48, %v20369_v51  ;;  %v20381_v43 = vadd.f32 %v6229_v63, %v5732_v42  ;;  %v6289_v15 = vmax.f32 %v6278_v16, 0.0 }
 0x2c5   : > { %v5753_v4 = vadd.f32 %v17424_v61, %v20268_v59  ;;  %v7212_v59 = vor.u32 %v7211_v50, %v7207_v47 }
 0x2c6   : > { %v5744_v32 = vpop.f32.mrf.mxu1  ;;  %v6292_v53 = vmax.f32 %v6281_v13, 0.0  ;;  %v6279_v17 = vadd.f32 %v20283_v48, %v20381_v43 }
 0x2c7   : > { %v5745_v3 = vadd.f32 %v5744_v32, %v20270_v40  ;;  %7264 = vrot.lane.b32.xlu1 %v7212_v59, %s17794_s15 }
 0x2c8   : > { %v17425_v46 = vpop.f32.mrf.mxu1  ;;  %v6337_v55 = vpack.c.bf16 %v6292_v53, %v6291_v14  ;;  %v16863_v27 = vpack.c.bf16 %v6292_v53, %v6292_v53  ;;  %v6290_v31 = vmax.f32 %v6279_v17, 0.0  ;;  %v17440_v2 = vpop.f32.mrf.mxu0 }
 0x2c9   : > { %v20395_v34 = vadd.f32 %v17440_v2, %v5753_v4 }
 0x2ca   : > { %v6500_v12 = vrot.slane %v6337_v55, %v18488_v35  ;;  %v6507_v33 = vrot.slane %v16863_v27, %v18488_v35  ;;  %v6336_v44 = vpack.c.bf16 %v6290_v31, %v6289_v15  ;;  %v16862_v38 = vpack.c.bf16 %v6290_v31, %v6290_v31  ;;  %v5747_v30 = vpop.f32.mrf.mxu1  ;;  %v6242_v1 = vpop.f32.mrf.mxu0 }
 0x2cb   : > { %23704 = vst [vmem:[#allocation19_spill] sm:$0xff] %v20395_v34  ;;  %v20406_v26 = vadd.f32 %v20283_v48, %v20395_v34  ;;  %v20416_v40 = vadd.f32 %v5747_v30, %v20276_v24  ;;  %v20418_v63 = vadd.f32 %v6242_v1, %v5745_v3  ;;  %7268 = vrot.lane.b32.xlu1 %v7226_v28, %s17794_s15 }
 0x2cc   : > { %v6508_v52 = vcombine.high %v6500_v12, %v6500_v12  ;;  %v6509_v49 = vcombine.high %v6507_v33, %v6507_v33  ;;  %v20409_v62 = vrot.slane %v6500_v12, %v18488_v35  ;;  %v6523_v42 = vrot.slane %v6507_v33, %v18488_v35  ;;  %v17441_v18 = vpop.f32.mrf.mxu0 }
 0x2cd   : > { %v6451_v11 = vrot.slane %v6336_v44, %v18488_v35  ;;  %v6458_v57 = vrot.slane %v16862_v38, %v18488_v35  ;;  %23705 = vst [vmem:[#allocation14_spill] sm:$0xff] %v20418_v63 }
 0x2ce   : > { %v6530_v61 = vrot.slane %v6508_v52, %v18488_v35  ;;  %v6537_v8 = vrot.slane %v6509_v49, %v18488_v35  ;;  %v6538_v10 = vcombine.high %v20409_v62, %v20409_v62  ;;  %v6539_v16 = vcombine.high %v6523_v42, %v6523_v42 }
 0x2cf   : > { %v6662_v13 = vunpack.i.h.s16 %v6523_v42  ;;  %v6459_v32 = vcombine.high %v6451_v11, %v6451_v11  ;;  %v6460_v7 = vcombine.high %v6458_v57, %v6458_v57  ;;  %v6467_v41 = vrot.slane %v6451_v11, %v18488_v35 }
 0x2d0   : > { %v6540_v50 = vcombine.high %v6530_v61, %v6530_v61  ;;  %v20425_v14 = vcombine.high %v6537_v8, %v6537_v8  ;;  %v6664_v24 = vunpack.i.h.s16 %v6537_v8  ;;  %v6666_v53 = vunpack.i.h.s16 %v6539_v16 }
 0x2d1   : > { %v16882_v17 = vpack.i.b16 %v6537_v8, %v6662_v13  ;;  %v6951_v45 = vrot.slane %v6538_v10, %v20302_v0  ;;  %v6474_v4 = vrot.slane %v6458_v57, %v18488_v35  ;;  %v6481_v46 = vrot.slane %v6459_v32, %v18488_v35 }
 0x2d2   : > { %v6660_v25 = vunpack.i.h.s16 %v6540_v50  ;;  %v16880_v47 = vpack.i.b16 %v6540_v50, %v6540_v50  ;;  %v16883_v29 = vpack.i.b16 %v6539_v16, %v6664_v24  ;;  %v16884_v15 = vpack.i.b16 %v20425_v14, %v6666_v53 }
 0x2d3   : > { %v6958_v55 = vrot.slane %v6951_v45, %v20302_v0  ;;  %v6488_v27 = vrot.slane %v6460_v7, %v18488_v35  ;;  %v6489_v31 = vcombine.high %v6467_v41, %v6467_v41  ;;  %v6490_v2 = vcombine.high %v6474_v4, %v6474_v4 }
 0x2d4   : > { %v16881_v59 = vpack.i.b16 %v6523_v42, %v6660_v25  ;;  %v6959_v36 = vcombine.low %v16880_v47, %v16882_v17  ;;  %v6989_v12 = vrot.slane %v16884_v15, %v20302_v0  ;;  %v6491_v33 = vcombine.high %v6481_v46, %v6481_v46  ;;  %v6245_v47 = vpop.f32.mrf.mxu0 }
 0x2d5   : > { %7119 = vst.msk [vmem:[#allocation3 + $0x34] sm:$0x1] %vm7098_vm7, %v6958_v55  ;;  %v6492_v44 = vcombine.high %v6488_v27, %v6488_v27  ;;  %v6642_v38 = vunpack.i.h.s16 %v6489_v31  ;;  %v6646_v30 = vunpack.i.h.s16 %v6474_v4  ;;  %v6648_v1 = vunpack.i.h.s16 %v6488_v27 }
 0x2d6   : > { %v6960_v3 = vcombine.low %v16881_v59, %v16883_v29  ;;  %v6967_v28 = vrot.slane %v6959_v36, %v20302_v0  ;;  %v6996_v52 = vrot.slane %v6989_v12, %v20302_v0  ;;  %v6644_v49 = vunpack.i.h.s16 %v6491_v33  ;;  %v7120_v29 = vld [vmem:[#allocation3 + $0x38] sm:$0xf]  ;;  %v7112_v12 = vld [vmem:[#allocation3 + $0x28] sm:$0xf] }
 0x2d7   : > { %v6650_v18 = vunpack.i.h.s16 %v6490_v2  ;;  %v16875_v11 = vpack.i.b16 %v6489_v31, %v6489_v31  ;;  %v16876_v57 = vpack.i.b16 %v6491_v33, %v6642_v38  ;;  %v16878_v42 = vpack.i.b16 %v6488_v27, %v6646_v30  ;;  %v7116_v38 = vld [vmem:[#allocation3 + $0x30] sm:$0xf] }
 0x2d8   : > { %v6974_v8 = vrot.slane %v6960_v3, %v20302_v0  ;;  %7123 = vst.msk [vmem:[#allocation3 + $0x3c] sm:$0x1] %vm7098_vm7, %v6996_v52  ;;  %v16877_v10 = vpack.i.b16 %v6474_v4, %v6644_v49  ;;  %v16879_v16 = vpack.i.b16 %v6490_v2, %v6648_v1  ;;  %v6846_v13 = vcombine.low %v6441_v39, %v6467_v41  ;;  %v7108_v2 = vld [vmem:[#allocation3 + $0x20] sm:$0xf] }
 0x2d9   : > { %v6711_v32 = vpack.i.b16 %v6650_v18, %v6650_v18  ;;  %v6875_v7 = vrot.slane %v6481_v46, %v20302_v0  ;;  %v6884_v50 = vcombine.low %v16876_v57, %v16878_v42  ;;  %v6922_v24 = vcombine.low %v6492_v44, %v6530_v61 }
 0x2da   : > { %v6975_v53 = vcombine.low %v6967_v28, %v6974_v8  ;;  %v6860_v17 = vrot.slane %v6846_v13, %v20302_v0  ;;  %v6883_v45 = vcombine.low %v16875_v11, %v16877_v10  ;;  %v6913_v25 = vrot.slane %v16879_v16, %v20302_v0 }
 0x2db   : > { %v6882_v4 = vrot.slane %v6875_v7, %v20302_v0  ;;  %v6898_v15 = vrot.slane %v6884_v50, %v20302_v0  ;;  %v6921_v6 = vcombine.low %v6711_v32, %v20409_v62  ;;  %v6295_v39 = vmax.f32 %v20406_v26, 0.0 }
 0x2dc   : > { %v6982_v41 = vrot.slane %v6975_v53, %v20302_v0  ;;  %v6861_v61 = vcombine.low %v6853_v9, %v6860_v17  ;;  %v6891_v46 = vrot.slane %v6883_v45, %v20302_v0  ;;  %v6920_v55 = vrot.slane %v6913_v25, %v20302_v0 }
 0x2dd   : > { %v6929_v27 = vrot.slane %v6921_v6, %v20302_v0  ;;  %v6936_v31 = vrot.slane %v6922_v24, %v20302_v0  ;;  %7111 = vst.msk [vmem:[#allocation3 + $0x24] sm:$0x1] %vm7098_vm7, %v6882_v4  ;;  %v6282_v26 = vadd.f32 %v20283_v48, %v20418_v63  ;;  %v20462_v62 = vadd.f32 %v6245_v47, %v20416_v40 }
 0x2de   : > { %v7121_v58 = vsel %vm20335_vm9, %v6982_v41, %v7120_v29  ;;  %v6868_v9 = vrot.slane %v6861_v61, %v20302_v0  ;;  %v6899_v59 = vcombine.low %v6891_v46, %v6898_v15  ;;  %7115 = vst.msk [vmem:[#allocation3 + $0x2c] sm:$0x1] %vm7098_vm7, %v6920_v55  ;;  %v6339_v30 = vpack.c.bf16 %v6295_v39, %v6295_v39 }
 0x2df   : > { %23706 = vst [vmem:[#allocation21_spill] sm:$0xff] %v20462_v62  ;;  %7122 = vst [vmem:[#allocation3 + $0x38] sm:$0xf] %v7121_v58  ;;  %v6937_v36 = vcombine.low %v6929_v27, %v6936_v31  ;;  %v6283_v33 = vadd.f32 %v20283_v48, %v20462_v62  ;;  %v6293_v3 = vmax.f32 %v6282_v26, 0.0  ;;  %v6668_v57 = vunpack.i.h.s16 %v20425_v14 }
 0x2e0   : > { %v6906_v44 = vrot.slane %v6899_v59, %v20302_v0  ;;  %v7109_v40 = vsel %vm20335_vm9, %v6868_v9, %v7108_v2  ;;  %v6597_v11 = vrot.slane %v6339_v30, %v18488_v35 }
 0x2e1   : > { %v6944_v1 = vrot.slane %v6937_v36, %v20302_v0  ;;  %7110 = vst [vmem:[#allocation3 + $0x20] sm:$0xf] %v7109_v40  ;;  %v6294_v28 = vmax.f32 %v6283_v33, 0.0  ;;  %v6721_v50 = vpack.i.b16 %v6668_v57, %v6668_v57 }
 0x2e2   : > { %v7113_v52 = vsel %vm20335_vm9, %v6906_v44, %v7112_v12  ;;  %v6604_v7 = vrot.slane %v6597_v11, %v18488_v35  ;;  %v7124_v11 = vld [vmem:[#allocation3 + $0x40] sm:$0xf] }
 0x2e3   : > { %7114 = vst [vmem:[#allocation3 + $0x28] sm:$0xf] %v7113_v52  ;;  %v7117_v49 = vsel %vm20335_vm9, %v6944_v1, %v7116_v38  ;;  %v6338_v48 = vpack.c.bf16 %v6294_v28, %v6293_v3  ;;  %v16864_v18 = vpack.c.bf16 %v6294_v28, %v6294_v28 }
 0x2e4   : > { %7118 = vst [vmem:[#allocation3 + $0x30] sm:$0xf] %v7117_v49 }
 0x2e5   : > { %v6549_v42 = vrot.slane %v6338_v48, %v18488_v35  ;;  %v6556_v8 = vrot.slane %v16864_v18, %v18488_v35 }
 0x2e6   : > { %v20501_v40 = vld [vmem:[#allocation3 + $0x38] sm:$0x3f]  }
 0x2e7   : > { %v6557_v10 = vcombine.high %v6549_v42, %v6549_v42  ;;  %v6558_v16 = vcombine.high %v6556_v8, %v6556_v8  ;;  %v6565_v13 = vrot.slane %v6549_v42, %v18488_v35  ;;  %v6572_v32 = vrot.slane %v6556_v8, %v18488_v35 }
 0x2e8   : > { %v20485_v24 = vld [vmem:[#allocation3 + $0x20] sm:$0x3f]  }
 0x2e9   : > { %v6579_v53 = vrot.slane %v6557_v10, %v18488_v35  ;;  %v6586_v17 = vrot.slane %v6558_v16, %v18488_v35  ;;  %v6587_v14 = vcombine.high %v6565_v13, %v6565_v13  ;;  %v6588_v45 = vcombine.high %v6572_v32, %v6572_v32 }
 0x2ea   : > { %v6678_v25 = vunpack.i.h.s16 %v6572_v32  ;;  %v16885_v47 = vpack.i.b16 %v6572_v32, %v6572_v32  ;;  %v7284_v29 = vrot.slane %v20485_v24, 1  ;;  %v7228_v4 = vshrl.u32 %v20485_v24, 16  ;;  %v20499_v44 = vld [vmem:[#allocation3 + $0x28] sm:$0x3f]  }
 0x2eb   : > { %v6589_v15 = vcombine.high %v6579_v53, %v6579_v53  ;;  %v6590_v6 = vcombine.high %v6586_v17, %v6586_v17  ;;  %v6680_v39 = vunpack.i.h.s16 %v6586_v17  ;;  %v6682_v41 = vunpack.i.h.s16 %v6588_v45  ;;  %v20491_v61 = vld [vmem:[#allocation3 + $0x30] sm:$0x3f]  }
 0x2ec   : > { %v16886_v46 = vpack.i.b16 %v6586_v17, %v6678_v25  ;;  %v6997_v55 = vcombine.low %v6721_v50, %v6579_v53  ;;  %v6998_v27 = vcombine.low %v6565_v13, %v6587_v14  ;;  %7297 = vrot.lane.b32.xlu0 %v7284_v29, %s17798_s17  ;;  %v7230_v31 = vshll.u32 %v20485_v24, 16  ;;  %v17697_v50 = vld [vmem:[%s23428_s4 + $0x28] sm:$0xff]   ;;  %v7128_v17 = vld [vmem:[#allocation3 + $0x48] sm:$0xf] }
 0x2ed   : > { %v6684_v2 = vunpack.i.h.s16 %v6590_v6  ;;  %v16887_v26 = vpack.i.b16 %v6588_v45, %v6680_v39  ;;  %v16888_v58 = vpack.i.b16 %v6590_v6, %v6682_v41  ;;  %v7027_v9 = vrot.slane %v6589_v15, %v20302_v0  ;;  %17442 = vmatprep.subr.bf16.mxu1 %v17697_v50 }
 0x2ee   : > { %v7005_v59 = vrot.slane %v6997_v55, %v20302_v0  ;;  %v7012_v36 = vrot.slane %v6998_v27, %v20302_v0  ;;  %v7232_v12 = vrot.slane %v7230_v31, 1  ;;  %v7286_v33 = vrot.slane %v20491_v61, 1  ;;  %17443 = vmatpush3.bf16.msra.mxu1 %v17697_v50  ;;  %v20536_v55 = vld [vmem:[#allocation3] sm:$0x3f]   ;;  %v17702_v50 = vld [vmem:[%s23428_s4 + $0x8] sm:$0xff]  }
 0x2ef   : > { %v16889_v38 = vpack.i.b16 %v6604_v7, %v6684_v2  ;;  %v7034_v30 = vrot.slane %v7027_v9, %v20302_v0  ;;  %v7035_v1 = vcombine.low %v16885_v47, %v16887_v26  ;;  %v7036_v3 = vcombine.low %v16886_v46, %v16888_v58  ;;  %v17698_v46 = vld [vmem:[%s23428_s4 + $0x20] sm:$0xff]   ;;  %v17699_v58 = vld [vmem:[%s23428_s4 + $0x18] sm:$0xff]  }
 0x2f0   : > { %v7013_v28 = vcombine.low %v7005_v59, %v7012_v36  ;;  %v7233_v52 = vor.u32 %v7232_v12, %v7228_v4  ;;  %7301 = vrot.lane.b32.xlu1 %v7286_v33, %s17798_s17  ;;  %v7244_v57 = vshll.u32 %v20491_v61, 16  ;;  %v7285_v8 = vrot.slane %v20499_v44, 1  ;;  %17444 = vmatprep.subr.bf16.mxu1 %v17698_v46  ;;  %v20551_v33 = vld [vmem:[#allocation3 + $0x50] sm:$0x3f]  }
 0x2f1   : > { %v7043_v49 = vrot.slane %v7035_v1, %v20302_v0  ;;  %v7050_v48 = vrot.slane %v7036_v3, %v20302_v0  ;;  %v7065_v18 = vrot.slane %v16889_v38, %v20302_v0  ;;  %7127 = vst.msk [vmem:[#allocation3 + $0x44] sm:$0x1] %vm7098_vm7, %v7034_v30  ;;  %v7287_v10 = vrot.slane %v20501_v40, 1 }
 0x2f2   : > { %v7020_v42 = vrot.slane %v7013_v28, %v20302_v0  ;;  %7270 = vrot.lane.b32.xlu0 %v7233_v52, %s17794_s15  ;;  %v7251_v16 = vshll.u32 %v20501_v40, 16  ;;  %v7249_v7 = vshrl.u32 %v20501_v40, 16  ;;  %v7246_v14 = vrot.slane %v7244_v57, 1  ;;  %17445 = vmatpush3.bf16.msra.mxu1 %v17698_v46 }
 0x2f3   : > { %v7051_v13 = vcombine.low %v7043_v49, %v7050_v48  ;;  %v7072_v32 = vrot.slane %v7065_v18, %v20302_v0  ;;  %v7237_v25 = vshll.u32 %v20499_v44, 16  ;;  %v7242_v29 = vshrl.u32 %v20491_v61, 16  ;;  %17446 = vmatprep.subr.bf16.mxu1 %v17699_v58 }
 0x2f4   : > { %v7125_v53 = vsel %vm20335_vm9, %v7020_v42, %v7124_v11  ;;  %7303 = vrot.lane.b32.xlu1 %v7287_v10, %s17798_s17  ;;  %v7253_v45 = vrot.slane %v7251_v16, 1  ;;  %v7235_v41 = vshrl.u32 %v20499_v44, 16  ;;  %v7202_v12 = vshll.u32 %v20536_v55, 16 }
 0x2f5   : > { %v7058_v47 = vrot.slane %v7051_v13, %v20302_v0  ;;  %7126 = vst [vmem:[#allocation3 + $0x40] sm:$0xf] %v7125_v53  ;;  %7131 = vst.msk [vmem:[#allocation3 + $0x4c] sm:$0x1] %vm7098_vm7, %v7072_v32  ;;  %v7247_v6 = vor.u32 %v7246_v14, %v7242_v29  ;;  %v7239_v39 = vrot.slane %v7237_v25, 1  ;;  %v7200_v52 = vshrl.u32 %v20536_v55, 16 }
 0x2f6   : > { %7299 = vrot.lane.b32.xlu0 %v7285_v8, %s17798_s17  ;;  %v7254_v4 = vor.u32 %v7253_v45, %v7249_v7  ;;  %17447 = vmatpush3.bf16.msra.mxu1 %v17699_v58  ;;  %v7204_v49 = vrot.slane %v7202_v12, 1  ;;  %v7280_v48 = vrot.slane %v20536_v55, 1  ;;  %v8696_v18 = vshll.u32 %v20551_v33, 16  ;;  %v17700_v13 = vld [vmem:[%s23428_s4 + $0x10] sm:$0xff]   ;;  %v20573_v32 = vld [vmem:[%s23428_s4 + $0x40] sm:$0xff]  }
 0x2f7   : > { %v7129_v15 = vsel %vm20335_vm9, %v7058_v47, %v7128_v17  ;;  %v7240_v27 = vor.u32 %v7239_v39, %v7235_v41  ;;  %v8694_v42 = vshrl.u32 %v20551_v33, 16  ;;  %v8702_v10 = vrot.slane %v20551_v33, 1  ;;  %17460 = vmatprep.subr.bf16.mxu0 %v17700_v13  ;;  %17478 = vmatprep.subr.bf16.mxu1 %v20573_v32  ;;  %v16859_v7 = vld [vmem:[%s23427_s3] ss:$0 sm:$0xff] }
 0x2f8   : > { %7130 = vst [vmem:[#allocation3 + $0x48] sm:$0xf] %v7129_v15  ;;  %7276 = vrot.lane.b32.xlu1 %v7254_v4, %s17794_s15  ;;  %v7205_v57 = vor.u32 %v7204_v49, %v7200_v52  ;;  %v8698_v8 = vrot.slane %v8696_v18, 1  ;;  %17461 = vmatpush3.bf16.msra.mxu0 %v17700_v13  ;;  %v17704_v53 = vld [vmem:[%s23428_s4] sm:$0xff]  }
 0x2f9   : > { %17462 = vmatprep.subr.bf16.mxu0 %v17702_v50 }
 0x2fa   : > { %7274 = vrot.lane.b32.xlu0 %v7247_v6, %s17794_s15  ;;  %v8699_v16 = vor.u32 %v8698_v8, %v8694_v42 }
 0x2fc   : > { %v20538_v31 = vld [vmem:[#allocation3 + $0x40] sm:$0x3f]   ;;  %17463 = vmatpush3.bf16.msra.mxu0 %v17702_v50 }
 0x2fd   : > { %v7288_v2 = vrot.slane %v20538_v31, 1  ;;  %v7258_v26 = vshll.u32 %v20538_v31, 16  ;;  %v7256_v59 = vshrl.u32 %v20538_v31, 16  ;;  %17464 = vmatprep.subr.bf16.mxu0 %v17704_v53 }
 0x2fe   : > { %7272 = vrot.lane.b32.xlu0 %v7240_v27, %s17794_s15 }
 0x2ff   : > { %v20546_v9 = vld [vmem:[#allocation3 + $0x48] sm:$0x3f]   ;;  %7305 = vrot.lane.b32.xlu1 %v7288_v2, %s17798_s17  ;;  %v7260_v36 = vrot.slane %v7258_v26, 1 }
 0x300   : > { %v7793_v38 = vshll.u32 %v20546_v9, 16  ;;  %v7799_v1 = vrot.slane %v20546_v9, 1  ;;  %v7791_v3 = vshrl.u32 %v20546_v9, 16  ;;  %17465 = vmatpush3.bf16.msra.mxu0 %v17704_v53 }
 0x301   : > { %v7261_v30 = vor.u32 %v7260_v36, %v7256_v59 }
 0x302   : > { %v7795_v28 = vrot.slane %v7793_v38, 1 }
 0x303   : > { %7278 = vrot.lane.b32.xlu0 %v7261_v30, %s17794_s15  ;;  %7800 = vrot.lane.b32.xlu1 %v7799_v1, %s17798_s17 }
 0x304   : > { %v7796_v11 = vor.u32 %v7795_v28, %v7791_v3 }
 0x307   : > { %7797 = vrot.lane.b32.xlu0 %v7796_v11, %s17794_s15  ;;  %7289 = vrot.lane.b32.xlu1 %v7280_v48, %s17798_s17 }
 0x30b   : > { %7262 = vrot.lane.b32.xlu0 %v7205_v57, %s17794_s15  ;;  %8703 = vrot.lane.b32.xlu1 %v8702_v10, %s17798_s17 }
 0x30f   : > { %8700 = vrot.lane.b32.xlu0 %v8699_v16, %s17794_s15 }
 0x313   : > { %6302 = vrot.lane.b32.xlu0 %v16859_v7, %s17794_s15 }
 0x330   : > { %v7292_v17 = vpop.permute.xlu0 %7291 }
 0x331   : > { %v7294_v14 = vpop.permute.xlu1 %7293 }
 0x335   : > { %v7296_v45 = vpop.permute.xlu1 %7295  ;;  %v7267_v25 = vpop.permute.xlu0 %7266 }
 0x336   : > { %v7312_v47 = vsel %vm1222_vm11, %v20362_v5, %v7267_v25 }
 0x337   : > { %v7331_v29 = vsel %vm7325_vm10, %v7312_v47, %v7294_v14 }
 0x338   : > { %v7438_v4 = vrot.slane %v7331_v29, %v18488_v35  ;;  %v7431_v12 = vcombine.high %v7331_v29, %v7331_v29 }
 0x339   : > { %v7265_v15 = vpop.permute.xlu1 %7264 }
 0x33a   : > { %v7310_v6 = vsel %vm1222_vm11, %v20355_v23, %v7265_v15  ;;  %v7446_v39 = vcombine.high %v7438_v4, %v7438_v4  ;;  %v20594_v41 = vrot.slane %v7438_v4, %v18488_v35  ;;  %v7445_v18 = vrot.slane %v7431_v12, %v18488_v35 }
 0x33b   : > { %v7329_v46 = vsel %vm7325_vm10, %v7310_v6, %v7292_v17 }
 0x33c   : > { %v7392_v27 = vcombine.high %v7329_v46, %v7329_v46  ;;  %v7399_v2 = vrot.slane %v7329_v46, %v18488_v35  ;;  %v20599_v26 = vrot.slane %v7446_v39, %v18488_v35  ;;  %v7468_v5 = vcombine.high %v20594_v41, %v20594_v41 }
 0x33d   : > { %v7269_v58 = vpop.permute.xlu1 %7268  ;;  %v7723_v28 = vunpack.i.h.s16 %v20594_v41  ;;  %v7460_v17 = vrot.slane %v7445_v18, %v18488_v35 }
 0x33e   : > { %v7406_v59 = vrot.slane %v7392_v27, %v18488_v35  ;;  %v7407_v36 = vcombine.high %v7399_v2, %v7399_v2  ;;  %v7314_v23 = vsel %vm1222_vm11, %v20357_v37, %v7269_v58  ;;  %v8363_v38 = vcombine.low %v20599_v26, %v7468_v5 }
 0x33f   : > { %v20608_v30 = vsel %vm7325_vm10, %v7314_v23, %v7296_v45  ;;  %v7469_v49 = vcombine.high %v20599_v26, %v20599_v26  ;;  %v7725_v48 = vunpack.i.h.s16 %v20599_v26  ;;  %v7727_v42 = vunpack.i.h.s16 %v7468_v5 }
 0x340   : > { %v7421_v1 = vrot.slane %v7406_v59, %v18488_v35  ;;  %v20612_v3 = vrot.slane %v7407_v36, %v18488_v35  ;;  %v7477_v52 = vrot.slane %v20608_v30, %v18488_v35  ;;  %v16901_v10 = vpack.i.b16 %v20599_v26, %v7723_v28 }
 0x341   : > { %v16902_v50 = vpack.i.b16 %v7468_v5, %v7725_v48  ;;  %v16903_v53 = vpack.i.b16 %v7469_v49, %v7727_v42  ;;  %v20636_v14 = vrot.slane %v7399_v2, %v18488_v35  ;;  %v8379_v39 = vrot.slane %v8363_v38, %v18488_v35 }
 0x342   : > { %v20621_v37 = vcombine.high %v20612_v3, %v20612_v3  ;;  %v16900_v11 = vpack.i.b16 %v20594_v41, %v7421_v1  ;;  %v7485_v57 = vcombine.high %v7477_v52, %v7477_v52  ;;  %v20629_v16 = vrot.slane %v7477_v52, %v18488_v35 }
 0x343   : > { %v7896_v15 = vcombine.low %v20636_v14, %v20612_v3  ;;  %v16920_v46 = vcombine.high %v20636_v14, %v20612_v3  ;;  %v7899_v27 = vcombine.low %v16902_v50, %v16903_v53  ;;  %v8768_v28 = vcombine.low %v20594_v41, %v20599_v26 }
 0x344   : > { %v7720_v8 = vunpack.i.h.s16 %v20621_v37  ;;  %v20632_v13 = vrot.slane %v7485_v57, %v18488_v35  ;;  %v7898_v45 = vcombine.low %v16900_v11, %v16901_v10  ;;  %v7732_v47 = vunpack.i.h.s16 %v20629_v16 }
 0x345   : > { %v16937_v4 = vpack.i.b16 %v20629_v16, %v7460_v17  ;;  %v7507_v2 = vcombine.high %v20629_v16, %v20629_v16  ;;  %v7906_v5 = vrot.slane %v7896_v15, %v18488_v35  ;;  %v7913_v36 = vrot.slane %v16920_v46, %v18488_v35 }
 0x346   : > { %v16936_v7 = vpack.i.b16 %v7421_v1, %v7720_v8  ;;  %v7734_v29 = vunpack.i.h.s16 %v20632_v13  ;;  %v7920_v58 = vrot.slane %v7898_v45, %v18488_v35  ;;  %v7927_v23 = vrot.slane %v7899_v27, %v18488_v35 }
 0x347   : > { %v16938_v12 = vpack.i.b16 %v20632_v13, %v7732_v47  ;;  %v8364_v1 = vcombine.low %v7469_v49, %v16937_v4  ;;  %v7928_v52 = vcombine.low %v7906_v5, %v7913_v36  ;;  %v20659_v18 = vcombine.high %v20632_v13, %v20632_v13 }
 0x348   : > { %v8362_v25 = vcombine.low %v16936_v7, %v20594_v41  ;;  %v16939_v38 = vpack.i.b16 %v7507_v2, %v7734_v29  ;;  %v7929_v48 = vcombine.low %v7920_v58, %v7927_v23  ;;  %v16970_v57 = vcombine.high %v20594_v41, %v20599_v26 }
 0x349   : > { %v7736_v42 = vunpack.i.h.s16 %v7507_v2  ;;  %v7936_v8 = vrot.slane %v7928_v52, %v18488_v35  ;;  %v8778_v7 = vrot.slane %v8768_v28, %v18488_v35  ;;  %v7729_v50 = vunpack.i.h.s16 %v7469_v49 }
 0x34a   : > { %v8372_v6 = vrot.slane %v8362_v25, %v18488_v35  ;;  %v8365_v11 = vcombine.low %v16938_v12, %v16939_v38  ;;  %v7943_v10 = vrot.slane %v7929_v48, %v18488_v35  ;;  %v8386_v53 = vrot.slane %v8364_v1, %v18488_v35 }
 0x34b   : > { %v8785_v25 = vrot.slane %v16970_v57, %v18488_v35  ;;  %v16904_v41 = vpack.i.b16 %v7460_v17, %v7729_v50  ;;  %v7470_v49 = vcombine.high %v20608_v30, %v20608_v30  ;;  %v7429_v46 = vcombine.high %v20636_v14, %v20636_v14 }
 0x34c   : > { %v8394_v59 = vcombine.low %v8372_v6, %v8379_v39  ;;  %v8393_v45 = vrot.slane %v8365_v11, %v18488_v35  ;;  %v7944_v47 = vcombine.low %v7936_v8, %v7943_v10  ;;  %v16940_v6 = vpack.i.b16 %v20659_v18, %v7736_v42 }
 0x34d   : > { %v8800_v29 = vcombine.low %v8778_v7, %v8785_v25  ;;  %v7484_v58 = vrot.slane %v7470_v49, %v18488_v35  ;;  %v7945_v17 = vcombine.low %v16904_v41, %v20629_v16  ;;  %v8770_v23 = vcombine.low %v16937_v4, %v16938_v12 }
 0x34e   : > { %v8395_v15 = vcombine.low %v8386_v53, %v8393_v45  ;;  %17448 = vmatprep.mubr.msk.bf16.mxu1 %vm8173_vm12, %v7944_v47  ;;  %v20672_v26 = vrot.slane %v8394_v59, %v18488_v35  ;;  %v8771_v5 = vcombine.low %v16939_v38, %v16940_v6  ;;  %v7946_v59 = vcombine.low %v20632_v13, %v7507_v2 }
 0x34f   : > { %v7718_v1 = vunpack.i.h.s16 %v7429_v46  ;;  %v7738_v30 = vunpack.i.h.s16 %v20659_v18  ;;  %v7716_v28 = vunpack.i.h.s16 %v20612_v3  ;;  %v7499_v48 = vrot.slane %v7484_v58, %v18488_v35 }
 0x350   : > { %v20677_v39 = vrot.slane %v8395_v15, %v18488_v35  ;;  %v8799_v52 = vrot.slane %v8771_v5, %v18488_v35  ;;  %v7955_v11 = vrot.slane %v7945_v17, %v18488_v35  ;;  %v7962_v38 = vrot.slane %v7946_v59, %v18488_v35 }
 0x351   : > { %v8792_v16 = vrot.slane %v8770_v23, %v18488_v35  ;;  %v16935_v13 = vpack.i.b16 %v20621_v37, %v7718_v1  ;;  %v20694_v2 = vpack.i.b16 %v7499_v48, %v7738_v30  ;;  %v16934_v12 = vpack.i.b16 %v7429_v46, %v7716_v28 }
 0x352   : > { %23707 = vst [vmem:[#allocation22_spill] sm:$0xff] %v20677_v39  ;;  %v7977_v10 = vcombine.low %v7955_v11, %v7962_v38  ;;  %v7714_v25 = vunpack.i.h.s16 %v20636_v14 }
 0x353   : > { %23708 = vst [vmem:[#allocation20_spill] sm:$0xff] %v20694_v2  ;;  %v8801_v8 = vcombine.low %v8792_v16, %v8799_v52  ;;  %v8411_v47 = vcombine.low %v16940_v6, %v20694_v2  ;;  %v8316_v15 = vcombine.low %v16934_v12, %v16935_v13 }
 0x354   : > { %v20710_v58 = vrot.slane %v7977_v10, %v18488_v35  ;;  %v20720_v59 = vpack.i.b16 %v20612_v3, %v7714_v25 }
 0x355   : > { %v20729_v28 = vrot.slane %v8316_v15, %v18488_v35  ;;  %v20732_v52 = vrot.slane %v8411_v47, %v18488_v35 }
 0x35e   : > { %v7298_v36 = vpop.permute.xlu0 %7297 }
 0x362   : > { %v7302_v57 = vpop.permute.xlu1 %7301 }
 0x364   : > { %v7271_v4 = vpop.permute.xlu0 %7270 }
 0x365   : > { %v7316_v42 = vsel %vm1222_vm11, %v20485_v24, %v7271_v4  ;;  %v20706_v24 = vrot.slane %v8801_v8, %v18488_v35 }
 0x366   : > { %v7335_v7 = vsel %vm7325_vm10, %v7316_v42, %v7298_v36  ;;  %v7304_v50 = vpop.permute.xlu1 %7303  ;;  %v20723_v36 = vrot.slane %v8800_v29, %v18488_v35 }
 0x367   : > { %v7509_v53 = vcombine.high %v7335_v7, %v7335_v7  ;;  %v7516_v45 = vrot.slane %v7335_v7, %v18488_v35  ;;  %23709 = vst [vmem:[#allocation27_spill] sm:$0xff] %v20706_v24 }
 0x368   : > { %v7300_v37 = vpop.permute.xlu0 %7299  ;;  %23710 = vst [vmem:[#allocation25_spill] sm:$0xff] %v20723_v36 }
 0x369   : > { %v7524_v41 = vcombine.high %v7516_v45, %v7516_v45  ;;  %v20703_v49 = vrot.slane %v7516_v45, %v18488_v35  ;;  %v7523_v46 = vrot.slane %v7509_v53, %v18488_v35 }
 0x36a   : > { %v7277_v5 = vpop.permute.xlu1 %7276 }
 0x36b   : > { %v20713_v17 = vrot.slane %v7524_v41, %v18488_v35  ;;  %v20717_v6 = vcombine.high %v20703_v49, %v20703_v49  ;;  %v16905_v23 = vpack.i.b16 %v20703_v49, %v7499_v48  ;;  %v7322_v30 = vsel %vm1222_vm11, %v20501_v40, %v7277_v5 }
 0x36c   : > { %v7275_v1 = vpop.permute.xlu0 %7274  ;;  %v7741_v3 = vunpack.i.h.s16 %v20703_v49  ;;  %v20743_v38 = vrot.slane %v7523_v46, %v18488_v35  ;;  %v7341_v13 = vsel %vm7325_vm10, %v7322_v30, %v7304_v50 }
 0x36d   : > { %v20736_v11 = vcombine.high %v20713_v17, %v20713_v17  ;;  %v7743_v29 = vunpack.i.h.s16 %v20713_v17  ;;  %v7745_v40 = vunpack.i.h.s16 %v20717_v6  ;;  %v7320_v16 = vsel %vm1222_vm11, %v20491_v61, %v7275_v1 }
 0x36e   : > { %v7339_v42 = vsel %vm7325_vm10, %v7320_v16, %v7302_v57  ;;  %v7947_v8 = vcombine.low %v20659_v18, %v16905_v23  ;;  %v7626_v53 = vcombine.high %v7341_v13, %v7341_v13  ;;  %v7633_v45 = vrot.slane %v7341_v13, %v18488_v35 }
 0x36f   : > { %v7747_v4 = vunpack.i.h.s16 %v20736_v11  ;;  %v16907_v12 = vpack.i.b16 %v20717_v6, %v7743_v29  ;;  %v7587_v10 = vcombine.high %v7339_v42, %v7339_v42  ;;  %v7594_v7 = vrot.slane %v7339_v42, %v18488_v35 }
 0x370   : > { %v7273_v25 = vpop.permute.xlu0 %7272  ;;  %v16906_v47 = vpack.i.b16 %v20713_v17, %v7741_v3  ;;  %v7640_v46 = vrot.slane %v7626_v53, %v18488_v35  ;;  %v7641_v23 = vcombine.high %v7633_v45, %v7633_v45  ;;  %v20771_v1 = vrot.slane %v7633_v45, %v18488_v35 }
 0x371   : > { %v7318_v50 = vsel %vm1222_vm11, %v20499_v44, %v7273_v25  ;;  %v20763_v18 = vpack.i.b16 %v20743_v38, %v7747_v4  ;;  %v7601_v15 = vrot.slane %v7587_v10, %v18488_v35  ;;  %v7602_v41 = vcombine.high %v7594_v7, %v7594_v7  ;;  %v7306_v29 = vpop.permute.xlu1 %7305 }
 0x372   : > { %v20768_v5 = vrot.slane %v7594_v7, %v18488_v35  ;;  %v7337_v44 = vsel %vm7325_vm10, %v7318_v50, %v7300_v37  ;;  %v20775_v30 = vpack.i.b16 %v20736_v11, %v7745_v40  ;;  %v7948_v16 = vcombine.low %v16906_v47, %v16907_v12 }
 0x373   : > { %v20778_v3 = vrot.slane %v7602_v41, %v18488_v35  ;;  %v7969_v13 = vrot.slane %v7947_v8, %v18488_v35  ;;  %v7616_v4 = vrot.slane %v7601_v15, %v18488_v35  ;;  %v20783_v42 = vrot.slane %v7641_v23, %v18488_v35 }
 0x374   : > { %v20787_v10 = vcombine.high %v20771_v1, %v20771_v1  ;;  %v7548_v37 = vcombine.high %v7337_v44, %v7337_v44  ;;  %v20796_v12 = vrot.slane %v7640_v46, %v18488_v35  ;;  %v7555_v8 = vrot.slane %v7337_v44, %v18488_v35 }
 0x375   : > { %v20793_v7 = vcombine.high %v20778_v3, %v20778_v3  ;;  %v7279_v53 = vpop.permute.xlu0 %7278  ;;  %v20801_v45 = vcombine.high %v20783_v42, %v20783_v42  ;;  %v7768_v25 = vunpack.i.h.s16 %v20771_v1  ;;  %v7759_v50 = vunpack.i.h.s16 %v20768_v5  ;;  %v7801_v54 = vpop.permute.xlu1 %7800 }
 0x376   : > { %v7772_v47 = vunpack.i.h.s16 %v20787_v10  ;;  %v7562_v41 = vrot.slane %v7548_v37, %v18488_v35  ;;  %v7563_v23 = vcombine.high %v7555_v8, %v7555_v8  ;;  %v20809_v46 = vrot.slane %v7555_v8, %v18488_v35 }
 0x377   : > { %v7765_v15 = vunpack.i.h.s16 %v20793_v7  ;;  %v7774_v44 = vunpack.i.h.s16 %v20801_v45  ;;  %v20813_v48 = vpack.i.b16 %v20771_v1, %v7616_v4  ;;  %v7324_v61 = vsel %vm1222_vm11, %v20538_v31, %v7279_v53 }
 0x378   : > { %v7976_v27 = vrot.slane %v7948_v16, %v18488_v35  ;;  %v7577_v40 = vrot.slane %v7562_v41, %v18488_v35  ;;  %v20822_v37 = vrot.slane %v7563_v23, %v18488_v35  ;;  %v7585_v8 = vcombine.high %v20809_v46, %v20809_v46 }
 0x379   : > { %23711 = vst [vmem:[#allocation26_spill] sm:$0xff] %v20813_v48  ;;  %v20818_v57 = vpack.i.b16 %v7616_v4, %v7765_v15  ;;  %v7798_v0 = vpop.permute.xlu0 %7797  ;;  %v20827_v34 = vpack.i.b16 %v20796_v12, %v7774_v44  ;;  %v16911_v24 = vpack.i.b16 %v20778_v3, %v7759_v50  ;;  %v7343_v31 = vsel %vm7325_vm10, %v7324_v61, %v7306_v29  ;;  %v7290_v48 = vpop.permute.xlu1 %7289 }
 0x37a   : > { %v7803_v16 = vsel %vm1222_vm11, %v20546_v9, %v7798_v0  ;;  %v20834_v4 = vpack.i.b16 %v20801_v45, %v7772_v47  ;;  %v7586_v53 = vcombine.high %v20822_v37, %v20822_v37  ;;  %v7752_v15 = vunpack.i.h.s16 %v20822_v37 }
 0x37b   : > { %23712 = vst [vmem:[#allocation39_spill] sm:$0xff] %v20827_v34  ;;  %v7978_v41 = vcombine.low %v7969_v13, %v7976_v27  ;;  %v7754_v23 = vunpack.i.h.s16 %v7585_v8  ;;  %v16910_v44 = vpack.i.b16 %v20768_v5, %v7577_v40  ;;  %v7665_v36 = vcombine.high %v7343_v31, %v7343_v31 }
 0x37c   : > { %23713 = vst [vmem:[#allocation30_spill] sm:$0xff] %v20834_v4  ;;  %v7672_v50 = vrot.slane %v7343_v31, %v18488_v35  ;;  %v20844_v0 = vpack.i.b16 %v20783_v42, %v7768_v25  ;;  %v7756_v9 = vunpack.i.h.s16 %v7586_v53  ;;  %v7805_v29 = vsel %vm7325_vm10, %v7803_v16, %v7801_v54 }
 0x37d   : > { %v7263_v47 = vpop.permute.xlu0 %7262  ;;  %v20849_v13 = vpack.i.b16 %v7585_v8, %v7752_v15  ;;  %v7679_v62 = vrot.slane %v7665_v36, %v18488_v35  ;;  %v7807_v2 = vcombine.high %v7805_v29, %v7805_v29  ;;  %v7814_v61 = vrot.slane %v7805_v29, %v18488_v35 }
 0x37e   : > { %23714 = vst [vmem:[#allocation31_spill] sm:$0xff] %v20844_v0  ;;  %v7680_v63 = vcombine.high %v7672_v50, %v7672_v50  ;;  %v20852_v31 = vpack.i.b16 %v7577_v40, %v7756_v9  ;;  %v7992_v25 = vrot.slane %v7978_v41, %v18488_v35  ;;  %v20856_v0 = vcombine.low %v16910_v44, %v16911_v24 }
 0x37f   : > { %v20858_v54 = vpack.i.b16 %v7586_v53, %v7754_v23  ;;  %v7308_v8 = vsel %vm1222_vm11, %v20536_v55, %v7263_v47  ;;  %v20866_v36 = vrot.slane %v7672_v50, %v18488_v35  ;;  %v20869_v40 = vrot.slane %v7679_v62, %v18488_v35  ;;  %v17703_v23 = vld [vmem:[%s23428_s4 + $0x38] sm:$0xff]  }
 0x380   : > { %23715 = vst [vmem:[#allocation40_spill] sm:$0xff] %v20852_v31  ;;  %v20861_v16 = vrot.slane %v7680_v63, %v18488_v35  ;;  %v7821_v15 = vrot.slane %v7807_v2, %v18488_v35  ;;  %v7822_v9 = vcombine.high %v7814_v61, %v7814_v61  ;;  %v20873_v24 = vrot.slane %v7814_v61, %v18488_v35  ;;  %v8704_v61 = vpop.permute.xlu1 %8703 }
 0x381   : > { %23716 = vst [vmem:[#allocation41_spill] sm:$0xff] %v20858_v54  ;;  %v8701_v41 = vpop.permute.xlu0 %8700  ;;  %v7993_v53 = vcombine.low %v20710_v58, %v7992_v25  ;;  %v7327_v63 = vsel %vm7325_vm10, %v7308_v8, %v7290_v48  ;;  %v7995_v55 = vcombine.low %v20809_v46, %v20822_v37 }
 0x382   : > { %v20885_v2 = vrot.slane %v7822_v9, %v18488_v35  ;;  %v7353_v44 = vcombine.high %v7327_v63, %v7327_v63  ;;  %v7360_v50 = vrot.slane %v7327_v63, %v18488_v35  ;;  %v20890_v58 = vcombine.high %v20861_v16, %v20861_v16 }
 0x383   : > { %v20893_v48 = vrot.slane %v7821_v15, %v18488_v35  ;;  %v20897_v29 = vcombine.high %v20873_v24, %v20873_v24  ;;  %17449 = vmatmul.mubr.msk.bf16.vlgmr.msra.gmra.mxu1 %vm8173_vm12, %v7993_v53  ;;  %v8706_v47 = vsel %vm1222_vm11, %v20551_v33, %v8701_v41  ;;  %v16921_v33 = vcombine.high %v20809_v46, %v20822_v37  ;;  %v17705_v41 = vld [vmem:[%s23428_s4 + $0x30] sm:$0xff]  }
 0x384   : > { %v7845_v8 = vcombine.high %v20885_v2, %v20885_v2  ;;  %v7367_v9 = vrot.slane %v7353_v44, %v18488_v35  ;;  %v7368_v63 = vcombine.high %v7360_v50, %v7360_v50  ;;  %17479 = vmatpush3.bf16.msra.mxu1 %v20573_v32  ;;  %v7375_v27 = vrot.slane %v7360_v50, %v18488_v35 }
 0x385   : > { %23717 = vst [vmem:[#allocation33_spill] sm:$0xff] %v20897_v29  ;;  %v7851_v15 = vunpack.i.h.s16 %v20897_v29  ;;  %v8708_v53 = vsel %vm7325_vm10, %v8706_v47, %v8704_v61  ;;  %17480 = vmatprep.subr.bf16.mxu1 %v17703_v23  ;;  %v7783_v29 = vunpack.i.h.s16 %v20890_v58  ;;  %v8011_v47 = vrot.slane %v7995_v55, %v18488_v35 }
 0x386   : > { %v7853_v62 = vunpack.i.h.s16 %v7845_v8  ;;  %v7382_v44 = vrot.slane %v7367_v9, %v18488_v35  ;;  %v7389_v25 = vrot.slane %v7368_v63, %v18488_v35  ;;  %v8710_v32 = vcombine.high %v8708_v53, %v8708_v53 }
 0x387   : > { %v8717_v61 = vrot.slane %v8708_v53, %v18488_v35  ;;  %v23718_v53 = vcombine.low %v20775_v30, %v20763_v18  ;;  %v20934_v55 = vpack.i.b16 %v7845_v8, %v7851_v15  ;;  %v20948_v30 = vpack.i.b16 %v20869_v40, %v7783_v29  ;;  %v20960_v29 = vpop.permute.xlu0 %6302 }
 0x388   : > { %v20923_v34 = vpack.i.b16 %v20893_v48, %v7853_v62  ;;  %v16932_v4 = vpack.i.b16 %v20636_v14, %v7382_v44  ;;  %v8313_v31 = vcombine.low %v7375_v27, %v7389_v25  ;;  %v16952_v54 = vcombine.high %v7375_v27, %v7389_v25  ;;  %17481 = vmatpush3.bf16.msra.mxu1 %v17703_v23 }
 0x389   : > { %v20927_v9 = vrot.slane %v8710_v32, %v18488_v35  ;;  %v8725_v63 = vcombine.high %v8717_v61, %v8717_v61  ;;  %v8732_v39 = vrot.slane %v8717_v61, %v18488_v35  ;;  %v8004_v50 = vrot.slane %v23718_v53, %v18488_v35  ;;  %17482 = vmatprep.subr.bf16.mxu1 %v17705_v41 }
 0x38a   : > { %v8315_v62 = vcombine.low %v16932_v4, %v20720_v59  ;;  %v20938_v14 = vrot.slane %v8313_v31, %v18488_v35  ;;  %v8018_v27 = vrot.slane %v16921_v33, %v18488_v35  ;;  %v20942_v23 = vrot.slane %v16952_v54, %v18488_v35 }
 0x38b   : > { %v8746_v25 = vrot.slane %v8725_v63, %v18488_v35  ;;  %v8025_v44 = vrot.slane %v20856_v0, %v18488_v35  ;;  %v8026_v18 = vcombine.low %v8004_v50, %v8011_v47  ;;  %v8965_v59 = vcombine.low %v20934_v55, %v20923_v34 }
 0x38c   : > { %v20954_v4 = vcombine.high %v20768_v5, %v20768_v5  ;;  %v7761_v31 = vunpack.i.h.s16 %v20778_v3  ;;  %17483 = vmatpush3.bf16.msra.mxu1 %v17705_v41  ;;  %v8739_v54 = vrot.slane %v20927_v9, %v18488_v35  ;;  %v8337_v33 = vrot.slane %v8315_v62, %v18488_v35 }
 0x38d   : > { %v8966_v8 = vcombine.low %v8732_v39, %v8746_v25  ;;  %v16972_v15 = vcombine.high %v8732_v39, %v8746_v25  ;;  %v8027_v0 = vcombine.low %v8018_v27, %v8025_v44  ;;  %v16915_v61 = vpack.i.b16 %v20866_v36, %v20796_v12 }
 0x38e   : > { %v7763_v32 = vunpack.i.h.s16 %v20954_v4  ;;  %v16912_v50 = vpack.i.b16 %v20954_v4, %v7761_v31  ;;  %v8345_v41 = vcombine.low %v20938_v14, %v20942_v23  ;;  %v8034_v39 = vrot.slane %v8026_v18, %v18488_v35 }
 0x38f   : > { %v20969_v47 = vrot.slane %v8966_v8, %v18488_v35  ;;  %v8041_v63 = vrot.slane %v8027_v0, %v18488_v35  ;;  %v20974_v53 = vrot.slane %v16972_v15, %v18488_v35  ;;  %v8045_v27 = vcombine.low %v20783_v42, %v20787_v10 }
 0x390   : > { %v16913_v62 = vpack.i.b16 %v20793_v7, %v7763_v32  ;;  %v8046_v12 = vcombine.low %v20801_v45, %v16915_v61  ;;  %v23719_v14 = vcombine.low %v20818_v57, %v20771_v1  ;;  %v6307_v44 = vadd.f32 %v20960_v29, %v20278_v56 }
 0x391   : > { %v8042_v25 = vcombine.low %v8034_v39, %v8041_v63  ;;  %v6306_v18 = vadd.f32 %v20960_v29, %v20295_v22  ;;  %v8067_v8 = vrot.slane %v8045_v27, %v18488_v35  ;;  %v6308_v45 = vadd.f32 %v20960_v29, %v20289_v21 }
 0x392   : > { %v8060_v23 = vrot.slane %v23719_v14, %v18488_v35  ;;  %v8043_v31 = vcombine.low %v16912_v50, %v16913_v62  ;;  %v8074_v15 = vrot.slane %v8046_v12, %v18488_v35  ;;  %9187 = vrot.lane.b32.xlu0 %v6307_v44, %s17799_s27  ;;  %v6305_v57 = vadd.f32 %v20960_v29, %v20285_v19 }
 0x393   : > { %17452 = vmatprep.mubr.msk.bf16.mxu1 %vm8173_vm12, %v8042_v25  ;;  %v20998_v56 = vcombine.high %v20866_v36, %v20866_v36  ;;  %v7777_v22 = vunpack.i.h.s16 %v20866_v36  ;;  %v7779_v1 = vunpack.i.h.s16 %v20861_v16  ;;  %9185 = vrot.lane.b32.xlu1 %v6306_v18, %s17799_s27  ;;  %v8094_v21 = vcombine.low %v20873_v24, %v20885_v2 }
 0x394   : > { %v8053_v0 = vrot.slane %v8043_v31, %v18488_v35  ;;  %v8076_v32 = vcombine.low %v8067_v8, %v8074_v15  ;;  %v16922_v50 = vcombine.high %v20873_v24, %v20885_v2  ;;  %v23720_v63 = vunpack.i.l.s16 %v20893_v48 }
 0x395   : > { %v7781_v19 = vunpack.i.h.s16 %v20998_v56  ;;  %v16916_v61 = vpack.i.b16 %v20861_v16, %v7777_v22  ;;  %v16917_v39 = vpack.i.b16 %v20998_v56, %v7779_v1  ;;  %v8116_v25 = vrot.slane %v8094_v21, %v18488_v35 }
 0x396   : > { %v21014_v62 = vrot.slane %v23720_v63, %v18488_v35  ;;  %v8075_v27 = vcombine.low %v8053_v0, %v8060_v23  ;;  %v8090_v12 = vrot.slane %v8076_v32, %v18488_v35  ;;  %v8123_v14 = vrot.slane %v16922_v50, %v18488_v35  ;;  %9183 = vrot.lane.b32.xlu0 %v6305_v57, %s17799_s27 }
 0x397   : > { %v16918_v44 = vpack.i.b16 %v20890_v58, %v7781_v19  ;;  %v8092_v18 = vcombine.low %v16916_v61, %v16917_v39  ;;  %v6309_v48 = vadd.f32 %v20960_v29, %v20360_v20  ;;  %9189 = vrot.lane.b32.xlu1 %v6308_v45, %s17799_s27  ;;  %v6310_v15 = vadd.f32 %v20960_v29, %v20381_v43 }
 0x398   : > { %v8154_v31 = vrot.slane %v21014_v62, %v18488_v35  ;;  %v8083_v8 = vrot.slane %v8075_v27, %v18488_v35  ;;  %v8125_v23 = vcombine.low %v8116_v25, %v8123_v14  ;;  %v8346_v22 = vcombine.low %v8337_v33, %v20729_v28  ;;  %v23722_v25 = vld [vmem:[#allocation22_spill] sm:$0xff] }
 0x399   : > { %v8093_v57 = vcombine.low %v16918_v44, %v20948_v30  ;;  %v8102_v1 = vrot.slane %v8092_v18, %v18488_v35  ;;  %v8353_v0 = vrot.slane %v8345_v41, %v18488_v35  ;;  %v7750_v32 = vunpack.i.h.s16 %v20809_v46  ;;  %v23724_v18 = vld [vmem:[#allocation20_spill] sm:$0xff] }
 0x39a   : > { %v8091_v21 = vcombine.low %v8083_v8, %v8090_v12  ;;  %v8139_v20 = vrot.slane %v8125_v23, %v18488_v35  ;;  %v8360_v50 = vrot.slane %v8346_v22, %v18488_v35  ;;  %v16942_v45 = vpack.i.b16 %v20809_v46, %v20743_v38  ;;  %9193 = vrot.lane.b32.xlu0 %v6310_v15, %s17799_s27 }
 0x39b   : > { %v8109_v43 = vrot.slane %v8093_v57, %v18488_v35  ;;  %v16943_v28 = vpack.i.b16 %v20822_v37, %v7750_v32  ;;  %v16953_v30 = vcombine.high %v20703_v49, %v20713_v17  ;;  %v23721_v33 = vcombine.low %v20703_v49, %v20713_v17  ;;  %9191 = vrot.lane.b32.xlu1 %v6309_v48, %s17799_s27  ;;  %v23727_v57 = vld [vmem:[#allocation21_spill] sm:$0xff] }
 0x39c   : > { %17453 = vmatmul.mubr.msk.bf16.gmra.mxu1 %vm8173_vm12, %v8091_v21  ;;  %v8361_v19 = vcombine.low %v8353_v0, %v8360_v50  ;;  %v8819_v38 = vcombine.low %v20736_v11, %v16942_v45  ;;  %v6311_v46 = vadd.f32 %v20960_v29, %v20353_v60  ;;  %v6312_v12 = vadd.f32 %v20960_v29, %v20369_v51  ;;  %v23728_v21 = vld [vmem:[#allocation31_spill] sm:$0xff]  ;;  %v23729_v50 = vld [vmem:[#allocation26_spill] sm:$0xff] }
 0x39d   : > { %v8428_v41 = vrot.slane %v23721_v33, %v18488_v35  ;;  %v8124_v61 = vcombine.low %v8102_v1, %v8109_v43  ;;  %v8414_v37 = vcombine.low %v16942_v45, %v16943_v28  ;;  %v8435_v39 = vrot.slane %v16953_v30, %v18488_v35 }
 0x39e   : > { %17466 = vmatprep.mubr.msk.bf16.mxu0 %vm8173_vm12, %v8361_v19  ;;  %v8820_v62 = vcombine.low %v16943_v28, %v20849_v13  ;;  %v8841_v27 = vrot.slane %v8819_v38, %v18488_v35  ;;  %v8818_v11 = vcombine.low %v20713_v17, %v20717_v6  ;;  %v23723_v14 = vcombine.low %v20672_v26, %v23722_v25  ;;  %v23726_v6 = vld [vmem:[#allocation14_spill] sm:$0xff]  ;;  %v23731_v28 = vld [vmem:[#allocation40_spill] sm:$0xff] }
 0x39f   : > { %v8443_v63 = vcombine.low %v20732_v52, %v8428_v41  ;;  %v8132_v60 = vrot.slane %v8124_v61, %v18488_v35  ;;  %v8442_v52 = vrot.slane %v8414_v37, %v18488_v35  ;;  %v23725_v48 = vcombine.low %v23724_v18, %v20703_v49  ;;  %9195 = vrot.lane.b32.xlu1 %v6311_v46, %s17799_s27  ;;  %v23733_v37 = vld [vmem:[#allocation25_spill] sm:$0xff] }
 0x3a0   : > { %17467 = vmatmul.mubr.msk.bf16.vlgmr.msra.gmra.mxu0 %vm8173_vm12, %v23723_v14  ;;  %v7770_v51 = vunpack.i.h.s16 %v20783_v42  ;;  %v8848_v17 = vrot.slane %v8820_v62, %v18488_v35  ;;  %9197 = vrot.lane.b32.xlu0 %v6312_v12, %s17799_s27  ;;  %v8834_v26 = vrot.slane %v8818_v11, %v18488_v35  ;;  %v6313_v23 = vadd.f32 %v20960_v29, %v23726_v6 }
 0x3a1   : > { %v8451_v44 = vrot.slane %v8443_v63, %v18488_v35  ;;  %v8827_v8 = vrot.slane %v23725_v48, %v18488_v35  ;;  %v8140_v15 = vcombine.low %v8132_v60, %v8139_v20  ;;  %v8444_v22 = vcombine.low %v8435_v39, %v8442_v52  ;;  %v23730_v20 = vld [vmem:[#allocation41_spill] sm:$0xff]  ;;  %v23734_v39 = vld [vmem:[#allocation27_spill] sm:$0xff] }
 0x3a2   : > { %v6314_v1 = vadd.f32 %v20960_v29, %v23727_v57  ;;  %v8867_v49 = vcombine.low %v20768_v5, %v20778_v3  ;;  %v8850_v0 = vcombine.low %v8841_v27, %v8848_v17  ;;  %v16971_v32 = vcombine.high %v20768_v5, %v20778_v3 }
 0x3a3   : > { %v8849_v42 = vcombine.low %v8827_v8, %v8834_v26  ;;  %v8869_v45 = vcombine.low %v23729_v50, %v23728_v21  ;;  %17456 = vmatprep.mubr.msk.bf16.mxu1 %vm8173_vm12, %v8140_v15  ;;  %v8458_v43 = vrot.slane %v8444_v22, %v18488_v35  ;;  %v23732_v30 = vcombine.low %v23730_v20, %v23731_v28 }
 0x3a4   : > { %v8883_v41 = vrot.slane %v8867_v49, %v18488_v35  ;;  %v8460_v19 = vcombine.low %v20849_v13, %v23730_v20  ;;  %17457 = vmatmul.mubr.msk.bf16.gmra.mxu1 %vm8173_vm12, %v8154_v31  ;;  %v8864_v46 = vrot.slane %v8850_v0, %v18488_v35  ;;  %9199 = vrot.lane.b32.xlu1 %v6313_v23, %s17799_s27  ;;  %v7847_v31 = vunpack.i.h.s16 %v20873_v24  ;;  %v23738_v23 = vld [vmem:[#allocation39_spill] sm:$0xff] }
 0x3a5   : > { %v8876_v33 = vrot.slane %v23732_v30, %v18488_v35  ;;  %v8857_v38 = vrot.slane %v8849_v42, %v18488_v35  ;;  %v8890_v61 = vrot.slane %v16971_v32, %v18488_v35  ;;  %v23735_v63 = vcombine.low %v23733_v37, %v23734_v39  ;;  %9201 = vrot.lane.b32.xlu0 %v6314_v1, %s17799_s27  ;;  %v23740_v1 = vld [vmem:[#allocation19_spill] sm:$0xff] }
 0x3a6   : > { %v8459_v62 = vcombine.low %v8451_v44, %v8458_v43  ;;  %v8897_v13 = vrot.slane %v8869_v45, %v18488_v35  ;;  %v8462_v11 = vcombine.low %v20778_v3, %v20954_v4  ;;  %v8463_v60 = vcombine.low %v20793_v7, %v23729_v50 }
 0x3a7   : > { %17484 = vmatprep.mubr.msk.bf16.mxu1 %vm8173_vm12, %v23735_v63  ;;  %v8898_v27 = vcombine.low %v8876_v33, %v8883_v41  ;;  %v8865_v12 = vcombine.low %v8857_v38, %v8864_v46  ;;  %v8470_v25 = vrot.slane %v8460_v19, %v18488_v35  ;;  %v23736_v44 = vcombine.low %v23731_v28, %v20768_v5  ;;  %v23737_v5 = vld [vmem:[#allocation30_spill] sm:$0xff] }
 0x3a8   : > { %17470 = vmatprep.mubr.msk.bf16.mxu0 %vm8173_vm12, %v8459_v62  ;;  %v8899_v14 = vcombine.low %v8890_v61, %v8897_v13  ;;  %v16949_v48 = vpack.i.b16 %v20787_v10, %v7770_v51  ;;  %v8484_v8 = vrot.slane %v8462_v11, %v18488_v35  ;;  %v8491_v3 = vrot.slane %v8463_v60, %v18488_v35 }
 0x3a9   : > { %v8906_v52 = vrot.slane %v8898_v27, %v18488_v35  ;;  %v8477_v18 = vrot.slane %v23736_v44, %v18488_v35  ;;  %v8511_v7 = vcombine.low %v20866_v36, %v20861_v16  ;;  %v16954_v4 = vcombine.high %v20866_v36, %v20861_v16 }
 0x3aa   : > { %v8913_v17 = vrot.slane %v8899_v14, %v18488_v35  ;;  %v8509_v6 = vcombine.low %v23728_v21, %v16949_v48  ;;  %v23739_v15 = vcombine.low %v23737_v5, %v23738_v23  ;;  %v8493_v51 = vcombine.low %v8484_v8, %v8491_v3 }
 0x3ab   : > { %v8492_v26 = vcombine.low %v8470_v25, %v8477_v18  ;;  %v8533_v22 = vrot.slane %v8511_v7, %v18488_v35  ;;  %v8540_v57 = vrot.slane %v16954_v4, %v18488_v35  ;;  %v6315_v49 = vadd.f32 %v20960_v29, %v23740_v1 }
 0x3ac   : > { %v8526_v10 = vrot.slane %v23739_v15, %v18488_v35  ;;  %v8914_v42 = vcombine.low %v8906_v52, %v8913_v17  ;;  %v8519_v32 = vrot.slane %v8509_v6, %v18488_v35  ;;  %v16965_v21 = vpack.i.b16 %v20873_v24, %v20869_v40  ;;  %17485 = vmatmul.mubr.msk.bf16.vlgmr.msra.gmra.mxu1 %vm8173_vm12, %v8865_v12 }
 0x3ad   : > { %v8500_v0 = vrot.slane %v8492_v26, %v18488_v35  ;;  %v8507_v50 = vrot.slane %v8493_v51, %v18488_v35  ;;  %v8542_v45 = vcombine.low %v8533_v22, %v8540_v57  ;;  %9203 = vrot.lane.b32.xlu1 %v6315_v49, %s17799_s27  ;;  %v8915_v43 = vcombine.low %v16949_v48, %v23737_v5  ;;  %v21193_v57 = vld [vmem:[%s23429_s5] ss:$0 sm:$0xff] }
 0x3ae   : > { %v7849_v20 = vunpack.i.h.s16 %v20885_v2  ;;  %17488 = vmatprep.mubr.msk.bf16.mxu1 %vm8173_vm12, %v8914_v42  ;;  %v8541_v29 = vcombine.low %v8519_v32, %v8526_v10  ;;  %v8916_v28 = vcombine.low %v23738_v23, %v20866_v36  ;;  %v8917_v24 = vcombine.low %v20861_v16, %v20998_v56 }
 0x3af   : > { %v8918_v30 = vcombine.low %v20890_v58, %v16965_v21  ;;  %v8508_v33 = vcombine.low %v8500_v0, %v8507_v50  ;;  %v8556_v41 = vrot.slane %v8542_v45, %v18488_v35  ;;  %v8925_v19 = vrot.slane %v8915_v43, %v18488_v35  ;;  %v23741_v58 = vld [vmem:[#allocation33_spill] sm:$0xff] }
 0x3b0   : > { %v7784_v38 = vunpack.i.l.s16 %v20869_v40  ;;  %v8549_v46 = vrot.slane %v8541_v29, %v18488_v35  ;;  %v8932_v61 = vrot.slane %v8916_v28, %v18488_v35  ;;  %v8939_v37 = vrot.slane %v8917_v24, %v18488_v35 }
 0x3b1   : > { %v8946_v36 = vrot.slane %v8918_v30, %v18488_v35  ;;  %17471 = vmatmul.mubr.msk.bf16.gmra.mxu0 %vm8173_vm12, %v8508_v33  ;;  %v16966_v16 = vpack.i.b16 %v20885_v2, %v7847_v31  ;;  %v16967_v56 = vpack.i.b16 %v23741_v58, %v7849_v20  ;;  %v8997_v40 = vcombine.low %v20969_v47, %v20974_v53 }
 0x3b2   : > { %v8557_v39 = vcombine.low %v8549_v46, %v8556_v41  ;;  %v8947_v63 = vcombine.low %v8925_v19, %v8932_v61  ;;  %v8981_v27 = vrot.slane %v8965_v59, %v18488_v35  ;;  %v8564_v12 = vrot.slane %v7784_v38, %v18488_v35 }
 0x3b3   : > { %v8948_v62 = vcombine.low %v8939_v37, %v8946_v36  ;;  %v8964_v13 = vcombine.low %v16966_v16, %v16967_v56  ;;  %v8757_v2 = vunpack.i.l.s16 %v8739_v54  ;;  %v9011_v25 = vrot.slane %v8997_v40, %v18488_v35 }
 0x3b4   : > { %17474 = vmatprep.mubr.msk.bf16.mxu0 %vm8173_vm12, %v8557_v39  ;;  %v8955_v31 = vrot.slane %v8947_v63, %v18488_v35  ;;  %v8571_v34 = vrot.slane %v8564_v12, %v18488_v35 }
 0x3b5   : > { %v8962_v11 = vrot.slane %v8948_v62, %v18488_v35  ;;  %v8974_v47 = vrot.slane %v8964_v13, %v18488_v35  ;;  %v9019_v55 = vrot.slane %v8757_v2, %v18488_v35 }
 0x3b7   : > { %v8963_v53 = vcombine.low %v8955_v31, %v8962_v11  ;;  %v8996_v60 = vcombine.low %v8974_v47, %v8981_v27  ;;  %v9026_v54 = vrot.slane %v9019_v55, %v18488_v35 }
 0x3b9   : > { %17489 = vmatmul.mubr.msk.bf16.gmra.mxu1 %vm8173_vm12, %v8963_v53  ;;  %v9004_v9 = vrot.slane %v8996_v60, %v18488_v35  ;;  %17475 = vmatmul.mubr.msk.bf16.gmra.mxu0 %vm8173_vm12, %v8571_v34 }
 0x3bb   : > { %v9012_v59 = vcombine.low %v9004_v9, %v9011_v25 }
 0x3bd   : > { %17492 = vmatprep.mubr.msk.bf16.mxu1 %vm8173_vm12, %v9012_v59 }
 0x3c1   : > { %17493 = vmatmul.mubr.msk.bf16.gmra.mxu1 %vm8173_vm12, %v9026_v54 }
 0x404   : > { %v9188_v32 = vpop.permute.xlu0 %9187 }
 0x405   : > { %v9186_v15 = vpop.permute.xlu1 %9185 }
 0x408   : > { %v9184_v37 = vpop.permute.xlu0 %9183 }
 0x409   : > { %v9190_v21 = vpop.permute.xlu1 %9189 }
 0x40d   : > { %v9192_v36 = vpop.permute.xlu1 %9191 }
 0x411   : > { %v9196_v59 = vpop.permute.xlu1 %9195 }
 0x443   : > { %v17450_v14 = vpop.f32.mrf.mxu1 }
 0x445   : > { %v8226_v52 = vpop.f32.mrf.mxu1 }
 0x447   : > { %v17451_v44 = vpop.f32.mrf.mxu1 }
 0x449   : > { %v8229_v18 = vpop.f32.mrf.mxu1 }
 0x45c   : > { %v17454_v48 = vpop.f32.mrf.mxu1 }
 0x45e   : > { %v8242_v8 = vpop.f32.mrf.mxu1 }
 0x460   : > { %v17455_v3 = vpop.f32.mrf.mxu1  ;;  %v17468_v7 = vpop.f32.mrf.mxu0 }
 0x461   : > { %v8651_v51 = vadd.f32 %v17468_v7, %v17450_v14 }
 0x462   : > { %v8245_v4 = vpop.f32.mrf.mxu1  ;;  %v8642_v26 = vpop.f32.mrf.mxu0 }
 0x463   : > { %v8643_v49 = vadd.f32 %v8642_v26, %v8226_v52 }
 0x464   : > { %v21184_v17 = vpop.f32.mrf.mxu1  ;;  %v17469_v23 = vpop.f32.mrf.mxu0 }
 0x465   : > { %v8654_v50 = vadd.f32 %v17469_v23, %v17451_v44 }
 0x466   : > { %v21186_v6 = vpop.f32.mrf.mxu1  ;;  %v8645_v1 = vpop.f32.mrf.mxu0 }
 0x467   : > { %v8646_v24 = vadd.f32 %v8645_v1, %v8229_v18 }
 0x468   : > { %v17459_v5 = vpop.f32.mrf.mxu1 }
 0x46a   : > { %v21188_v10 = vpop.f32.mrf.mxu1 }
 0x46c   : > { %v17486_v22 = vpop.f32.mrf.mxu1 }
 0x46d   : > { %v9145_v42 = vadd.f32 %v17486_v22, %v8651_v51 }
 0x46e   : > { %v9097_v0 = vpop.f32.mrf.mxu1 }
 0x46f   : > { %v9163_v45 = vadd.f32 %v21193_v57, %v9145_v42  ;;  %v9143_v43 = vadd.f32 %v9097_v0, %v8643_v49 }
 0x470   : > { %v17487_v29 = vpop.f32.mrf.mxu1 }
 0x471   : > { %v17472_v20 = vpop.f32.mrf.mxu0  ;;  %v9146_v28 = vadd.f32 %v17487_v29, %v8654_v50  ;;  %v9161_v30 = vadd.f32 %v21193_v57, %v9143_v43  ;;  %v9218_v19 = vadd.f32 %v9188_v32, %v9163_v45 }
 0x472   : > { %v9100_v41 = vpop.f32.mrf.mxu1  ;;  %v8667_v56 = vadd.f32 %v17472_v20, %v17454_v48  ;;  %v23744_v20 = vld [vmem:[#allocation15_spill] sm:$0xff] }
 0x473   : > { %v8658_v33 = vpop.f32.mrf.mxu0  ;;  %v9164_v38 = vadd.f32 %v21193_v57, %v9146_v28  ;;  %v9144_v46 = vadd.f32 %v9100_v41, %v8646_v24  ;;  %v9216_v58 = vadd.f32 %v9184_v37, %v9161_v30  ;;  %v9229_v62 = vmax.f32 %v9218_v19, 0.0 }
 0x474   : > { %v8659_v27 = vadd.f32 %v8658_v33, %v8242_v8 }
 0x475   : > { %v17473_v61 = vpop.f32.mrf.mxu0  ;;  %v9219_v16 = vadd.f32 %v9190_v21, %v9164_v38  ;;  %v9162_v39 = vadd.f32 %v21193_v57, %v9144_v46  ;;  %v9227_v60 = vmax.f32 %v9216_v58, 0.0 }
 0x476   : > { %v21205_v52 = vadd.f32 %v17473_v61, %v17455_v3 }
 0x477   : > { %v8661_v63 = vpop.f32.mrf.mxu0  ;;  %v9230_v40 = vmax.f32 %v9219_v16, 0.0  ;;  %v9217_v12 = vadd.f32 %v9186_v15, %v9162_v39 }
 0x478   : > { %v21207_v44 = vadd.f32 %v8661_v63, %v8245_v4 }
 0x479   : > { %v17490_v13 = vpop.f32.mrf.mxu1  ;;  %v17476_v31 = vpop.f32.mrf.mxu0  ;;  %v21199_v11 = vpack.c.bf16 %v9230_v40, %v9229_v62  ;;  %v16984_v47 = vpack.c.bf16 %v9230_v40, %v9230_v40  ;;  %v9228_v25 = vmax.f32 %v9217_v12, 0.0 }
 0x47a   : > { %v9149_v2 = vadd.f32 %v17490_v13, %v8667_v56  ;;  %v21226_v49 = vadd.f32 %v17476_v31, %v21184_v17 }
 0x47b   : > { %23742 = vst [vmem:[#allocation32_spill] sm:$0xff] %v21199_v11  ;;  %v9113_v53 = vpop.f32.mrf.mxu1  ;;  %v8674_v9 = vpop.f32.mrf.mxu0  ;;  %v9342_v54 = vrot.slane %v21199_v11, %v18488_v35  ;;  %v9349_v14 = vrot.slane %v16984_v47, %v18488_v35  ;;  %v21211_v48 = vpack.c.bf16 %v9228_v25, %v9227_v60  ;;  %v16983_v8 = vpack.c.bf16 %v9228_v25, %v9228_v25 }
 0x47c   : > { %v9167_v34 = vadd.f32 %v21193_v57, %v9149_v2  ;;  %v9147_v55 = vadd.f32 %v9113_v53, %v8659_v27  ;;  %v21229_v42 = vadd.f32 %v8674_v9, %v21186_v6 }
 0x47d   : > { %v21209_v18 = vpop.f32.mrf.mxu1  ;;  %23743 = vst [vmem:[#allocation34_spill] sm:$0xff] %v21211_v48  ;;  %v17477_v5 = vpop.f32.mrf.mxu0  ;;  %v9350_v23 = vcombine.high %v9342_v54, %v9342_v54  ;;  %v9351_v15 = vcombine.high %v9349_v14, %v9349_v14  ;;  %v9358_v51 = vrot.slane %v9342_v54, %v18488_v35  ;;  %v21218_v22 = vrot.slane %v9349_v14, %v18488_v35 }
 0x47e   : > { %v21213_v7 = vadd.f32 %v9196_v59, %v9167_v34  ;;  %v9165_v26 = vadd.f32 %v21193_v57, %v9147_v55  ;;  %v9293_v4 = vrot.slane %v21211_v48, %v18488_v35  ;;  %v9300_v1 = vrot.slane %v16983_v8, %v18488_v35  ;;  %v9194_v59 = vpop.permute.xlu0 %9193 }
 0x47f   : > { %v21220_v3 = vpop.f32.mrf.mxu1  ;;  %v9372_v0 = vrot.slane %v9350_v23, %v18488_v35  ;;  %v21233_v32 = vrot.slane %v9351_v15, %v18488_v35  ;;  %v9380_v21 = vcombine.high %v9358_v51, %v9358_v51  ;;  %v9570_v43 = vunpack.i.h.s16 %v21218_v22 }
 0x480   : > { %v9233_v50 = vmax.f32 %v21213_v7, 0.0  ;;  %v9739_v29 = vrot.slane %v9358_v51, %v23744_v20  ;;  %v9301_v28 = vcombine.high %v9293_v4, %v9293_v4  ;;  %v21240_v17 = vadd.f32 %v9192_v36, %v9165_v26 }
 0x481   : > { %v21236_v45 = vpop.f32.mrf.mxu1  ;;  %v9382_v24 = vcombine.high %v9372_v0, %v9372_v0  ;;  %v9564_v6 = vunpack.i.h.s16 %v9372_v0  ;;  %v9566_v30 = vunpack.i.h.s16 %v9380_v21  ;;  %v9302_v33 = vcombine.high %v9300_v1, %v9300_v1 }
 0x482   : > { %v9381_v19 = vcombine.high %v21218_v22, %v21218_v22  ;;  %v9572_v38 = vunpack.i.h.s16 %v21233_v32  ;;  %v16997_v46 = vpack.i.b16 %v21233_v32, %v9570_v43  ;;  %v9746_v61 = vrot.slane %v9739_v29, %v23744_v20 }
 0x483   : > { %v21242_v41 = vpop.f32.mrf.mxu1  ;;  %v9568_v37 = vunpack.i.h.s16 %v9382_v24  ;;  %v16993_v16 = vpack.i.b16 %v9372_v0, %v9372_v0  ;;  %v16995_v58 = vpack.i.b16 %v9382_v24, %v9566_v30  ;;  %v9309_v36 = vrot.slane %v9293_v4, %v18488_v35 }
 0x484   : > { %v16994_v39 = vpack.i.b16 %v9380_v21, %v9564_v6  ;;  %v9777_v63 = vrot.slane %v16997_v46, %v23744_v20  ;;  %10038 = vst.msk [vmem:[#allocation3 + $0x14] sm:$0x1] %vm7098_vm7, %v9746_v61  ;;  %v9316_v62 = vrot.slane %v9300_v1, %v18488_v35  ;;  %v9323_v40 = vrot.slane %v9301_v28, %v18488_v35  ;;  %v9200_v6 = vpop.permute.xlu1 %9199 }
 0x485   : > { %v17495_v56 = vpop.f32.mrf.mxu1  ;;  %v16996_v13 = vpack.i.b16 %v21218_v22, %v9568_v37  ;;  %v9747_v27 = vcombine.low %v16993_v16, %v16995_v58  ;;  %v9330_v12 = vrot.slane %v9302_v33, %v18488_v35  ;;  %v9331_v2 = vcombine.high %v9309_v36, %v9309_v36  ;;  %v8677_v58 = vpop.f32.mrf.mxu0 }
 0x486   : > { %v9641_v31 = vpack.i.b16 %v9572_v38, %v9572_v38  ;;  %v9784_v47 = vrot.slane %v9777_v63, %v23744_v20  ;;  %v9332_v53 = vcombine.high %v9316_v62, %v9316_v62  ;;  %v9333_v60 = vcombine.high %v9323_v40, %v9323_v40  ;;  %v10039_v56 = vld [vmem:[#allocation3 + $0x18] sm:$0xf] }
 0x487   : > { %v9748_v25 = vcombine.low %v16994_v39, %v16996_v13  ;;  %v9755_v34 = vrot.slane %v9747_v27, %v23744_v20  ;;  %v9334_v55 = vcombine.high %v9330_v12, %v9330_v12  ;;  %v9546_v9 = vunpack.i.h.s16 %v9309_v36 }
 0x488   : > { %10042 = vst.msk [vmem:[#allocation3 + $0x1c] sm:$0x1] %vm7098_vm7, %v9784_v47  ;;  %v9548_v54 = vunpack.i.h.s16 %v9323_v40  ;;  %v9550_v14 = vunpack.i.h.s16 %v9331_v2  ;;  %v9552_v8 = vunpack.i.h.s16 %v9333_v60  ;;  %v9554_v26 = vunpack.i.h.s16 %v9316_v62 }
 0x489   : > { %v9762_v5 = vrot.slane %v9748_v25, %v23744_v20  ;;  %v16988_v23 = vpack.i.b16 %v9309_v36, %v9309_v36  ;;  %v16989_v15 = vpack.i.b16 %v9323_v40, %v9546_v9  ;;  %v9710_v51 = vcombine.low %v9330_v12, %v9334_v55  ;;  %v9198_v36 = vpop.permute.xlu0 %9197  ;;  %v9204_v55 = vpop.permute.xlu1 %9203 }
 0x48a   : > { %v16990_v4 = vpack.i.b16 %v9331_v2, %v9548_v54  ;;  %v16991_v1 = vpack.i.b16 %v9333_v60, %v9550_v14  ;;  %v16992_v0 = vpack.i.b16 %v9316_v62, %v9552_v8  ;;  %v9631_v21 = vpack.i.b16 %v9554_v26, %v9554_v26  ;;  %v10031_v14 = vld [vmem:[#allocation3 + $0x8] sm:$0xf]  ;;  %v10035_v8 = vld [vmem:[#allocation3 + $0x10] sm:$0xf] }
 0x48b   : > { %v9383_v43 = vcombine.high %v21233_v32, %v21233_v32  ;;  %v9763_v29 = vcombine.low %v9755_v34, %v9762_v5  ;;  %v9724_v28 = vrot.slane %v9710_v51, %v23744_v20  ;;  %v9150_v24 = vadd.f32 %v21209_v18, %v21205_v52 }
 0x48c   : > { %v9671_v30 = vcombine.low %v16988_v23, %v16990_v4  ;;  %v9672_v33 = vcombine.low %v16989_v15, %v16991_v1  ;;  %v9701_v38 = vrot.slane %v16992_v0, %v23744_v20  ;;  %v9709_v46 = vcombine.low %v9631_v21, %v9332_v53 }
 0x48d   : > { %v9770_v61 = vrot.slane %v9763_v29, %v23744_v20  ;;  %v21267_v37 = vcombine.low %v9641_v31, %v9383_v43  ;;  %v9168_v16 = vadd.f32 %v21193_v57, %v9150_v24  ;;  %v9148_v32 = vadd.f32 %v21220_v3, %v21207_v44  ;;  %v9132_v3 = vpop.f32.mrf.mxu1  ;;  %v9202_v15 = vpop.permute.xlu0 %9201 }
 0x48e   : > { %v9679_v52 = vrot.slane %v9671_v30, %v23744_v20  ;;  %v9686_v18 = vrot.slane %v9672_v33, %v23744_v20  ;;  %v9708_v39 = vrot.slane %v9701_v38, %v23744_v20  ;;  %v9717_v63 = vrot.slane %v9709_v46, %v23744_v20 }
 0x48f   : > { %v10040_v40 = vsel %vm20335_vm9, %v9770_v61, %v10039_v56  ;;  %v9223_v13 = vadd.f32 %v9198_v36, %v9168_v16  ;;  %v9166_v27 = vadd.f32 %v21193_v57, %v9148_v32  ;;  %v9153_v44 = vadd.f32 %v21236_v45, %v21226_v49 }
 0x490   : > { %10041 = vst [vmem:[#allocation3 + $0x18] sm:$0xf] %v10040_v40  ;;  %v9687_v12 = vcombine.low %v9679_v52, %v9686_v18  ;;  %v9725_v2 = vcombine.low %v9717_v63, %v9724_v28  ;;  %10034 = vst.msk [vmem:[#allocation3 + $0xc] sm:$0x1] %vm7098_vm7, %v9708_v39  ;;  %v8678_v31 = vadd.f32 %v8677_v58, %v21188_v10  ;;  %v9231_v53 = vmax.f32 %v21240_v17, 0.0 }
 0x491   : > { %v9151_v47 = vadd.f32 %v21242_v41, %v21229_v42  ;;  %v9234_v60 = vmax.f32 %v9223_v13, 0.0  ;;  %v9221_v25 = vadd.f32 %v9194_v59, %v9166_v27  ;;  %v9171_v34 = vadd.f32 %v21193_v57, %v9153_v44 }
 0x492   : > { %v9694_v49 = vrot.slane %v9687_v12, %v23744_v20  ;;  %v9732_v45 = vrot.slane %v9725_v2, %v23744_v20  ;;  %v9152_v54 = vadd.f32 %v9132_v3, %v8678_v31  ;;  %v9793_v1 = vrot.slane %v21267_v37, %v23744_v20 }
 0x493   : > { %v9169_v9 = vadd.f32 %v21193_v57, %v9151_v47  ;;  %v21292_v10 = vpack.c.bf16 %v9234_v60, %v9233_v50  ;;  %v16986_v42 = vpack.c.bf16 %v9234_v60, %v9234_v60  ;;  %v9232_v17 = vmax.f32 %v9221_v25, 0.0 }
 0x494   : > { %v9226_v41 = vadd.f32 %v9204_v55, %v9171_v34  ;;  %v10032_v59 = vsel %vm20335_vm9, %v9694_v49, %v10031_v14  ;;  %v10036_v26 = vsel %vm20335_vm9, %v9732_v45, %v10035_v8  ;;  %v9170_v23 = vadd.f32 %v21193_v57, %v9152_v54 }
 0x495   : > { %23746 = vst [vmem:[#allocation35_spill] sm:$0xff] %v21292_v10  ;;  %v21298_v5 = vadd.f32 %v9200_v6, %v9169_v9  ;;  %10033 = vst [vmem:[#allocation3 + $0x8] sm:$0xf] %v10032_v59  ;;  %v9440_v7 = vrot.slane %v21292_v10, %v18488_v35  ;;  %v9447_v50 = vrot.slane %v16986_v42, %v18488_v35 }
 0x496   : > { %10037 = vst [vmem:[#allocation3 + $0x10] sm:$0xf] %v10036_v26  ;;  %v21304_v51 = vpack.c.bf16 %v9232_v17, %v9231_v53  ;;  %v16985_v4 = vpack.c.bf16 %v9232_v17, %v9232_v17  ;;  %v9237_v0 = vmax.f32 %v9226_v41, 0.0  ;;  %v9225_v43 = vadd.f32 %v9202_v15, %v9170_v23 }
 0x497   : > { %v9235_v21 = vmax.f32 %v21298_v5, 0.0  ;;  %v9448_v29 = vcombine.high %v9440_v7, %v9440_v7  ;;  %v9449_v57 = vcombine.high %v9447_v50, %v9447_v50  ;;  %v21310_v28 = vrot.slane %v9440_v7, %v18488_v35 }
 0x498   : > { %23747 = vst [vmem:[#allocation37_spill] sm:$0xff] %v21304_v51  ;;  %v9463_v24 = vrot.slane %v9447_v50, %v18488_v35  ;;  %v9391_v6 = vrot.slane %v21304_v51, %v18488_v35  ;;  %v9398_v30 = vrot.slane %v16985_v4, %v18488_v35  ;;  %v21316_v33 = vpack.c.bf16 %v9237_v0, %v9237_v0 }
 0x499   : > { %v21318_v38 = vmax.f32 %v9225_v43, 0.0  ;;  %v9470_v46 = vrot.slane %v9448_v29, %v18488_v35  ;;  %v9477_v61 = vrot.slane %v9449_v57, %v18488_v35  ;;  %v9478_v16 = vcombine.high %v21310_v28, %v21310_v28 }
 0x49a   : > { %23748 = vst [vmem:[#allocation38_spill] sm:$0xff] %v21316_v33  ;;  %v9479_v32 = vcombine.high %v9463_v24, %v9463_v24  ;;  %v9602_v58 = vunpack.i.h.s16 %v9463_v24  ;;  %v9399_v36 = vcombine.high %v9391_v6, %v9391_v6  ;;  %v9400_v56 = vcombine.high %v9398_v30, %v9398_v30 }
 0x49b   : > { %v9407_v52 = vrot.slane %v9391_v6, %v18488_v35  ;;  %v9480_v18 = vcombine.high %v9470_v46, %v9470_v46  ;;  %v21325_v39 = vcombine.high %v9477_v61, %v9477_v61  ;;  %v9604_v63 = vunpack.i.h.s16 %v9477_v61 }
 0x49c   : > { %v9606_v40 = vunpack.i.h.s16 %v9479_v32  ;;  %v17005_v13 = vpack.i.b16 %v9477_v61, %v9602_v58  ;;  %v9891_v27 = vrot.slane %v9478_v16, %v23744_v20  ;;  %v9414_v44 = vrot.slane %v9398_v30, %v18488_v35 }
 0x49d   : > { %v9421_v3 = vrot.slane %v9399_v36, %v18488_v35  ;;  %v9600_v12 = vunpack.i.h.s16 %v9480_v18  ;;  %v9608_v2 = vunpack.i.h.s16 %v21325_v39  ;;  %v17003_v31 = vpack.i.b16 %v9480_v18, %v9480_v18 }
 0x49e   : > { %v17006_v47 = vpack.i.b16 %v9479_v32, %v9604_v63  ;;  %v17007_v53 = vpack.i.b16 %v21325_v39, %v9606_v40  ;;  %v9898_v60 = vrot.slane %v9891_v27, %v23744_v20  ;;  %v9428_v25 = vrot.slane %v9400_v56, %v18488_v35  ;;  %v21355_v40 = vld [vmem:[#allocation3 + $0x8] sm:$0x3f]  }
 0x49f   : > { %v9429_v34 = vcombine.high %v9407_v52, %v9407_v52  ;;  %v17004_v55 = vpack.i.b16 %v9463_v24, %v9600_v12  ;;  %v9899_v49 = vcombine.low %v17003_v31, %v17005_v13  ;;  %v9430_v45 = vcombine.high %v9414_v44, %v9414_v44  ;;  %v10055_v13 = vld [vmem:[#allocation3 + $0x38] sm:$0xf] }
 0x4a0   : > { %v9431_v9 = vcombine.high %v9421_v3, %v9421_v3  ;;  %v9929_v54 = vrot.slane %v17007_v53, %v23744_v20  ;;  %10054 = vst.msk [vmem:[#allocation3 + $0x34] sm:$0x1] %vm7098_vm7, %v9898_v60  ;;  %v9432_v14 = vcombine.high %v9428_v25, %v9428_v25  ;;  %v9586_v42 = vunpack.i.h.s16 %v9414_v44 }
 0x4a1   : > { %v9582_v8 = vunpack.i.h.s16 %v9429_v34  ;;  %v9900_v17 = vcombine.low %v17004_v55, %v17006_v47  ;;  %v9907_v41 = vrot.slane %v9899_v49, %v23744_v20  ;;  %v9588_v26 = vunpack.i.h.s16 %v9428_v25 }
 0x4a2   : > { %v9584_v59 = vunpack.i.h.s16 %v9431_v9  ;;  %v9936_v23 = vrot.slane %v9929_v54, %v23744_v20  ;;  %v9590_v15 = vunpack.i.h.s16 %v9430_v45  ;;  %v16998_v7 = vpack.i.b16 %v9429_v34, %v9429_v34  ;;  %v10043_v34 = vld [vmem:[#allocation3 + $0x20] sm:$0xf] }
 0x4a3   : > { %v16999_v50 = vpack.i.b16 %v9431_v9, %v9582_v8  ;;  %v9914_v4 = vrot.slane %v9900_v17, %v23744_v20  ;;  %v17001_v43 = vpack.i.b16 %v9428_v25, %v9586_v42  ;;  %v17002_v29 = vpack.i.b16 %v9430_v45, %v9588_v26  ;;  %v10047_v9 = vld [vmem:[#allocation3 + $0x28] sm:$0xf]  ;;  %v10051_v42 = vld [vmem:[#allocation3 + $0x30] sm:$0xf] }
 0x4a4   : > { %v17000_v0 = vpack.i.b16 %v9414_v44, %v9584_v59  ;;  %10058 = vst.msk [vmem:[#allocation3 + $0x3c] sm:$0x1] %vm7098_vm7, %v9936_v23  ;;  %v9651_v57 = vpack.i.b16 %v9590_v15, %v9590_v15  ;;  %v9786_v24 = vcombine.low %v9381_v19, %v9407_v52  ;;  %v9815_v6 = vrot.slane %v9421_v3, %v23744_v20  ;;  %v21353_v52 = vld [vmem:[#allocation3 + $0x10] sm:$0x3f]  }
 0x4a5   : > { %v9862_v30 = vcombine.low %v9432_v14, %v9470_v46  ;;  %v9915_v61 = vcombine.low %v9907_v41, %v9914_v4  ;;  %v9824_v32 = vcombine.low %v16999_v50, %v17001_v43  ;;  %v9853_v58 = vrot.slane %v17002_v29, %v23744_v20 }
 0x4a6   : > { %v9823_v16 = vcombine.low %v16998_v7, %v17000_v0  ;;  %v9800_v36 = vrot.slane %v9786_v24, %v23744_v20  ;;  %v9822_v56 = vrot.slane %v9815_v6, %v23744_v20  ;;  %v9861_v18 = vcombine.low %v9651_v57, %v21310_v28 }
 0x4a7   : > { %v9876_v39 = vrot.slane %v9862_v30, %v23744_v20  ;;  %v9922_v63 = vrot.slane %v9915_v61, %v23744_v20  ;;  %v9838_v19 = vrot.slane %v9824_v32, %v23744_v20  ;;  %v9860_v46 = vrot.slane %v9853_v58, %v23744_v20 }
 0x4a8   : > { %v9831_v22 = vrot.slane %v9823_v16, %v23744_v20  ;;  %v9801_v27 = vcombine.low %v9793_v1, %v9800_v36  ;;  %v9869_v28 = vrot.slane %v9861_v18, %v23744_v20  ;;  %10046 = vst.msk [vmem:[#allocation3 + $0x24] sm:$0x1] %vm7098_vm7, %v9822_v56  ;;  %v9537_v44 = vrot.slane %v21316_v33, %v18488_v35 }
 0x4a9   : > { %v21367_v3 = vpack.c.bf16 %v21318_v38, %v9235_v21  ;;  %v10056_v12 = vsel %vm20335_vm9, %v9922_v63, %v10055_v13  ;;  %10050 = vst.msk [vmem:[#allocation3 + $0x2c] sm:$0x1] %vm7098_vm7, %v9860_v46  ;;  %v16987_v37 = vpack.c.bf16 %v21318_v38, %v21318_v38  ;;  %v9661_v1 = vpack.i.b16 %v9608_v2, %v9608_v2  ;;  %v21378_v21 = vld [vmem:[#allocation3 + $0x18] sm:$0x3f]  }
 0x4aa   : > { %v9839_v31 = vcombine.low %v9831_v22, %v9838_v19  ;;  %10057 = vst [vmem:[#allocation3 + $0x38] sm:$0xf] %v10056_v12  ;;  %v9808_v47 = vrot.slane %v9801_v27, %v23744_v20  ;;  %v9877_v53 = vcombine.low %v9869_v28, %v9876_v39  ;;  %v9544_v60 = vrot.slane %v9537_v44, %v18488_v35 }
 0x4ab   : > { %23749 = vst [vmem:[#allocation36_spill] sm:$0xff] %v21367_v3  ;;  %v9489_v5 = vrot.slane %v21367_v3, %v18488_v35  ;;  %v9496_v55 = vrot.slane %v16987_v37, %v18488_v35  ;;  %v10217_v49 = vrot.slane %v21353_v52, 1  ;;  %v10216_v38 = vrot.slane %v21355_v40, 1 }
 0x4ac   : > { %v9846_v25 = vrot.slane %v9839_v31, %v23744_v20  ;;  %v9884_v2 = vrot.slane %v9877_v53, %v23744_v20  ;;  %v10044_v45 = vsel %vm20335_vm9, %v9808_v47, %v10043_v34  ;;  %v10218_v15 = vrot.slane %v21378_v21, 1 }
 0x4ad   : > { %v9497_v54 = vcombine.high %v9489_v5, %v9489_v5  ;;  %v9505_v14 = vrot.slane %v9489_v5, %v18488_v35  ;;  %10045 = vst [vmem:[#allocation3 + $0x20] sm:$0xf] %v10044_v45  ;;  %v9498_v17 = vcombine.high %v9496_v55, %v9496_v55  ;;  %v9512_v41 = vrot.slane %v9496_v55, %v18488_v35 }
 0x4ae   : > { %v10048_v8 = vsel %vm20335_vm9, %v9846_v25, %v10047_v9  ;;  %10228 = vrot.lane.b32.xlu1 %v10217_v49, %s17798_s17  ;;  %10226 = vrot.lane.b32.xlu0 %v10216_v38, %s17798_s17  ;;  %v10052_v59 = vsel %vm20335_vm9, %v9884_v2, %v10051_v42  ;;  %v10149_v0 = vshrl.u32 %v21353_v52, 16  ;;  %v10151_v24 = vshll.u32 %v21353_v52, 16 }
 0x4af   : > { %10049 = vst [vmem:[#allocation3 + $0x28] sm:$0xf] %v10048_v8  ;;  %v9519_v26 = vrot.slane %v9497_v54, %v18488_v35  ;;  %v9527_v23 = vcombine.high %v9505_v14, %v9505_v14  ;;  %10053 = vst [vmem:[#allocation3 + $0x30] sm:$0xf] %v10052_v59  ;;  %v9526_v7 = vrot.slane %v9498_v17, %v18488_v35  ;;  %v9618_v4 = vunpack.i.h.s16 %v9512_v41 }
 0x4b0   : > { %v9528_v50 = vcombine.high %v9512_v41, %v9512_v41  ;;  %v17008_v16 = vpack.i.b16 %v9512_v41, %v9512_v41  ;;  %v10153_v56 = vrot.slane %v10151_v24, 1  ;;  %v10144_v27 = vshll.u32 %v21355_v40, 16 }
 0x4b1   : > { %v9529_v43 = vcombine.high %v9519_v26, %v9519_v26  ;;  %v9937_v29 = vcombine.low %v9661_v1, %v9519_v26  ;;  %v9938_v57 = vcombine.low %v9505_v14, %v9527_v23  ;;  %v9530_v6 = vcombine.high %v9526_v7, %v9526_v7  ;;  %v21431_v26 = vld [vmem:[#allocation3 + $0x38] sm:$0x3f]   ;;  %v10063_v23 = vld [vmem:[#allocation3 + $0x48] sm:$0xf] }
 0x4b2   : > { %v9620_v30 = vunpack.i.h.s16 %v9526_v7  ;;  %v9622_v61 = vunpack.i.h.s16 %v9528_v50  ;;  %10230 = vrot.lane.b32.xlu1 %v10218_v15, %s17798_s17  ;;  %v17009_v39 = vpack.i.b16 %v9526_v7, %v9618_v4  ;;  %v10154_v13 = vor.u32 %v10153_v56, %v10149_v0 }
 0x4b3   : > { %v9945_v32 = vrot.slane %v9937_v29, %v23744_v20  ;;  %v9952_v58 = vrot.slane %v9938_v57, %v23744_v20  ;;  %v9967_v36 = vrot.slane %v9529_v43, %v23744_v20  ;;  %v9624_v18 = vunpack.i.h.s16 %v9530_v6 }
 0x4b4   : > { %v17010_v63 = vpack.i.b16 %v9528_v50, %v9620_v30  ;;  %v17011_v22 = vpack.i.b16 %v9530_v6, %v9622_v61  ;;  %v21406_v28 = vld [vmem:[#allocation3 + $0x20] sm:$0x3f]   ;;  %10201 = vrot.lane.b32.xlu0 %v10154_v13, %s17794_s15  ;;  %v10142_v1 = vshrl.u32 %v21355_v40, 16  ;;  %v10146_v47 = vrot.slane %v10144_v27, 1 }
 0x4b5   : > { %v9953_v19 = vcombine.low %v9945_v32, %v9952_v58  ;;  %v9974_v46 = vrot.slane %v9967_v36, %v23744_v20  ;;  %v17012_v44 = vpack.i.b16 %v9544_v60, %v9624_v18  ;;  %v10158_v53 = vshll.u32 %v21378_v21, 16  ;;  %v10059_v60 = vld [vmem:[#allocation3 + $0x40] sm:$0xf] }
 0x4b6   : > { %v9975_v12 = vcombine.low %v17008_v16, %v17010_v63  ;;  %v9976_v31 = vcombine.low %v17009_v39, %v17011_v22  ;;  %v10219_v55 = vrot.slane %v21406_v28, 1  ;;  %v10147_v38 = vor.u32 %v10146_v47, %v10142_v1  ;;  %v21420_v9 = vld [vmem:[#allocation3 + $0x30] sm:$0x3f]   ;;  %v21429_v59 = vld [vmem:[#allocation3 + $0x28] sm:$0x3f]   ;;  %v17717_v16 = vld [vmem:[%s23430_s6 + $0x28] sm:$0xff]  }
 0x4b7   : > { %v9960_v37 = vrot.slane %v9953_v19, %v23744_v20  ;;  %10062 = vst.msk [vmem:[#allocation3 + $0x44] sm:$0x1] %vm7098_vm7, %v9974_v46  ;;  %v10005_v34 = vrot.slane %v17012_v44, %v23744_v20  ;;  %v10160_v2 = vrot.slane %v10158_v53, 1  ;;  %v10165_v45 = vshll.u32 %v21406_v28, 16  ;;  %17496 = vmatprep.subr.bf16.mxu0 %v17717_v16  ;;  %v21458_v22 = vld [vmem:[#allocation3] sm:$0x3f]  }
 0x4b8   : > { %v9983_v5 = vrot.slane %v9975_v12, %v23744_v20  ;;  %v9990_v25 = vrot.slane %v9976_v31, %v23744_v20  ;;  %10199 = vrot.lane.b32.xlu1 %v10147_v38, %s17794_s15  ;;  %10232 = vrot.lane.b32.xlu0 %v10219_v55, %s17798_s17  ;;  %v10156_v8 = vshrl.u32 %v21378_v21, 16  ;;  %v10163_v42 = vshrl.u32 %v21406_v28, 16  ;;  %v17718_v19 = vld [vmem:[%s23430_s6 + $0x20] sm:$0xff]  }
 0x4b9   : > { %v10060_v49 = vsel %vm20335_vm9, %v9960_v37, %v10059_v60  ;;  %v10012_v14 = vrot.slane %v10005_v34, %v23744_v20  ;;  %v10167_v17 = vrot.slane %v10165_v45, 1  ;;  %v10179_v50 = vshll.u32 %v21420_v9, 16  ;;  %17497 = vmatpush3.bf16.msra.mxu0 %v17717_v16  ;;  %v21468_v37 = vld [vmem:[#allocation3 + $0x50] sm:$0x3f]  }
 0x4ba   : > { %v9991_v54 = vcombine.low %v9983_v5, %v9990_v25  ;;  %10061 = vst [vmem:[#allocation3 + $0x40] sm:$0xf] %v10060_v49  ;;  %v10161_v15 = vor.u32 %v10160_v2, %v10156_v8  ;;  %v10221_v0 = vrot.slane %v21420_v9, 1  ;;  %v10220_v43 = vrot.slane %v21429_v59, 1  ;;  %17498 = vmatprep.subr.bf16.mxu0 %v17718_v19 }
 0x4bb   : > { %10066 = vst.msk [vmem:[#allocation3 + $0x4c] sm:$0x1] %vm7098_vm7, %v10012_v14  ;;  %v10168_v7 = vor.u32 %v10167_v17, %v10163_v42  ;;  %v10186_v29 = vshll.u32 %v21431_v26, 16  ;;  %v10181_v57 = vrot.slane %v10179_v50, 1  ;;  %v10172_v24 = vshll.u32 %v21429_v59, 16  ;;  %v17719_v42 = vld [vmem:[%s23430_s6 + $0x18] sm:$0xff]  }
 0x4bc   : > { %v9998_v41 = vrot.slane %v9991_v54, %v23744_v20  ;;  %10203 = vrot.lane.b32.xlu1 %v10161_v15, %s17794_s15  ;;  %v10177_v30 = vshrl.u32 %v21420_v9, 16  ;;  %v10222_v61 = vrot.slane %v21431_v26, 1  ;;  %v10184_v39 = vshrl.u32 %v21431_v26, 16  ;;  %v17720_v17 = vld [vmem:[%s23430_s6 + $0x10] sm:$0xff]   ;;  %v17724_v15 = vld [vmem:[%s23430_s6] sm:$0xff]  }
 0x4bd   : > { %10205 = vrot.lane.b32.xlu0 %v10168_v7, %s17794_s15  ;;  %v10188_v58 = vrot.slane %v10186_v29, 1  ;;  %v10174_v36 = vrot.slane %v10172_v24, 1  ;;  %v10170_v63 = vshrl.u32 %v21429_v59, 16  ;;  %v10137_v31 = vshll.u32 %v21458_v22, 16  ;;  %17499 = vmatpush3.bf16.msra.mxu0 %v17718_v19 }
 0x4be   : > { %v10064_v4 = vsel %vm20335_vm9, %v9998_v41, %v10063_v23  ;;  %v10182_v32 = vor.u32 %v10181_v57, %v10177_v30  ;;  %v10135_v25 = vshrl.u32 %v21458_v22, 16  ;;  %v11629_v60 = vshll.u32 %v21468_v37, 16  ;;  %17500 = vmatprep.subr.bf16.mxu0 %v17719_v42  ;;  %17514 = vmatprep.subr.bf16.mxu1 %v17720_v17  ;;  %v21495_v41 = vld [vmem:[%s23430_s6 + $0x40] sm:$0xff]   ;;  %v17722_v23 = vld [vmem:[%s23430_s6 + $0x8] sm:$0xff]  }
 0x4bf   : > { %10065 = vst [vmem:[#allocation3 + $0x48] sm:$0xf] %v10064_v4  ;;  %v10189_v46 = vor.u32 %v10188_v58, %v10184_v39  ;;  %v10175_v13 = vor.u32 %v10174_v36, %v10170_v63  ;;  %v10139_v34 = vrot.slane %v10137_v31, 1  ;;  %v10215_v2 = vrot.slane %v21458_v22, 1  ;;  %17515 = vmatpush3.bf16.msra.mxu1 %v17720_v17 }
 0x4c0   : > { %10236 = vrot.lane.b32.xlu1 %v10221_v0, %s17798_s17  ;;  %v11627_v45 = vshrl.u32 %v21468_v37, 16  ;;  %v11631_v54 = vrot.slane %v11629_v60, 1  ;;  %v11635_v8 = vrot.slane %v21468_v37, 1  ;;  %17516 = vmatprep.subr.bf16.mxu1 %v17722_v23 }
 0x4c1   : > { %v21442_v6 = vld [vmem:[#allocation3 + $0x40] sm:$0x3f]   ;;  %10234 = vrot.lane.b32.xlu0 %v10220_v43, %s17798_s17  ;;  %v10140_v38 = vor.u32 %v10139_v34, %v10135_v25  ;;  %17501 = vmatpush3.bf16.msra.mxu0 %v17719_v42 }
 0x4c2   : > { %v10193_v56 = vshll.u32 %v21442_v6, 16  ;;  %v10191_v12 = vshrl.u32 %v21442_v6, 16  ;;  %v10223_v1 = vrot.slane %v21442_v6, 1  ;;  %v11632_v14 = vor.u32 %v11631_v54, %v11627_v45  ;;  %17532 = vmatprep.subr.bf16.mxu0 %v21495_v41 }
 0x4c3   : > { %17517 = vmatpush3.bf16.msra.mxu1 %v17722_v23 }
 0x4c4   : > { %10238 = vrot.lane.b32.xlu1 %v10222_v61, %s17798_s17  ;;  %v10195_v27 = vrot.slane %v10193_v56, 1  ;;  %17518 = vmatprep.subr.bf16.mxu1 %v17724_v15 }
 0x4c5   : > { %10209 = vrot.lane.b32.xlu0 %v10182_v32, %s17794_s15 }
 0x4c6   : > { %v21452_v18 = vld [vmem:[#allocation3 + $0x48] sm:$0x3f]   ;;  %v10196_v47 = vor.u32 %v10195_v27, %v10191_v12 }
 0x4c7   : > { %v10727_v44 = vshll.u32 %v21452_v18, 16  ;;  %v10725_v5 = vshrl.u32 %v21452_v18, 16  ;;  %v10733_v55 = vrot.slane %v21452_v18, 1  ;;  %17519 = vmatpush3.bf16.msra.mxu1 %v17724_v15 }
 0x4c8   : > { %10211 = vrot.lane.b32.xlu1 %v10189_v46, %s17794_s15 }
 0x4c9   : > { %10207 = vrot.lane.b32.xlu0 %v10175_v13, %s17794_s15  ;;  %v10729_v53 = vrot.slane %v10727_v44, 1 }
 0x4cb   : > { %v10730_v49 = vor.u32 %v10729_v53, %v10725_v5 }
 0x4cc   : > { %10240 = vrot.lane.b32.xlu1 %v10223_v1, %s17798_s17 }
 0x4cd   : > { %10213 = vrot.lane.b32.xlu0 %v10196_v47, %s17794_s15 }
 0x4d0   : > { %10734 = vrot.lane.b32.xlu1 %v10733_v55, %s17798_s17 }
 0x4d1   : > { %10731 = vrot.lane.b32.xlu0 %v10730_v49, %s17794_s15 }
 0x4d4   : > { %10224 = vrot.lane.b32.xlu1 %v10215_v2, %s17798_s17 }
 0x4d5   : > { %10197 = vrot.lane.b32.xlu0 %v10140_v38, %s17794_s15 }
 0x4d8   : > { %11636 = vrot.lane.b32.xlu1 %v11635_v8, %s17798_s17 }
 0x4d9   : > { %11633 = vrot.lane.b32.xlu0 %v11632_v14, %s17794_s15 }
 0x520   : > { %v10229_v7 = vpop.permute.xlu1 %10228  ;;  %v10227_v50 = vpop.permute.xlu0 %10226 }
 0x524   : > { %v10231_v4 = vpop.permute.xlu1 %10230 }
 0x526   : > { %v10202_v0 = vpop.permute.xlu0 %10201 }
 0x527   : > { %v10247_v43 = vsel %vm1222_vm11, %v21353_v52, %v10202_v0 }
 0x528   : > { %v10265_v29 = vsel %vm7325_vm10, %v10247_v43, %v10229_v7 }
 0x529   : > { %v10365_v57 = vcombine.high %v10265_v29, %v10265_v29  ;;  %v10372_v24 = vrot.slane %v10265_v29, %v18488_v35 }
 0x52a   : > { %v10200_v30 = vpop.permute.xlu1 %10199  ;;  %v10233_v61 = vpop.permute.xlu0 %10232 }
 0x52b   : > { %v10379_v16 = vrot.slane %v10365_v57, %v18488_v35  ;;  %v10380_v32 = vcombine.high %v10372_v24, %v10372_v24  ;;  %v21510_v58 = vrot.slane %v10372_v24, %v18488_v35  ;;  %v10245_v36 = vsel %vm1222_vm11, %v21355_v40, %v10200_v30 }
 0x52c   : > { %v10263_v56 = vsel %vm7325_vm10, %v10245_v36, %v10227_v50 }
 0x52d   : > { %v21516_v52 = vrot.slane %v10380_v32, %v18488_v35  ;;  %v21520_v39 = vcombine.high %v21510_v58, %v21510_v58  ;;  %v10326_v63 = vcombine.high %v10263_v56, %v10263_v56  ;;  %v10333_v19 = vrot.slane %v10263_v56, %v18488_v35 }
 0x52e   : > { %v10204_v46 = vpop.permute.xlu1 %10203  ;;  %v10394_v27 = vrot.slane %v10379_v16, %v18488_v35  ;;  %v10657_v47 = vunpack.i.h.s16 %v21510_v58 }
 0x52f   : > { %v10206_v13 = vpop.permute.xlu0 %10205  ;;  %v21526_v44 = vcombine.high %v21516_v52, %v21516_v52  ;;  %v10340_v40 = vrot.slane %v10326_v63, %v18488_v35  ;;  %v10249_v12 = vsel %vm1222_vm11, %v21378_v21, %v10204_v46  ;;  %v10341_v31 = vcombine.high %v10333_v19, %v10333_v19 }
 0x530   : > { %v21532_v1 = vrot.slane %v10333_v19, %v18488_v35  ;;  %v10267_v53 = vsel %vm7325_vm10, %v10249_v12, %v10231_v4  ;;  %v11296_v34 = vcombine.low %v21516_v52, %v21520_v39  ;;  %v10251_v49 = vsel %vm1222_vm11, %v21406_v28, %v10206_v13 }
 0x531   : > { %v10663_v5 = vunpack.i.h.s16 %v21526_v44  ;;  %v10355_v25 = vrot.slane %v10340_v40, %v18488_v35  ;;  %v10404_v60 = vcombine.high %v10267_v53, %v10267_v53  ;;  %v21541_v55 = vrot.slane %v10341_v31, %v18488_v35 }
 0x532   : > { %v10411_v21 = vrot.slane %v10267_v53, %v18488_v35  ;;  %v10237_v38 = vpop.permute.xlu1 %10236  ;;  %v21550_v54 = vcombine.high %v21532_v1, %v21532_v1  ;;  %v10269_v8 = vsel %vm7325_vm10, %v10251_v49, %v10233_v61  ;;  %v17024_v15 = vpack.i.b16 %v21516_v52, %v10657_v47 }
 0x533   : > { %v21546_v2 = vpop.permute.xlu0 %10234  ;;  %v17027_v45 = vpack.i.b16 %v10394_v27, %v10663_v5  ;;  %v17023_v14 = vpack.i.b16 %v21510_v58, %v10355_v25  ;;  %v10364_v42 = vcombine.high %v21541_v55, %v21541_v55  ;;  %v10418_v17 = vrot.slane %v10404_v60, %v18488_v35 }
 0x534   : > { %23750 = vst [vmem:[#allocation28_spill] sm:$0xff] %v21550_v54  ;;  %v10419_v23 = vcombine.high %v10411_v21, %v10411_v21  ;;  %v10426_v28 = vrot.slane %v10411_v21, %v18488_v35  ;;  %v21560_v7 = vrot.slane %v11296_v34, %v18488_v35  ;;  %v10443_v50 = vcombine.high %v10269_v8, %v10269_v8 }
 0x535   : > { %v10654_v4 = vunpack.i.h.s16 %v10364_v42  ;;  %v10450_v29 = vrot.slane %v10269_v8, %v18488_v35  ;;  %v10652_v57 = vunpack.i.h.s16 %v21550_v54  ;;  %v21569_v24 = vcombine.low %v17023_v14, %v17024_v15 }
 0x536   : > { %v21563_v0 = vrot.slane %v10419_v23, %v18488_v35  ;;  %v21565_v43 = vcombine.high %v10426_v28, %v10426_v28  ;;  %v10879_v30 = vcombine.low %v17027_v45, %v10426_v28  ;;  %v21571_v61 = vpack.i.b16 %v10426_v28, %v10394_v27  ;;  %v10239_v63 = vpop.permute.xlu1 %10238 }
 0x537   : > { %v17059_v16 = vpack.i.b16 %v10355_v25, %v10654_v4  ;;  %v21574_v32 = vrot.slane %v10418_v17, %v18488_v35  ;;  %v10666_v56 = vunpack.i.h.s16 %v10426_v28  ;;  %v10210_v19 = vpop.permute.xlu0 %10209  ;;  %v10457_v27 = vrot.slane %v10443_v50, %v18488_v35 }
 0x538   : > { %v21578_v36 = vcombine.high %v21563_v0, %v21563_v0  ;;  %v10670_v46 = vunpack.i.h.s16 %v21565_v43  ;;  %v10880_v13 = vcombine.low %v21563_v0, %v21565_v43  ;;  %v21584_v40 = vrot.slane %v10879_v30, %v18488_v35 }
 0x539   : > { %v11295_v12 = vcombine.low %v17059_v16, %v21510_v58  ;;  %v11297_v47 = vcombine.low %v21526_v44, %v21571_v61  ;;  %v10458_v53 = vcombine.high %v10450_v29, %v10450_v29  ;;  %v21591_v5 = vpack.i.b16 %v10364_v42, %v10652_v57 }
 0x53a   : > { %v10672_v31 = vunpack.i.h.s16 %v21578_v36  ;;  %v21595_v34 = vrot.slane %v10880_v13, %v18488_v35  ;;  %v21598_v60 = vrot.slane %v10450_v29, %v18488_v35  ;;  %v10255_v14 = vsel %vm1222_vm11, %v21420_v9, %v10210_v19  ;;  %v10212_v4 = vpop.permute.xlu1 %10211 }
 0x53b   : > { %23751 = vst [vmem:[#allocation29_spill] sm:$0xff] %v21591_v5  ;;  %v11305_v21 = vrot.slane %v11295_v12, %v18488_v35  ;;  %v21605_v45 = vrot.slane %v10458_v53, %v18488_v35  ;;  %v21610_v8 = vpack.i.b16 %v21563_v0, %v10666_v56  ;;  %v21613_v42 = vpack.i.b16 %v21578_v36, %v10670_v46  ;;  %v10208_v29 = vpop.permute.xlu0 %10207 }
 0x53c   : > { %v21602_v49 = vpack.i.b16 %v21574_v32, %v10672_v31  ;;  %v21617_v17 = vcombine.high %v21598_v60, %v21598_v60  ;;  %v10675_v23 = vunpack.i.h.s16 %v21598_v60  ;;  %v21623_v15 = vrot.slane %v11297_v47, %v18488_v35 }
 0x53d   : > { %23753 = vst [vmem:[#allocation12_spill] sm:$0xff] %v21605_v45  ;;  %v21626_v9 = vrot.slane %v10457_v27, %v18488_v35  ;;  %v21630_v50 = vcombine.high %v21605_v45, %v21605_v45  ;;  %v11327_v57 = vcombine.low %v11305_v21, %v21560_v7  ;;  %v10273_v56 = vsel %vm7325_vm10, %v10255_v14, %v10237_v38 }
 0x53e   : > { %23752 = vst [vmem:[#allocation24_spill] sm:$0xff] %v21602_v49  ;;  %23754 = vst [vmem:[#allocation10_spill] sm:$0xff] %v21617_v17  ;;  %v10677_v19 = vunpack.i.h.s16 %v21605_v45  ;;  %v10679_v46 = vunpack.i.h.s16 %v21617_v17  ;;  %v10521_v27 = vcombine.high %v10273_v56, %v10273_v56  ;;  %v21642_v12 = vpack.i.b16 %v21605_v45, %v10675_v23 }
 0x53f   : > { %23755 = vst [vmem:[#allocation5_spill] sm:$0xff] %v21626_v9  ;;  %23756 = vst [vmem:[#allocation9_spill] sm:$0xff] %v21630_v50  ;;  %v10681_v13 = vunpack.i.h.s16 %v21630_v50  ;;  %v10528_v7 = vrot.slane %v10273_v56, %v18488_v35  ;;  %v10257_v31 = vsel %vm1222_vm11, %v21431_v26, %v10212_v4  ;;  %v10253_v47 = vsel %vm1222_vm11, %v21429_v59, %v10208_v29 }
 0x540   : > { %v10535_v53 = vrot.slane %v10521_v27, %v18488_v35  ;;  %v10275_v21 = vsel %vm7325_vm10, %v10257_v31, %v10239_v63  ;;  %v10271_v14 = vsel %vm7325_vm10, %v10253_v47, %v21546_v2  ;;  %v21660_v4 = vpack.i.b16 %v21630_v50, %v10679_v46 }
 0x541   : > { %v10536_v23 = vcombine.high %v10528_v7, %v10528_v7  ;;  %v21656_v30 = vrot.slane %v10528_v7, %v18488_v35  ;;  %v10560_v56 = vcombine.high %v10275_v21, %v10275_v21  ;;  %v10567_v26 = vrot.slane %v10275_v21, %v18488_v35 }
 0x542   : > { %v21663_v59 = vpack.i.b16 %v21626_v9, %v10681_v13  ;;  %v10482_v29 = vcombine.high %v10271_v14, %v10271_v14  ;;  %v10489_v27 = vrot.slane %v10271_v14, %v18488_v35  ;;  %v10550_v63 = vrot.slane %v10535_v53, %v18488_v35 }
 0x543   : > { %v21668_v2 = vrot.slane %v10536_v23, %v18488_v35  ;;  %v10575_v31 = vcombine.high %v10567_v26, %v10567_v26  ;;  %v21671_v7 = vrot.slane %v10567_v26, %v18488_v35  ;;  %v10574_v47 = vrot.slane %v10560_v56, %v18488_v35  ;;  %v10214_v56 = vpop.permute.xlu0 %10213 }
 0x544   : > { %v10496_v46 = vrot.slane %v10482_v29, %v18488_v35  ;;  %v10497_v21 = vcombine.high %v10489_v27, %v10489_v27  ;;  %v21676_v13 = vrot.slane %v10489_v27, %v18488_v35  ;;  %v10693_v26 = vunpack.i.h.s16 %v21656_v30 }
 0x545   : > { %v21680_v14 = vcombine.high %v21668_v2, %v21668_v2  ;;  %v21683_v53 = vrot.slane %v10575_v31, %v18488_v35  ;;  %v21687_v23 = vcombine.high %v21671_v7, %v21671_v7  ;;  %v21691_v29 = vrot.slane %v11327_v57, %v18488_v35  ;;  %v10241_v31 = vpop.permute.xlu1 %10240 }
 0x546   : > { %v21694_v27 = vpack.i.b16 %v21617_v17, %v10677_v19  ;;  %v10702_v38 = vunpack.i.h.s16 %v21671_v7  ;;  %v10511_v25 = vrot.slane %v10496_v46, %v18488_v35  ;;  %v21707_v57 = vrot.slane %v10574_v47, %v18488_v35 }
 0x547   : > { %23757 = vst [vmem:[#allocation16_spill] sm:$0xff] %v21691_v29  ;;  %v10699_v28 = vunpack.i.h.s16 %v21680_v14  ;;  %v21703_v16 = vcombine.high %v21683_v53, %v21683_v53  ;;  %v10706_v3 = vunpack.i.h.s16 %v21687_v23  ;;  %v21710_v19 = vrot.slane %v10497_v21, %v18488_v35  ;;  %v10732_v49 = vpop.permute.xlu0 %10731 }
 0x548   : > { %v10519_v46 = vcombine.high %v21676_v13, %v21676_v13  ;;  %v17033_v33 = vpack.i.b16 %v21656_v30, %v10511_v25  ;;  %v21717_v10 = vpack.i.b16 %v21671_v7, %v10550_v63  ;;  %v17034_v48 = vpack.i.b16 %v21668_v2, %v10693_v26 }
 0x549   : > { %v10708_v51 = vunpack.i.h.s16 %v21703_v16  ;;  %v10659_v11 = vunpack.i.h.s16 %v21516_v52  ;;  %v21721_v47 = vpack.i.b16 %v10550_v63, %v10699_v28  ;;  %v21725_v62 = vpack.i.b16 %v21683_v53, %v10702_v38 }
 0x54a   : > { %23758 = vst [vmem:[#allocation18_spill] sm:$0xff] %v21717_v10  ;;  %v10520_v20 = vcombine.high %v21710_v19, %v21710_v19  ;;  %v21730_v17 = vpack.i.b16 %v21703_v16, %v10706_v3  ;;  %v10686_v50 = vunpack.i.h.s16 %v21710_v19  ;;  %v10661_v10 = vunpack.i.h.s16 %v21520_v39 }
 0x54b   : > { %23759 = vst [vmem:[#allocation8_spill] sm:$0xff] %v21725_v62  ;;  %v17025_v26 = vpack.i.b16 %v21520_v39, %v10659_v11  ;;  %v10688_v28 = vunpack.i.h.s16 %v10519_v46  ;;  %v21735_v29 = vcombine.low %v17033_v33, %v17034_v48  ;;  %v10830_v38 = vcombine.low %v21532_v1, %v21541_v55  ;;  %v10735_v33 = vpop.permute.xlu1 %10734 }
 0x54c   : > { %v10690_v63 = vunpack.i.h.s16 %v10520_v20  ;;  %v21740_v21 = vpack.i.b16 %v21707_v57, %v10708_v51  ;;  %v17026_v3 = vpack.i.b16 %v21526_v44, %v10661_v10  ;;  %v17043_v62 = vcombine.high %v21532_v1, %v21541_v55 }
 0x54d   : > { %v10854_v5 = vrot.slane %v21569_v24, %v18488_v35  ;;  %v10840_v39 = vrot.slane %v10830_v38, %v18488_v35  ;;  %v10259_v48 = vsel %vm1222_vm11, %v21442_v6, %v10214_v56  ;;  %v10737_v51 = vsel %vm1222_vm11, %v21452_v18, %v10732_v49  ;;  %v10198_v49 = vpop.permute.xlu0 %10197 }
 0x54e   : > { %v21747_v11 = vpack.i.b16 %v10511_v25, %v10690_v63  ;;  %v10833_v45 = vcombine.low %v17025_v26, %v17026_v3  ;;  %v10847_v10 = vrot.slane %v17043_v62, %v18488_v35  ;;  %v10277_v44 = vsel %vm7325_vm10, %v10259_v48, %v10241_v31 }
 0x54f   : > { %v10739_v54 = vsel %vm7325_vm10, %v10737_v51, %v10735_v33  ;;  %v10978_v24 = vcombine.low %v21721_v47, %v21671_v7  ;;  %v21759_v25 = vpack.i.b16 %v10519_v46, %v10686_v50  ;;  %v10599_v63 = vcombine.high %v10277_v44, %v10277_v44 }
 0x550   : > { %v10606_v38 = vrot.slane %v10277_v44, %v18488_v35  ;;  %v10861_v6 = vrot.slane %v10833_v45, %v18488_v35  ;;  %v10862_v56 = vcombine.low %v10840_v39, %v10847_v10  ;;  %v10741_v9 = vcombine.high %v10739_v54, %v10739_v54 }
 0x551   : > { %v10748_v18 = vrot.slane %v10739_v54, %v18488_v35  ;;  %v21766_v31 = vpack.i.b16 %v10520_v20, %v10688_v28  ;;  %v23760_v50 = vpack.i.b16 %v21598_v60, %v21574_v32  ;;  %v10613_v39 = vrot.slane %v10599_v63, %v18488_v35  ;;  %v10225_v54 = vpop.permute.xlu1 %10224 }
 0x552   : > { %v10614_v26 = vcombine.high %v10606_v38, %v10606_v38  ;;  %v10863_v45 = vcombine.low %v10854_v5, %v10861_v6  ;;  %v10755_v20 = vrot.slane %v10741_v9, %v18488_v35  ;;  %v10882_v32 = vcombine.low %v21642_v12, %v21694_v27 }
 0x553   : > { %v10881_v46 = vcombine.low %v21578_v36, %v23760_v50  ;;  %v10756_v48 = vcombine.high %v10748_v18, %v10748_v18  ;;  %v21780_v28 = vrot.slane %v10748_v18, %v18488_v35  ;;  %v10870_v5 = vrot.slane %v10862_v56, %v18488_v35  ;;  %v11634_v18 = vpop.permute.xlu0 %11633 }
 0x554   : > { %v21776_v33 = vrot.slane %v10614_v26, %v18488_v35  ;;  %v10877_v51 = vrot.slane %v10863_v45, %v18488_v35  ;;  %v21792_v44 = vrot.slane %v10606_v38, %v18488_v35  ;;  %v10910_v12 = vrot.slane %v10882_v32, %v18488_v35 }
 0x555   : > { %v21789_v10 = vrot.slane %v10756_v48, %v18488_v35  ;;  %v10903_v63 = vrot.slane %v10881_v46, %v18488_v35  ;;  %v21802_v6 = vcombine.high %v21780_v28, %v21780_v28  ;;  %v10243_v38 = vsel %vm1222_vm11, %v21458_v22, %v10198_v49  ;;  %v11637_v62 = vpop.permute.xlu1 %11636 }
 0x556   : > { %v21796_v9 = vcombine.high %v21776_v33, %v21776_v33  ;;  %v10878_v27 = vcombine.low %v10870_v5, %v10877_v51  ;;  %v21809_v26 = vrot.slane %v10613_v39, %v18488_v35  ;;  %v21812_v50 = vrot.slane %v10755_v20, %v18488_v35 }
 0x557   : > { %v10779_v56 = vcombine.high %v21789_v10, %v21789_v10  ;;  %v10912_v46 = vcombine.low %v10903_v63, %v10910_v12  ;;  %v10261_v45 = vsel %vm7325_vm10, %v10243_v38, %v10225_v54  ;;  %v10648_v51 = vunpack.i.h.s16 %v21532_v1 }
 0x558   : > { %17502 = vmatprep.mubr.msk.bf16.mxu0 %vm8173_vm12, %v10878_v27  ;;  %v10287_v32 = vcombine.high %v10261_v45, %v10261_v45  ;;  %v10294_v5 = vrot.slane %v10261_v45, %v18488_v35  ;;  %v10717_v22 = vunpack.i.h.s16 %v21796_v9  ;;  %v23761_v49 = vcombine.low %v21584_v40, %v21595_v34 }
 0x559   : > { %v10787_v48 = vunpack.i.h.s16 %v10779_v56  ;;  %v10926_v20 = vrot.slane %v10912_v46, %v18488_v35  ;;  %v11639_v54 = vsel %vm1222_vm11, %v21468_v37, %v11634_v18  ;;  %v10785_v63 = vunpack.i.h.s16 %v21802_v6  ;;  %v17723_v37 = vld [vmem:[%s23430_s6 + $0x38] sm:$0xff]  }
 0x55a   : > { %v10919_v39 = vrot.slane %v23761_v49, %v18488_v35  ;;  %v10301_v12 = vrot.slane %v10287_v32, %v18488_v35  ;;  %v10302_v27 = vcombine.high %v10294_v5, %v10294_v5  ;;  %v10309_v38 = vrot.slane %v10294_v5, %v18488_v35 }
 0x55b   : > { %v21830_v45 = vpack.i.b16 %v21812_v50, %v10787_v48  ;;  %v11641_v36 = vsel %vm7325_vm10, %v11639_v54, %v11637_v62  ;;  %v10929_v40 = vcombine.low %v21676_v13, %v21710_v19  ;;  %v17056_v46 = vpack.i.b16 %v21541_v55, %v10648_v51 }
 0x55c   : > { %v10927_v3 = vcombine.low %v10919_v39, %v10926_v20  ;;  %v10316_v34 = vrot.slane %v10301_v12, %v18488_v35  ;;  %v10323_v18 = vrot.slane %v10302_v27, %v18488_v35  ;;  %v11643_v32 = vcombine.high %v11641_v36, %v11641_v36 }
 0x55d   : > { %v11650_v48 = vrot.slane %v11641_v36, %v18488_v35  ;;  %v17044_v62 = vcombine.high %v21676_v13, %v21710_v19  ;;  %v23762_v5 = vcombine.low %v21660_v4, %v21663_v59  ;;  %v10945_v39 = vrot.slane %v10929_v40, %v18488_v35 }
 0x55e   : > { %17503 = vmatmul.mubr.msk.bf16.vlgmr.msra.gmra.mxu0 %vm8173_vm12, %v10927_v3  ;;  %v17055_v20 = vpack.i.b16 %v21532_v1, %v10316_v34  ;;  %v11246_v54 = vcombine.low %v10309_v38, %v10323_v18  ;;  %v17075_v12 = vcombine.high %v10309_v38, %v10323_v18  ;;  %v21853_v3 = vrot.slane %v11643_v32, %v18488_v35  ;;  %v17725_v1 = vld [vmem:[%s23430_s6 + $0x30] sm:$0xff]  }
 0x55f   : > { %v10938_v49 = vrot.slane %v23762_v5, %v18488_v35  ;;  %17533 = vmatpush3.bf16.msra.mxu0 %v21495_v41  ;;  %v11658_v36 = vcombine.high %v11650_v48, %v11650_v48  ;;  %v21856_v51 = vrot.slane %v11650_v48, %v18488_v35  ;;  %v10952_v27 = vrot.slane %v17044_v62, %v18488_v35 }
 0x560   : > { %v10959_v4 = vrot.slane %v21735_v29, %v18488_v35  ;;  %17534 = vmatprep.subr.bf16.mxu0 %v17723_v37  ;;  %v21864_v59 = vpack.i.b16 %v10779_v56, %v10785_v63  ;;  %v11248_v41 = vcombine.low %v17055_v20, %v17056_v46  ;;  %v21867_v38 = vrot.slane %v11246_v54, %v18488_v35 }
 0x561   : > { %v21870_v40 = vrot.slane %v17075_v12, %v18488_v35  ;;  %v21873_v34 = vrot.slane %v11658_v36, %v18488_v35  ;;  %v10960_v18 = vcombine.low %v10938_v49, %v10945_v39  ;;  %v21877_v29 = vcombine.high %v21656_v30, %v21656_v30 }
 0x562   : > { %v10961_v32 = vcombine.low %v10952_v27, %v10959_v4  ;;  %v17042_v48 = vpack.i.b16 %v21809_v26, %v10717_v22  ;;  %v10788_v56 = vunpack.i.l.s16 %v21812_v50  ;;  %v10695_v46 = vunpack.i.h.s16 %v21668_v2 }
 0x563   : > { %17535 = vmatpush3.bf16.msra.mxu0 %v17723_v37  ;;  %v11899_v5 = vcombine.low %v21856_v51, %v21873_v34  ;;  %v10968_v49 = vrot.slane %v10960_v18, %v18488_v35  ;;  %v21891_v22 = vrot.slane %v11248_v41, %v18488_v35  ;;  %v10697_v50 = vunpack.i.h.s16 %v21877_v29 }
 0x564   : > { %v10975_v39 = vrot.slane %v10961_v32, %v18488_v35  ;;  %17536 = vmatprep.subr.bf16.mxu0 %v17725_v1  ;;  %v17035_v20 = vpack.i.b16 %v21877_v29, %v10695_v46  ;;  %v17038_v37 = vpack.i.b16 %v21792_v44, %v21707_v57  ;;  %v11278_v54 = vcombine.low %v21867_v38, %v21870_v40 }
 0x565   : > { %v17095_v12 = vcombine.high %v21856_v51, %v21873_v34  ;;  %v10979_v27 = vcombine.low %v21683_v53, %v21687_v23  ;;  %v21904_v4 = vrot.slane %v11899_v5, %v18488_v35  ;;  %v17036_v41 = vpack.i.b16 %v21680_v14, %v10697_v50 }
 0x566   : > { %v10976_v36 = vcombine.low %v10968_v49, %v10975_v39  ;;  %v10980_v18 = vcombine.low %v21703_v16, %v17038_v37  ;;  %v21910_v57 = vcombine.high %v21792_v44, %v21792_v44  ;;  %v10994_v38 = vrot.slane %v10978_v24, %v18488_v35 }
 0x567   : > { %17537 = vmatpush3.bf16.msra.mxu0 %v17725_v1  ;;  %v11001_v40 = vrot.slane %v10979_v27, %v18488_v35  ;;  %v10711_v32 = vunpack.i.h.s16 %v21792_v44  ;;  %v10713_v46 = vunpack.i.h.s16 %v21776_v33  ;;  %v10977_v5 = vcombine.low %v17035_v20, %v17036_v41 }
 0x568   : > { %17506 = vmatprep.mubr.msk.bf16.mxu0 %vm8173_vm12, %v10976_v36  ;;  %v11008_v16 = vrot.slane %v10980_v18, %v18488_v35  ;;  %v10715_v49 = vunpack.i.h.s16 %v21910_v57  ;;  %v11028_v1 = vcombine.low %v21780_v28, %v21789_v10  ;;  %v17045_v7 = vcombine.high %v21780_v28, %v21789_v10 }
 0x569   : > { %v17039_v39 = vpack.i.b16 %v21776_v33, %v10711_v32  ;;  %v17040_v50 = vpack.i.b16 %v21910_v57, %v10713_v46  ;;  %v21929_v47 = vrot.slane %v10788_v56, %v18488_v35  ;;  %v10987_v24 = vrot.slane %v10977_v5, %v18488_v35 }
 0x56a   : > { %v11010_v20 = vcombine.low %v11001_v40, %v11008_v16  ;;  %v17041_v37 = vpack.i.b16 %v21796_v9, %v10715_v49  ;;  %v11050_v36 = vrot.slane %v11028_v1, %v18488_v35  ;;  %v11057_v41 = vrot.slane %v17045_v7, %v18488_v35 }
 0x56b   : > { %v11026_v27 = vcombine.low %v17039_v39, %v17040_v50  ;;  %v11088_v18 = vrot.slane %v21929_v47, %v18488_v35  ;;  %v23763_v32 = vunpack.i.h.s16 %v21563_v0  ;;  %v11009_v63 = vcombine.low %v10987_v24, %v10994_v38 }
 0x56c   : > { %v11024_v56 = vrot.slane %v11010_v20, %v18488_v35  ;;  %v11027_v62 = vcombine.low %v17041_v37, %v17042_v48  ;;  %v11701_v40 = vcombine.low %v21510_v58, %v21516_v52  ;;  %v11059_v16 = vcombine.low %v11050_v36, %v11057_v41  ;;  %v23764_v41 = vld [vmem:[#allocation5_spill] sm:$0xff] }
 0x56d   : > { %v17062_v46 = vpack.i.b16 %v21565_v43, %v23763_v32  ;;  %v11036_v5 = vrot.slane %v11026_v27, %v18488_v35  ;;  %v17093_v1 = vcombine.high %v21510_v58, %v21516_v52  ;;  %v11017_v39 = vrot.slane %v11009_v63, %v18488_v35 }
 0x56e   : > { %v11043_v0 = vrot.slane %v11027_v62, %v18488_v35  ;;  %v11703_v43 = vcombine.low %v21571_v61, %v21610_v8  ;;  %v11073_v38 = vrot.slane %v11059_v16, %v18488_v35  ;;  %v11711_v7 = vrot.slane %v11701_v40, %v18488_v35 }
 0x56f   : > { %v11298_v49 = vcombine.low %v21610_v8, %v17062_v46  ;;  %v11704_v48 = vcombine.low %v17062_v46, %v21613_v42  ;;  %v11718_v47 = vrot.slane %v17093_v1, %v18488_v35  ;;  %v11025_v24 = vcombine.low %v11017_v39, %v11024_v56  ;;  %v23765_v56 = vld [vmem:[#allocation28_spill] sm:$0xff]  ;;  %v23767_v39 = vld [vmem:[#allocation29_spill] sm:$0xff] }
 0x570   : > { %v11058_v20 = vcombine.low %v11036_v5, %v11043_v0  ;;  %v11725_v58 = vrot.slane %v11703_v43, %v18488_v35  ;;  %v10650_v62 = vunpack.i.h.s16 %v21541_v55  ;;  %v11286_v61 = vrot.slane %v11278_v54, %v18488_v35  ;;  %v23766_v5 = vld [vmem:[#allocation12_spill] sm:$0xff] }
 0x571   : > { %v11326_v50 = vrot.slane %v11298_v49, %v18488_v35  ;;  %v11732_v52 = vrot.slane %v11704_v48, %v18488_v35  ;;  %v11733_v63 = vcombine.low %v11711_v7, %v11718_v47  ;;  %17507 = vmatmul.mubr.msk.bf16.gmra.mxu0 %vm8173_vm12, %v11025_v24  ;;  %v10684_v27 = vunpack.i.h.s16 %v21676_v13  ;;  %v23769_v48 = vld [vmem:[#allocation24_spill] sm:$0xff] }
 0x572   : > { %v11066_v37 = vrot.slane %v11058_v20, %v18488_v35  ;;  %v17065_v32 = vpack.i.b16 %v21676_v13, %v23764_v41  ;;  %v17057_v40 = vpack.i.b16 %v23765_v56, %v10650_v62  ;;  %v11345_v54 = vcombine.low %v21598_v60, %v23766_v5  ;;  %v23768_v13 = vld [vmem:[#allocation16_spill] sm:$0xff]  ;;  %v23771_v20 = vld [vmem:[#allocation9_spill] sm:$0xff] }
 0x573   : > { %v11328_v8 = vcombine.low %v21623_v15, %v11326_v50  ;;  %v11734_v36 = vcombine.low %v11725_v58, %v11732_v52  ;;  %v11741_v46 = vrot.slane %v11733_v63, %v18488_v35  ;;  %v17066_v49 = vpack.i.b16 %v21710_v19, %v10684_v27 }
 0x574   : > { %v11074_v15 = vcombine.low %v11066_v37, %v11073_v38  ;;  %v17076_v1 = vcombine.high %v21598_v60, %v23766_v5  ;;  %v11249_v0 = vcombine.low %v17057_v40, %v23767_v39  ;;  %v23770_v50 = vcombine.low %v21613_v42, %v23769_v48 }
 0x575   : > { %v11342_v55 = vrot.slane %v11328_v8, %v18488_v35  ;;  %v11748_v16 = vrot.slane %v11734_v36, %v18488_v35  ;;  %v11361_v47 = vrot.slane %v11345_v54, %v18488_v35  ;;  %v11347_v24 = vcombine.low %v17065_v32, %v17066_v49  ;;  %v23772_v8 = vld [vmem:[#allocation10_spill] sm:$0xff] }
 0x576   : > { %v11354_v7 = vrot.slane %v23770_v50, %v18488_v35  ;;  %17510 = vmatprep.mubr.msk.bf16.mxu0 %vm8173_vm12, %v11074_v15  ;;  %v11368_v19 = vrot.slane %v17076_v1, %v18488_v35  ;;  %v11752_v58 = vcombine.low %v23771_v20, %v17065_v32  ;;  %v11277_v52 = vrot.slane %v11249_v0, %v18488_v35  ;;  %v23774_v15 = vld [vmem:[#allocation8_spill] sm:$0xff] }
 0x577   : > { %v11343_v43 = vcombine.low %v23768_v13, %v11342_v55  ;;  %v11749_v38 = vcombine.low %v11741_v46, %v11748_v16  ;;  %v11753_v62 = vcombine.low %v17066_v49, %v21759_v25  ;;  %v11751_v37 = vcombine.low %v23766_v5, %v23772_v8 }
 0x578   : > { %v11376_v63 = vcombine.low %v11354_v7, %v11361_v47  ;;  %v11375_v42 = vrot.slane %v11347_v24, %v18488_v35  ;;  %v11774_v36 = vrot.slane %v11752_v58, %v18488_v35  ;;  %v23773_v27 = vcombine.low %v23769_v48, %v21598_v60  ;;  %v23775_v60 = vld [vmem:[#allocation18_spill] sm:$0xff] }
 0x579   : > { %v11800_v32 = vcombine.low %v21656_v30, %v21668_v2  ;;  %v11279_v46 = vcombine.low %v21891_v22, %v11277_v52  ;;  %v11781_v40 = vrot.slane %v11753_v62, %v18488_v35  ;;  %v11767_v55 = vrot.slane %v11751_v37, %v18488_v35  ;;  %17511 = vmatmul.mubr.msk.bf16.gmra.mxu0 %vm8173_vm12, %v11088_v18 }
 0x57a   : > { %v11760_v41 = vrot.slane %v23773_v27, %v18488_v35  ;;  %v11384_v56 = vrot.slane %v11376_v63, %v18488_v35  ;;  %v11377_v5 = vcombine.low %v11368_v19, %v11375_v42  ;;  %v17094_v54 = vcombine.high %v21656_v30, %v21668_v2  ;;  %17538 = vmatprep.mubr.msk.bf16.mxu0 %vm8173_vm12, %v11749_v38 }
 0x57b   : > { %v11802_v16 = vcombine.low %v23775_v60, %v23774_v15  ;;  %v23776_v49 = vcombine.low %v21766_v31, %v21747_v11  ;;  %v11293_v1 = vrot.slane %v11279_v46, %v18488_v35  ;;  %v11783_v0 = vcombine.low %v11774_v36, %v11781_v40 }
 0x57c   : > { %v11782_v39 = vcombine.low %v11760_v41, %v11767_v55  ;;  %v11816_v18 = vrot.slane %v11800_v32, %v18488_v35  ;;  %v11391_v13 = vrot.slane %v11377_v5, %v18488_v35  ;;  %v11823_v48 = vrot.slane %v17094_v54, %v18488_v35 }
 0x57d   : > { %v11809_v22 = vrot.slane %v23776_v49, %v18488_v35  ;;  %v11830_v50 = vrot.slane %v11802_v16, %v18488_v35  ;;  %v11393_v7 = vcombine.low %v21759_v25, %v21766_v31  ;;  %v11294_v47 = vcombine.low %v11286_v61, %v11293_v1 }
 0x57e   : > { %v11790_v24 = vrot.slane %v11782_v39, %v18488_v35  ;;  %v11797_v38 = vrot.slane %v11783_v0, %v18488_v35  ;;  %v11392_v20 = vcombine.low %v11384_v56, %v11391_v13  ;;  %v11395_v52 = vcombine.low %v21668_v2, %v21877_v29 }
 0x57f   : > { %v11831_v19 = vcombine.low %v11809_v22, %v11816_v18  ;;  %v11832_v58 = vcombine.low %v11823_v48, %v11830_v50  ;;  %v11396_v63 = vcombine.low %v21680_v14, %v23775_v60  ;;  %17520 = vmatprep.mubr.msk.bf16.mxu1 %vm8173_vm12, %v11294_v47  ;;  %v11403_v25 = vrot.slane %v11393_v7, %v18488_v35 }
 0x580   : > { %v11798_v62 = vcombine.low %v11790_v24, %v11797_v38  ;;  %v23777_v31 = vcombine.low %v21747_v11, %v21656_v30  ;;  %17521 = vmatmul.mubr.msk.bf16.vlgmr.msra.gmra.mxu1 %vm8173_vm12, %v11343_v43  ;;  %v11417_v2 = vrot.slane %v11395_v52, %v18488_v35  ;;  %v23778_v29 = vunpack.i.h.s16 %v21683_v53 }
 0x581   : > { %v11839_v8 = vrot.slane %v11831_v19, %v18488_v35  ;;  %v11846_v37 = vrot.slane %v11832_v58, %v18488_v35  ;;  %v11424_v14 = vrot.slane %v11396_v63, %v18488_v35  ;;  %17524 = vmatprep.mubr.msk.bf16.mxu1 %vm8173_vm12, %v11392_v20  ;;  %v11444_v27 = vcombine.low %v21792_v44, %v21776_v33 }
 0x582   : > { %v11410_v61 = vrot.slane %v23777_v31, %v18488_v35  ;;  %v17072_v42 = vpack.i.b16 %v21687_v23, %v23778_v29  ;;  %v17077_v30 = vcombine.high %v21792_v44, %v21776_v33  ;;  %v23779_v11 = vcombine.low %v21730_v17, %v21740_v21  ;;  %17539 = vmatmul.mubr.msk.bf16.vlgmr.msra.gmra.mxu0 %vm8173_vm12, %v11798_v62 }
 0x583   : > { %v11847_v41 = vcombine.low %v11839_v8, %v11846_v37  ;;  %v11426_v53 = vcombine.low %v11417_v2, %v11424_v14  ;;  %v17088_v32 = vpack.i.b16 %v21780_v28, %v21809_v26  ;;  %v11466_v56 = vrot.slane %v11444_v27, %v18488_v35 }
 0x584   : > { %v11425_v36 = vcombine.low %v11403_v25, %v11410_v61  ;;  %v11459_v43 = vrot.slane %v23779_v11, %v18488_v35  ;;  %v11442_v23 = vcombine.low %v23774_v15, %v17072_v42  ;;  %v11473_v40 = vrot.slane %v17077_v30, %v18488_v35 }
 0x585   : > { %v11848_v55 = vcombine.low %v17072_v42, %v21730_v17  ;;  %17542 = vmatprep.mubr.msk.bf16.mxu0 %vm8173_vm12, %v11847_v41  ;;  %v11440_v5 = vrot.slane %v11426_v53, %v18488_v35  ;;  %v11849_v15 = vcombine.low %v21740_v21, %v21792_v44  ;;  %v11850_v60 = vcombine.low %v21776_v33, %v21910_v57 }
 0x586   : > { %v11433_v46 = vrot.slane %v11425_v36, %v18488_v35  ;;  %v11452_v54 = vrot.slane %v11442_v23, %v18488_v35  ;;  %v11928_v16 = vrot.slane %v17095_v12, %v18488_v35  ;;  %v11475_v49 = vcombine.low %v11466_v56, %v11473_v40  ;;  %v22110_v56 = vld [vmem:[%s23431_s7] ss:$0 sm:$0xff] }
 0x587   : > { %v11851_v17 = vcombine.low %v21796_v9, %v17088_v32  ;;  %v10781_v22 = vunpack.i.h.s16 %v21780_v28  ;;  %v11858_v0 = vrot.slane %v11848_v55, %v18488_v35  ;;  %v11865_v18 = vrot.slane %v11849_v15, %v18488_v35 }
 0x588   : > { %v11441_v1 = vcombine.low %v11433_v46, %v11440_v5  ;;  %v11474_v39 = vcombine.low %v11452_v54, %v11459_v43  ;;  %v11489_v21 = vrot.slane %v11475_v49, %v18488_v35  ;;  %v11872_v33 = vrot.slane %v11850_v60, %v18488_v35 }
 0x589   : > { %v11879_v44 = vrot.slane %v11851_v17, %v18488_v35  ;;  %v10783_v51 = vunpack.i.h.s16 %v21789_v10  ;;  %v11880_v34 = vcombine.low %v11858_v0, %v11865_v18  ;;  %v17089_v12 = vpack.i.b16 %v21789_v10, %v10781_v22 }
 0x58a   : > { %17525 = vmatmul.mubr.msk.bf16.gmra.mxu1 %vm8173_vm12, %v11441_v1  ;;  %v11482_v9 = vrot.slane %v11474_v39, %v18488_v35  ;;  %v10718_v13 = vunpack.i.l.s16 %v21809_v26  ;;  %v23780_v48 = vrot.slane %v21853_v3, %v18488_v35  ;;  %v11930_v7 = vcombine.low %v21904_v4, %v11928_v16 }
 0x58b   : > { %v11881_v28 = vcombine.low %v11872_v33, %v11879_v44  ;;  %v17090_v57 = vpack.i.b16 %v21802_v6, %v10783_v51  ;;  %v23781_v24 = vcombine.low %v21864_v59, %v21830_v45  ;;  %v11888_v19 = vrot.slane %v11880_v34, %v18488_v35 }
 0x58c   : > { %v11690_v50 = vunpack.i.l.s16 %v23780_v48  ;;  %v11490_v47 = vcombine.low %v11482_v9, %v11489_v21  ;;  %v11497_v6 = vrot.slane %v10718_v13, %v18488_v35  ;;  %v11944_v59 = vrot.slane %v11930_v7, %v18488_v35 }
 0x58d   : > { %v11914_v38 = vrot.slane %v23781_v24, %v18488_v35  ;;  %v11895_v10 = vrot.slane %v11881_v28, %v18488_v35  ;;  %v11897_v20 = vcombine.low %v17089_v12, %v17090_v57 }
 0x58e   : > { %17528 = vmatprep.mubr.msk.bf16.mxu1 %vm8173_vm12, %v11490_v47  ;;  %v11504_v4 = vrot.slane %v11497_v6, %v18488_v35  ;;  %v11952_v58 = vrot.slane %v11690_v50, %v18488_v35 }
 0x58f   : > { %v11896_v26 = vcombine.low %v11888_v19, %v11895_v10  ;;  %v11907_v3 = vrot.slane %v11897_v20, %v18488_v35 }
 0x590   : > { %v11959_v62 = vrot.slane %v11952_v58, %v18488_v35 }
 0x591   : > { %17543 = vmatmul.mubr.msk.bf16.gmra.mxu0 %vm8173_vm12, %v11896_v26  ;;  %v11929_v45 = vcombine.low %v11907_v3, %v11914_v38 }
 0x592   : > { %17529 = vmatmul.mubr.msk.bf16.gmra.mxu1 %vm8173_vm12, %v11504_v4 }
 0x593   : > { %v11937_v52 = vrot.slane %v11929_v45, %v18488_v35 }
 0x595   : > { %v11945_v63 = vcombine.low %v11937_v52, %v11944_v59 }
 0x597   : > { %17546 = vmatprep.mubr.msk.bf16.mxu0 %vm8173_vm12, %v11945_v63 }
 0x599   : > { %17547 = vmatmul.mubr.msk.bf16.gmra.mxu0 %vm8173_vm12, %v11959_v62 }
 0x61e   : > { %v17504_v8 = vpop.f32.mrf.mxu0 }
 0x620   : > { %v11159_v25 = vpop.f32.mrf.mxu0 }
 0x622   : > { %v17505_v31 = vpop.f32.mrf.mxu0 }
 0x624   : > { %v11162_v61 = vpop.f32.mrf.mxu0 }
 0x631   : > { %v17508_v37 = vpop.f32.mrf.mxu0 }
 0x633   : > { %v11175_v2 = vpop.f32.mrf.mxu0 }
 0x635   : > { %v17509_v14 = vpop.f32.mrf.mxu0 }
 0x637   : > { %v11178_v29 = vpop.f32.mrf.mxu0 }
 0x639   : > { %v22101_v42 = vpop.f32.mrf.mxu0 }
 0x63b   : > { %v22103_v36 = vpop.f32.mrf.mxu0 }
 0x63d   : > { %v17513_v27 = vpop.f32.mrf.mxu0 }
 0x63f   : > { %v22105_v11 = vpop.f32.mrf.mxu0 }
 0x640   : > { %v17522_v30 = vpop.f32.mrf.mxu1 }
 0x641   : > { %v11584_v43 = vadd.f32 %v17522_v30, %v17504_v8 }
 0x642   : > { %v11575_v41 = vpop.f32.mrf.mxu1  ;;  %v17540_v53 = vpop.f32.mrf.mxu0 }
 0x643   : > { %v11576_v23 = vadd.f32 %v11575_v41, %v11159_v25  ;;  %v12078_v32 = vadd.f32 %v17540_v53, %v11584_v43 }
 0x644   : > { %v17523_v46 = vpop.f32.mrf.mxu1  ;;  %v12030_v40 = vpop.f32.mrf.mxu0 }
 0x645   : > { %v11587_v55 = vadd.f32 %v17523_v46, %v17505_v31  ;;  %v12076_v5 = vadd.f32 %v12030_v40, %v11576_v23  ;;  %v12096_v60 = vadd.f32 %v22110_v56, %v12078_v32 }
 0x646   : > { %v11578_v54 = vpop.f32.mrf.mxu1  ;;  %v17541_v15 = vpop.f32.mrf.mxu0 }
 0x647   : > { %v11579_v16 = vadd.f32 %v11578_v54, %v11162_v61  ;;  %v12079_v49 = vadd.f32 %v17541_v15, %v11587_v55  ;;  %v12094_v1 = vadd.f32 %v22110_v56, %v12076_v5  ;;  %v12107_v21 = vmax.f32 %v12096_v60, 0.0  ;;  %v23782_v61 = vld [vmem:[#allocation15_spill] sm:$0xff] }
 0x648   : > { %v12033_v22 = vpop.f32.mrf.mxu0 }
 0x649   : > { %v12097_v39 = vadd.f32 %v22110_v56, %v12079_v49  ;;  %v12077_v0 = vadd.f32 %v12033_v22, %v11579_v16  ;;  %v12105_v9 = vmax.f32 %v12094_v1, 0.0 }
 0x64a   : > { %v17526_v17 = vpop.f32.mrf.mxu1 }
 0x64b   : > { %v12108_v33 = vmax.f32 %v12097_v39, 0.0  ;;  %v12095_v44 = vadd.f32 %v22110_v56, %v12077_v0  ;;  %v11600_v24 = vadd.f32 %v17526_v17, %v17508_v37 }
 0x64c   : > { %v11591_v18 = vpop.f32.mrf.mxu1 }
 0x64d   : > { %v12117_v34 = vpack.c.bf16 %v12108_v33, %v12107_v21  ;;  %v17107_v28 = vpack.c.bf16 %v12108_v33, %v12108_v33  ;;  %v12106_v12 = vmax.f32 %v12095_v44, 0.0  ;;  %v11592_v38 = vadd.f32 %v11591_v18, %v11175_v2 }
 0x64e   : > { %v17527_v51 = vpop.f32.mrf.mxu1 }
 0x64f   : > { %v12184_v13 = vrot.slane %v12117_v34, %v18488_v35  ;;  %v12191_v48 = vrot.slane %v17107_v28, %v18488_v35  ;;  %v12116_v50 = vpack.c.bf16 %v12106_v12, %v12105_v9  ;;  %v17106_v7 = vpack.c.bf16 %v12106_v12, %v12106_v12 }
 0x650   : > { %v11594_v57 = vpop.f32.mrf.mxu1  ;;  %v22126_v45 = vadd.f32 %v17527_v51, %v17509_v14 }
 0x651   : > { %v17544_v47 = vpop.f32.mrf.mxu0  ;;  %v12192_v10 = vcombine.high %v12184_v13, %v12184_v13  ;;  %v12193_v20 = vcombine.high %v12191_v48, %v12191_v48  ;;  %v12200_v6 = vrot.slane %v12184_v13, %v18488_v35  ;;  %v22122_v26 = vrot.slane %v12191_v48, %v18488_v35 }
 0x652   : > { %v22118_v19 = vpop.f32.mrf.mxu1  ;;  %v12135_v4 = vrot.slane %v12116_v50, %v18488_v35  ;;  %v12142_v58 = vrot.slane %v17106_v7, %v18488_v35  ;;  %v12082_v59 = vadd.f32 %v17544_v47, %v11600_v24  ;;  %v22136_v30 = vadd.f32 %v11594_v57, %v11178_v29 }
 0x653   : > { %v12046_v3 = vpop.f32.mrf.mxu0  ;;  %v12214_v63 = vrot.slane %v12192_v10, %v18488_v35  ;;  %v12221_v62 = vrot.slane %v12193_v20, %v18488_v35  ;;  %v12222_v8 = vcombine.high %v12200_v6, %v12200_v6  ;;  %v12412_v25 = vunpack.i.h.s16 %v22122_v26 }
 0x654   : > { %v22128_v52 = vpop.f32.mrf.mxu1  ;;  %v12581_v37 = vrot.slane %v12200_v6, %v23782_v61  ;;  %v12143_v2 = vcombine.high %v12135_v4, %v12135_v4  ;;  %v12144_v27 = vcombine.high %v12142_v58, %v12142_v58  ;;  %v12151_v23 = vrot.slane %v12135_v4, %v18488_v35 }
 0x655   : > { %v22133_v31 = vpop.f32.mrf.mxu0  ;;  %v12224_v43 = vcombine.high %v12214_v63, %v12214_v63  ;;  %v12406_v41 = vunpack.i.h.s16 %v12214_v63  ;;  %v12408_v53 = vunpack.i.h.s16 %v12222_v8  ;;  %v12414_v46 = vunpack.i.h.s16 %v12221_v62 }
 0x656   : > { %v17531_v14 = vpop.f32.mrf.mxu1  ;;  %v17120_v40 = vpack.i.b16 %v12221_v62, %v12412_v25  ;;  %v12588_v55 = vrot.slane %v12581_v37, %v23782_v61  ;;  %v12080_v5 = vadd.f32 %v12046_v3, %v11592_v38  ;;  %v17116_v15 = vpack.i.b16 %v12214_v63, %v12214_v63 }
 0x657   : > { %v12049_v32 = vpop.f32.mrf.mxu0  ;;  %v12410_v54 = vunpack.i.h.s16 %v12224_v43  ;;  %v17118_v60 = vpack.i.b16 %v12224_v43, %v12408_v53  ;;  %v12158_v16 = vrot.slane %v12142_v58, %v18488_v35  ;;  %v12225_v29 = vcombine.high %v12221_v62, %v12221_v62 }
 0x658   : > { %v12619_v17 = vrot.slane %v17120_v40, %v23782_v61  ;;  %12880 = vst.msk [vmem:[#allocation3 + $0x14] sm:$0x1] %vm7098_vm7, %v12588_v55  ;;  %v12165_v22 = vrot.slane %v12143_v2, %v18488_v35  ;;  %v12172_v1 = vrot.slane %v12144_v27, %v18488_v35  ;;  %v17117_v39 = vpack.i.b16 %v12222_v8, %v12406_v41  ;;  %v12881_v40 = vld [vmem:[#allocation3 + $0x18] sm:$0xf] }
 0x659   : > { %v17548_v49 = vpop.f32.mrf.mxu0  ;;  %v17119_v0 = vpack.i.b16 %v22122_v26, %v12410_v54  ;;  %v12589_v18 = vcombine.low %v17116_v15, %v17118_v60  ;;  %v12173_v21 = vcombine.high %v12151_v23, %v12151_v23  ;;  %v12483_v44 = vpack.i.b16 %v12414_v46, %v12414_v46 }
 0x65a   : > { %v12626_v51 = vrot.slane %v12619_v17, %v23782_v61  ;;  %v12175_v9 = vcombine.high %v12165_v22, %v12165_v22  ;;  %v12176_v34 = vcombine.high %v12172_v1, %v12172_v1  ;;  %v12174_v12 = vcombine.high %v12158_v16, %v12158_v16 }
 0x65b   : > { %v12062_v33 = vpop.f32.mrf.mxu0  ;;  %v12590_v28 = vcombine.low %v17117_v39, %v17119_v0  ;;  %v12388_v57 = vunpack.i.h.s16 %v12151_v23  ;;  %v12390_v13 = vunpack.i.h.s16 %v12165_v22  ;;  %v12597_v50 = vrot.slane %v12589_v18, %v23782_v61 }
 0x65c   : > { %12884 = vst.msk [vmem:[#allocation3 + $0x1c] sm:$0x1] %vm7098_vm7, %v12626_v51  ;;  %v12392_v7 = vunpack.i.h.s16 %v12173_v21  ;;  %v12394_v47 = vunpack.i.h.s16 %v12175_v9  ;;  %v12396_v24 = vunpack.i.h.s16 %v12158_v16  ;;  %v17111_v10 = vpack.i.b16 %v12151_v23, %v12151_v23  ;;  %v12877_v51 = vld [vmem:[#allocation3 + $0x10] sm:$0xf] }
 0x65d   : > { %v17549_v48 = vpop.f32.mrf.mxu0  ;;  %v12604_v38 = vrot.slane %v12590_v28, %v23782_v61  ;;  %v17113_v20 = vpack.i.b16 %v12173_v21, %v12390_v13  ;;  %v12552_v6 = vcombine.low %v12172_v1, %v12176_v34  ;;  %v17112_v3 = vpack.i.b16 %v12165_v22, %v12388_v57 }
 0x65e   : > { %v17114_v4 = vpack.i.b16 %v12175_v9, %v12392_v7  ;;  %v17115_v58 = vpack.i.b16 %v12158_v16, %v12394_v47  ;;  %v12473_v63 = vpack.i.b16 %v12396_v24, %v12396_v24  ;;  %v22150_v8 = vcombine.low %v12483_v44, %v12225_v29 }
 0x65f   : > { %v12605_v62 = vcombine.low %v12597_v50, %v12604_v38  ;;  %v12513_v25 = vcombine.low %v17111_v10, %v17113_v20  ;;  %v12100_v37 = vadd.f32 %v22110_v56, %v12082_v59  ;;  %v12566_v43 = vrot.slane %v12552_v6, %v23782_v61  ;;  %v12065_v21 = vpop.f32.mrf.mxu0 }
 0x660   : > { %v12514_v2 = vcombine.low %v17112_v3, %v17114_v4  ;;  %v12543_v27 = vrot.slane %v17115_v58, %v23782_v61  ;;  %v12551_v14 = vcombine.low %v12473_v63, %v12174_v12  ;;  %v12098_v23 = vadd.f32 %v22110_v56, %v12080_v5 }
 0x661   : > { %v12612_v41 = vrot.slane %v12605_v62, %v23782_v61  ;;  %v12521_v53 = vrot.slane %v12513_v25, %v23782_v61  ;;  %v12083_v46 = vadd.f32 %v22133_v31, %v22126_v45  ;;  %v11616_v15 = vadd.f32 %v22118_v19, %v22101_v42  ;;  %v11610_v31 = vpop.f32.mrf.mxu1 }
 0x662   : > { %v12528_v55 = vrot.slane %v12514_v2, %v23782_v61  ;;  %v12550_v59 = vrot.slane %v12543_v27, %v23782_v61  ;;  %v12559_v54 = vrot.slane %v12551_v14, %v23782_v61  ;;  %v11608_v5 = vadd.f32 %v22128_v52, %v22103_v36 }
 0x663   : > { %v12882_v16 = vsel %vm20335_vm9, %v12612_v41, %v12881_v40  ;;  %v12101_v29 = vadd.f32 %v22110_v56, %v12083_v46  ;;  %v12081_v45 = vadd.f32 %v12049_v32, %v22136_v30  ;;  %v12111_v1 = vmax.f32 %v12100_v37, 0.0  ;;  %v12873_v32 = vld [vmem:[#allocation3 + $0x8] sm:$0xf] }
 0x664   : > { %12883 = vst [vmem:[#allocation3 + $0x18] sm:$0xf] %v12882_v16  ;;  %v12529_v17 = vcombine.low %v12521_v53, %v12528_v55  ;;  %v12567_v22 = vcombine.low %v12559_v54, %v12566_v43  ;;  %12876 = vst.msk [vmem:[#allocation3 + $0xc] sm:$0x1] %vm7098_vm7, %v12550_v59  ;;  %v12086_v39 = vadd.f32 %v17548_v49, %v11616_v15  ;;  %v12109_v0 = vmax.f32 %v12098_v23, 0.0 }
 0x665   : > { %v12112_v42 = vmax.f32 %v12101_v29, 0.0  ;;  %v12099_v19 = vadd.f32 %v22110_v56, %v12081_v45  ;;  %v12084_v18 = vadd.f32 %v12062_v33, %v11608_v5  ;;  %v11611_v30 = vadd.f32 %v11610_v31, %v22105_v11 }
 0x666   : > { %v12536_v44 = vrot.slane %v12529_v17, %v23782_v61  ;;  %v12574_v36 = vrot.slane %v12567_v22, %v23782_v61  ;;  %v12104_v52 = vadd.f32 %v22110_v56, %v12086_v39  ;;  %v12223_v47 = vcombine.high %v22122_v26, %v22122_v26 }
 0x667   : > { %v12119_v9 = vpack.c.bf16 %v12112_v42, %v12111_v1  ;;  %v17109_v34 = vpack.c.bf16 %v12112_v42, %v12112_v42  ;;  %v12110_v28 = vmax.f32 %v12099_v19, 0.0  ;;  %v22178_v49 = vadd.f32 %v22110_v56, %v12084_v18 }
 0x668   : > { %v12874_v33 = vsel %vm20335_vm9, %v12536_v44, %v12873_v32  ;;  %v12878_v12 = vsel %vm20335_vm9, %v12574_v36, %v12877_v51  ;;  %v12115_v57 = vmax.f32 %v12104_v52, 0.0  ;;  %v12085_v13 = vadd.f32 %v12065_v21, %v11611_v30 }
 0x669   : > { %12875 = vst [vmem:[#allocation3 + $0x8] sm:$0xf] %v12874_v33  ;;  %12879 = vst [vmem:[#allocation3 + $0x10] sm:$0xf] %v12878_v12  ;;  %v12282_v11 = vrot.slane %v12119_v9, %v18488_v35  ;;  %v12289_v48 = vrot.slane %v17109_v34, %v18488_v35  ;;  %v12118_v50 = vpack.c.bf16 %v12110_v28, %v12109_v0  ;;  %v12113_v26 = vmax.f32 %v22178_v49, 0.0 }
 0x66a   : > { %v17108_v7 = vpack.c.bf16 %v12110_v28, %v12110_v28  ;;  %v12635_v24 = vrot.slane %v22150_v8, %v23782_v61  ;;  %v22190_v38 = vpack.c.bf16 %v12115_v57, %v12115_v57  ;;  %v12103_v10 = vadd.f32 %v22110_v56, %v12085_v13  ;;  %v12885_v49 = vld [vmem:[#allocation3 + $0x20] sm:$0xf] }
 0x66b   : > { %v12290_v20 = vcombine.high %v12282_v11, %v12282_v11  ;;  %v12291_v6 = vcombine.high %v12289_v48, %v12289_v48  ;;  %v22194_v3 = vrot.slane %v12282_v11, %v18488_v35  ;;  %v12305_v4 = vrot.slane %v12289_v48, %v18488_v35 }
 0x66c   : > { %v12233_v58 = vrot.slane %v12118_v50, %v18488_v35  ;;  %v12240_v63 = vrot.slane %v17108_v7, %v18488_v35  ;;  %v22200_v62 = vmax.f32 %v12103_v10, 0.0 }
 0x66d   : > { %v12312_v25 = vrot.slane %v12290_v20, %v18488_v35  ;;  %v12319_v37 = vrot.slane %v12291_v6, %v18488_v35  ;;  %v12320_v56 = vcombine.high %v22194_v3, %v22194_v3  ;;  %v12321_v2 = vcombine.high %v12305_v4, %v12305_v4 }
 0x66e   : > { %v12444_v27 = vunpack.i.h.s16 %v12305_v4  ;;  %v12241_v14 = vcombine.high %v12233_v58, %v12233_v58  ;;  %v12242_v43 = vcombine.high %v12240_v63, %v12240_v63  ;;  %v12249_v41 = vrot.slane %v12233_v58, %v18488_v35 }
 0x66f   : > { %v12322_v53 = vcombine.high %v12312_v25, %v12312_v25  ;;  %v22207_v23 = vcombine.high %v12319_v37, %v12319_v37  ;;  %v12446_v46 = vunpack.i.h.s16 %v12319_v37  ;;  %v12448_v40 = vunpack.i.h.s16 %v12321_v2 }
 0x670   : > { %v17128_v55 = vpack.i.b16 %v12319_v37, %v12444_v27  ;;  %v12733_v59 = vrot.slane %v12320_v56, %v23782_v61  ;;  %v12256_v54 = vrot.slane %v12240_v63, %v18488_v35  ;;  %v12263_v15 = vrot.slane %v12241_v14, %v18488_v35 }
 0x671   : > { %v12442_v16 = vunpack.i.h.s16 %v12322_v53  ;;  %v17126_v29 = vpack.i.b16 %v12322_v53, %v12322_v53  ;;  %v17129_v5 = vpack.i.b16 %v12321_v2, %v12446_v46  ;;  %v17130_v45 = vpack.i.b16 %v22207_v23, %v12448_v40  ;;  %v22229_v2 = vld [vmem:[#allocation3 + $0x10] sm:$0x3f]   ;;  %v12897_v53 = vld [vmem:[#allocation3 + $0x38] sm:$0xf] }
 0x672   : > { %v12740_v31 = vrot.slane %v12733_v59, %v23782_v61  ;;  %v12270_v17 = vrot.slane %v12242_v43, %v18488_v35  ;;  %v12271_v22 = vcombine.high %v12249_v41, %v12249_v41  ;;  %v12272_v1 = vcombine.high %v12256_v54, %v12256_v54 }
 0x673   : > { %v17127_v39 = vpack.i.b16 %v12305_v4, %v12442_v16  ;;  %v12741_v0 = vcombine.low %v17126_v29, %v17128_v55  ;;  %v12771_v42 = vrot.slane %v17130_v45, %v23782_v61  ;;  %v12273_v19 = vcombine.high %v12263_v15, %v12263_v15 }
 0x674   : > { %12896 = vst.msk [vmem:[#allocation3 + $0x34] sm:$0x1] %vm7098_vm7, %v12740_v31  ;;  %v12274_v18 = vcombine.high %v12270_v17, %v12270_v17  ;;  %v12424_v21 = vunpack.i.h.s16 %v12271_v22  ;;  %v12428_v44 = vunpack.i.h.s16 %v12256_v54  ;;  %v12430_v36 = vunpack.i.h.s16 %v12270_v17 }
 0x675   : > { %v12742_v52 = vcombine.low %v17127_v39, %v17129_v5  ;;  %v12749_v30 = vrot.slane %v12741_v0, %v23782_v61  ;;  %v12778_v32 = vrot.slane %v12771_v42, %v23782_v61  ;;  %v12426_v51 = vunpack.i.h.s16 %v12273_v19  ;;  %v12893_v42 = vld [vmem:[#allocation3 + $0x30] sm:$0xf] }
 0x676   : > { %v12432_v9 = vunpack.i.h.s16 %v12272_v1  ;;  %v17121_v34 = vpack.i.b16 %v12271_v22, %v12271_v22  ;;  %v17122_v28 = vpack.i.b16 %v12273_v19, %v12424_v21  ;;  %v17124_v33 = vpack.i.b16 %v12270_v17, %v12428_v44  ;;  %v12889_v17 = vld [vmem:[#allocation3 + $0x28] sm:$0xf] }
 0x677   : > { %v12756_v12 = vrot.slane %v12742_v52, %v23782_v61  ;;  %12900 = vst.msk [vmem:[#allocation3 + $0x3c] sm:$0x1] %vm7098_vm7, %v12778_v32  ;;  %v17123_v57 = vpack.i.b16 %v12256_v54, %v12426_v51  ;;  %v17125_v13 = vpack.i.b16 %v12272_v1, %v12430_v36  ;;  %v12628_v11 = vcombine.low %v12223_v47, %v12249_v41  ;;  %v22237_v41 = vld [vmem:[#allocation3 + $0x8] sm:$0x3f]   ;;  %v22252_v54 = vld [vmem:[#allocation3 + $0x18] sm:$0x3f]  }
 0x678   : > { %v12493_v48 = vpack.i.b16 %v12432_v9, %v12432_v9  ;;  %v12657_v50 = vrot.slane %v12263_v15, %v23782_v61  ;;  %v12666_v7 = vcombine.low %v17122_v28, %v17124_v33  ;;  %v12704_v10 = vcombine.low %v12274_v18, %v12312_v25 }
 0x679   : > { %v12757_v20 = vcombine.low %v12749_v30, %v12756_v12  ;;  %v12642_v6 = vrot.slane %v12628_v11, %v23782_v61  ;;  %v12665_v4 = vcombine.low %v17121_v34, %v17123_v57  ;;  %v12695_v58 = vrot.slane %v17125_v13, %v23782_v61 }
 0x67a   : > { %v12664_v63 = vrot.slane %v12657_v50, %v23782_v61  ;;  %v12680_v37 = vrot.slane %v12666_v7, %v23782_v61  ;;  %v12703_v56 = vcombine.low %v12493_v48, %v22194_v3  ;;  %v12379_v47 = vrot.slane %v22190_v38, %v18488_v35 }
 0x67b   : > { %v12764_v27 = vrot.slane %v12757_v20, %v23782_v61  ;;  %v12643_v25 = vcombine.low %v12635_v24, %v12642_v6  ;;  %v12673_v14 = vrot.slane %v12665_v4, %v23782_v61  ;;  %v12702_v43 = vrot.slane %v12695_v58, %v23782_v61 }
 0x67c   : > { %v12711_v3 = vrot.slane %v12703_v56, %v23782_v61  ;;  %v12718_v46 = vrot.slane %v12704_v10, %v23782_v61  ;;  %12888 = vst.msk [vmem:[#allocation3 + $0x24] sm:$0x1] %vm7098_vm7, %v12664_v63  ;;  %v12120_v38 = vpack.c.bf16 %v22200_v62, %v12113_v26  ;;  %v17110_v8 = vpack.c.bf16 %v22200_v62, %v22200_v62 }
 0x67d   : > { %v12898_v24 = vsel %vm20335_vm9, %v12764_v27, %v12897_v53  ;;  %v12650_v40 = vrot.slane %v12643_v25, %v23782_v61  ;;  %v12681_v55 = vcombine.low %v12673_v14, %v12680_v37  ;;  %12892 = vst.msk [vmem:[#allocation3 + $0x2c] sm:$0x1] %vm7098_vm7, %v12702_v43  ;;  %v12450_v59 = vunpack.i.h.s16 %v22207_v23 }
 0x67e   : > { %12899 = vst [vmem:[#allocation3 + $0x38] sm:$0xf] %v12898_v24  ;;  %v12719_v15 = vcombine.low %v12711_v3, %v12718_v46  ;;  %v12331_v26 = vrot.slane %v12120_v38, %v18488_v35  ;;  %v12338_v16 = vrot.slane %v17110_v8, %v18488_v35  ;;  %v13059_v62 = vrot.slane %v22229_v2, 1 }
 0x67f   : > { %v12688_v29 = vrot.slane %v12681_v55, %v23782_v61  ;;  %v12886_v5 = vsel %vm20335_vm9, %v12650_v40, %v12885_v49  ;;  %v12386_v45 = vrot.slane %v12379_v47, %v18488_v35  ;;  %v13058_v23 = vrot.slane %v22237_v41, 1 }
 0x680   : > { %v12726_v31 = vrot.slane %v12719_v15, %v23782_v61  ;;  %12887 = vst [vmem:[#allocation3 + $0x20] sm:$0xf] %v12886_v5  ;;  %v12339_v22 = vcombine.high %v12331_v26, %v12331_v26  ;;  %v12340_v1 = vcombine.high %v12338_v16, %v12338_v16  ;;  %v12347_v39 = vrot.slane %v12331_v26, %v18488_v35 }
 0x681   : > { %13070 = vrot.lane.b32.xlu1 %v13059_v62, %s17798_s17  ;;  %v12890_v0 = vsel %vm20335_vm9, %v12688_v29, %v12889_v17  ;;  %v12354_v19 = vrot.slane %v12338_v16, %v18488_v35  ;;  %v12503_v18 = vpack.i.b16 %v12450_v59, %v12450_v59  ;;  %13068 = vrot.lane.b32.xlu0 %v13058_v23, %s17798_s17  ;;  %v13060_v21 = vrot.slane %v22252_v54, 1  ;;  %v12901_v16 = vld [vmem:[#allocation3 + $0x40] sm:$0xf] }
 0x682   : > { %12891 = vst [vmem:[#allocation3 + $0x28] sm:$0xf] %v12890_v0  ;;  %v12894_v44 = vsel %vm20335_vm9, %v12726_v31, %v12893_v42  ;;  %v12361_v36 = vrot.slane %v12339_v22, %v18488_v35  ;;  %v12368_v52 = vrot.slane %v12340_v1, %v18488_v35  ;;  %v12369_v30 = vcombine.high %v12347_v39, %v12347_v39  ;;  %v12905_v42 = vld [vmem:[#allocation3 + $0x48] sm:$0xf] }
 0x683   : > { %12895 = vst [vmem:[#allocation3 + $0x30] sm:$0xf] %v12894_v44  ;;  %v12370_v32 = vcombine.high %v12354_v19, %v12354_v19  ;;  %v12460_v51 = vunpack.i.h.s16 %v12354_v19  ;;  %v12991_v9 = vshrl.u32 %v22229_v2, 16  ;;  %v12993_v34 = vshll.u32 %v22229_v2, 16 }
 0x684   : > { %v12371_v28 = vcombine.high %v12361_v36, %v12361_v36  ;;  %v12372_v33 = vcombine.high %v12368_v52, %v12368_v52  ;;  %v12462_v12 = vunpack.i.h.s16 %v12368_v52  ;;  %v12779_v57 = vcombine.low %v12503_v18, %v12361_v36 }
 0x685   : > { %13072 = vrot.lane.b32.xlu1 %v13060_v21, %s17798_s17  ;;  %v12464_v13 = vunpack.i.h.s16 %v12370_v32  ;;  %v17131_v11 = vpack.i.b16 %v12354_v19, %v12354_v19  ;;  %v12780_v48 = vcombine.low %v12347_v39, %v12369_v30  ;;  %v12995_v50 = vrot.slane %v12993_v34, 1  ;;  %v22308_v18 = vld [vmem:[#allocation3 + $0x38] sm:$0x3f]  }
 0x686   : > { %v12466_v7 = vunpack.i.h.s16 %v12372_v33  ;;  %v17133_v10 = vpack.i.b16 %v12370_v32, %v12462_v12  ;;  %v12787_v20 = vrot.slane %v12779_v57, %v23782_v61  ;;  %v12809_v6 = vrot.slane %v12371_v28, %v23782_v61 }
 0x687   : > { %v17132_v4 = vpack.i.b16 %v12368_v52, %v12460_v51  ;;  %v17134_v58 = vpack.i.b16 %v12372_v33, %v12464_v13  ;;  %v12794_v63 = vrot.slane %v12780_v48, %v23782_v61  ;;  %v12996_v37 = vor.u32 %v12995_v50, %v12991_v9  ;;  %v22280_v56 = vld [vmem:[#allocation3 + $0x20] sm:$0x3f]   ;;  %v17737_v33 = vld [vmem:[%s23432_s8 + $0x28] sm:$0xff]  }
 0x688   : > { %v17135_v47 = vpack.i.b16 %v12386_v45, %v12466_v7  ;;  %v12816_v27 = vrot.slane %v12809_v6, %v23782_v61  ;;  %v12817_v25 = vcombine.low %v17131_v11, %v17133_v10  ;;  %v12986_v14 = vshll.u32 %v22237_v41, 16  ;;  %v22328_v13 = vld [vmem:[#allocation3] sm:$0x3f]   ;;  %17550 = vmatprep.subr.bf16.mxu1 %v17737_v33  ;;  %v17738_v6 = vld [vmem:[%s23432_s8 + $0x20] sm:$0xff]  }
 0x689   : > { %v12795_v43 = vcombine.low %v12787_v20, %v12794_v63  ;;  %v12818_v53 = vcombine.low %v17132_v4, %v17134_v58  ;;  %13043 = vrot.lane.b32.xlu0 %v12996_v37, %s17794_s15  ;;  %v12984_v3 = vshrl.u32 %v22237_v41, 16  ;;  %v13000_v24 = vshll.u32 %v22252_v54, 16  ;;  %v22305_v39 = vld [vmem:[#allocation3 + $0x28] sm:$0x3f]   ;;  %17551 = vmatpush3.bf16.msra.mxu1 %v17737_v33  ;;  %v22343_v37 = vld [vmem:[#allocation3 + $0x50] sm:$0x3f]  }
 0x68a   : > { %v12825_v46 = vrot.slane %v12817_v25, %v23782_v61  ;;  %v12847_v38 = vrot.slane %v17135_v47, %v23782_v61  ;;  %12904 = vst.msk [vmem:[#allocation3 + $0x44] sm:$0x1] %vm7098_vm7, %v12816_v27  ;;  %v12988_v8 = vrot.slane %v12986_v14, 1  ;;  %v13061_v59 = vrot.slane %v22280_v56, 1  ;;  %v22294_v49 = vld [vmem:[#allocation3 + $0x30] sm:$0x3f]   ;;  %17552 = vmatprep.subr.bf16.mxu1 %v17738_v6 }
 0x68b   : > { %v12802_v40 = vrot.slane %v12795_v43, %v23782_v61  ;;  %v12832_v55 = vrot.slane %v12818_v53, %v23782_v61  ;;  %v13007_v15 = vshll.u32 %v22280_v56, 16  ;;  %v13002_v29 = vrot.slane %v13000_v24, 1 }
 0x68c   : > { %v12854_v26 = vrot.slane %v12847_v38, %v23782_v61  ;;  %v12989_v62 = vor.u32 %v12988_v8, %v12984_v3  ;;  %v13005_v23 = vshrl.u32 %v22280_v56, 16  ;;  %v12998_v17 = vshrl.u32 %v22252_v54, 16 }
 0x68d   : > { %v12833_v5 = vcombine.low %v12825_v46, %v12832_v55  ;;  %v12902_v45 = vsel %vm20335_vm9, %v12802_v40, %v12901_v16  ;;  %13074 = vrot.lane.b32.xlu0 %v13061_v59, %s17798_s17  ;;  %v13009_v31 = vrot.slane %v13007_v15, 1  ;;  %v13021_v0 = vshll.u32 %v22294_v49, 16  ;;  %17553 = vmatpush3.bf16.msra.mxu1 %v17738_v6  ;;  %v17740_v16 = vld [vmem:[%s23432_s8 + $0x10] sm:$0xff]  }
 0x68e   : > { %12903 = vst [vmem:[#allocation3 + $0x40] sm:$0xf] %v12902_v45  ;;  %12908 = vst.msk [vmem:[#allocation3 + $0x4c] sm:$0x1] %vm7098_vm7, %v12854_v26  ;;  %13041 = vrot.lane.b32.xlu1 %v12989_v62, %s17794_s15  ;;  %v13003_v19 = vor.u32 %v13002_v29, %v12998_v17  ;;  %v13062_v44 = vrot.slane %v22305_v39, 1  ;;  %v13014_v52 = vshll.u32 %v22305_v39, 16  ;;  %17568 = vmatprep.subr.bf16.mxu0 %v17740_v16 }
 0x68f   : > { %v12840_v22 = vrot.slane %v12833_v5, %v23782_v61  ;;  %v13010_v1 = vor.u32 %v13009_v31, %v13005_v23  ;;  %v13023_v36 = vrot.slane %v13021_v0, 1  ;;  %v13063_v30 = vrot.slane %v22294_v49, 1  ;;  %v17739_v26 = vld [vmem:[%s23432_s8 + $0x18] sm:$0xff]   ;;  %17569 = vmatpush3.bf16.msra.mxu0 %v17740_v16  ;;  %v22371_v62 = vld [vmem:[%s23432_s8 + $0x40] sm:$0xff]   ;;  %v17742_v29 = vld [vmem:[%s23432_s8 + $0x8] sm:$0xff]  }
 0x690   : > { %v13019_v32 = vshrl.u32 %v22294_v49, 16  ;;  %v13028_v51 = vshll.u32 %v22308_v18, 16  ;;  %v13016_v34 = vrot.slane %v13014_v52, 1  ;;  %v13064_v12 = vrot.slane %v22308_v18, 1  ;;  %17554 = vmatprep.subr.bf16.mxu1 %v17739_v26  ;;  %17570 = vmatprep.subr.bf16.mxu0 %v17742_v29  ;;  %v17744_v5 = vld [vmem:[%s23432_s8] sm:$0xff]  }
 0x691   : > { %v12906_v21 = vsel %vm20335_vm9, %v12840_v22, %v12905_v42  ;;  %13047 = vrot.lane.b32.xlu0 %v13010_v1, %s17794_s15  ;;  %v13012_v11 = vshrl.u32 %v22305_v39, 16  ;;  %v13026_v50 = vshrl.u32 %v22308_v18, 16  ;;  %v12979_v63 = vshll.u32 %v22328_v13, 16  ;;  %17555 = vmatpush3.bf16.msra.mxu1 %v17739_v26 }
 0x692   : > { %12907 = vst [vmem:[#allocation3 + $0x48] sm:$0xf] %v12906_v21  ;;  %13045 = vrot.lane.b32.xlu1 %v13003_v19, %s17794_s15  ;;  %v13024_v9 = vor.u32 %v13023_v36, %v13019_v32  ;;  %v13030_v57 = vrot.slane %v13028_v51, 1  ;;  %v12977_v43 = vshrl.u32 %v22328_v13, 16  ;;  %v14471_v3 = vshll.u32 %v22343_v37, 16  ;;  %17586 = vmatprep.subr.bf16.mxu1 %v22371_v62 }
 0x693   : > { %v13017_v7 = vor.u32 %v13016_v34, %v13012_v11  ;;  %v12981_v53 = vrot.slane %v12979_v63, 1  ;;  %v14469_v24 = vshrl.u32 %v22343_v37, 16  ;;  %v13057_v55 = vrot.slane %v22328_v13, 1  ;;  %17571 = vmatpush3.bf16.msra.mxu0 %v17742_v29 }
 0x694   : > { %v13031_v4 = vor.u32 %v13030_v57, %v13026_v50  ;;  %v14473_v40 = vrot.slane %v14471_v3, 1  ;;  %v14477_v15 = vrot.slane %v22343_v37, 1  ;;  %17572 = vmatprep.subr.bf16.mxu0 %v17744_v5 }
 0x695   : > { %13076 = vrot.lane.b32.xlu0 %v13062_v44, %s17798_s17  ;;  %v22320_v60 = vld [vmem:[#allocation3 + $0x40] sm:$0x3f]   ;;  %v12982_v8 = vor.u32 %v12981_v53, %v12977_v43 }
 0x696   : > { %13078 = vrot.lane.b32.xlu1 %v13063_v30, %s17798_s17  ;;  %v13035_v28 = vshll.u32 %v22320_v60, 16  ;;  %v13033_v58 = vshrl.u32 %v22320_v60, 16  ;;  %v13065_v25 = vrot.slane %v22320_v60, 1  ;;  %v14474_v59 = vor.u32 %v14473_v40, %v14469_v24 }
 0x697   : > { %17573 = vmatpush3.bf16.msra.mxu0 %v17744_v5 }
 0x698   : > { %v13037_v10 = vrot.slane %v13035_v28, 1 }
 0x699   : > { %13051 = vrot.lane.b32.xlu0 %v13024_v9, %s17794_s15  ;;  %v22332_v48 = vld [vmem:[#allocation3 + $0x48] sm:$0x3f]  }
 0x69a   : > { %13080 = vrot.lane.b32.xlu1 %v13064_v12, %s17798_s17  ;;  %v13569_v20 = vshll.u32 %v22332_v48, 16  ;;  %v13038_v47 = vor.u32 %v13037_v10, %v13033_v58  ;;  %v13567_v14 = vshrl.u32 %v22332_v48, 16  ;;  %v13575_v38 = vrot.slane %v22332_v48, 1 }
 0x69c   : > { %v13571_v27 = vrot.slane %v13569_v20, 1 }
 0x69d   : > { %13049 = vrot.lane.b32.xlu0 %v13017_v7, %s17794_s15 }
 0x69e   : > { %13053 = vrot.lane.b32.xlu1 %v13031_v4, %s17794_s15  ;;  %v13572_v46 = vor.u32 %v13571_v27, %v13567_v14 }
 0x6a1   : > { %13055 = vrot.lane.b32.xlu0 %v13038_v47, %s17794_s15 }
 0x6a2   : > { %13082 = vrot.lane.b32.xlu1 %v13065_v25, %s17798_s17 }
 0x6a5   : > { %13573 = vrot.lane.b32.xlu0 %v13572_v46, %s17794_s15 }
 0x6a6   : > { %13576 = vrot.lane.b32.xlu1 %v13575_v38, %s17798_s17 }
 0x6a9   : > { %13039 = vrot.lane.b32.xlu0 %v12982_v8, %s17794_s15 }
 0x6aa   : > { %13066 = vrot.lane.b32.xlu1 %v13057_v55, %s17798_s17 }
 0x6ad   : > { %14475 = vrot.lane.b32.xlu0 %v14474_v59, %s17794_s15  ;;  %s23038_s15 = scalar_lea.vmem %s23436_s12, %s17626_s14 }
 0x6ae   : > { %14478 = vrot.lane.b32.xlu1 %v14477_v15, %s17798_s17 }
 0x6f3   : > { %v13071_v45 = vpop.permute.xlu1 %13070  ;;  %v13069_v23 = vpop.permute.xlu0 %13068 }
 0x6f7   : > { %v13073_v31 = vpop.permute.xlu1 %13072 }
 0x6fb   : > { %v13044_v17 = vpop.permute.xlu0 %13043 }
 0x6fc   : > { %v13089_v22 = vsel %vm1222_vm11, %v22229_v2, %v13044_v17 }
 0x6fd   : > { %v13107_v1 = vsel %vm7325_vm10, %v13089_v22, %v13071_v45 }
 0x6fe   : > { %v13207_v0 = vcombine.high %v13107_v1, %v13107_v1  ;;  %v13214_v42 = vrot.slane %v13107_v1, %v18488_v35 }
 0x6ff   : > { %v13075_v19 = vpop.permute.xlu0 %13074 }
 0x700   : > { %v13221_v21 = vrot.slane %v13207_v0, %v18488_v35  ;;  %v13222_v44 = vcombine.high %v13214_v42, %v13214_v42  ;;  %v22386_v36 = vrot.slane %v13214_v42, %v18488_v35  ;;  %v13042_v52 = vpop.permute.xlu1 %13041 }
 0x701   : > { %v13087_v30 = vsel %vm1222_vm11, %v22237_v41, %v13042_v52 }
 0x702   : > { %v22391_v32 = vrot.slane %v13222_v44, %v18488_v35  ;;  %v22395_v2 = vcombine.high %v22386_v36, %v22386_v36  ;;  %v13105_v51 = vsel %vm7325_vm10, %v13087_v30, %v13069_v23  ;;  %v13236_v33 = vrot.slane %v13221_v21, %v18488_v35 }
 0x703   : > { %v13168_v9 = vcombine.high %v13105_v51, %v13105_v51  ;;  %v13175_v34 = vrot.slane %v13105_v51, %v18488_v35  ;;  %v13048_v28 = vpop.permute.xlu0 %13047  ;;  %v13499_v10 = vunpack.i.h.s16 %v22386_v36 }
 0x704   : > { %v22402_v12 = vcombine.high %v22391_v32, %v22391_v32  ;;  %v13046_v41 = vpop.permute.xlu1 %13045  ;;  %v13093_v57 = vsel %vm1222_vm11, %v22280_v56, %v13048_v28  ;;  %v14138_v6 = vcombine.low %v22391_v32, %v22395_v2  ;;  %v13501_v38 = vunpack.i.h.s16 %v22391_v32 }
 0x705   : > { %v13182_v11 = vrot.slane %v13168_v9, %v18488_v35  ;;  %v13183_v50 = vcombine.high %v13175_v34, %v13175_v34  ;;  %v22408_v7 = vrot.slane %v13175_v34, %v18488_v35  ;;  %v13091_v4 = vsel %vm1222_vm11, %v22252_v54, %v13046_v41 }
 0x706   : > { %v13505_v20 = vunpack.i.h.s16 %v22402_v12  ;;  %v13111_v58 = vsel %vm7325_vm10, %v13093_v57, %v13075_v19  ;;  %v13109_v27 = vsel %vm7325_vm10, %v13091_v4, %v13073_v31  ;;  %v17147_v8 = vpack.i.b16 %v22391_v32, %v13499_v10 }
 0x707   : > { %v13197_v56 = vrot.slane %v13182_v11, %v18488_v35  ;;  %v22419_v63 = vrot.slane %v13183_v50, %v18488_v35  ;;  %v22423_v47 = vcombine.high %v22408_v7, %v22408_v7  ;;  %v22426_v25 = vpop.permute.xlu0 %13076  ;;  %v13246_v14 = vcombine.high %v13109_v27, %v13109_v27 }
 0x708   : > { %v13253_v43 = vrot.slane %v13109_v27, %v18488_v35  ;;  %v13079_v53 = vpop.permute.xlu1 %13078  ;;  %v17150_v54 = vpack.i.b16 %v13236_v33, %v13505_v20  ;;  %v13292_v46 = vrot.slane %v13111_v58, %v18488_v35  ;;  %v13285_v55 = vcombine.high %v13111_v58, %v13111_v58 }
 0x709   : > { %23784 = vst [vmem:[#allocation13_spill] sm:$0xff] %v22423_v47  ;;  %v13206_v3 = vcombine.high %v22419_v63, %v22419_v63  ;;  %v13494_v59 = vunpack.i.h.s16 %v22423_v47  ;;  %v17146_v26 = vpack.i.b16 %v22386_v36, %v13197_v56  ;;  %v14154_v16 = vrot.slane %v14138_v6, %v18488_v35 }
 0x70a   : > { %v13261_v24 = vcombine.high %v13253_v43, %v13253_v43  ;;  %v13268_v40 = vrot.slane %v13253_v43, %v18488_v35  ;;  %v13260_v29 = vrot.slane %v13246_v14, %v18488_v35  ;;  %v13300_v23 = vcombine.high %v13292_v46, %v13292_v46 }
 0x70b   : > { %v13496_v15 = vunpack.i.h.s16 %v13206_v3  ;;  %v22447_v1 = vrot.slane %v13292_v46, %v18488_v35  ;;  %v13052_v42 = vpop.permute.xlu0 %13051  ;;  %v13299_v52 = vrot.slane %v13285_v55, %v18488_v35  ;;  %v22456_v30 = vcombine.low %v17146_v26, %v17147_v8 }
 0x70c   : > { %v22440_v5 = vrot.slane %v13261_v24, %v18488_v35  ;;  %v22442_v45 = vcombine.high %v13268_v40, %v13268_v40  ;;  %v13721_v17 = vcombine.low %v17150_v54, %v13268_v40  ;;  %v22444_v22 = vpack.i.b16 %v13268_v40, %v13236_v33  ;;  %v13081_v0 = vpop.permute.xlu1 %13080 }
 0x70d   : > { %v17182_v31 = vpack.i.b16 %v13197_v56, %v13496_v15  ;;  %v13508_v21 = vunpack.i.h.s16 %v13268_v40  ;;  %v22463_v28 = vrot.slane %v13260_v29, %v18488_v35  ;;  %v22472_v11 = vpack.i.b16 %v13206_v3, %v13494_v59 }
 0x70e   : > { %v22451_v19 = vcombine.high %v22440_v5, %v22440_v5  ;;  %v13722_v44 = vcombine.low %v22440_v5, %v22442_v45  ;;  %v13512_v9 = vunpack.i.h.s16 %v22442_v45  ;;  %v14139_v34 = vcombine.low %v22402_v12, %v22444_v22 }
 0x70f   : > { %v14137_v51 = vcombine.low %v17182_v31, %v22386_v36  ;;  %v22467_v41 = vrot.slane %v13721_v17, %v18488_v35  ;;  %23785 = vst [vmem:[#allocation11_spill] sm:$0xff] %v22472_v11  ;;  %v22476_v10 = vrot.slane %v13300_v23, %v18488_v35  ;;  %v22480_v20 = vcombine.high %v22447_v1, %v22447_v1  ;;  %v13050_v46 = vpop.permute.xlu0 %13049 }
 0x710   : > { %v13514_v33 = vunpack.i.h.s16 %v22451_v19  ;;  %v22470_v57 = vrot.slane %v13722_v44, %v18488_v35  ;;  %v22484_v4 = vpack.i.b16 %v22440_v5, %v13508_v21  ;;  %v13517_v56 = vunpack.i.h.s16 %v22447_v1  ;;  %v13054_v3 = vpop.permute.xlu1 %13053 }
 0x711   : > { %v14147_v50 = vrot.slane %v14137_v51, %v18488_v35  ;;  %23786 = vst [vmem:[#allocation17_spill] sm:$0xff] %v22476_v10  ;;  %23787 = vst [vmem:[#allocation6_spill] sm:$0xff] %v22480_v20  ;;  %v22491_v27 = vpack.i.b16 %v22451_v19, %v13512_v9  ;;  %v22494_v14 = vrot.slane %v14139_v34, %v18488_v35  ;;  %v13519_v15 = vunpack.i.h.s16 %v22476_v10 }
 0x712   : > { %v22487_v58 = vpack.i.b16 %v22463_v28, %v13514_v33  ;;  %v22497_v43 = vrot.slane %v13299_v52, %v18488_v35  ;;  %v22501_v54 = vcombine.high %v22476_v10, %v22476_v10  ;;  %v13097_v55 = vsel %vm1222_vm11, %v22294_v49, %v13052_v42 }
 0x713   : > { %v14169_v8 = vcombine.low %v14147_v50, %v14154_v16  ;;  %v13521_v26 = vunpack.i.h.s16 %v22480_v20  ;;  %v22515_v16 = vpack.i.b16 %v22476_v10, %v13517_v56  ;;  %v13115_v23 = vsel %vm7325_vm10, %v13097_v55, %v13079_v53 }
 0x714   : > { %23788 = vst [vmem:[#allocation7_spill] sm:$0xff] %v22487_v58  ;;  %23789 = vst [vmem:[#allocation4_spill] sm:$0xff] %v22497_v43  ;;  %v13523_v29 = vunpack.i.h.s16 %v22501_v54  ;;  %v13099_v31 = vsel %vm1222_vm11, %v22308_v18, %v13054_v3  ;;  %v13095_v49 = vsel %vm1222_vm11, %v22305_v39, %v13050_v46  ;;  %v13363_v42 = vcombine.high %v13115_v23, %v13115_v23 }
 0x715   : > { %23790 = vst [vmem:[#allocation22_spill] sm:$0xff] %v22501_v54  ;;  %v13370_v21 = vrot.slane %v13115_v23, %v18488_v35  ;;  %v13117_v44 = vsel %vm7325_vm10, %v13099_v31, %v13081_v0  ;;  %v22527_v52 = vrot.slane %v14169_v8, %v18488_v35  ;;  %v13113_v18 = vsel %vm7325_vm10, %v13095_v49, %v22426_v25 }
 0x716   : > { %v13402_v51 = vcombine.high %v13117_v44, %v13117_v44  ;;  %v13409_v53 = vrot.slane %v13117_v44, %v18488_v35  ;;  %v22533_v9 = vpack.i.b16 %v22497_v43, %v13523_v29  ;;  %v13377_v39 = vrot.slane %v13363_v42, %v18488_v35 }
 0x717   : > { %23791 = vst [vmem:[#allocation20_spill] sm:$0xff] %v22527_v52  ;;  %v13378_v34 = vcombine.high %v13370_v21, %v13370_v21  ;;  %v22537_v33 = vrot.slane %v13370_v21, %v18488_v35  ;;  %v13324_v3 = vcombine.high %v13113_v18, %v13113_v18  ;;  %v22544_v46 = vpack.i.b16 %v22480_v20, %v13519_v15 }
 0x718   : > { %v13416_v0 = vrot.slane %v13402_v51, %v18488_v35  ;;  %v13417_v50 = vcombine.high %v13409_v53, %v13409_v53  ;;  %v22541_v56 = vrot.slane %v13409_v53, %v18488_v35  ;;  %v22547_v25 = vpack.i.b16 %v22501_v54, %v13521_v26  ;;  %v13056_v26 = vpop.permute.xlu0 %13055 }
 0x719   : > { %v22550_v8 = vrot.slane %v13378_v34, %v18488_v35  ;;  %v13331_v55 = vrot.slane %v13113_v18, %v18488_v35  ;;  %v13503_v31 = vunpack.i.h.s16 %v22395_v2  ;;  %v17148_v15 = vpack.i.b16 %v22395_v2, %v13501_v38 }
 0x71a   : > { %v22554_v29 = vrot.slane %v13417_v50, %v18488_v35  ;;  %v22558_v23 = vcombine.high %v22541_v56, %v22541_v56  ;;  %v13392_v49 = vrot.slane %v13377_v39, %v18488_v35  ;;  %v13535_v21 = vunpack.i.h.s16 %v22537_v33 }
 0x71b   : > { %v22567_v42 = vcombine.high %v22550_v8, %v22550_v8  ;;  %v13338_v44 = vrot.slane %v13324_v3, %v18488_v35  ;;  %v22574_v53 = vrot.slane %v13416_v0, %v18488_v35  ;;  %v13544_v38 = vunpack.i.h.s16 %v22541_v56  ;;  %v13083_v0 = vpop.permute.xlu1 %13082 }
 0x71c   : > { %v22578_v2 = vcombine.high %v22554_v29, %v22554_v29  ;;  %v13548_v39 = vunpack.i.h.s16 %v22558_v23  ;;  %v13339_v34 = vcombine.high %v13331_v55, %v13331_v55  ;;  %v22584_v50 = vrot.slane %v13331_v55, %v18488_v35  ;;  %v13574_v20 = vpop.permute.xlu0 %13573 }
 0x71d   : > { %v13541_v18 = vunpack.i.h.s16 %v22567_v42  ;;  %v13353_v17 = vrot.slane %v13338_v44, %v18488_v35  ;;  %v17149_v59 = vpack.i.b16 %v22402_v12, %v13503_v31  ;;  %v13672_v6 = vcombine.low %v22408_v7, %v22419_v63 }
 0x71e   : > { %v13550_v3 = vunpack.i.h.s16 %v22578_v2  ;;  %v22594_v24 = vpack.i.b16 %v22541_v56, %v13392_v49  ;;  %v17157_v40 = vpack.i.b16 %v22550_v8, %v13535_v21  ;;  %v22598_v55 = vrot.slane %v13339_v34, %v18488_v35 }
 0x71f   : > { %v22591_v51 = vpack.i.b16 %v13392_v49, %v13541_v18  ;;  %v13361_v61 = vcombine.high %v22584_v50, %v22584_v50  ;;  %v17166_v44 = vcombine.high %v22408_v7, %v22419_v63  ;;  %v13675_v12 = vcombine.low %v17148_v15, %v17149_v59  ;;  %v13577_v52 = vpop.permute.xlu1 %13576 }
 0x720   : > { %23792 = vst [vmem:[#allocation14_spill] sm:$0xff] %v22594_v24  ;;  %v13682_v31 = vrot.slane %v13672_v6, %v18488_v35  ;;  %v22607_v49 = vpack.i.b16 %v22554_v29, %v13544_v38  ;;  %v22610_v21 = vpack.i.b16 %v22574_v53, %v13550_v3  ;;  %v13362_v34 = vcombine.high %v22598_v55, %v22598_v55  ;;  %v13040_v43 = vpop.permute.xlu0 %13039 }
 0x721   : > { %v22615_v24 = vpack.i.b16 %v22578_v2, %v13548_v39  ;;  %v17156_v54 = vpack.i.b16 %v22537_v33, %v13353_v17  ;;  %v13689_v59 = vrot.slane %v17166_v44, %v18488_v35  ;;  %v13696_v6 = vrot.slane %v22456_v30, %v18488_v35 }
 0x722   : > { %23793 = vst [vmem:[#allocation21_spill] sm:$0xff] %v22607_v49  ;;  %v13528_v38 = vunpack.i.h.s16 %v22598_v55  ;;  %v13532_v3 = vunpack.i.h.s16 %v13362_v34  ;;  %v13703_v18 = vrot.slane %v13675_v12, %v18488_v35  ;;  %v13530_v49 = vunpack.i.h.s16 %v13361_v61 }
 0x723   : > { %v13704_v58 = vcombine.low %v13682_v31, %v13689_v59  ;;  %v13101_v39 = vsel %vm1222_vm11, %v22320_v60, %v13056_v26  ;;  %v13579_v44 = vsel %vm1222_vm11, %v22332_v48, %v13574_v20  ;;  %v23794_v20 = vpack.i.b16 %v22447_v1, %v22463_v28 }
 0x724   : > { %v13705_v11 = vcombine.low %v13696_v6, %v13703_v18  ;;  %v13119_v15 = vsel %vm7325_vm10, %v13101_v39, %v13083_v0  ;;  %v13581_v10 = vsel %vm7325_vm10, %v13579_v44, %v13577_v52  ;;  %v22633_v47 = vpack.i.b16 %v13353_v17, %v13532_v3 }
 0x725   : > { %v13441_v12 = vcombine.high %v13119_v15, %v13119_v15  ;;  %v13448_v31 = vrot.slane %v13119_v15, %v18488_v35  ;;  %v13583_v59 = vcombine.high %v13581_v10, %v13581_v10  ;;  %v13712_v60 = vrot.slane %v13704_v58, %v18488_v35  ;;  %v13067_v15 = vpop.permute.xlu1 %13066 }
 0x726   : > { %v13719_v26 = vrot.slane %v13705_v11, %v18488_v35  ;;  %v13590_v48 = vrot.slane %v13581_v10, %v18488_v35  ;;  %v13723_v0 = vcombine.low %v22451_v19, %v23794_v20  ;;  %v22643_v18 = vcombine.low %v17156_v54, %v17157_v40 }
 0x727   : > { %v22645_v17 = vpack.i.b16 %v13362_v34, %v13530_v49  ;;  %v13455_v52 = vrot.slane %v13441_v12, %v18488_v35  ;;  %v13456_v6 = vcombine.high %v13448_v31, %v13448_v31  ;;  %v13724_v11 = vcombine.low %v22515_v16, %v22544_v46  ;;  %v14476_v12 = vpop.permute.xlu0 %14475 }
 0x728   : > { %v13720_v3 = vcombine.low %v13712_v60, %v13719_v26  ;;  %v13598_v39 = vcombine.high %v13590_v48, %v13590_v48  ;;  %v22649_v58 = vrot.slane %v13590_v48, %v18488_v35  ;;  %v22653_v10 = vpack.i.b16 %v13361_v61, %v13528_v38 }
 0x729   : > { %v22658_v28 = vrot.slane %v13456_v6, %v18488_v35  ;;  %v13597_v54 = vrot.slane %v13583_v59, %v18488_v35  ;;  %v14641_v40 = vcombine.low %v22645_v17, %v22633_v47  ;;  %v13745_v16 = vrot.slane %v13723_v0, %v18488_v35 }
 0x72a   : > { %17556 = vmatprep.mubr.msk.bf16.mxu1 %vm8173_vm12, %v13720_v3  ;;  %v22665_v49 = vrot.slane %v13598_v39, %v18488_v35  ;;  %v13752_v61 = vrot.slane %v13724_v11, %v18488_v35  ;;  %v22670_v46 = vrot.slane %v13448_v31, %v18488_v35  ;;  %v22673_v34 = vrot.slane %v13455_v52, %v18488_v35 }
 0x72b   : > { %v22677_v38 = vcombine.high %v22649_v58, %v22649_v58  ;;  %v13085_v44 = vsel %vm1222_vm11, %v22328_v13, %v13040_v43  ;;  %v22683_v59 = vcombine.high %v22658_v28, %v22658_v28  ;;  %v22689_v48 = vrot.slane %v13597_v54, %v18488_v35  ;;  %v14479_v13 = vpop.permute.xlu1 %14478 }
 0x72c   : > { %v13621_v60 = vcombine.high %v22665_v49, %v22665_v49  ;;  %v13754_v31 = vcombine.low %v13745_v16, %v13752_v61  ;;  %v13103_v26 = vsel %vm7325_vm10, %v13085_v44, %v13067_v15  ;;  %v13490_v52 = vunpack.i.h.s16 %v22408_v7 }
 0x72d   : > { %v13129_v20 = vcombine.high %v13103_v26, %v13103_v26  ;;  %v13136_v0 = vrot.slane %v13103_v26, %v18488_v35  ;;  %v23795_v6 = vcombine.low %v22467_v41, %v22470_v57  ;;  %v14481_v15 = vsel %vm1222_vm11, %v22343_v37, %v14476_v12  ;;  %v17743_v57 = vld [vmem:[%s23432_s8 + $0x38] sm:$0xff]  }
 0x72e   : > { %v13629_v43 = vunpack.i.h.s16 %v13621_v60  ;;  %v13768_v39 = vrot.slane %v13754_v31, %v18488_v35  ;;  %v13627_v11 = vunpack.i.h.s16 %v22677_v38  ;;  %v13559_v44 = vunpack.i.h.s16 %v22683_v59 }
 0x72f   : > { %v13761_v3 = vrot.slane %v23795_v6, %v18488_v35  ;;  %v13143_v54 = vrot.slane %v13129_v20, %v18488_v35  ;;  %v13144_v16 = vcombine.high %v13136_v0, %v13136_v0  ;;  %v13151_v61 = vrot.slane %v13136_v0, %v18488_v35 }
 0x730   : > { %v14483_v30 = vsel %vm7325_vm10, %v14481_v15, %v14479_v13  ;;  %v13771_v41 = vcombine.low %v22584_v50, %v22598_v55  ;;  %v17179_v31 = vpack.i.b16 %v22419_v63, %v13490_v52  ;;  %v22715_v0 = vpack.i.b16 %v22689_v48, %v13629_v43 }
 0x731   : > { %v13769_v26 = vcombine.low %v13761_v3, %v13768_v39  ;;  %v13158_v37 = vrot.slane %v13143_v54, %v18488_v35  ;;  %v13165_v12 = vrot.slane %v13144_v16, %v18488_v35  ;;  %v14492_v20 = vrot.slane %v14483_v30, %v18488_v35 }
 0x732   : > { %v14485_v13 = vcombine.high %v14483_v30, %v14483_v30  ;;  %v17167_v6 = vcombine.high %v22584_v50, %v22598_v55  ;;  %v13787_v3 = vrot.slane %v13771_v41, %v18488_v35  ;;  %v23796_v52 = vcombine.low %v22547_v25, %v22533_v9 }
 0x733   : > { %17557 = vmatmul.mubr.msk.bf16.vlgmr.msra.gmra.mxu1 %vm8173_vm12, %v13769_v26  ;;  %v17178_v39 = vpack.i.b16 %v22408_v7, %v13158_v37  ;;  %v14088_v15 = vcombine.low %v13151_v61, %v13165_v12  ;;  %v17198_v54 = vcombine.high %v13151_v61, %v13165_v12  ;;  %v14500_v16 = vcombine.high %v14492_v20, %v14492_v20  ;;  %v17745_v7 = vld [vmem:[%s23432_s8 + $0x30] sm:$0xff]  }
 0x734   : > { %17587 = vmatpush3.bf16.msra.mxu1 %v22371_v62  ;;  %v13780_v43 = vrot.slane %v23796_v52, %v18488_v35  ;;  %v22728_v26 = vrot.slane %v14492_v20, %v18488_v35  ;;  %v13794_v30 = vrot.slane %v17167_v6, %v18488_v35  ;;  %v13801_v41 = vrot.slane %v22643_v18, %v18488_v35 }
 0x735   : > { %17588 = vmatprep.subr.bf16.mxu1 %v17743_v57  ;;  %v22736_v62 = vpack.i.b16 %v13621_v60, %v13627_v11  ;;  %v14090_v61 = vcombine.low %v17178_v39, %v17179_v31  ;;  %v22739_v9 = vrot.slane %v14088_v15, %v18488_v35  ;;  %v22742_v25 = vrot.slane %v17198_v54, %v18488_v35 }
 0x736   : > { %v22745_v37 = vrot.slane %v14500_v16, %v18488_v35  ;;  %v13802_v12 = vcombine.low %v13780_v43, %v13787_v3  ;;  %v13803_v20 = vcombine.low %v13794_v30, %v13801_v41  ;;  %v22749_v18 = vcombine.high %v22537_v33, %v22537_v33 }
 0x737   : > { %v17165_v6 = vpack.i.b16 %v22673_v34, %v13559_v44  ;;  %v13630_v60 = vunpack.i.l.s16 %v22689_v48  ;;  %v13537_v31 = vunpack.i.h.s16 %v22550_v8  ;;  %v22757_v39 = vrot.slane %v14485_v13, %v18488_v35 }
 0x738   : > { %17589 = vmatpush3.bf16.msra.mxu1 %v17743_v57  ;;  %v14741_v3 = vcombine.low %v22728_v26, %v22745_v37  ;;  %v13810_v15 = vrot.slane %v13802_v12, %v18488_v35  ;;  %v13817_v54 = vrot.slane %v13803_v20, %v18488_v35  ;;  %v22764_v44 = vrot.slane %v14090_v61, %v18488_v35 }
 0x739   : > { %17590 = vmatprep.subr.bf16.mxu1 %v17745_v7  ;;  %v13539_v48 = vunpack.i.h.s16 %v22749_v18  ;;  %v17158_v52 = vpack.i.b16 %v22749_v18, %v13537_v31  ;;  %v17161_v57 = vpack.i.b16 %v22670_v46, %v22574_v53  ;;  %v14120_v13 = vcombine.low %v22739_v9, %v22742_v25 }
 0x73a   : > { %v13818_v16 = vcombine.low %v13810_v15, %v13817_v54  ;;  %v13821_v30 = vcombine.low %v22554_v29, %v22558_v23  ;;  %v22777_v41 = vrot.slane %v14741_v3, %v18488_v35  ;;  %v22783_v53 = vcombine.high %v22670_v46, %v22670_v46 }
 0x73b   : > { %v17159_v61 = vpack.i.b16 %v22567_v42, %v13539_v48  ;;  %v13822_v12 = vcombine.low %v22578_v2, %v17161_v57  ;;  %v23797_v9 = vcombine.low %v22591_v51, %v22541_v56  ;;  %v13553_v31 = vunpack.i.h.s16 %v22670_v46 }
 0x73c   : > { %17591 = vmatpush3.bf16.msra.mxu1 %v17745_v7  ;;  %17560 = vmatprep.mubr.msk.bf16.mxu1 %vm8173_vm12, %v13818_v16  ;;  %v13843_v20 = vrot.slane %v13821_v30, %v18488_v35  ;;  %v13555_v3 = vunpack.i.h.s16 %v22658_v28  ;;  %v13557_v54 = vunpack.i.h.s16 %v22783_v53  ;;  %v13870_v7 = vcombine.low %v22649_v58, %v22665_v49 }
 0x73d   : > { %v13836_v25 = vrot.slane %v23797_v9, %v18488_v35  ;;  %v13819_v15 = vcombine.low %v17158_v52, %v17159_v61  ;;  %v13850_v2 = vrot.slane %v13822_v12, %v18488_v35  ;;  %v17162_v48 = vpack.i.b16 %v22658_v28, %v13553_v31 }
 0x73e   : > { %v17163_v57 = vpack.i.b16 %v22783_v53, %v13555_v3  ;;  %v17168_v56 = vcombine.high %v22649_v58, %v22665_v49  ;;  %v22802_v51 = vrot.slane %v13630_v60, %v18488_v35  ;;  %v17164_v30 = vpack.i.b16 %v22683_v59, %v13557_v54 }
 0x73f   : > { %v13829_v16 = vrot.slane %v13819_v15, %v18488_v35  ;;  %v13852_v52 = vcombine.low %v13843_v20, %v13850_v2  ;;  %v13892_v61 = vrot.slane %v13870_v7, %v18488_v35  ;;  %v23798_v3 = vunpack.i.h.s16 %v22440_v5 }
 0x740   : > { %v13868_v12 = vcombine.low %v17162_v48, %v17163_v57  ;;  %v13899_v9 = vrot.slane %v17168_v56, %v18488_v35  ;;  %v13930_v31 = vrot.slane %v22802_v51, %v18488_v35  ;;  %v13869_v19 = vcombine.low %v17164_v30, %v17165_v6 }
 0x741   : > { %v17185_v11 = vpack.i.b16 %v22442_v45, %v23798_v3  ;;  %v13851_v43 = vcombine.low %v13829_v16, %v13836_v25  ;;  %v13866_v60 = vrot.slane %v13852_v52, %v18488_v35  ;;  %v14543_v20 = vcombine.low %v22386_v36, %v22391_v32 }
 0x742   : > { %v13878_v15 = vrot.slane %v13868_v12, %v18488_v35  ;;  %v13901_v2 = vcombine.low %v13892_v61, %v13899_v9  ;;  %v17216_v7 = vcombine.high %v22386_v36, %v22391_v32  ;;  %v13885_v5 = vrot.slane %v13869_v19, %v18488_v35  ;;  %v23799_v12 = vld [vmem:[#allocation4_spill] sm:$0xff] }
 0x743   : > { %v14140_v54 = vcombine.low %v22484_v4, %v17185_v11  ;;  %v13859_v48 = vrot.slane %v13851_v43, %v18488_v35  ;;  %v14545_v45 = vcombine.low %v22444_v22, %v22484_v4  ;;  %v14546_v6 = vcombine.low %v17185_v11, %v22491_v27 }
 0x744   : > { %v13915_v25 = vrot.slane %v13901_v2, %v18488_v35  ;;  %v14553_v56 = vrot.slane %v14543_v20, %v18488_v35  ;;  %v14560_v51 = vrot.slane %v17216_v7, %v18488_v35  ;;  %v13900_v52 = vcombine.low %v13878_v15, %v13885_v5  ;;  %v23801_v15 = vld [vmem:[#allocation17_spill] sm:$0xff] }
 0x745   : > { %v14168_v57 = vrot.slane %v14140_v54, %v18488_v35  ;;  %v13867_v16 = vcombine.low %v13859_v48, %v13866_v60  ;;  %v14567_v36 = vrot.slane %v14545_v45, %v18488_v35  ;;  %v14574_v32 = vrot.slane %v14546_v6, %v18488_v35  ;;  %v23800_v60 = vld [vmem:[#allocation13_spill] sm:$0xff]  ;;  %v23802_v48 = vld [vmem:[#allocation11_spill] sm:$0xff] }
 0x746   : > { %v14575_v19 = vcombine.low %v14553_v56, %v14560_v51  ;;  %v13492_v43 = vunpack.i.h.s16 %v22419_v63  ;;  %v14128_v22 = vrot.slane %v14120_v13, %v18488_v35  ;;  %v13908_v11 = vrot.slane %v13900_v52, %v18488_v35  ;;  %v23804_v6 = vld [vmem:[#allocation7_spill] sm:$0xff]  ;;  %v23806_v52 = vld [vmem:[#allocation22_spill] sm:$0xff] }
 0x747   : > { %v14170_v4 = vcombine.low %v22494_v14, %v14168_v57  ;;  %17561 = vmatmul.mubr.msk.bf16.gmra.mxu1 %vm8173_vm12, %v13867_v16  ;;  %v14576_v30 = vcombine.low %v14567_v36, %v14574_v32  ;;  %v13526_v61 = vunpack.i.h.s16 %v22584_v50  ;;  %v17188_v9 = vpack.i.b16 %v22584_v50, %v23799_v12  ;;  %v23803_v50 = vld [vmem:[#allocation20_spill] sm:$0xff] }
 0x748   : > { %v14583_v3 = vrot.slane %v14575_v19, %v18488_v35  ;;  %v17180_v20 = vpack.i.b16 %v23800_v60, %v13492_v43  ;;  %v14187_v13 = vcombine.low %v22447_v1, %v23801_v15  ;;  %v13916_v14 = vcombine.low %v13908_v11, %v13915_v25 }
 0x749   : > { %v14184_v63 = vrot.slane %v14170_v4, %v18488_v35  ;;  %v14590_v2 = vrot.slane %v14576_v30, %v18488_v35  ;;  %v17189_v54 = vpack.i.b16 %v22598_v55, %v13526_v61  ;;  %v17199_v7 = vcombine.high %v22447_v1, %v23801_v15  ;;  %v23807_v4 = vld [vmem:[#allocation6_spill] sm:$0xff] }
 0x74a   : > { %v14091_v5 = vcombine.low %v17180_v20, %v23802_v48  ;;  %v23805_v57 = vcombine.low %v22491_v27, %v23804_v6  ;;  %v14203_v51 = vrot.slane %v14187_v13, %v18488_v35  ;;  %17564 = vmatprep.mubr.msk.bf16.mxu1 %vm8173_vm12, %v13916_v14  ;;  %v14594_v36 = vcombine.low %v23806_v52, %v17188_v9  ;;  %v23809_v14 = vld [vmem:[#allocation21_spill] sm:$0xff] }
 0x74b   : > { %v14185_v45 = vcombine.low %v23803_v50, %v14184_v63  ;;  %v14591_v25 = vcombine.low %v14583_v3, %v14590_v2  ;;  %v14189_v16 = vcombine.low %v17188_v9, %v17189_v54  ;;  %v14210_v55 = vrot.slane %v17199_v7, %v18488_v35 }
 0x74c   : > { %v14196_v56 = vrot.slane %v23805_v57, %v18488_v35  ;;  %v14119_v32 = vrot.slane %v14091_v5, %v18488_v35  ;;  %v14595_v43 = vcombine.low %v17189_v54, %v22653_v10  ;;  %v14593_v11 = vcombine.low %v23801_v15, %v23807_v4 }
 0x74d   : > { %v14217_v27 = vrot.slane %v14189_v16, %v18488_v35  ;;  %v14616_v30 = vrot.slane %v14594_v36, %v18488_v35  ;;  %v23808_v61 = vcombine.low %v23804_v6, %v22447_v1  ;;  %v14642_v9 = vcombine.low %v22537_v33, %v22550_v8  ;;  %v23810_v1 = vld [vmem:[#allocation14_spill] sm:$0xff] }
 0x74e   : > { %v14218_v19 = vcombine.low %v14196_v56, %v14203_v51  ;;  %v14121_v3 = vcombine.low %v22764_v44, %v14119_v32  ;;  %v14623_v20 = vrot.slane %v14595_v43, %v18488_v35  ;;  %v14609_v63 = vrot.slane %v14593_v11, %v18488_v35 }
 0x74f   : > { %v14602_v12 = vrot.slane %v23808_v61, %v18488_v35  ;;  %17565 = vmatmul.mubr.msk.bf16.gmra.mxu1 %vm8173_vm12, %v13930_v31  ;;  %v14219_v15 = vcombine.low %v14210_v55, %v14217_v27  ;;  %v17217_v13 = vcombine.high %v22537_v33, %v22550_v8  ;;  %v14644_v2 = vcombine.low %v23810_v1, %v23809_v14 }
 0x750   : > { %v14226_v60 = vrot.slane %v14218_v19, %v18488_v35  ;;  %v14651_v44 = vrot.slane %v14641_v40, %v18488_v35  ;;  %17592 = vmatprep.mubr.msk.bf16.mxu1 %vm8173_vm12, %v14591_v25  ;;  %v14135_v54 = vrot.slane %v14121_v3, %v18488_v35  ;;  %v14625_v48 = vcombine.low %v14616_v30, %v14623_v20 }
 0x751   : > { %v14624_v7 = vcombine.low %v14602_v12, %v14609_v63  ;;  %v14658_v31 = vrot.slane %v14642_v9, %v18488_v35  ;;  %v14233_v5 = vrot.slane %v14219_v15, %v18488_v35  ;;  %v14665_v50 = vrot.slane %v17217_v13, %v18488_v35 }
 0x752   : > { %v14672_v6 = vrot.slane %v14644_v2, %v18488_v35  ;;  %v14235_v57 = vcombine.low %v22653_v10, %v22645_v17  ;;  %v14136_v56 = vcombine.low %v14128_v22, %v14135_v54  ;;  %v14639_v51 = vrot.slane %v14625_v48, %v18488_v35 }
 0x753   : > { %v14632_v40 = vrot.slane %v14624_v7, %v18488_v35  ;;  %v14673_v25 = vcombine.low %v14651_v44, %v14658_v31  ;;  %v14234_v16 = vcombine.low %v14226_v60, %v14233_v5  ;;  %v14237_v52 = vcombine.low %v22550_v8, %v22749_v18 }
 0x754   : > { %v14674_v55 = vcombine.low %v14665_v50, %v14672_v6  ;;  %v14238_v36 = vcombine.low %v22567_v42, %v23810_v1  ;;  %17574 = vmatprep.mubr.msk.bf16.mxu0 %vm8173_vm12, %v14136_v56  ;;  %v14245_v17 = vrot.slane %v14235_v57, %v18488_v35  ;;  %v23811_v10 = vcombine.low %v22633_v47, %v22537_v33 }
 0x755   : > { %v14640_v32 = vcombine.low %v14632_v40, %v14639_v51  ;;  %v14681_v19 = vrot.slane %v14673_v25, %v18488_v35  ;;  %17575 = vmatmul.mubr.msk.bf16.vlgmr.msra.gmra.mxu0 %vm8173_vm12, %v14185_v45  ;;  %v14259_v8 = vrot.slane %v14237_v52, %v18488_v35  ;;  %v23812_v18 = vunpack.i.h.s16 %v22554_v29 }
 0x756   : > { %v14252_v22 = vrot.slane %v23811_v10, %v18488_v35  ;;  %v14688_v43 = vrot.slane %v14674_v55, %v18488_v35  ;;  %v14266_v42 = vrot.slane %v14238_v36, %v18488_v35  ;;  %17578 = vmatprep.mubr.msk.bf16.mxu0 %vm8173_vm12, %v14234_v16  ;;  %v14286_v27 = vcombine.low %v22670_v46, %v22658_v28 }
 0x757   : > { %v17195_v4 = vpack.i.b16 %v22558_v23, %v23812_v18  ;;  %v17200_v47 = vcombine.high %v22670_v46, %v22658_v28  ;;  %v23813_v33 = vcombine.low %v22615_v24, %v22610_v21  ;;  %17593 = vmatmul.mubr.msk.bf16.vlgmr.msra.gmra.mxu1 %vm8173_vm12, %v14640_v32  ;;  %v17211_v61 = vpack.i.b16 %v22649_v58, %v22673_v34 }
 0x758   : > { %v14267_v11 = vcombine.low %v14245_v17, %v14252_v22  ;;  %v14689_v30 = vcombine.low %v14681_v19, %v14688_v43  ;;  %v14268_v29 = vcombine.low %v14259_v8, %v14266_v42  ;;  %v14308_v9 = vrot.slane %v14286_v27, %v18488_v35  ;;  %v17746_v17 = vld [vmem:[%s23434_s10] sm:$0xff]  }
 0x759   : > { %v14301_v45 = vrot.slane %v23813_v33, %v18488_v35  ;;  %v14284_v23 = vcombine.low %v23809_v14, %v17195_v4  ;;  %v14315_v3 = vrot.slane %v17200_v47, %v18488_v35  ;;  %v14690_v60 = vcombine.low %v17195_v4, %v22615_v24  ;;  %17604 = vmatprep.subr.bf16.mxu0 %v17746_v17 }
 0x75a   : > { %v14275_v12 = vrot.slane %v14267_v11, %v18488_v35  ;;  %17596 = vmatprep.mubr.msk.bf16.mxu1 %vm8173_vm12, %v14689_v30  ;;  %v14282_v20 = vrot.slane %v14268_v29, %v18488_v35  ;;  %v14691_v15 = vcombine.low %v22610_v21, %v22670_v46  ;;  %v14692_v13 = vcombine.low %v22658_v28, %v22783_v53 }
 0x75b   : > { %v14294_v63 = vrot.slane %v14284_v23, %v18488_v35  ;;  %v23814_v14 = vcombine.high %v22728_v26, %v22745_v37  ;;  %v14317_v2 = vcombine.low %v14308_v9, %v14315_v3  ;;  %v14693_v24 = vcombine.low %v22683_v59, %v17211_v61  ;;  %17605 = vmatpush3.bf16.msra.mxu0 %v17746_v17 }
 0x75c   : > { %v13623_v44 = vunpack.i.h.s16 %v22649_v58  ;;  %v14283_v54 = vcombine.low %v14275_v12, %v14282_v20  ;;  %v14700_v48 = vrot.slane %v14690_v60, %v18488_v35  ;;  %v14707_v31 = vrot.slane %v14691_v15, %v18488_v35  ;;  %v22991_v12 = vld [vmem:[%s23433_s9] ss:$0 sm:$0xff] }
 0x75d   : > { %v14770_v1 = vrot.slane %v23814_v14, %v18488_v35  ;;  %v14316_v7 = vcombine.low %v14294_v63, %v14301_v45  ;;  %v14331_v21 = vrot.slane %v14317_v2, %v18488_v35  ;;  %v14714_v28 = vrot.slane %v14692_v13, %v18488_v35  ;;  %v23816_v2 = vld [vmem:[#allocation32_spill] sm:$0xff] }
 0x75e   : > { %v14721_v46 = vrot.slane %v14693_v24, %v18488_v35  ;;  %v13625_v26 = vunpack.i.h.s16 %v22665_v49  ;;  %v14514_v37 = vrot.slane %v22757_v39, %v18488_v35  ;;  %17579 = vmatmul.mubr.msk.bf16.gmra.mxu0 %vm8173_vm12, %v14283_v54  ;;  %v14722_v59 = vcombine.low %v14700_v48, %v14707_v31 }
 0x75f   : > { %v14324_v58 = vrot.slane %v14316_v7, %v18488_v35  ;;  %v17212_v5 = vpack.i.b16 %v22665_v49, %v13623_v44  ;;  %v13560_v6 = vunpack.i.l.s16 %v22673_v34  ;;  %v14772_v57 = vcombine.low %v22777_v41, %v14770_v1 }
 0x760   : > { %v14723_v53 = vcombine.low %v14714_v28, %v14721_v46  ;;  %v17213_v50 = vpack.i.b16 %v22677_v38, %v13625_v26  ;;  %v23815_v40 = vcombine.low %v22736_v62, %v22715_v0  ;;  %v14730_v51 = vrot.slane %v14722_v59, %v18488_v35  ;;  %v23817_v26 = vld [vmem:[#allocation34_spill] sm:$0xff] }
 0x761   : > { %v14332_v56 = vcombine.low %v14324_v58, %v14331_v21  ;;  %v14339_v55 = vrot.slane %v13560_v6, %v18488_v35  ;;  %v14532_v49 = vunpack.i.l.s16 %v14514_v37  ;;  %v14786_v0 = vrot.slane %v14772_v57, %v18488_v35 }
 0x762   : > { %v14756_v39 = vrot.slane %v23815_v40, %v18488_v35  ;;  %v14737_v25 = vrot.slane %v14723_v53, %v18488_v35  ;;  %v14739_v16 = vcombine.low %v17212_v5, %v17213_v50  ;;  %v14949_v24 = vunpack.c.l.bf16 %v23816_v2 }
 0x763   : > { %17582 = vmatprep.mubr.msk.bf16.mxu0 %vm8173_vm12, %v14332_v56  ;;  %v14346_v41 = vrot.slane %v14339_v55, %v18488_v35  ;;  %v14794_v62 = vrot.slane %v14532_v49, %v18488_v35  ;;  %v14950_v46 = vunpack.c.h.bf16 %v23816_v2  ;;  %v14947_v37 = vunpack.c.l.bf16 %v23817_v26  ;;  %v23818_v49 = vld [vmem:[#allocation35_spill] sm:$0xff] }
 0x764   : > { %v14738_v38 = vcombine.low %v14730_v51, %v14737_v25  ;;  %v14749_v34 = vrot.slane %v14739_v16, %v18488_v35  ;;  %v14948_v6 = vunpack.c.h.bf16 %v23817_v26 }
 0x765   : > { %v14801_v19 = vrot.slane %v14794_v62, %v18488_v35 }
 0x766   : > { %17597 = vmatmul.mubr.msk.bf16.gmra.mxu1 %vm8173_vm12, %v14738_v38  ;;  %v14771_v52 = vcombine.low %v14749_v34, %v14756_v39  ;;  %17583 = vmatmul.mubr.msk.bf16.gmra.mxu0 %vm8173_vm12, %v14346_v41  ;;  %v14953_v38 = vunpack.c.l.bf16 %v23818_v49  ;;  %v23819_v34 = vld [vmem:[#allocation37_spill] sm:$0xff] }
 0x767   : > { %v14951_v41 = vunpack.c.l.bf16 %v23819_v34 }
 0x768   : > { %v14779_v36 = vrot.slane %v14771_v52, %v18488_v35 }
 0x76a   : > { %v14787_v32 = vcombine.low %v14779_v36, %v14786_v0  ;;  %v14954_v36 = vunpack.c.h.bf16 %v23818_v49 }
 0x76c   : > { %17600 = vmatprep.mubr.msk.bf16.mxu1 %vm8173_vm12, %v14787_v32  ;;  %v14952_v32 = vunpack.c.h.bf16 %v23819_v34 }
 0x76e   : > { %17601 = vmatmul.mubr.msk.bf16.gmra.mxu1 %vm8173_vm12, %v14801_v19 }
 0x7f3   : > { %v17558_v10 = vpop.f32.mrf.mxu1 }
 0x7f5   : > { %v14001_v22 = vpop.f32.mrf.mxu1 }
 0x7f7   : > { %v17559_v43 = vpop.f32.mrf.mxu1 }
 0x7f9   : > { %v14004_v8 = vpop.f32.mrf.mxu1 }
 0x807   : > { %v17562_v42 = vpop.f32.mrf.mxu1 }
 0x809   : > { %v22976_v18 = vpop.f32.mrf.mxu1 }
 0x80b   : > { %v22978_v4 = vpop.f32.mrf.mxu1 }
 0x80d   : > { %v22980_v11 = vpop.f32.mrf.mxu1 }
 0x80f   : > { %v22982_v27 = vpop.f32.mrf.mxu1 }
 0x811   : > { %v22984_v47 = vpop.f32.mrf.mxu1 }
 0x813   : > { %v17567_v33 = vpop.f32.mrf.mxu1 }
 0x815   : > { %v17576_v45 = vpop.f32.mrf.mxu0  ;;  %v22986_v30 = vpop.f32.mrf.mxu1 }
 0x816   : > { %v14426_v29 = vadd.f32 %v17576_v45, %v17558_v10 }
 0x817   : > { %v14417_v23 = vpop.f32.mrf.mxu0  ;;  %v17594_v61 = vpop.f32.mrf.mxu1 }
 0x818   : > { %v14418_v9 = vadd.f32 %v14417_v23, %v14001_v22  ;;  %v14920_v3 = vadd.f32 %v17594_v61, %v14426_v29  ;;  %v23820_v22 = vld [vmem:[#allocation38_spill] sm:$0xff] }
 0x819   : > { %v17577_v60 = vpop.f32.mrf.mxu0  ;;  %v14872_v20 = vpop.f32.mrf.mxu1 }
 0x81a   : > { %v14429_v63 = vadd.f32 %v17577_v60, %v17559_v43  ;;  %v14938_v15 = vadd.f32 %v22991_v12, %v14920_v3  ;;  %v14918_v13 = vadd.f32 %v14872_v20, %v14418_v9  ;;  %v14957_v43 = vunpack.c.l.bf16 %v23820_v22 }
 0x81b   : > { %v14420_v14 = vpop.f32.mrf.mxu0  ;;  %v17595_v1 = vpop.f32.mrf.mxu1 }
 0x81c   : > { %v14921_v44 = vadd.f32 %v17595_v1, %v14429_v63  ;;  %v14421_v54 = vadd.f32 %v14420_v14, %v14004_v8  ;;  %v14936_v7 = vadd.f32 %v22991_v12, %v14918_v13  ;;  %v14960_v21 = vadd.f32 %v14949_v24, %v14938_v15  ;;  %v23821_v8 = vld [vmem:[#allocation36_spill] sm:$0xff] }
 0x81d   : > { %v14875_v31 = vpop.f32.mrf.mxu1  ;;  %v14955_v33 = vunpack.c.l.bf16 %v23821_v8 }
 0x81e   : > { %v17580_v48 = vpop.f32.mrf.mxu0  ;;  %v14939_v28 = vadd.f32 %v22991_v12, %v14921_v44  ;;  %v14919_v59 = vadd.f32 %v14875_v31, %v14421_v54  ;;  %v14958_v5 = vadd.f32 %v14947_v37, %v14936_v7  ;;  %v14971_v56 = vmax.f32 %v14960_v21, 0.0 }
 0x81f   : > { %v14442_v45 = vadd.f32 %v17580_v48, %v17562_v42 }
 0x820   : > { %v14433_v58 = vpop.f32.mrf.mxu0  ;;  %v14961_v53 = vadd.f32 %v14950_v46, %v14939_v28  ;;  %v14937_v50 = vadd.f32 %v22991_v12, %v14919_v59  ;;  %v14969_v52 = vmax.f32 %v14958_v5, 0.0 }
 0x821   : > { %v14434_v20 = vadd.f32 %v14433_v58, %v22976_v18  ;;  %v23822_v58 = vld [vmem:[#allocation15_spill] sm:$0xff] }
 0x822   : > { %v17581_v57 = vpop.f32.mrf.mxu0  ;;  %v14972_v40 = vmax.f32 %v14961_v53, 0.0  ;;  %v14959_v39 = vadd.f32 %v14948_v6, %v14937_v50 }
 0x823   : > { %v23021_v13 = vadd.f32 %v17581_v57, %v22978_v4 }
 0x824   : > { %v14436_v51 = vpop.f32.mrf.mxu0  ;;  %v14981_v25 = vpack.c.bf16 %v14972_v40, %v14971_v56  ;;  %v17230_v16 = vpack.c.bf16 %v14972_v40, %v14972_v40  ;;  %v14970_v0 = vmax.f32 %v14959_v39, 0.0 }
 0x825   : > { %v14437_v26 = vadd.f32 %v14436_v51, %v22980_v11  ;;  %v15745_v11 = vld [vmem:[%s23038_s15 + $0xc] sm:$0x1] }
 0x826   : > { %v17598_v55 = vpop.f32.mrf.mxu1  ;;  %v17584_v62 = vpop.f32.mrf.mxu0  ;;  %v15048_v19 = vrot.slane %v14981_v25, %v18488_v35  ;;  %v15055_v17 = vrot.slane %v17230_v16, %v18488_v35  ;;  %v14980_v29 = vpack.c.bf16 %v14970_v0, %v14969_v52  ;;  %v17229_v23 = vpack.c.bf16 %v14970_v0, %v14970_v0  ;;  %v15749_v16 = vld [vmem:[%s23038_s15 + $0x14] sm:$0x1] }
 0x827   : > { %v14924_v14 = vadd.f32 %v17598_v55, %v14442_v45  ;;  %v23050_v50 = vadd.f32 %v17584_v62, %v22982_v27 }
 0x828   : > { %v14888_v10 = vpop.f32.mrf.mxu1  ;;  %v23010_v61 = vpop.f32.mrf.mxu0  ;;  %v15056_v9 = vcombine.high %v15048_v19, %v15048_v19  ;;  %v15057_v3 = vcombine.high %v15055_v17, %v15055_v17  ;;  %v23013_v60 = vrot.slane %v15048_v19, %v18488_v35  ;;  %v14999_v15 = vrot.slane %v14980_v29, %v18488_v35  ;;  %17606 = vmatprep.mubr.msk.bf16.mxu0 %vm1222_vm11, %v14980_v29 }
 0x829   : > { %v15006_v42 = vrot.slane %v17229_v23, %v18488_v35  ;;  %v14922_v44 = vadd.f32 %v14888_v10, %v14434_v20  ;;  %17607 = vmatmul.mubr.msk.bf16.vlgmr.msra.gmra.mxu0 %vm1222_vm11, %v14981_v25  ;;  %v15071_v4 = vrot.slane %v15055_v17, %v18488_v35  ;;  %v14942_v39 = vadd.f32 %v22991_v12, %v14924_v14 }
 0x82a   : > { %v23016_v63 = vpop.f32.mrf.mxu1  ;;  %v17585_v1 = vpop.f32.mrf.mxu0  ;;  %v15078_v2 = vrot.slane %v15056_v9, %v18488_v35  ;;  %v23026_v24 = vrot.slane %v15057_v3, %v18488_v35  ;;  %v15086_v18 = vcombine.high %v23013_v60, %v23013_v60  ;;  %v15268_v7 = vunpack.i.h.s16 %v23013_v60 }
 0x82b   : > { %v15007_v48 = vcombine.high %v14999_v15, %v14999_v15  ;;  %v15008_v31 = vcombine.high %v15006_v42, %v15006_v42  ;;  %v15015_v46 = vrot.slane %v14999_v15, %v18488_v35  ;;  %v15022_v5 = vrot.slane %v15006_v42, %v18488_v35 }
 0x82c   : > { %v23030_v54 = vpop.f32.mrf.mxu1  ;;  %v15088_v21 = vcombine.high %v15078_v2, %v15078_v2  ;;  %v15277_v28 = vunpack.i.l.s16 %v23026_v24  ;;  %v15445_v59 = vrot.slane %v15268_v7, %v23822_v58  ;;  %v15454_v53 = vcombine.low %v15086_v18, %v15071_v4 }
 0x82d   : > { %v15029_v40 = vrot.slane %v15007_v48, %v18488_v35  ;;  %v15036_v55 = vrot.slane %v15008_v31, %v18488_v35  ;;  %v14940_v52 = vadd.f32 %v22991_v12, %v14922_v44  ;;  %v15037_v19 = vcombine.high %v15015_v46, %v15015_v46 }
 0x82e   : > { %v23045_v37 = vpop.f32.mrf.mxu1  ;;  %v15453_v6 = vcombine.low %v15078_v2, %v15088_v21  ;;  %v15483_v57 = vrot.slane %v15277_v28, %v23822_v58  ;;  %v15452_v25 = vrot.slane %v15445_v59, %v23822_v58  ;;  %v15468_v27 = vrot.slane %v15454_v53, %v23822_v58 }
 0x82f   : > { %v15038_v17 = vcombine.high %v15022_v5, %v15022_v5  ;;  %v15039_v29 = vcombine.high %v15029_v40, %v15029_v40  ;;  %v15040_v23 = vcombine.high %v15036_v55, %v15036_v55  ;;  %v15259_v9 = vunpack.i.l.s16 %v15022_v5 }
 0x830   : > { %v14904_v51 = vpop.f32.mrf.mxu1  ;;  %v15461_v0 = vrot.slane %v15453_v6, %v23822_v58  ;;  %v15490_v62 = vrot.slane %v15483_v57, %v23822_v58  ;;  %v15746_v45 = vsel %vm23055_vm14, %v15452_v25, %v15745_v11  ;;  %v15260_v15 = vunpack.i.h.s16 %v15022_v5  ;;  %v15741_v5 = vld [vmem:[%s23038_s15 + $0x4] sm:$0x1] }
 0x831   : > { %15747 = vst [vmem:[%s23038_s15 + $0xc] sm:$0x1] %v15746_v45  ;;  %v15262_v42 = vunpack.i.h.s16 %v15036_v55  ;;  %v15264_v14 = vunpack.i.h.s16 %v15038_v17  ;;  %v15266_v1 = vunpack.i.h.s16 %v15040_v23  ;;  %v15377_v2 = vcombine.low %v15015_v46, %v15037_v19 }
 0x832   : > { %v17603_v10 = vpop.f32.mrf.mxu1  ;;  %v15469_v3 = vcombine.low %v15461_v0, %v15468_v27  ;;  %v15750_v20 = vsel %vm23055_vm14, %v15490_v62, %v15749_v16  ;;  %v15378_v18 = vcombine.low %v15029_v40, %v15039_v29  ;;  %v17234_v7 = vpack.i.b16 %v15036_v55, %v15260_v15  ;;  %v14452_v16 = vpop.f32.mrf.mxu0 }
 0x833   : > { %15751 = vst [vmem:[%s23038_s15 + $0x14] sm:$0x1] %v15750_v20  ;;  %v17235_v48 = vpack.i.b16 %v15038_v17, %v15262_v42  ;;  %v15407_v31 = vrot.slane %v15259_v9, %v23822_v58  ;;  %v17236_v21 = vpack.i.b16 %v15040_v23, %v15264_v14  ;;  %v17237_v28 = vpack.i.b16 %v23013_v60, %v15266_v1 }
 0x834   : > { %v15476_v44 = vrot.slane %v15469_v3, %v23822_v58  ;;  %v15385_v59 = vrot.slane %v15377_v2, %v23822_v58  ;;  %v15392_v53 = vrot.slane %v15378_v18, %v23822_v58  ;;  %v15087_v6 = vcombine.high %v15071_v4, %v15071_v4  ;;  %v14907_v19 = vpop.f32.mrf.mxu1 }
 0x835   : > { %v15414_v46 = vrot.slane %v15407_v31, %v23822_v58  ;;  %v14964_v57 = vadd.f32 %v14953_v38, %v14942_v39  ;;  %v14925_v11 = vadd.f32 %v23016_v63, %v23021_v13  ;;  %v23090_v60 = vcombine.high %v23026_v24, %v23026_v24 }
 0x836   : > { %15748 = vst.msk [vmem:[%s23038_s15 + $0x10] sm:$0xf] %vm517_vm3, %v15476_v44  ;;  %v15393_v40 = vcombine.low %v15385_v59, %v15392_v53  ;;  %v15415_v25 = vcombine.low %v17234_v7, %v17236_v21  ;;  %v15416_v27 = vcombine.low %v17235_v48, %v17237_v28  ;;  %v14962_v55 = vadd.f32 %v14951_v41, %v14940_v52 }
 0x837   : > { %v15742_v4 = vsel %vm23055_vm14, %v15414_v46, %v15741_v5  ;;  %v14943_v38 = vadd.f32 %v22991_v12, %v14925_v11  ;;  %v14923_v39 = vadd.f32 %v23030_v54, %v14437_v26  ;;  %v14450_v62 = vadd.f32 %v23010_v61, %v22984_v47 }
 0x838   : > { %v15400_v63 = vrot.slane %v15393_v40, %v23822_v58  ;;  %v15423_v13 = vrot.slane %v15415_v25, %v23822_v58  ;;  %v15430_v0 = vrot.slane %v15416_v27, %v23822_v58  ;;  %15743 = vst [vmem:[%s23038_s15 + $0x4] sm:$0x1] %v15742_v4  ;;  %v14928_v52 = vadd.f32 %v23045_v37, %v23050_v50 }
 0x839   : > { %v14965_v17 = vadd.f32 %v14954_v36, %v14943_v38  ;;  %v14941_v41 = vadd.f32 %v22991_v12, %v14923_v39  ;;  %v14453_v54 = vadd.f32 %v14452_v16, %v22986_v30  ;;  %v15278_v26 = vunpack.i.h.s16 %v23026_v24 }
 0x83a   : > { %v15431_v10 = vcombine.low %v15423_v13, %v15430_v0  ;;  %15737 = vst.msk [vmem:[%s23038_s15] sm:$0xf] %vm517_vm3, %v15400_v63  ;;  %v14975_v45 = vmax.f32 %v14964_v57, 0.0  ;;  %v14926_v29 = vadd.f32 %v14904_v51, %v14450_v62  ;;  %v14946_v36 = vadd.f32 %v22991_v12, %v14928_v52 }
 0x83b   : > { %v14976_v47 = vmax.f32 %v14965_v17, 0.0  ;;  %v14963_v49 = vadd.f32 %v14952_v32, %v14941_v41  ;;  %v14927_v61 = vadd.f32 %v14907_v19, %v14453_v54  ;;  %v15280_v23 = vunpack.i.h.s16 %v15087_v6  ;;  %v15761_v41 = vld [vmem:[%s23038_s15 + $0x2c] sm:$0x1] }
 0x83c   : > { %v15438_v37 = vrot.slane %v15431_v10, %v23822_v58  ;;  %v14973_v50 = vmax.f32 %v14962_v55, 0.0  ;;  %v14944_v30 = vadd.f32 %v22991_v12, %v14926_v29  ;;  %v14968_v20 = vadd.f32 %v14957_v43, %v14946_v36 }
 0x83d   : > { %v14983_v24 = vpack.c.bf16 %v14976_v47, %v14975_v45  ;;  %v17232_v9 = vpack.c.bf16 %v14976_v47, %v14976_v47  ;;  %v14974_v3 = vmax.f32 %v14963_v49, 0.0  ;;  %v23120_v51 = vpack.i.b16 %v15087_v6, %v15278_v26  ;;  %v15765_v49 = vld [vmem:[%s23038_s15 + $0x34] sm:$0x1] }
 0x83e   : > { %15744 = vst.msk [vmem:[%s23038_s15 + $0x8] sm:$0xf] %vm517_vm3, %v15438_v37  ;;  %v23126_v34 = vadd.f32 %v14955_v33, %v14944_v30  ;;  %v14945_v32 = vadd.f32 %v22991_v12, %v14927_v61  ;;  %v14956_v15 = vunpack.c.h.bf16 %v23821_v8  ;;  %v23133_v22 = vpack.i.b16 %v23090_v60, %v15280_v23 }
 0x83f   : > { %v15146_v42 = vrot.slane %v14983_v24, %v18488_v35  ;;  %v15153_v14 = vrot.slane %v17232_v9, %v18488_v35  ;;  %v14982_v1 = vpack.c.bf16 %v14974_v3, %v14973_v50  ;;  %v17231_v2 = vpack.c.bf16 %v14974_v3, %v14974_v3 }
 0x840   : > { %v15282_v43 = vunpack.i.h.s16 %v23090_v60  ;;  %v14979_v18 = vmax.f32 %v14968_v20, 0.0  ;;  %v14977_v44 = vmax.f32 %v23126_v34, 0.0  ;;  %v14967_v28 = vadd.f32 %v14956_v15, %v14945_v32 }
 0x841   : > { %v15154_v33 = vcombine.high %v15146_v42, %v15146_v42  ;;  %v15155_v7 = vcombine.high %v15153_v14, %v15153_v14  ;;  %v15162_v12 = vrot.slane %v15146_v42, %v18488_v35  ;;  %v15169_v8 = vrot.slane %v15153_v14, %v18488_v35  ;;  %17610 = vmatprep.mubr.msk.bf16.mxu0 %vm1222_vm11, %v14982_v1 }
 0x842   : > { %v15097_v48 = vrot.slane %v14982_v1, %v18488_v35  ;;  %v15104_v31 = vrot.slane %v17231_v2, %v18488_v35  ;;  %v23142_v21 = vpack.c.bf16 %v14979_v18, %v14979_v18  ;;  %17611 = vmatmul.mubr.msk.bf16.gmra.mxu0 %vm1222_vm11, %v14983_v24  ;;  %v23152_v39 = vmax.f32 %v14967_v28, 0.0 }
 0x843   : > { %v15176_v59 = vrot.slane %v15154_v33, %v18488_v35  ;;  %v15183_v53 = vrot.slane %v15155_v7, %v18488_v35  ;;  %v15184_v5 = vcombine.high %v15162_v12, %v15162_v12  ;;  %v15185_v6 = vcombine.high %v15169_v8, %v15169_v8 }
 0x844   : > { %v15300_v46 = vunpack.i.h.s16 %v15162_v12  ;;  %v15105_v57 = vcombine.high %v15097_v48, %v15097_v48  ;;  %v15106_v11 = vcombine.high %v15104_v31, %v15104_v31  ;;  %v15113_v60 = vrot.slane %v15097_v48, %v18488_v35 }
 0x845   : > { %v15186_v40 = vcombine.high %v15176_v59, %v15176_v59  ;;  %v23148_v25 = vcombine.high %v15183_v53, %v15183_v53  ;;  %v15302_v27 = vunpack.i.h.s16 %v15176_v59  ;;  %v15304_v16 = vunpack.i.h.s16 %v15184_v5 }
 0x846   : > { %v15606_v4 = vcombine.low %v15169_v8, %v15185_v6  ;;  %v15120_v55 = vrot.slane %v15104_v31, %v18488_v35  ;;  %v15127_v38 = vrot.slane %v15105_v57, %v18488_v35  ;;  %v17244_v13 = vpack.i.b16 %v15176_v59, %v15300_v46  ;;  %v15753_v8 = vld [vmem:[%s23038_s15 + $0x1c] sm:$0x1] }
 0x847   : > { %v15313_v63 = vunpack.i.l.s16 %v23148_v25  ;;  %v17245_v0 = vpack.i.b16 %v15184_v5, %v15302_v27  ;;  %v15597_v62 = vrot.slane %v15304_v16, %v23822_v58  ;;  %v15605_v19 = vcombine.low %v15186_v40, %v15183_v53 }
 0x848   : > { %v15620_v17 = vrot.slane %v15606_v4, %v23822_v58  ;;  %v15134_v52 = vrot.slane %v15106_v11, %v18488_v35  ;;  %v15135_v54 = vcombine.high %v15113_v60, %v15113_v60  ;;  %v15136_v45 = vcombine.high %v15120_v55, %v15120_v55 }
 0x849   : > { %v15604_v26 = vrot.slane %v15597_v62, %v23822_v58  ;;  %v15635_v10 = vrot.slane %v15313_v63, %v23822_v58  ;;  %v15137_v29 = vcombine.high %v15127_v38, %v15127_v38  ;;  %v15613_v47 = vrot.slane %v15605_v19, %v23822_v58 }
 0x84a   : > { %v15138_v36 = vcombine.high %v15134_v52, %v15134_v52  ;;  %v15284_v61 = vunpack.i.h.s16 %v15113_v60  ;;  %v15286_v23 = vunpack.i.h.s16 %v15127_v38  ;;  %v15295_v30 = vunpack.i.l.s16 %v15136_v45 }
 0x84b   : > { %v15642_v37 = vrot.slane %v15635_v10, %v23822_v58  ;;  %v15762_v50 = vsel %vm23055_vm14, %v15604_v26, %v15761_v41  ;;  %v15296_v24 = vunpack.i.h.s16 %v15136_v45  ;;  %v15621_v9 = vcombine.low %v15613_v47, %v15620_v17 }
 0x84c   : > { %15763 = vst [vmem:[%s23038_s15 + $0x2c] sm:$0x1] %v15762_v50  ;;  %v15298_v3 = vunpack.i.h.s16 %v15138_v36  ;;  %v17240_v20 = vpack.i.b16 %v15113_v60, %v15282_v43  ;;  %v17241_v32 = vpack.i.b16 %v15127_v38, %v15284_v61  ;;  %v15521_v14 = vrot.slane %v15286_v23, %v23822_v58 }
 0x84d   : > { %v15766_v15 = vsel %vm23055_vm14, %v15642_v37, %v15765_v49  ;;  %v17242_v42 = vpack.i.b16 %v15138_v36, %v15296_v24  ;;  %v15529_v1 = vcombine.low %v15135_v54, %v15120_v55  ;;  %v15628_v2 = vrot.slane %v15621_v9, %v23822_v58 }
 0x84e   : > { %15767 = vst [vmem:[%s23038_s15 + $0x34] sm:$0x1] %v15766_v15  ;;  %v17243_v18 = vpack.i.b16 %v15162_v12, %v15298_v3  ;;  %v15491_v33 = vcombine.low %v23120_v51, %v17240_v20  ;;  %v15492_v7 = vcombine.low %v23133_v22, %v17241_v32  ;;  %v15528_v43 = vrot.slane %v15521_v14, %v23822_v58  ;;  %v15757_v51 = vld [vmem:[%s23038_s15 + $0x24] sm:$0x1] }
 0x84f   : > { %v15530_v48 = vcombine.low %v15137_v29, %v15134_v52  ;;  %v15537_v31 = vrot.slane %v15529_v1, %v23822_v58  ;;  %v15559_v28 = vrot.slane %v15295_v30, %v23822_v58  ;;  %15764 = vst.msk [vmem:[%s23038_s15 + $0x30] sm:$0xf] %vm517_vm3, %v15628_v2  ;;  %v15567_v12 = vcombine.low %v17242_v42, %v17244_v13 }
 0x850   : > { %v15499_v59 = vrot.slane %v15491_v33, %v23822_v58  ;;  %v15506_v53 = vrot.slane %v15492_v7, %v23822_v58  ;;  %v15568_v5 = vcombine.low %v17243_v18, %v17245_v0  ;;  %v15754_v46 = vsel %vm23055_vm14, %v15528_v43, %v15753_v8  ;;  %v15769_v33 = vld [vmem:[%s23038_s15 + $0x3c] sm:$0x1] }
 0x851   : > { %v15544_v22 = vrot.slane %v15530_v48, %v23822_v58  ;;  %v15566_v6 = vrot.slane %v15559_v28, %v23822_v58  ;;  %v15243_v57 = vrot.slane %v23142_v21, %v18488_v35  ;;  %v15575_v60 = vrot.slane %v15567_v12, %v23822_v58  ;;  %15755 = vst [vmem:[%s23038_s15 + $0x1c] sm:$0x1] %v15754_v46 }
 0x852   : > { %v15507_v11 = vcombine.low %v15499_v59, %v15506_v53  ;;  %v15582_v40 = vrot.slane %v15568_v5, %v23822_v58  ;;  %v14984_v27 = vpack.c.bf16 %v23152_v39, %v14977_v44  ;;  %v17233_v38 = vpack.c.bf16 %v23152_v39, %v23152_v39  ;;  %v23245_v5 = vld [vmem:[%s23435_s11] ss:$0 sm:$0xff] }
 0x853   : > { %v15545_v16 = vcombine.low %v15537_v31, %v15544_v22  ;;  %v15758_v4 = vsel %vm23055_vm14, %v15566_v6, %v15757_v51  ;;  %v15250_v55 = vrot.slane %v15243_v57, %v18488_v35  ;;  %v15314_v39 = vunpack.i.h.s16 %v23148_v25 }
 0x854   : > { %v15514_v63 = vrot.slane %v15507_v11, %v23822_v58  ;;  %v15583_v13 = vcombine.low %v15575_v60, %v15582_v40  ;;  %15759 = vst [vmem:[%s23038_s15 + $0x24] sm:$0x1] %v15758_v4  ;;  %v15195_v34 = vrot.slane %v14984_v27, %v18488_v35  ;;  %17614 = vmatprep.mubr.msk.bf16.mxu0 %vm1222_vm11, %v14984_v27 }
 0x855   : > { %v15552_v44 = vrot.slane %v15545_v16, %v23822_v58  ;;  %v15331_v0 = vunpack.i.l.s16 %v15250_v55  ;;  %v15202_v62 = vrot.slane %v17233_v38, %v18488_v35  ;;  %17615 = vmatmul.mubr.msk.bf16.gmra.mxu0 %vm1222_vm11, %v23142_v21  ;;  %v15773_v21 = vld [vmem:[%s23038_s15 + $0x44] sm:$0x1]  ;;  %vm16659_vm11 = vcmask 516096  }
 0x856   : > { %v15590_v19 = vrot.slane %v15583_v13, %v23822_v58  ;;  %15752 = vst.msk [vmem:[%s23038_s15 + $0x18] sm:$0xf] %vm517_vm3, %v15514_v63  ;;  %v15203_v17 = vcombine.high %v15195_v34, %v15195_v34  ;;  %v15211_v41 = vrot.slane %v15195_v34, %v18488_v35  ;;  %vm23274_vm15 = vmand %vm16659_vm11, %vm15739_vm13 }
 0x857   : > { %15756 = vst.msk [vmem:[%s23038_s15 + $0x20] sm:$0xf] %vm517_vm3, %v15552_v44  ;;  %v15711_v52 = vrot.slane %v15331_v0, %v23822_v58  ;;  %v15204_v54 = vcombine.high %v15202_v62, %v15202_v62  ;;  %v15218_v26 = vrot.slane %v15202_v62, %v18488_v35 }
 0x858   : > { %15760 = vst.msk [vmem:[%s23038_s15 + $0x28] sm:$0xf] %vm517_vm3, %v15590_v19  ;;  %v15225_v25 = vrot.slane %v15203_v17, %v18488_v35  ;;  %v15233_v10 = vcombine.high %v15211_v41, %v15211_v41  ;;  %v15316_v45 = vunpack.i.h.s16 %v15211_v41  ;;  %v17246_v29 = vpack.i.b16 %v15211_v41, %v15314_v39 }
 0x859   : > { %v15718_v47 = vrot.slane %v15711_v52, %v23822_v58  ;;  %v15232_v49 = vrot.slane %v15204_v54, %v18488_v35  ;;  %v15234_v36 = vcombine.high %v15218_v26, %v15218_v26 }
 0x85a   : > { %v15235_v61 = vcombine.high %v15225_v25, %v15225_v25  ;;  %v15318_v23 = vunpack.i.h.s16 %v15225_v25  ;;  %v15320_v37 = vunpack.i.h.s16 %v15233_v10  ;;  %v17247_v3 = vpack.i.b16 %v15225_v25, %v15316_v45 }
 0x85b   : > { %v15774_v50 = vsel %vm23055_vm14, %v15718_v47, %v15773_v21  ;;  %v15236_v30 = vcombine.high %v15232_v49, %v15232_v49  ;;  %v15681_v24 = vcombine.low %v15218_v26, %v15234_v36 }
 0x85c   : > { %15775 = vst [vmem:[%s23038_s15 + $0x44] sm:$0x1] %v15774_v50  ;;  %v15322_v9 = vunpack.i.h.s16 %v15235_v61  ;;  %v17248_v20 = vpack.i.b16 %v15233_v10, %v15318_v23  ;;  %v17249_v32 = vpack.i.b16 %v15235_v61, %v15320_v37  ;;  %v16665_v50 = vld [vmem:[%s23265_s22 + $0xc] sm:$0x1] }
 0x85d   : > { %v15682_v15 = vcombine.low %v15232_v49, %v15236_v30  ;;  %v15689_v2 = vrot.slane %v15681_v24, %v23822_v58 }
 0x85e   : > { %v15643_v42 = vcombine.low %v17246_v29, %v17248_v20  ;;  %v15644_v14 = vcombine.low %v17247_v3, %v17249_v32  ;;  %v15673_v1 = vrot.slane %v15322_v9, %v23822_v58  ;;  %v16669_v3 = vld [vmem:[%s23265_s22 + $0x14] sm:$0x1] }
 0x85f   : > { %v15696_v18 = vrot.slane %v15682_v15, %v23822_v58 }
 0x860   : > { %v15651_v7 = vrot.slane %v15643_v42, %v23822_v58  ;;  %v15658_v8 = vrot.slane %v15644_v14, %v23822_v58  ;;  %v15680_v43 = vrot.slane %v15673_v1, %v23822_v58 }
 0x861   : > { %v15697_v48 = vcombine.low %v15689_v2, %v15696_v18 }
 0x862   : > { %v15659_v31 = vcombine.low %v15651_v7, %v15658_v8  ;;  %v15770_v28 = vsel %vm23055_vm14, %v15680_v43, %v15769_v33 }
 0x863   : > { %v15704_v59 = vrot.slane %v15697_v48, %v23822_v58  ;;  %15771 = vst [vmem:[%s23038_s15 + $0x3c] sm:$0x1] %v15770_v28 }
 0x864   : > { %v15666_v53 = vrot.slane %v15659_v31, %v23822_v58 }
 0x865   : > { %15772 = vst.msk [vmem:[%s23038_s15 + $0x40] sm:$0xf] %vm517_vm3, %v15704_v59 }
 0x866   : > { %15768 = vst.msk [vmem:[%s23038_s15 + $0x38] sm:$0xf] %vm517_vm3, %v15666_v53 }
 0x8e9   : > { %v17608_v12 = vpop.f32.mrf.mxu0 }
 0x8ea   : > { %v15852_v22 = vadd.f32 %v17608_v12, %v23245_v5 }
 0x8eb   : > { %v15843_v51 = vpop.f32.mrf.mxu0 }
 0x8ec   : > { %v15844_v6 = vadd.f32 %v23245_v5, %v15843_v51  ;;  %v15891_v11 = vmax.f32 %v15852_v22, 0.0 }
 0x8ed   : > { %v17609_v56 = vpop.f32.mrf.mxu0 }
 0x8ee   : > { %v15855_v46 = vadd.f32 %v17609_v56, %v23245_v5  ;;  %v15889_v27 = vmax.f32 %v15844_v6, 0.0 }
 0x8ef   : > { %v15846_v57 = vpop.f32.mrf.mxu0 }
 0x8f0   : > { %v15892_v60 = vmax.f32 %v15855_v46, 0.0  ;;  %v15847_v40 = vadd.f32 %v23245_v5, %v15846_v57 }
 0x8f2   : > { %v15901_v16 = vpack.c.bf16 %v15892_v60, %v15891_v11  ;;  %v17259_v4 = vpack.c.bf16 %v15892_v60, %v15892_v60  ;;  %v15890_v55 = vmax.f32 %v15847_v40, 0.0  ;;  %v16661_v40 = vld [vmem:[%s23265_s22 + $0x4] sm:$0x1] }
 0x8f4   : > { %v15968_v38 = vrot.slane %v15901_v16, %v18488_v35  ;;  %v15975_v63 = vrot.slane %v17259_v4, %v18488_v35  ;;  %v15900_v13 = vpack.c.bf16 %v15890_v55, %v15889_v27  ;;  %v17258_v34 = vpack.c.bf16 %v15890_v55, %v15890_v55 }
 0x8f6   : > { %v15976_v44 = vcombine.high %v15968_v38, %v15968_v38  ;;  %v15977_v0 = vcombine.high %v15975_v63, %v15975_v63  ;;  %v15984_v62 = vrot.slane %v15968_v38, %v18488_v35  ;;  %v15919_v39 = vrot.slane %v15900_v13, %v18488_v35 }
 0x8f7   : > { %v15926_v19 = vrot.slane %v17258_v34, %v18488_v35  ;;  %v15991_v54 = vrot.slane %v15975_v63, %v18488_v35 }
 0x8f8   : > { %v15998_v17 = vrot.slane %v15976_v44, %v18488_v35  ;;  %v23258_v41 = vrot.slane %v15977_v0, %v18488_v35  ;;  %v16006_v52 = vcombine.high %v15984_v62, %v15984_v62  ;;  %v16188_v26 = vunpack.i.h.s16 %v15984_v62 }
 0x8f9   : > { %v15927_v21 = vcombine.high %v15919_v39, %v15919_v39  ;;  %v15928_v25 = vcombine.high %v15926_v19, %v15926_v19  ;;  %v15935_v29 = vrot.slane %v15919_v39, %v18488_v35  ;;  %v15942_v36 = vrot.slane %v15926_v19, %v18488_v35 }
 0x8fa   : > { %v16008_v10 = vcombine.high %v15998_v17, %v15998_v17  ;;  %v16197_v45 = vunpack.i.l.s16 %v23258_v41  ;;  %v16365_v47 = vrot.slane %v16188_v26, %v23822_v58  ;;  %v16374_v49 = vcombine.low %v16006_v52, %v15991_v54 }
 0x8fb   : > { %v15949_v30 = vrot.slane %v15927_v21, %v18488_v35  ;;  %v15956_v20 = vrot.slane %v15928_v25, %v18488_v35  ;;  %v15957_v42 = vcombine.high %v15935_v29, %v15935_v29  ;;  %v15958_v14 = vcombine.high %v15942_v36, %v15942_v36 }
 0x8fc   : > { %v16373_v61 = vcombine.low %v15998_v17, %v16008_v10  ;;  %v16403_v23 = vrot.slane %v16197_v45, %v23822_v58  ;;  %v16372_v24 = vrot.slane %v16365_v47, %v23822_v58  ;;  %v16388_v9 = vrot.slane %v16374_v49, %v23822_v58 }
 0x8fd   : > { %v15959_v2 = vcombine.high %v15949_v30, %v15949_v30  ;;  %v15960_v18 = vcombine.high %v15956_v20, %v15956_v20  ;;  %v16179_v33 = vunpack.i.l.s16 %v15942_v36  ;;  %v16180_v43 = vunpack.i.h.s16 %v15942_v36 }
 0x8fe   : > { %v16381_v32 = vrot.slane %v16373_v61, %v23822_v58  ;;  %v16410_v15 = vrot.slane %v16403_v23, %v23822_v58  ;;  %v16666_v1 = vsel %vm23274_vm15, %v16372_v24, %v16665_v50  ;;  %v16182_v48 = vunpack.i.h.s16 %v15956_v20 }
 0x8ff   : > { %16667 = vst [vmem:[%s23265_s22 + $0xc] sm:$0x1] %v16666_v1  ;;  %v16184_v31 = vunpack.i.h.s16 %v15958_v14  ;;  %v16186_v28 = vunpack.i.h.s16 %v15960_v18  ;;  %v16297_v59 = vcombine.low %v15935_v29, %v15957_v42  ;;  %v16298_v53 = vcombine.low %v15949_v30, %v15959_v2 }
 0x900   : > { %v16389_v7 = vcombine.low %v16381_v32, %v16388_v9  ;;  %v16670_v8 = vsel %vm23274_vm15, %v16410_v15, %v16669_v3  ;;  %v17263_v51 = vpack.i.b16 %v15956_v20, %v16180_v43  ;;  %v17264_v22 = vpack.i.b16 %v15958_v14, %v16182_v48 }
 0x901   : > { %16671 = vst [vmem:[%s23265_s22 + $0x14] sm:$0x1] %v16670_v8  ;;  %v16327_v56 = vrot.slane %v16179_v33, %v23822_v58  ;;  %v17265_v46 = vpack.i.b16 %v15960_v18, %v16184_v31  ;;  %v17266_v57 = vpack.i.b16 %v15984_v62, %v16186_v28  ;;  %v16305_v11 = vrot.slane %v16297_v59, %v23822_v58 }
 0x902   : > { %v16396_v12 = vrot.slane %v16389_v7, %v23822_v58  ;;  %v17612_v6 = vpop.f32.mrf.mxu0  ;;  %v16312_v60 = vrot.slane %v16298_v53, %v23822_v58  ;;  %v16007_v63 = vcombine.high %v15991_v54, %v15991_v54  ;;  %v23314_v21 = vcombine.high %v23258_v41, %v23258_v41 }
 0x903   : > { %v16334_v27 = vrot.slane %v16327_v56, %v23822_v58  ;;  %v16335_v55 = vcombine.low %v17263_v51, %v17265_v46  ;;  %v16336_v38 = vcombine.low %v17264_v22, %v17266_v57  ;;  %v15868_v34 = vadd.f32 %v17612_v6, %v23245_v5 }
 0x904   : > { %16668 = vst.msk [vmem:[%s23265_s22 + $0x10] sm:$0xf] %vm16657_vm0, %v16396_v12  ;;  %v15859_v16 = vpop.f32.mrf.mxu0  ;;  %v16313_v4 = vcombine.low %v16305_v11, %v16312_v60  ;;  %v16198_v25 = vunpack.i.h.s16 %v23258_v41  ;;  %v16200_v29 = vunpack.i.h.s16 %v16007_v63  ;;  %v16202_v12 = vunpack.i.h.s16 %v23314_v21 }
 0x905   : > { %v16662_v13 = vsel %vm23274_vm15, %v16334_v27, %v16661_v40  ;;  %v16343_v62 = vrot.slane %v16335_v55, %v23822_v58  ;;  %v16350_v39 = vrot.slane %v16336_v38, %v23822_v58  ;;  %v15860_v19 = vadd.f32 %v23245_v5, %v15859_v16 }
 0x906   : > { %v17613_v44 = vpop.f32.mrf.mxu0  ;;  %v16320_v0 = vrot.slane %v16313_v4, %v23822_v58  ;;  %16663 = vst [vmem:[%s23265_s22 + $0x4] sm:$0x1] %v16662_v13  ;;  %v15895_v10 = vmax.f32 %v15868_v34, 0.0  ;;  %v23322_v3 = vpack.i.b16 %v16007_v63, %v16198_v25  ;;  %v23325_v41 = vpack.i.b16 %v23314_v21, %v16200_v29  ;;  %v16681_v13 = vld [vmem:[%s23265_s22 + $0x2c] sm:$0x1] }
 0x907   : > { %v15871_v17 = vadd.f32 %v17613_v44, %v23245_v5  ;;  %v16351_v54 = vcombine.low %v16343_v62, %v16350_v39  ;;  %v15893_v49 = vmax.f32 %v15860_v19, 0.0 }
 0x908   : > { %v15862_v52 = vpop.f32.mrf.mxu0  ;;  %16658 = vst.msk [vmem:[%s23265_s22] sm:$0xf] %vm16657_vm0, %v16320_v0 }
 0x909   : > { %v15863_v26 = vadd.f32 %v23245_v5, %v15862_v52  ;;  %v15896_v45 = vmax.f32 %v15871_v17, 0.0  ;;  %v16358_v47 = vrot.slane %v16351_v54, %v23822_v58  ;;  %v16685_v54 = vld [vmem:[%s23265_s22 + $0x34] sm:$0x1] }
 0x90b   : > { %v15894_v36 = vmax.f32 %v15863_v26, 0.0  ;;  %v15903_v61 = vpack.c.bf16 %v15896_v45, %v15895_v10  ;;  %v17261_v23 = vpack.c.bf16 %v15896_v45, %v15896_v45  ;;  %16664 = vst.msk [vmem:[%s23265_s22 + $0x8] sm:$0xf] %vm16657_vm0, %v16358_v47 }
 0x90d   : > { %v15902_v50 = vpack.c.bf16 %v15894_v36, %v15893_v49  ;;  %v17260_v30 = vpack.c.bf16 %v15894_v36, %v15894_v36  ;;  %v16066_v24 = vrot.slane %v15903_v61, %v18488_v35  ;;  %v16073_v9 = vrot.slane %v17261_v23, %v18488_v35 }
 0x90f   : > { %v16017_v20 = vrot.slane %v15902_v50, %v18488_v35  ;;  %v16024_v32 = vrot.slane %v17260_v30, %v18488_v35  ;;  %v16074_v15 = vcombine.high %v16066_v24, %v16066_v24  ;;  %v16075_v42 = vcombine.high %v16073_v9, %v16073_v9 }
 0x910   : > { %v16082_v14 = vrot.slane %v16066_v24, %v18488_v35  ;;  %v16089_v1 = vrot.slane %v16073_v9, %v18488_v35 }
 0x911   : > { %v16025_v2 = vcombine.high %v16017_v20, %v16017_v20  ;;  %v16026_v18 = vcombine.high %v16024_v32, %v16024_v32  ;;  %v16033_v33 = vrot.slane %v16017_v20, %v18488_v35  ;;  %v16040_v7 = vrot.slane %v16024_v32, %v18488_v35  ;;  %v16673_v32 = vld [vmem:[%s23265_s22 + $0x1c] sm:$0x1] }
 0x912   : > { %v16096_v8 = vrot.slane %v16074_v15, %v18488_v35  ;;  %v16103_v43 = vrot.slane %v16075_v42, %v18488_v35  ;;  %v16104_v48 = vcombine.high %v16082_v14, %v16082_v14  ;;  %v16105_v31 = vcombine.high %v16089_v1, %v16089_v1 }
 0x913   : > { %v16220_v28 = vunpack.i.h.s16 %v16082_v14  ;;  %v16047_v59 = vrot.slane %v16025_v2, %v18488_v35  ;;  %v16054_v53 = vrot.slane %v16026_v18, %v18488_v35  ;;  %v16055_v11 = vcombine.high %v16033_v33, %v16033_v33 }
 0x914   : > { %v16106_v51 = vcombine.high %v16096_v8, %v16096_v8  ;;  %v23338_v22 = vcombine.high %v16103_v43, %v16103_v43  ;;  %v16222_v56 = vunpack.i.h.s16 %v16096_v8  ;;  %v16224_v6 = vunpack.i.h.s16 %v16104_v48 }
 0x915   : > { %v17273_v46 = vpack.i.b16 %v16096_v8, %v16220_v28  ;;  %v16526_v57 = vcombine.low %v16089_v1, %v16105_v31  ;;  %v16056_v60 = vcombine.high %v16040_v7, %v16040_v7  ;;  %v17616_v40 = vpop.f32.mrf.mxu0  ;;  %v16057_v55 = vcombine.high %v16047_v59, %v16047_v59 }
 0x916   : > { %v16233_v27 = vunpack.i.l.s16 %v23338_v22  ;;  %v17274_v16 = vpack.i.b16 %v16104_v48, %v16222_v56  ;;  %v16517_v4 = vrot.slane %v16224_v6, %v23822_v58  ;;  %v16525_v38 = vcombine.low %v16106_v51, %v16103_v43 }
 0x917   : > { %v16540_v63 = vrot.slane %v16526_v57, %v23822_v58  ;;  %v16058_v34 = vcombine.high %v16054_v53, %v16054_v53  ;;  %v16204_v44 = vunpack.i.h.s16 %v16033_v33  ;;  %v15875_v0 = vpop.f32.mrf.mxu0  ;;  %v16206_v19 = vunpack.i.h.s16 %v16047_v59 }
 0x918   : > { %v16524_v62 = vrot.slane %v16517_v4, %v23822_v58  ;;  %v16555_v39 = vrot.slane %v16233_v27, %v23822_v58  ;;  %v16215_v17 = vunpack.i.l.s16 %v16056_v60  ;;  %v16533_v52 = vrot.slane %v16525_v38, %v23822_v58 }
 0x919   : > { %v16216_v26 = vunpack.i.h.s16 %v16056_v60  ;;  %v16218_v21 = vunpack.i.h.s16 %v16058_v34  ;;  %v17269_v25 = vpack.i.b16 %v16033_v33, %v16202_v12  ;;  %v17617_v10 = vpop.f32.mrf.mxu0  ;;  %v17270_v47 = vpack.i.b16 %v16047_v59, %v16204_v44 }
 0x91a   : > { %v16562_v45 = vrot.slane %v16555_v39, %v23822_v58  ;;  %v16682_v29 = vsel %vm23274_vm15, %v16524_v62, %v16681_v13  ;;  %v16441_v49 = vrot.slane %v16206_v19, %v23822_v58  ;;  %v16541_v36 = vcombine.low %v16533_v52, %v16540_v63 }
 0x91b   : > { %16683 = vst [vmem:[%s23265_s22 + $0x2c] sm:$0x1] %v16682_v29  ;;  %v17271_v61 = vpack.i.b16 %v16058_v34, %v16216_v26  ;;  %v17272_v23 = vpack.i.b16 %v16082_v14, %v16218_v21  ;;  %v16411_v50 = vcombine.low %v23322_v3, %v17269_v25  ;;  %v16412_v24 = vcombine.low %v23325_v41, %v17270_v47  ;;  %v16677_v41 = vld [vmem:[%s23265_s22 + $0x24] sm:$0x1]  ;;  %v15878_v8 = vpop.f32.mrf.mxu0 }
 0x91c   : > { %v16686_v30 = vsel %vm23274_vm15, %v16562_v45, %v16685_v54  ;;  %v16448_v9 = vrot.slane %v16441_v49, %v23822_v58  ;;  %v16449_v20 = vcombine.low %v16055_v11, %v16040_v7  ;;  %v16548_v15 = vrot.slane %v16541_v36, %v23822_v58  ;;  %v16693_v25 = vld [vmem:[%s23265_s22 + $0x44] sm:$0x1] }
 0x91d   : > { %16687 = vst [vmem:[%s23265_s22 + $0x34] sm:$0x1] %v16686_v30  ;;  %v16419_v42 = vrot.slane %v16411_v50, %v23822_v58  ;;  %v16450_v1 = vcombine.low %v16057_v55, %v16054_v53  ;;  %v16479_v14 = vrot.slane %v16215_v17, %v23822_v58  ;;  %v16426_v3 = vrot.slane %v16412_v24, %v23822_v58 }
 0x91e   : > { %v16457_v2 = vrot.slane %v16449_v20, %v23822_v58  ;;  %v16487_v18 = vcombine.low %v17271_v61, %v17273_v46  ;;  %v16488_v33 = vcombine.low %v17272_v23, %v17274_v16  ;;  %16684 = vst.msk [vmem:[%s23265_s22 + $0x30] sm:$0xf] %vm16657_vm0, %v16548_v15  ;;  %v16674_v48 = vsel %vm23274_vm15, %v16448_v9, %v16673_v32 }
 0x91f   : > { %v16464_v7 = vrot.slane %v16450_v1, %v23822_v58  ;;  %v16486_v43 = vrot.slane %v16479_v14, %v23822_v58  ;;  %v15884_v31 = vadd.f32 %v17616_v40, %v23245_v5  ;;  %v16427_v28 = vcombine.low %v16419_v42, %v16426_v3  ;;  %16675 = vst [vmem:[%s23265_s22 + $0x1c] sm:$0x1] %v16674_v48  ;;  %v16689_v3 = vld [vmem:[%s23265_s22 + $0x3c] sm:$0x1] }
 0x920   : > { %v16495_v59 = vrot.slane %v16487_v18, %v23822_v58  ;;  %v16502_v53 = vrot.slane %v16488_v33, %v23822_v58  ;;  %v15876_v12 = vadd.f32 %v23245_v5, %v15875_v0  ;;  %v15879_v46 = vadd.f32 %v23245_v5, %v15878_v8 }
 0x921   : > { %v16465_v51 = vcombine.low %v16457_v2, %v16464_v7  ;;  %v16678_v56 = vsel %vm23274_vm15, %v16486_v43, %v16677_v41  ;;  %v15899_v6 = vmax.f32 %v15884_v31, 0.0  ;;  %v16434_v57 = vrot.slane %v16427_v28, %v23822_v58 }
 0x922   : > { %v16503_v11 = vcombine.low %v16495_v59, %v16502_v53  ;;  %16679 = vst [vmem:[%s23265_s22 + $0x24] sm:$0x1] %v16678_v56  ;;  %v15897_v27 = vmax.f32 %v15876_v12, 0.0  ;;  %v15898_v16 = vmax.f32 %v15879_v46, 0.0  ;;  %v16234_v21 = vunpack.i.h.s16 %v23338_v22 }
 0x923   : > { %v16472_v60 = vrot.slane %v16465_v51, %v23822_v58  ;;  %v15905_v40 = vpack.c.bf16 %v15899_v6, %v15899_v6  ;;  %16672 = vst.msk [vmem:[%s23265_s22 + $0x18] sm:$0xf] %vm16657_vm0, %v16434_v57 }
 0x924   : > { %v16510_v4 = vrot.slane %v16503_v11, %v23822_v58  ;;  %v15904_v38 = vpack.c.bf16 %v15898_v16, %v15897_v27  ;;  %v17262_v5 = vpack.c.bf16 %v15898_v16, %v15898_v16 }
 0x925   : > { %16676 = vst.msk [vmem:[%s23265_s22 + $0x20] sm:$0xf] %vm16657_vm0, %v16472_v60  ;;  %v16163_v55 = vrot.slane %v15905_v40, %v18488_v35 }
 0x926   : > { %16680 = vst.msk [vmem:[%s23265_s22 + $0x28] sm:$0xf] %vm16657_vm0, %v16510_v4  ;;  %v16115_v13 = vrot.slane %v15904_v38, %v18488_v35  ;;  %v16122_v34 = vrot.slane %v17262_v5, %v18488_v35 }
 0x927   : > { %v16170_v63 = vrot.slane %v16163_v55, %v18488_v35 }
 0x928   : > { %v16123_v0 = vcombine.high %v16115_v13, %v16115_v13  ;;  %v16124_v62 = vcombine.high %v16122_v34, %v16122_v34  ;;  %v16131_v39 = vrot.slane %v16115_v13, %v18488_v35  ;;  %v16138_v19 = vrot.slane %v16122_v34, %v18488_v35 }
 0x929   : > { %v16251_v44 = vunpack.i.l.s16 %v16170_v63 }
 0x92a   : > { %v16145_v52 = vrot.slane %v16123_v0, %v18488_v35  ;;  %v16152_v54 = vrot.slane %v16124_v62, %v18488_v35  ;;  %v16153_v26 = vcombine.high %v16131_v39, %v16131_v39  ;;  %v16154_v10 = vcombine.high %v16138_v19, %v16138_v19 }
 0x92b   : > { %v16631_v17 = vrot.slane %v16251_v44, %v23822_v58  ;;  %v16236_v45 = vunpack.i.h.s16 %v16131_v39  ;;  %v17275_v23 = vpack.i.b16 %v16131_v39, %v16234_v21 }
 0x92c   : > { %v16155_v47 = vcombine.high %v16145_v52, %v16145_v52  ;;  %v16156_v49 = vcombine.high %v16152_v54, %v16152_v54  ;;  %v16238_v36 = vunpack.i.h.s16 %v16145_v52  ;;  %v16240_v61 = vunpack.i.h.s16 %v16153_v26 }
 0x92d   : > { %v16638_v29 = vrot.slane %v16631_v17, %v23822_v58  ;;  %v16601_v50 = vcombine.low %v16138_v19, %v16154_v10  ;;  %v17276_v22 = vpack.i.b16 %v16145_v52, %v16236_v45 }
 0x92e   : > { %v16242_v35 = vunpack.i.h.s16 %v16155_v47  ;;  %v17277_v24 = vpack.i.b16 %v16153_v26, %v16238_v36  ;;  %v16602_v9 = vcombine.low %v16152_v54, %v16156_v49  ;;  %v17278_v20 = vpack.i.b16 %v16155_v47, %v16240_v61 }
 0x92f   : > { %v16694_v30 = vsel %vm23274_vm15, %v16638_v29, %v16693_v25  ;;  %v16609_v42 = vrot.slane %v16601_v50, %v23822_v58 }
 0x930   : > { %16695 = vst [vmem:[%s23265_s22 + $0x44] sm:$0x1] %v16694_v30  ;;  %v16563_v32 = vcombine.low %v17275_v23, %v17277_v24  ;;  %v16593_v15 = vrot.slane %v16242_v35, %v23822_v58  ;;  %v16616_v1 = vrot.slane %v16602_v9, %v23822_v58  ;;  %v16564_v14 = vcombine.low %v17276_v22, %v17278_v20 }
 0x932   : > { %v16571_v2 = vrot.slane %v16563_v32, %v23822_v58  ;;  %v16600_v18 = vrot.slane %v16593_v15, %v23822_v58  ;;  %v16617_v33 = vcombine.low %v16609_v42, %v16616_v1  ;;  %v16578_v41 = vrot.slane %v16564_v14, %v23822_v58 }
 0x934   : > { %v16624_v8 = vrot.slane %v16617_v33, %v23822_v58  ;;  %v16690_v7 = vsel %vm23274_vm15, %v16600_v18, %v16689_v3  ;;  %v16579_v43 = vcombine.low %v16571_v2, %v16578_v41 }
 0x935   : > { %16691 = vst [vmem:[%s23265_s22 + $0x3c] sm:$0x1] %v16690_v7 }
 0x936   : > { %16692 = vst.msk [vmem:[%s23265_s22 + $0x40] sm:$0xf] %vm16657_vm0, %v16624_v8  ;;  %v16586_v48 = vrot.slane %v16579_v43, %v23822_v58 }
 0x938   : > { %16688 = vst.msk [vmem:[%s23265_s22 + $0x38] sm:$0xf] %vm16657_vm0, %v16586_v48 }
 0x939 PF: > { %s24_s25 = sadd.s32 1, %s17791_s25  }
 0x93a   : > { %p21_p4 = scmp.ge.s32.totalorder %s24_s25, 4  }
 0x93c   :  { %23 = sbr.rel (!%p21_p4) target bundleno = 1 (0x1), region = 112 }

</bundles_post_ra>
